<compile_context>
chip_gen: v6e
topology: v6e:2x2x1
jax: 0.10.0
libtpu: 0.0.40
codegen_flags: <defaults>
</compile_context>

<pallas_src>
import jax
import jax.numpy as jnp
from jax.experimental import pallas as pl
from jax.experimental.pallas import tpu as pltpu

BB_REGRESSOR_LAYER = ('layer2', 'layer3')
_CONV_VMEM_LIMIT = 48 * 1024 * 1024     # <= ~48 MiB keeps v7x (64 MiB VMEM) safe
_REG_VMEM_LIMIT = 32 * 1024 * 1024


# ----------------------------- fused 3x3 / stride-2 conv -----------------------------
#
# conv(x, W)[b, ho, wo, :] = sum_{i,j} x_pad[b, 2*ho + i, 2*wo + j, :] @ W[i, j]
# Tap (i, j) reads plane A[i % 2, j] rows [(i//2)*Wo : (i//2)*Wo + Ho*Wo]  — a
# contiguous, leading-dim-only slice of a (1, (Ho+1)*Wo, Cin) VMEM block.

def _make_conv_kernel(Ho, Wo, Cout):
    HW = Ho * Wo

    def kernel(a00, a01, a02, a10, a11, a12, w_ref, b_ref, o_ref):
        planes = ((a00, a01, a02), (a10, a11, a12))
        acc = jnp.zeros((HW, Cout), jnp.float32)
        for i in range(3):
            for j in range(3):
                row0 = (i // 2) * Wo
                patch = planes[i % 2][j][0, row0:row0 + HW, :]      # (HW, Cin) bf16
                acc = acc + jnp.dot(patch, w_ref[i * 3 + j],
                                    preferred_element_type=jnp.float32)
        o_ref[0] = jnp.maximum(acc + b_ref[...], 0.0).astype(o_ref.dtype)

    return kernel


def conv2d_3x3_s2_relu(x_nhwc, w_hwio, b):
    """3x3, stride-2, pad-1 conv + bias + ReLU. bf16 in/out, f32 MXU accumulation."""
    B, H, W, Cin = x_nhwc.shape
    kh, kw, _, Cout = w_hwio.shape
    assert (kh, kw) == (3, 3)
    Ho = (H + 2 - 3) // 2 + 1
    Wo = (W + 2 - 3) // 2 + 1
    Hp, Wp = 2 * Ho + 2, 2 * Wo + 2
    xp = jnp.pad(x_nhwc.astype(jnp.bfloat16),
                 ((0, 0), (1, Hp - H - 1), (1, Wp - W - 1), (0, 0)))
    # six stride-2 tap planes, flattened so in-kernel taps are contiguous row slices
    planes = [xp[:, p::2, j::2, :][:, :, :Wo, :].reshape(B, (Ho + 1) * Wo, Cin)
              for p in (0, 1) for j in (0, 1, 2)]
    w9 = w_hwio.reshape(9, Cin, Cout).astype(jnp.bfloat16)
    b2 = b.reshape(1, Cout).astype(jnp.float32)

    plane_spec = pl.BlockSpec((1, (Ho + 1) * Wo, Cin), lambda bi: (bi, 0, 0))
    # TODO(synk): at production image sizes, band Ho with a manual halo DMA
    # (overlapping row windows are not expressible with Blocked BlockSpecs).
    # TODO(synk): single-buffer the resident w/b blocks (pipeline_mode=pl.Buffered(1))
    # to shave redundant VMEM on v7x once that path is exercised at scale.
    y = pl.pallas_call(
        _make_conv_kernel(Ho, Wo, Cout),
        out_shape=jax.ShapeDtypeStruct((B, Ho * Wo, Cout), jnp.bfloat16),
        grid=(B,),
        in_specs=[plane_spec] * 6 + [
            pl.BlockSpec((9, Cin, Cout), lambda bi: (0, 0, 0)),
            pl.BlockSpec((1, Cout), lambda bi: (0, 0)),
        ],
        out_specs=pl.BlockSpec((1, Ho * Wo, Cout), lambda bi: (bi, 0, 0)),
        compiler_params=pltpu.CompilerParams(
            dimension_semantics=("parallel",),
            vmem_limit_bytes=_CONV_VMEM_LIMIT),
    )(*planes, w9, b2)
    return y.reshape(B, Ho, Wo, Cout)


# ----------------------------- synthetic backbone -----------------------------

def feature_extractor(params, im_nchw, layers):
    x = jnp.transpose(im_nchw, (0, 2, 3, 1)).astype(jnp.bfloat16)   # NCHW -> NHWC, one cast
    f2 = conv2d_3x3_s2_relu(x, params['conv1_w'], params['conv1_b'])    # bf16
    f3 = conv2d_3x3_s2_relu(f2, params['conv2_w'], params['conv2_b'])   # bf16
    feats = {'layer2': f2, 'layer3': f3}
    return {l: feats[l] for l in layers}


# ----------------------------- fused bb_regressor kernel -----------------------------

def _bb_regressor_kernel(tr2_ref, te2_ref, tr3_ref, te3_ref, bb_ref, prop_ref,
                         pool2_ref, pool3_ref,
                         pw2_ref, pb2_ref, pw3_ref, pb3_ref,
                         wm2_ref, wbb2_ref, bm2_ref,
                         wm3_ref, wbb3_ref, bm3_ref,
                         wf2_ref, wf3_ref, wpb_ref, hb_ref,
                         o_ref):
    f32 = jnp.float32
    bf16 = jnp.bfloat16

    def branch(tr_ref, te_ref, pool_ref, pw_ref, pb_ref, wm_ref, wbb_ref, bm_ref):
        pw = pw_ref[...]                                              # (C, Cm) bf16
        # pointwise projection + ReLU (bf16 MXU inputs, f32 accumulation)
        yt = jnp.maximum(jnp.dot(tr_ref[0], pw, preferred_element_type=f32)
                         + pb_ref[...], 0.0)
        ys = jnp.maximum(jnp.dot(te_ref[0], pw, preferred_element_type=f32)
                         + pb_ref[...], 0.0)
        # global average pool over HW as a (1, HW) @ (HW, Cm) MXU matmul
        tvec = jnp.dot(pool_ref[...], yt.astype(bf16), preferred_element_type=f32)
        svec = jnp.dot(pool_ref[...], ys.astype(bf16), preferred_element_type=f32)
        # train-branch modulation conditioned on train_bb (small, kept in f32)
        mod = jnp.dot(tvec, wm_ref[...], preferred_element_type=f32)
        mod = mod + jnp.dot(bb_ref[0], wbb_ref[...], preferred_element_type=f32)
        mod = jnp.maximum(mod + bm_ref[...], 0.0)
        return svec * mod                                             # (1, Cm)

    f2 = branch(tr2_ref, te2_ref, pool2_ref, pw2_ref, pb2_ref, wm2_ref, wbb2_ref, bm2_ref)
    f3 = branch(tr3_ref, te3_ref, pool3_ref, pw3_ref, pb3_ref, wm3_ref, wbb3_ref, bm3_ref)

    feat_score = (jnp.dot(f2, wf2_ref[...], preferred_element_type=f32)
                  + jnp.dot(f3, wf3_ref[...], preferred_element_type=f32))       # (1, 1)
    prop_score = jnp.dot(prop_ref[0], wpb_ref[...], preferred_element_type=f32)  # (1, PN)
    o_ref[0] = prop_score + feat_score + hb_ref[...]


def bb_regressor(params, train_feat_iou, test_feat_iou, train_bb, test_proposals):
    # Synthetic DR head: consumes the first train/test frame (matches ATOM's
    # single-train-frame default; num_train_images == 1 in this demo).
    S = train_bb.shape[1]
    bb = train_bb[0].astype(jnp.float32).reshape(S, 1, 4)
    props = test_proposals[0]                              # (S, P, 4)
    P = props.shape[1]
    PN = ((P + 127) // 128) * 128                          # lane-dense padded score width

    tf2, sf2 = train_feat_iou[0][0], test_feat_iou[0][0]   # (S, H2, W2, C2) bf16
    tf3, sf3 = train_feat_iou[1][0], test_feat_iou[1][0]   # (S, H3, W3, C3) bf16
    _, H2, W2, C2 = tf2.shape
    _, H3, W3, C3 = tf3.shape
    HW2, HW3 = H2 * W2, H3 * W3
    Cm = params['proj_l2_w'].shape[1]

    # per-sequence flattening in the wrapper: kernel stays reshape-free
    tr2 = tf2.reshape(S, HW2, C2)
    te2 = sf2.reshape(S, HW2, C2)
    tr3 = tf3.reshape(S, HW3, C3)
    te3 = sf3.reshape(S, HW3, C3)

    # one mean-pool row per block (replaces the old O(S^2*HW) kron pooling matrix)
    pool2 = jnp.full((1, HW2), 1.0 / HW2, jnp.bfloat16)
    pool3 = jnp.full((1, HW3), 1.0 / HW3, jnp.bfloat16)

    # proposal scoring as a matmul against kron(I_P, wp), zero-padded to PN lanes
    prop2d = props.reshape(S, 1, P * 4).astype(jnp.float32)
    wp_block = jnp.kron(jnp.eye(P, dtype=jnp.float32), params['head_wp'].reshape(4, 1))
    wp_block = jnp.pad(wp_block, ((0, 0), (0, PN - P)))

    wf = params['head_wf']
    wf2 = wf[:Cm].reshape(Cm, 1)
    wf3 = wf[Cm:].reshape(Cm, 1)
    bf16 = jnp.bfloat16

    args = (
        tr2, te2, tr3, te3, bb, prop2d, pool2, pool3,
        params['proj_l2_w'].astype(bf16), params['proj_l2_b'].reshape(1, Cm),
        params['proj_l3_w'].astype(bf16), params['proj_l3_b'].reshape(1, Cm),
        params['mod_l2_wm'], params['mod_l2_wbb'], params['mod_l2_bm'].reshape(1, Cm),
        params['mod_l3_wm'], params['mod_l3_wbb'], params['mod_l3_bm'].reshape(1, Cm),
        wf2, wf3, wp_block, params['head_b'].reshape(1, 1),
    )

    seq = lambda s: (s, 0, 0)        # per-sequence blocks
    const2 = lambda s: (0, 0)        # resident weights / pool rows
    in_specs = [
        pl.BlockSpec((1, HW2, C2), seq),
        pl.BlockSpec((1, HW2, C2), seq),
        pl.BlockSpec((1, HW3, C3), seq),
        pl.BlockSpec((1, HW3, C3), seq),
        pl.BlockSpec((1, 1, 4), seq),
        pl.BlockSpec((1, 1, 4 * P), seq),
        pl.BlockSpec((1, HW2), const2),
        pl.BlockSpec((1, HW3), const2),
        pl.BlockSpec((C2, Cm), const2),
        pl.BlockSpec((1, Cm), const2),
        pl.BlockSpec((C3, Cm), const2),
        pl.BlockSpec((1, Cm), const2),
        pl.BlockSpec((Cm, Cm), const2),
        pl.BlockSpec((4, Cm), const2),
        pl.BlockSpec((1, Cm), const2),
        pl.BlockSpec((Cm, Cm), const2),
        pl.BlockSpec((4, Cm), const2),
        pl.BlockSpec((1, Cm), const2),
        pl.BlockSpec((Cm, 1), const2),
        pl.BlockSpec((Cm, 1), const2),
        pl.BlockSpec((4 * P, PN), const2),
        pl.BlockSpec((1, 1), const2),
    ]

    scores = pl.pallas_call(
        _bb_regressor_kernel,
        out_shape=jax.ShapeDtypeStruct((S, 1, PN), jnp.float32),
        grid=(S,),
        in_specs=in_specs,
        out_specs=pl.BlockSpec((1, 1, PN), seq),
        compiler_params=pltpu.CompilerParams(
            dimension_semantics=("parallel",),
            vmem_limit_bytes=_REG_VMEM_LIMIT),
    )(*args)

    scores = scores.reshape(S, PN)[:, :P]
    return scores.reshape(test_proposals.shape[0], S, P)


# ----------------------------- DRNet.forward -----------------------------

def drnet_forward(params, train_imgs, test_imgs, train_bb, test_proposals,
                  mode=None):
    num_sequences = train_imgs.shape[-4]
    num_train_images = train_imgs.shape[0] if train_imgs.ndim == 5 else 1
    num_test_images = test_imgs.shape[0] if test_imgs.ndim == 5 else 1

    tr_flat = train_imgs.reshape(-1, *train_imgs.shape[-3:])
    te_flat = test_imgs.reshape(-1, *test_imgs.shape[-3:])
    n_tr = tr_flat.shape[0]

    # single batched backbone pass over train + test frames
    all_feat = feature_extractor(
        params, jnp.concatenate([tr_flat, te_flat], axis=0), BB_REGRESSOR_LAYER)
    train_feat = {l: all_feat[l][:n_tr] for l in BB_REGRESSOR_LAYER}
    test_feat = {l: all_feat[l][n_tr:] for l in BB_REGRESSOR_LAYER}

    train_feat_iou = [
        train_feat[l].reshape(num_train_images, num_sequences, *train_feat[l].shape[-3:])
        for l in BB_REGRESSOR_LAYER]
    test_feat_iou = [
        test_feat[l].reshape(num_test_images, num_sequences, *test_feat[l].shape[-3:])
        for l in BB_REGRESSOR_LAYER]

    # NOTE: the original PyTorch DRNet uses num_train_images for the proposal
    # view as well; kept to match the reference semantics.
    reg_pred = bb_regressor(
        params, train_feat_iou, test_feat_iou,
        train_bb.reshape(num_train_images, num_sequences, 4),
        test_proposals.reshape(num_train_images, num_sequences, -1, 4))

    if mode == 'train':
        return reg_pred, train_feat, test_feat
    return reg_pred


# ----------------------------- parameters -----------------------------

def init_params(key):
    ks = jax.random.split(key, 16)

    def nrm(k, shape, scale=0.05):
        return scale * jax.random.normal(k, shape, jnp.float32)

    # 256-wide channels: fills the 2x256 MXU on v6e/v7x, 2x native width on v5e
    C1, C2, Cm = 256, 256, 256
    return {
        # backbone (weights stored HWIO)
        'conv1_w': nrm(ks[0], (3, 3, 3, C1)),
        'conv1_b': nrm(ks[1], (C1,)),
        'conv2_w': nrm(ks[2], (3, 3, C1, C2)),
        'conv2_b': nrm(ks[3], (C2,)),
        # regressor feature projections
        'proj_l2_w': nrm(ks[4], (C1, Cm)),
        'proj_l2_b': nrm(ks[5], (Cm,)),
        'proj_l3_w': nrm(ks[6], (C2, Cm)),
        'proj_l3_b': nrm(ks[7], (Cm,)),
        # modulation (train branch, conditioned on train_bb)
        'mod_l2_wm': nrm(ks[8], (Cm, Cm)),
        'mod_l2_wbb': nrm(ks[9], (4, Cm)),
        'mod_l2_bm': nrm(ks[10], (Cm,)),
        'mod_l3_wm': nrm(ks[11], (Cm, Cm)),
        'mod_l3_wbb': nrm(ks[12], (4, Cm)),
        'mod_l3_bm': nrm(ks[13], (Cm,)),
        # proposal scoring head
        'head_wf': nrm(ks[14], (2 * Cm,)),
        'head_wp': nrm(ks[15], (4,)),
        'head_b': jnp.zeros((1,), jnp.float32),
    }


# ----------------------------- main -----------------------------

if __name__ == "__main__":
    key = jax.random.PRNGKey(0)
    k1, k2, k3, k4, kp = jax.random.split(key, 5)

    num_train, num_test, S, P = 1, 1, 2, 8          # images, sequences, proposals
    train_imgs = jax.random.normal(k1, (num_train, S, 3, 32, 32), jnp.float32)
    test_imgs = jax.random.normal(k2, (num_test, S, 3, 32, 32), jnp.float32)
    train_bb = jax.random.uniform(k3, (num_train, S, 4), jnp.float32, 0.0, 32.0)
    test_proposals = jax.random.uniform(k4, (num_train, S, P, 4),
                                        jnp.float32, 0.0, 32.0)

    params = init_params(kp)

    reg_pred = jax.jit(drnet_forward)(params, train_imgs, test_imgs,
                                      train_bb, test_proposals)
    jax.block_until_ready(reg_pred)
    assert reg_pred.shape == (num_train, S, P)
    assert bool(jnp.all(jnp.isfinite(reg_pred)))
    print("KERNEL_OK")
</pallas_src>

<mosaic_0001>
module attributes {stable_mosaic.version = 11 : i64} {
  func.func @kernel(%arg0: i32, %arg1: memref<1x272x3xbf16, #tpu.memory_space<vmem>>, %arg2: memref<1x272x3xbf16, #tpu.memory_space<vmem>>, %arg3: memref<1x272x3xbf16, #tpu.memory_space<vmem>>, %arg4: memref<1x272x3xbf16, #tpu.memory_space<vmem>>, %arg5: memref<1x272x3xbf16, #tpu.memory_space<vmem>>, %arg6: memref<1x272x3xbf16, #tpu.memory_space<vmem>>, %arg7: memref<9x3x256xbf16, #tpu.memory_space<vmem>>, %arg8: memref<1x256xf32, #tpu.memory_space<vmem>>, %arg9: memref<1x256x256xbf16, #tpu.memory_space<vmem>>) attributes {dimension_semantics = [#tpu.dimension_semantics<parallel>], iteration_bounds = array<i64: 4>, scalar_prefetch = 0 : i64, scratch_operands = 0 : i64, tpu.core_type = #tpu.core_type<tc>, window_params = [{transform_indices = @transform_0, window_bounds = array<i64: 1, 272, 3>}, {transform_indices = @transform_1, window_bounds = array<i64: 1, 272, 3>}, {transform_indices = @transform_2, window_bounds = array<i64: 1, 272, 3>}, {transform_indices = @transform_3, window_bounds = array<i64: 1, 272, 3>}, {transform_indices = @transform_4, window_bounds = array<i64: 1, 272, 3>}, {transform_indices = @transform_5, window_bounds = array<i64: 1, 272, 3>}, {pipeline_mode = #tpu.pipeline_mode<synchronous>, transform_indices = @transform_6, window_bounds = array<i64: 9, 3, 256>}, {pipeline_mode = #tpu.pipeline_mode<synchronous>, transform_indices = @transform_7, window_bounds = array<i64: 1, 256>}, {transform_indices = @transform_8, window_bounds = array<i64: 1, 256, 256>}]} {
    %cst = arith.constant 0.000000e+00 : f32
    %0 = vector.broadcast %cst : f32 to vector<256x256xf32>
    %c0 = arith.constant 0 : index
    %c0_0 = arith.constant 0 : index
    %c0_1 = arith.constant 0 : index
    %1 = vector.load %arg1[%c0, %c0_0, %c0_1] : memref<1x272x3xbf16, #tpu.memory_space<vmem>>, vector<1x256x3xbf16>
    %2 = vector.shape_cast %1 : vector<1x256x3xbf16> to vector<256x3xbf16>
    %c0_2 = arith.constant 0 : index
    %c0_3 = arith.constant 0 : index
    %c0_4 = arith.constant 0 : index
    %3 = vector.load %arg7[%c0_2, %c0_3, %c0_4] : memref<9x3x256xbf16, #tpu.memory_space<vmem>>, vector<1x3x256xbf16>
    %4 = vector.shape_cast %3 : vector<1x3x256xbf16> to vector<3x256xbf16>
    %cst_5 = arith.constant dense<0.000000e+00> : vector<256x256xf32>
    %5 = tpu.matmul %2, %4, %cst_5 {dimension_numbers = #tpu.dot_dimension_numbers<[1], [0], [0], [1], [0, 0, 1, 1], [], []>} : vector<256x3xbf16>, vector<3x256xbf16>, vector<256x256xf32> -> vector<256x256xf32>
    %6 = arith.addf %0, %5 : vector<256x256xf32>
    %c0_6 = arith.constant 0 : index
    %c0_7 = arith.constant 0 : index
    %c0_8 = arith.constant 0 : index
    %7 = vector.load %arg2[%c0_6, %c0_7, %c0_8] : memref<1x272x3xbf16, #tpu.memory_space<vmem>>, vector<1x256x3xbf16>
    %8 = vector.shape_cast %7 : vector<1x256x3xbf16> to vector<256x3xbf16>
    %c1 = arith.constant 1 : index
    %c0_9 = arith.constant 0 : index
    %c0_10 = arith.constant 0 : index
    %9 = vector.load %arg7[%c1, %c0_9, %c0_10] : memref<9x3x256xbf16, #tpu.memory_space<vmem>>, vector<1x3x256xbf16>
    %10 = vector.shape_cast %9 : vector<1x3x256xbf16> to vector<3x256xbf16>
    %cst_11 = arith.constant dense<0.000000e+00> : vector<256x256xf32>
    %11 = tpu.matmul %8, %10, %cst_11 {dimension_numbers = #tpu.dot_dimension_numbers<[1], [0], [0], [1], [0, 0, 1, 1], [], []>} : vector<256x3xbf16>, vector<3x256xbf16>, vector<256x256xf32> -> vector<256x256xf32>
    %12 = arith.addf %6, %11 : vector<256x256xf32>
    %c0_12 = arith.constant 0 : index
    %c0_13 = arith.constant 0 : index
    %c0_14 = arith.constant 0 : index
    %13 = vector.load %arg3[%c0_12, %c0_13, %c0_14] : memref<1x272x3xbf16, #tpu.memory_space<vmem>>, vector<1x256x3xbf16>
    %14 = vector.shape_cast %13 : vector<1x256x3xbf16> to vector<256x3xbf16>
    %c2 = arith.constant 2 : index
    %c0_15 = arith.constant 0 : index
    %c0_16 = arith.constant 0 : index
    %15 = vector.load %arg7[%c2, %c0_15, %c0_16] : memref<9x3x256xbf16, #tpu.memory_space<vmem>>, vector<1x3x256xbf16>
    %16 = vector.shape_cast %15 : vector<1x3x256xbf16> to vector<3x256xbf16>
    %cst_17 = arith.constant dense<0.000000e+00> : vector<256x256xf32>
    %17 = tpu.matmul %14, %16, %cst_17 {dimension_numbers = #tpu.dot_dimension_numbers<[1], [0], [0], [1], [0, 0, 1, 1], [], []>} : vector<256x3xbf16>, vector<3x256xbf16>, vector<256x256xf32> -> vector<256x256xf32>
    %18 = arith.addf %12, %17 : vector<256x256xf32>
    %c0_18 = arith.constant 0 : index
    %c0_19 = arith.constant 0 : index
    %c0_20 = arith.constant 0 : index
    %19 = vector.load %arg4[%c0_18, %c0_19, %c0_20] : memref<1x272x3xbf16, #tpu.memory_space<vmem>>, vector<1x256x3xbf16>
    %20 = vector.shape_cast %19 : vector<1x256x3xbf16> to vector<256x3xbf16>
    %c3 = arith.constant 3 : index
    %c0_21 = arith.constant 0 : index
    %c0_22 = arith.constant 0 : index
    %21 = vector.load %arg7[%c3, %c0_21, %c0_22] : memref<9x3x256xbf16, #tpu.memory_space<vmem>>, vector<1x3x256xbf16>
    %22 = vector.shape_cast %21 : vector<1x3x256xbf16> to vector<3x256xbf16>
    %cst_23 = arith.constant dense<0.000000e+00> : vector<256x256xf32>
    %23 = tpu.matmul %20, %22, %cst_23 {dimension_numbers = #tpu.dot_dimension_numbers<[1], [0], [0], [1], [0, 0, 1, 1], [], []>} : vector<256x3xbf16>, vector<3x256xbf16>, vector<256x256xf32> -> vector<256x256xf32>
    %24 = arith.addf %18, %23 : vector<256x256xf32>
    %c0_24 = arith.constant 0 : index
    %c0_25 = arith.constant 0 : index
    %c0_26 = arith.constant 0 : index
    %25 = vector.load %arg5[%c0_24, %c0_25, %c0_26] : memref<1x272x3xbf16, #tpu.memory_space<vmem>>, vector<1x256x3xbf16>
    %26 = vector.shape_cast %25 : vector<1x256x3xbf16> to vector<256x3xbf16>
    %c4 = arith.constant 4 : index
    %c0_27 = arith.constant 0 : index
    %c0_28 = arith.constant 0 : index
    %27 = vector.load %arg7[%c4, %c0_27, %c0_28] : memref<9x3x256xbf16, #tpu.memory_space<vmem>>, vector<1x3x256xbf16>
    %28 = vector.shape_cast %27 : vector<1x3x256xbf16> to vector<3x256xbf16>
    %cst_29 = arith.constant dense<0.000000e+00> : vector<256x256xf32>
    %29 = tpu.matmul %26, %28, %cst_29 {dimension_numbers = #tpu.dot_dimension_numbers<[1], [0], [0], [1], [0, 0, 1, 1], [], []>} : vector<256x3xbf16>, vector<3x256xbf16>, vector<256x256xf32> -> vector<256x256xf32>
    %30 = arith.addf %24, %29 : vector<256x256xf32>
    %c0_30 = arith.constant 0 : index
    %c0_31 = arith.constant 0 : index
    %c0_32 = arith.constant 0 : index
    %31 = vector.load %arg6[%c0_30, %c0_31, %c0_32] : memref<1x272x3xbf16, #tpu.memory_space<vmem>>, vector<1x256x3xbf16>
    %32 = vector.shape_cast %31 : vector<1x256x3xbf16> to vector<256x3xbf16>
    %c5 = arith.constant 5 : index
    %c0_33 = arith.constant 0 : index
    %c0_34 = arith.constant 0 : index
    %33 = vector.load %arg7[%c5, %c0_33, %c0_34] : memref<9x3x256xbf16, #tpu.memory_space<vmem>>, vector<1x3x256xbf16>
    %34 = vector.shape_cast %33 : vector<1x3x256xbf16> to vector<3x256xbf16>
    %cst_35 = arith.constant dense<0.000000e+00> : vector<256x256xf32>
    %35 = tpu.matmul %32, %34, %cst_35 {dimension_numbers = #tpu.dot_dimension_numbers<[1], [0], [0], [1], [0, 0, 1, 1], [], []>} : vector<256x3xbf16>, vector<3x256xbf16>, vector<256x256xf32> -> vector<256x256xf32>
    %36 = arith.addf %30, %35 : vector<256x256xf32>
    %c0_36 = arith.constant 0 : index
    %c16 = arith.constant 16 : index
    %c0_37 = arith.constant 0 : index
    %37 = vector.load %arg1[%c0_36, %c16, %c0_37] : memref<1x272x3xbf16, #tpu.memory_space<vmem>>, vector<1x256x3xbf16>
    %38 = vector.shape_cast %37 : vector<1x256x3xbf16> to vector<256x3xbf16>
    %c6 = arith.constant 6 : index
    %c0_38 = arith.constant 0 : index
    %c0_39 = arith.constant 0 : index
    %39 = vector.load %arg7[%c6, %c0_38, %c0_39] : memref<9x3x256xbf16, #tpu.memory_space<vmem>>, vector<1x3x256xbf16>
    %40 = vector.shape_cast %39 : vector<1x3x256xbf16> to vector<3x256xbf16>
    %cst_40 = arith.constant dense<0.000000e+00> : vector<256x256xf32>
    %41 = tpu.matmul %38, %40, %cst_40 {dimension_numbers = #tpu.dot_dimension_numbers<[1], [0], [0], [1], [0, 0, 1, 1], [], []>} : vector<256x3xbf16>, vector<3x256xbf16>, vector<256x256xf32> -> vector<256x256xf32>
    %42 = arith.addf %36, %41 : vector<256x256xf32>
    %c0_41 = arith.constant 0 : index
    %c16_42 = arith.constant 16 : index
    %c0_43 = arith.constant 0 : index
    %43 = vector.load %arg2[%c0_41, %c16_42, %c0_43] : memref<1x272x3xbf16, #tpu.memory_space<vmem>>, vector<1x256x3xbf16>
    %44 = vector.shape_cast %43 : vector<1x256x3xbf16> to vector<256x3xbf16>
    %c7 = arith.constant 7 : index
    %c0_44 = arith.constant 0 : index
    %c0_45 = arith.constant 0 : index
    %45 = vector.load %arg7[%c7, %c0_44, %c0_45] : memref<9x3x256xbf16, #tpu.memory_space<vmem>>, vector<1x3x256xbf16>
    %46 = vector.shape_cast %45 : vector<1x3x256xbf16> to vector<3x256xbf16>
    %cst_46 = arith.constant dense<0.000000e+00> : vector<256x256xf32>
    %47 = tpu.matmul %44, %46, %cst_46 {dimension_numbers = #tpu.dot_dimension_numbers<[1], [0], [0], [1], [0, 0, 1, 1], [], []>} : vector<256x3xbf16>, vector<3x256xbf16>, vector<256x256xf32> -> vector<256x256xf32>
    %48 = arith.addf %42, %47 : vector<256x256xf32>
    %c0_47 = arith.constant 0 : index
    %c16_48 = arith.constant 16 : index
    %c0_49 = arith.constant 0 : index
    %49 = vector.load %arg3[%c0_47, %c16_48, %c0_49] : memref<1x272x3xbf16, #tpu.memory_space<vmem>>, vector<1x256x3xbf16>
    %50 = vector.shape_cast %49 : vector<1x256x3xbf16> to vector<256x3xbf16>
    %c8 = arith.constant 8 : index
    %c0_50 = arith.constant 0 : index
    %c0_51 = arith.constant 0 : index
    %51 = vector.load %arg7[%c8, %c0_50, %c0_51] : memref<9x3x256xbf16, #tpu.memory_space<vmem>>, vector<1x3x256xbf16>
    %52 = vector.shape_cast %51 : vector<1x3x256xbf16> to vector<3x256xbf16>
    %cst_52 = arith.constant dense<0.000000e+00> : vector<256x256xf32>
    %53 = tpu.matmul %50, %52, %cst_52 {dimension_numbers = #tpu.dot_dimension_numbers<[1], [0], [0], [1], [0, 0, 1, 1], [], []>} : vector<256x3xbf16>, vector<3x256xbf16>, vector<256x256xf32> -> vector<256x256xf32>
    %54 = arith.addf %48, %53 : vector<256x256xf32>
    %c0_53 = arith.constant 0 : index
    %c0_54 = arith.constant 0 : index
    %55 = vector.load %arg8[%c0_53, %c0_54] : memref<1x256xf32, #tpu.memory_space<vmem>>, vector<1x256xf32>
    %56 = vector.broadcast %55 : vector<1x256xf32> to vector<256x256xf32>
    %57 = arith.addf %54, %56 : vector<256x256xf32>
    %cst_55 = arith.constant 0.000000e+00 : f32
    %58 = vector.broadcast %cst_55 : f32 to vector<256x256xf32>
    %59 = arith.maximumf %57, %58 : vector<256x256xf32>
    %60 = arith.truncf %59 : vector<256x256xf32> to vector<256x256xbf16>
    %c0_56 = arith.constant 0 : index
    %c0_57 = arith.constant 0 : index
    %c0_58 = arith.constant 0 : index
    %61 = vector.load %arg9[%c0_56, %c0_57, %c0_58] : memref<1x256x256xbf16, #tpu.memory_space<vmem>>, vector<1x256x256xbf16>
    %62 = vector.shape_cast %61 : vector<1x256x256xbf16> to vector<256x256xbf16>
    %63 = vector.shape_cast %60 : vector<256x256xbf16> to vector<1x256x256xbf16>
    tpu.vector_store %arg9[%c0_56, %c0_57, %c0_58], %63 {strides = array<i32>} : memref<1x256x256xbf16, #tpu.memory_space<vmem>>, vector<1x256x256xbf16>,
    return
  }
  func.func @transform_0(%arg0: i32) -> (i32, i32, i32) {
    %c0_i32 = arith.constant 0 : i32
    %c0_i32_0 = arith.constant 0 : i32
    %c0_i32_1 = arith.constant 0 : i32
    return %arg0, %c0_i32, %c0_i32_0 : i32, i32, i32
  }
  func.func @transform_1(%arg0: i32) -> (i32, i32, i32) {
    %c0_i32 = arith.constant 0 : i32
    %c0_i32_0 = arith.constant 0 : i32
    %c0_i32_1 = arith.constant 0 : i32
    return %arg0, %c0_i32, %c0_i32_0 : i32, i32, i32
  }
  func.func @transform_2(%arg0: i32) -> (i32, i32, i32) {
    %c0_i32 = arith.constant 0 : i32
    %c0_i32_0 = arith.constant 0 : i32
    %c0_i32_1 = arith.constant 0 : i32
    return %arg0, %c0_i32, %c0_i32_0 : i32, i32, i32
  }
  func.func @transform_3(%arg0: i32) -> (i32, i32, i32) {
    %c0_i32 = arith.constant 0 : i32
    %c0_i32_0 = arith.constant 0 : i32
    %c0_i32_1 = arith.constant 0 : i32
    return %arg0, %c0_i32, %c0_i32_0 : i32, i32, i32
  }
  func.func @transform_4(%arg0: i32) -> (i32, i32, i32) {
    %c0_i32 = arith.constant 0 : i32
    %c0_i32_0 = arith.constant 0 : i32
    %c0_i32_1 = arith.constant 0 : i32
    return %arg0, %c0_i32, %c0_i32_0 : i32, i32, i32
  }
  func.func @transform_5(%arg0: i32) -> (i32, i32, i32) {
    %c0_i32 = arith.constant 0 : i32
    %c0_i32_0 = arith.constant 0 : i32
    %c0_i32_1 = arith.constant 0 : i32
    return %arg0, %c0_i32, %c0_i32_0 : i32, i32, i32
  }
  func.func @transform_6(%arg0: i32) -> (i32, i32, i32) {
    %c0_i32 = arith.constant 0 : i32
    %c0_i32_0 = arith.constant 0 : i32
    %c0_i32_1 = arith.constant 0 : i32
    %c0_i32_2 = arith.constant 0 : i32
    return %c0_i32, %c0_i32_0, %c0_i32_1 : i32, i32, i32
  }
  func.func @transform_7(%arg0: i32) -> (i32, i32) {
    %c0_i32 = arith.constant 0 : i32
    %c0_i32_0 = arith.constant 0 : i32
    %c0_i32_1 = arith.constant 0 : i32
    return %c0_i32, %c0_i32_0 : i32, i32
  }
  func.func @transform_8(%arg0: i32) -> (i32, i32, i32) {
    %c0_i32 = arith.constant 0 : i32
    %c0_i32_0 = arith.constant 0 : i32
    %c0_i32_1 = arith.constant 0 : i32
    return %arg0, %c0_i32, %c0_i32_0 : i32, i32, i32
  }
}

module attributes {stable_mosaic.version = 11 : i64} {
  func.func @kernel(%arg0: i32, %arg1: memref<1x72x256xbf16, #tpu.memory_space<vmem>>, %arg2: memref<1x72x256xbf16, #tpu.memory_space<vmem>>, %arg3: memref<1x72x256xbf16, #tpu.memory_space<vmem>>, %arg4: memref<1x72x256xbf16, #tpu.memory_space<vmem>>, %arg5: memref<1x72x256xbf16, #tpu.memory_space<vmem>>, %arg6: memref<1x72x256xbf16, #tpu.memory_space<vmem>>, %arg7: memref<9x256x256xbf16, #tpu.memory_space<vmem>>, %arg8: memref<1x256xf32, #tpu.memory_space<vmem>>, %arg9: memref<1x64x256xbf16, #tpu.memory_space<vmem>>) attributes {dimension_semantics = [#tpu.dimension_semantics<parallel>], iteration_bounds = array<i64: 4>, scalar_prefetch = 0 : i64, scratch_operands = 0 : i64, tpu.core_type = #tpu.core_type<tc>, window_params = [{transform_indices = @transform_0, window_bounds = array<i64: 1, 72, 256>}, {transform_indices = @transform_1, window_bounds = array<i64: 1, 72, 256>}, {transform_indices = @transform_2, window_bounds = array<i64: 1, 72, 256>}, {transform_indices = @transform_3, window_bounds = array<i64: 1, 72, 256>}, {transform_indices = @transform_4, window_bounds = array<i64: 1, 72, 256>}, {transform_indices = @transform_5, window_bounds = array<i64: 1, 72, 256>}, {pipeline_mode = #tpu.pipeline_mode<synchronous>, transform_indices = @transform_6, window_bounds = array<i64: 9, 256, 256>}, {pipeline_mode = #tpu.pipeline_mode<synchronous>, transform_indices = @transform_7, window_bounds = array<i64: 1, 256>}, {transform_indices = @transform_8, window_bounds = array<i64: 1, 64, 256>}]} {
    %cst = arith.constant 0.000000e+00 : f32
    %0 = vector.broadcast %cst : f32 to vector<64x256xf32>
    %c0 = arith.constant 0 : index
    %c0_0 = arith.constant 0 : index
    %c0_1 = arith.constant 0 : index
    %1 = vector.load %arg1[%c0, %c0_0, %c0_1] : memref<1x72x256xbf16, #tpu.memory_space<vmem>>, vector<1x64x256xbf16>
    %2 = vector.shape_cast %1 : vector<1x64x256xbf16> to vector<64x256xbf16>
    %c0_2 = arith.constant 0 : index
    %c0_3 = arith.constant 0 : index
    %c0_4 = arith.constant 0 : index
    %3 = vector.load %arg7[%c0_2, %c0_3, %c0_4] : memref<9x256x256xbf16, #tpu.memory_space<vmem>>, vector<1x256x256xbf16>
    %4 = vector.shape_cast %3 : vector<1x256x256xbf16> to vector<256x256xbf16>
    %cst_5 = arith.constant dense<0.000000e+00> : vector<64x256xf32>
    %5 = tpu.matmul %2, %4, %cst_5 {dimension_numbers = #tpu.dot_dimension_numbers<[1], [0], [0], [1], [0, 0, 1, 1], [], []>} : vector<64x256xbf16>, vector<256x256xbf16>, vector<64x256xf32> -> vector<64x256xf32>
    %6 = arith.addf %0, %5 : vector<64x256xf32>
    %c0_6 = arith.constant 0 : index
    %c0_7 = arith.constant 0 : index
    %c0_8 = arith.constant 0 : index
    %7 = vector.load %arg2[%c0_6, %c0_7, %c0_8] : memref<1x72x256xbf16, #tpu.memory_space<vmem>>, vector<1x64x256xbf16>
    %8 = vector.shape_cast %7 : vector<1x64x256xbf16> to vector<64x256xbf16>
    %c1 = arith.constant 1 : index
    %c0_9 = arith.constant 0 : index
    %c0_10 = arith.constant 0 : index
    %9 = vector.load %arg7[%c1, %c0_9, %c0_10] : memref<9x256x256xbf16, #tpu.memory_space<vmem>>, vector<1x256x256xbf16>
    %10 = vector.shape_cast %9 : vector<1x256x256xbf16> to vector<256x256xbf16>
    %cst_11 = arith.constant dense<0.000000e+00> : vector<64x256xf32>
    %11 = tpu.matmul %8, %10, %cst_11 {dimension_numbers = #tpu.dot_dimension_numbers<[1], [0], [0], [1], [0, 0, 1, 1], [], []>} : vector<64x256xbf16>, vector<256x256xbf16>, vector<64x256xf32> -> vector<64x256xf32>
    %12 = arith.addf %6, %11 : vector<64x256xf32>
    %c0_12 = arith.constant 0 : index
    %c0_13 = arith.constant 0 : index
    %c0_14 = arith.constant 0 : index
    %13 = vector.load %arg3[%c0_12, %c0_13, %c0_14] : memref<1x72x256xbf16, #tpu.memory_space<vmem>>, vector<1x64x256xbf16>
    %14 = vector.shape_cast %13 : vector<1x64x256xbf16> to vector<64x256xbf16>
    %c2 = arith.constant 2 : index
    %c0_15 = arith.constant 0 : index
    %c0_16 = arith.constant 0 : index
    %15 = vector.load %arg7[%c2, %c0_15, %c0_16] : memref<9x256x256xbf16, #tpu.memory_space<vmem>>, vector<1x256x256xbf16>
    %16 = vector.shape_cast %15 : vector<1x256x256xbf16> to vector<256x256xbf16>
    %cst_17 = arith.constant dense<0.000000e+00> : vector<64x256xf32>
    %17 = tpu.matmul %14, %16, %cst_17 {dimension_numbers = #tpu.dot_dimension_numbers<[1], [0], [0], [1], [0, 0, 1, 1], [], []>} : vector<64x256xbf16>, vector<256x256xbf16>, vector<64x256xf32> -> vector<64x256xf32>
    %18 = arith.addf %12, %17 : vector<64x256xf32>
    %c0_18 = arith.constant 0 : index
    %c0_19 = arith.constant 0 : index
    %c0_20 = arith.constant 0 : index
    %19 = vector.load %arg4[%c0_18, %c0_19, %c0_20] : memref<1x72x256xbf16, #tpu.memory_space<vmem>>, vector<1x64x256xbf16>
    %20 = vector.shape_cast %19 : vector<1x64x256xbf16> to vector<64x256xbf16>
    %c3 = arith.constant 3 : index
    %c0_21 = arith.constant 0 : index
    %c0_22 = arith.constant 0 : index
    %21 = vector.load %arg7[%c3, %c0_21, %c0_22] : memref<9x256x256xbf16, #tpu.memory_space<vmem>>, vector<1x256x256xbf16>
    %22 = vector.shape_cast %21 : vector<1x256x256xbf16> to vector<256x256xbf16>
    %cst_23 = arith.constant dense<0.000000e+00> : vector<64x256xf32>
    %23 = tpu.matmul %20, %22, %cst_23 {dimension_numbers = #tpu.dot_dimension_numbers<[1], [0], [0], [1], [0, 0, 1, 1], [], []>} : vector<64x256xbf16>, vector<256x256xbf16>, vector<64x256xf32> -> vector<64x256xf32>
    %24 = arith.addf %18, %23 : vector<64x256xf32>
    %c0_24 = arith.constant 0 : index
    %c0_25 = arith.constant 0 : index
    %c0_26 = arith.constant 0 : index
    %25 = vector.load %arg5[%c0_24, %c0_25, %c0_26] : memref<1x72x256xbf16, #tpu.memory_space<vmem>>, vector<1x64x256xbf16>
    %26 = vector.shape_cast %25 : vector<1x64x256xbf16> to vector<64x256xbf16>
    %c4 = arith.constant 4 : index
    %c0_27 = arith.constant 0 : index
    %c0_28 = arith.constant 0 : index
    %27 = vector.load %arg7[%c4, %c0_27, %c0_28] : memref<9x256x256xbf16, #tpu.memory_space<vmem>>, vector<1x256x256xbf16>
    %28 = vector.shape_cast %27 : vector<1x256x256xbf16> to vector<256x256xbf16>
    %cst_29 = arith.constant dense<0.000000e+00> : vector<64x256xf32>
    %29 = tpu.matmul %26, %28, %cst_29 {dimension_numbers = #tpu.dot_dimension_numbers<[1], [0], [0], [1], [0, 0, 1, 1], [], []>} : vector<64x256xbf16>, vector<256x256xbf16>, vector<64x256xf32> -> vector<64x256xf32>
    %30 = arith.addf %24, %29 : vector<64x256xf32>
    %c0_30 = arith.constant 0 : index
    %c0_31 = arith.constant 0 : index
    %c0_32 = arith.constant 0 : index
    %31 = vector.load %arg6[%c0_30, %c0_31, %c0_32] : memref<1x72x256xbf16, #tpu.memory_space<vmem>>, vector<1x64x256xbf16>
    %32 = vector.shape_cast %31 : vector<1x64x256xbf16> to vector<64x256xbf16>
    %c5 = arith.constant 5 : index
    %c0_33 = arith.constant 0 : index
    %c0_34 = arith.constant 0 : index
    %33 = vector.load %arg7[%c5, %c0_33, %c0_34] : memref<9x256x256xbf16, #tpu.memory_space<vmem>>, vector<1x256x256xbf16>
    %34 = vector.shape_cast %33 : vector<1x256x256xbf16> to vector<256x256xbf16>
    %cst_35 = arith.constant dense<0.000000e+00> : vector<64x256xf32>
    %35 = tpu.matmul %32, %34, %cst_35 {dimension_numbers = #tpu.dot_dimension_numbers<[1], [0], [0], [1], [0, 0, 1, 1], [], []>} : vector<64x256xbf16>, vector<256x256xbf16>, vector<64x256xf32> -> vector<64x256xf32>
    %36 = arith.addf %30, %35 : vector<64x256xf32>
    %c0_36 = arith.constant 0 : index
    %c8 = arith.constant 8 : index
    %c0_37 = arith.constant 0 : index
    %37 = vector.load %arg1[%c0_36, %c8, %c0_37] : memref<1x72x256xbf16, #tpu.memory_space<vmem>>, vector<1x64x256xbf16>
    %38 = vector.shape_cast %37 : vector<1x64x256xbf16> to vector<64x256xbf16>
    %c6 = arith.constant 6 : index
    %c0_38 = arith.constant 0 : index
    %c0_39 = arith.constant 0 : index
    %39 = vector.load %arg7[%c6, %c0_38, %c0_39] : memref<9x256x256xbf16, #tpu.memory_space<vmem>>, vector<1x256x256xbf16>
    %40 = vector.shape_cast %39 : vector<1x256x256xbf16> to vector<256x256xbf16>
    %cst_40 = arith.constant dense<0.000000e+00> : vector<64x256xf32>
    %41 = tpu.matmul %38, %40, %cst_40 {dimension_numbers = #tpu.dot_dimension_numbers<[1], [0], [0], [1], [0, 0, 1, 1], [], []>} : vector<64x256xbf16>, vector<256x256xbf16>, vector<64x256xf32> -> vector<64x256xf32>
    %42 = arith.addf %36, %41 : vector<64x256xf32>
    %c0_41 = arith.constant 0 : index
    %c8_42 = arith.constant 8 : index
    %c0_43 = arith.constant 0 : index
    %43 = vector.load %arg2[%c0_41, %c8_42, %c0_43] : memref<1x72x256xbf16, #tpu.memory_space<vmem>>, vector<1x64x256xbf16>
    %44 = vector.shape_cast %43 : vector<1x64x256xbf16> to vector<64x256xbf16>
    %c7 = arith.constant 7 : index
    %c0_44 = arith.constant 0 : index
    %c0_45 = arith.constant 0 : index
    %45 = vector.load %arg7[%c7, %c0_44, %c0_45] : memref<9x256x256xbf16, #tpu.memory_space<vmem>>, vector<1x256x256xbf16>
    %46 = vector.shape_cast %45 : vector<1x256x256xbf16> to vector<256x256xbf16>
    %cst_46 = arith.constant dense<0.000000e+00> : vector<64x256xf32>
    %47 = tpu.matmul %44, %46, %cst_46 {dimension_numbers = #tpu.dot_dimension_numbers<[1], [0], [0], [1], [0, 0, 1, 1], [], []>} : vector<64x256xbf16>, vector<256x256xbf16>, vector<64x256xf32> -> vector<64x256xf32>
    %48 = arith.addf %42, %47 : vector<64x256xf32>
    %c0_47 = arith.constant 0 : index
    %c8_48 = arith.constant 8 : index
    %c0_49 = arith.constant 0 : index
    %49 = vector.load %arg3[%c0_47, %c8_48, %c0_49] : memref<1x72x256xbf16, #tpu.memory_space<vmem>>, vector<1x64x256xbf16>
    %50 = vector.shape_cast %49 : vector<1x64x256xbf16> to vector<64x256xbf16>
    %c8_50 = arith.constant 8 : index
    %c0_51 = arith.constant 0 : index
    %c0_52 = arith.constant 0 : index
    %51 = vector.load %arg7[%c8_50, %c0_51, %c0_52] : memref<9x256x256xbf16, #tpu.memory_space<vmem>>, vector<1x256x256xbf16>
    %52 = vector.shape_cast %51 : vector<1x256x256xbf16> to vector<256x256xbf16>
    %cst_53 = arith.constant dense<0.000000e+00> : vector<64x256xf32>
    %53 = tpu.matmul %50, %52, %cst_53 {dimension_numbers = #tpu.dot_dimension_numbers<[1], [0], [0], [1], [0, 0, 1, 1], [], []>} : vector<64x256xbf16>, vector<256x256xbf16>, vector<64x256xf32> -> vector<64x256xf32>
    %54 = arith.addf %48, %53 : vector<64x256xf32>
    %c0_54 = arith.constant 0 : index
    %c0_55 = arith.constant 0 : index
    %55 = vector.load %arg8[%c0_54, %c0_55] : memref<1x256xf32, #tpu.memory_space<vmem>>, vector<1x256xf32>
    %56 = vector.broadcast %55 : vector<1x256xf32> to vector<64x256xf32>
    %57 = arith.addf %54, %56 : vector<64x256xf32>
    %cst_56 = arith.constant 0.000000e+00 : f32
    %58 = vector.broadcast %cst_56 : f32 to vector<64x256xf32>
    %59 = arith.maximumf %57, %58 : vector<64x256xf32>
    %60 = arith.truncf %59 : vector<64x256xf32> to vector<64x256xbf16>
    %c0_57 = arith.constant 0 : index
    %c0_58 = arith.constant 0 : index
    %c0_59 = arith.constant 0 : index
    %61 = vector.load %arg9[%c0_57, %c0_58, %c0_59] : memref<1x64x256xbf16, #tpu.memory_space<vmem>>, vector<1x64x256xbf16>
    %62 = vector.shape_cast %61 : vector<1x64x256xbf16> to vector<64x256xbf16>
    %63 = vector.shape_cast %60 : vector<64x256xbf16> to vector<1x64x256xbf16>
    tpu.vector_store %arg9[%c0_57, %c0_58, %c0_59], %63 {strides = array<i32>} : memref<1x64x256xbf16, #tpu.memory_space<vmem>>, vector<1x64x256xbf16>,
    return
  }
  func.func @transform_0(%arg0: i32) -> (i32, i32, i32) {
    %c0_i32 = arith.constant 0 : i32
    %c0_i32_0 = arith.constant 0 : i32
    %c0_i32_1 = arith.constant 0 : i32
    return %arg0, %c0_i32, %c0_i32_0 : i32, i32, i32
  }
  func.func @transform_1(%arg0: i32) -> (i32, i32, i32) {
    %c0_i32 = arith.constant 0 : i32
    %c0_i32_0 = arith.constant 0 : i32
    %c0_i32_1 = arith.constant 0 : i32
    return %arg0, %c0_i32, %c0_i32_0 : i32, i32, i32
  }
  func.func @transform_2(%arg0: i32) -> (i32, i32, i32) {
    %c0_i32 = arith.constant 0 : i32
    %c0_i32_0 = arith.constant 0 : i32
    %c0_i32_1 = arith.constant 0 : i32
    return %arg0, %c0_i32, %c0_i32_0 : i32, i32, i32
  }
  func.func @transform_3(%arg0: i32) -> (i32, i32, i32) {
    %c0_i32 = arith.constant 0 : i32
    %c0_i32_0 = arith.constant 0 : i32
    %c0_i32_1 = arith.constant 0 : i32
    return %arg0, %c0_i32, %c0_i32_0 : i32, i32, i32
  }
  func.func @transform_4(%arg0: i32) -> (i32, i32, i32) {
    %c0_i32 = arith.constant 0 : i32
    %c0_i32_0 = arith.constant 0 : i32
    %c0_i32_1 = arith.constant 0 : i32
    return %arg0, %c0_i32, %c0_i32_0 : i32, i32, i32
  }
  func.func @transform_5(%arg0: i32) -> (i32, i32, i32) {
    %c0_i32 = arith.constant 0 : i32
    %c0_i32_0 = arith.constant 0 : i32
    %c0_i32_1 = arith.constant 0 : i32
    return %arg0, %c0_i32, %c0_i32_0 : i32, i32, i32
  }
  func.func @transform_6(%arg0: i32) -> (i32, i32, i32) {
    %c0_i32 = arith.constant 0 : i32
    %c0_i32_0 = arith.constant 0 : i32
    %c0_i32_1 = arith.constant 0 : i32
    %c0_i32_2 = arith.constant 0 : i32
    return %c0_i32, %c0_i32_0, %c0_i32_1 : i32, i32, i32
  }
  func.func @transform_7(%arg0: i32) -> (i32, i32) {
    %c0_i32 = arith.constant 0 : i32
    %c0_i32_0 = arith.constant 0 : i32
    %c0_i32_1 = arith.constant 0 : i32
    return %c0_i32, %c0_i32_0 : i32, i32
  }
  func.func @transform_8(%arg0: i32) -> (i32, i32, i32) {
    %c0_i32 = arith.constant 0 : i32
    %c0_i32_0 = arith.constant 0 : i32
    %c0_i32_1 = arith.constant 0 : i32
    return %arg0, %c0_i32, %c0_i32_0 : i32, i32, i32
  }
}

module attributes {stable_mosaic.version = 11 : i64} {
  func.func @_bb_regressor_kernel(%arg0: i32, %arg1: memref<1x256x256xbf16, #tpu.memory_space<vmem>>, %arg2: memref<1x256x256xbf16, #tpu.memory_space<vmem>>, %arg3: memref<1x64x256xbf16, #tpu.memory_space<vmem>>, %arg4: memref<1x64x256xbf16, #tpu.memory_space<vmem>>, %arg5: memref<1x1x4xf32, #tpu.memory_space<vmem>>, %arg6: memref<1x1x32xf32, #tpu.memory_space<vmem>>, %arg7: memref<1x256xbf16, #tpu.memory_space<vmem>>, %arg8: memref<1x64xbf16, #tpu.memory_space<vmem>>, %arg9: memref<256x256xbf16, #tpu.memory_space<vmem>>, %arg10: memref<1x256xf32, #tpu.memory_space<vmem>>, %arg11: memref<256x256xbf16, #tpu.memory_space<vmem>>, %arg12: memref<1x256xf32, #tpu.memory_space<vmem>>, %arg13: memref<256x256xf32, #tpu.memory_space<vmem>>, %arg14: memref<4x256xf32, #tpu.memory_space<vmem>>, %arg15: memref<1x256xf32, #tpu.memory_space<vmem>>, %arg16: memref<256x256xf32, #tpu.memory_space<vmem>>, %arg17: memref<4x256xf32, #tpu.memory_space<vmem>>, %arg18: memref<1x256xf32, #tpu.memory_space<vmem>>, %arg19: memref<256x1xf32, #tpu.memory_space<vmem>>, %arg20: memref<256x1xf32, #tpu.memory_space<vmem>>, %arg21: memref<32x128xf32, #tpu.memory_space<vmem>>, %arg22: memref<1x1xf32, #tpu.memory_space<vmem>>, %arg23: memref<1x1x128xf32, #tpu.memory_space<vmem>>) attributes {dimension_semantics = [#tpu.dimension_semantics<parallel>], iteration_bounds = array<i64: 2>, scalar_prefetch = 0 : i64, scratch_operands = 0 : i64, tpu.core_type = #tpu.core_type<tc>, window_params = [{transform_indices = @transform_0, window_bounds = array<i64: 1, 256, 256>}, {transform_indices = @transform_1, window_bounds = array<i64: 1, 256, 256>}, {transform_indices = @transform_2, window_bounds = array<i64: 1, 64, 256>}, {transform_indices = @transform_3, window_bounds = array<i64: 1, 64, 256>}, {transform_indices = @transform_4, window_bounds = array<i64: 1, 1, 4>}, {transform_indices = @transform_5, window_bounds = array<i64: 1, 1, 32>}, {pipeline_mode = #tpu.pipeline_mode<synchronous>, transform_indices = @transform_6, window_bounds = array<i64: 1, 256>}, {pipeline_mode = #tpu.pipeline_mode<synchronous>, transform_indices = @transform_7, window_bounds = array<i64: 1, 64>}, {pipeline_mode = #tpu.pipeline_mode<synchronous>, transform_indices = @transform_8, window_bounds = array<i64: 256, 256>}, {pipeline_mode = #tpu.pipeline_mode<synchronous>, transform_indices = @transform_9, window_bounds = array<i64: 1, 256>}, {pipeline_mode = #tpu.pipeline_mode<synchronous>, transform_indices = @transform_10, window_bounds = array<i64: 256, 256>}, {pipeline_mode = #tpu.pipeline_mode<synchronous>, transform_indices = @transform_11, window_bounds = array<i64: 1, 256>}, {pipeline_mode = #tpu.pipeline_mode<synchronous>, transform_indices = @transform_12, window_bounds = array<i64: 256, 256>}, {pipeline_mode = #tpu.pipeline_mode<synchronous>, transform_indices = @transform_13, window_bounds = array<i64: 4, 256>}, {pipeline_mode = #tpu.pipeline_mode<synchronous>, transform_indices = @transform_14, window_bounds = array<i64: 1, 256>}, {pipeline_mode = #tpu.pipeline_mode<synchronous>, transform_indices = @transform_15, window_bounds = array<i64: 256, 256>}, {pipeline_mode = #tpu.pipeline_mode<synchronous>, transform_indices = @transform_16, window_bounds = array<i64: 4, 256>}, {pipeline_mode = #tpu.pipeline_mode<synchronous>, transform_indices = @transform_17, window_bounds = array<i64: 1, 256>}, {pipeline_mode = #tpu.pipeline_mode<synchronous>, transform_indices = @transform_18, window_bounds = array<i64: 256, 1>}, {pipeline_mode = #tpu.pipeline_mode<synchronous>, transform_indices = @transform_19, window_bounds = array<i64: 256, 1>}, {pipeline_mode = #tpu.pipeline_mode<synchronous>, transform_indices = @transform_20, window_bounds = array<i64: 32, 128>}, {pipeline_mode = #tpu.pipeline_mode<synchronous>, transform_indices = @transform_21, window_bounds = array<i64: 1, 1>}, {transform_indices = @transform_22, window_bounds = array<i64: 1, 1, 128>}]} {
    %c0 = arith.constant 0 : index
    %c0_0 = arith.constant 0 : index
    %0 = vector.load %arg9[%c0, %c0_0] : memref<256x256xbf16, #tpu.memory_space<vmem>>, vector<256x256xbf16>
    %c0_1 = arith.constant 0 : index
    %c0_2 = arith.constant 0 : index
    %c0_3 = arith.constant 0 : index
    %1 = vector.load %arg1[%c0_1, %c0_2, %c0_3] : memref<1x256x256xbf16, #tpu.memory_space<vmem>>, vector<1x256x256xbf16>
    %2 = vector.shape_cast %1 : vector<1x256x256xbf16> to vector<256x256xbf16>
    %cst = arith.constant dense<0.000000e+00> : vector<256x256xf32>
    %3 = tpu.matmul %2, %0, %cst {dimension_numbers = #tpu.dot_dimension_numbers<[1], [0], [0], [1], [0, 0, 1, 1], [], []>} : vector<256x256xbf16>, vector<256x256xbf16>, vector<256x256xf32> -> vector<256x256xf32>
    %c0_4 = arith.constant 0 : index
    %c0_5 = arith.constant 0 : index
    %4 = vector.load %arg10[%c0_4, %c0_5] : memref<1x256xf32, #tpu.memory_space<vmem>>, vector<1x256xf32>
    %5 = vector.broadcast %4 : vector<1x256xf32> to vector<256x256xf32>
    %6 = arith.addf %3, %5 : vector<256x256xf32>
    %cst_6 = arith.constant 0.000000e+00 : f32
    %7 = vector.broadcast %cst_6 : f32 to vector<256x256xf32>
    %8 = arith.maximumf %6, %7 : vector<256x256xf32>
    %c0_7 = arith.constant 0 : index
    %c0_8 = arith.constant 0 : index
    %c0_9 = arith.constant 0 : index
    %9 = vector.load %arg2[%c0_7, %c0_8, %c0_9] : memref<1x256x256xbf16, #tpu.memory_space<vmem>>, vector<1x256x256xbf16>
    %10 = vector.shape_cast %9 : vector<1x256x256xbf16> to vector<256x256xbf16>
    %cst_10 = arith.constant dense<0.000000e+00> : vector<256x256xf32>
    %11 = tpu.matmul %10, %0, %cst_10 {dimension_numbers = #tpu.dot_dimension_numbers<[1], [0], [0], [1], [0, 0, 1, 1], [], []>} : vector<256x256xbf16>, vector<256x256xbf16>, vector<256x256xf32> -> vector<256x256xf32>
    %c0_11 = arith.constant 0 : index
    %c0_12 = arith.constant 0 : index
    %12 = vector.load %arg10[%c0_11, %c0_12] : memref<1x256xf32, #tpu.memory_space<vmem>>, vector<1x256xf32>
    %13 = vector.broadcast %12 : vector<1x256xf32> to vector<256x256xf32>
    %14 = arith.addf %11, %13 : vector<256x256xf32>
    %cst_13 = arith.constant 0.000000e+00 : f32
    %15 = vector.broadcast %cst_13 : f32 to vector<256x256xf32>
    %16 = arith.maximumf %14, %15 : vector<256x256xf32>
    %c0_14 = arith.constant 0 : index
    %c0_15 = arith.constant 0 : index
    %17 = vector.load %arg7[%c0_14, %c0_15] : memref<1x256xbf16, #tpu.memory_space<vmem>>, vector<1x256xbf16>
    %18 = arith.truncf %8 : vector<256x256xf32> to vector<256x256xbf16>
    %cst_16 = arith.constant dense<0.000000e+00> : vector<1x256xf32>
    %19 = tpu.matmul %17, %18, %cst_16 {dimension_numbers = #tpu.dot_dimension_numbers<[1], [0], [0], [1], [0, 0, 1, 1], [], []>} : vector<1x256xbf16>, vector<256x256xbf16>, vector<1x256xf32> -> vector<1x256xf32>
    %c0_17 = arith.constant 0 : index
    %c0_18 = arith.constant 0 : index
    %20 = vector.load %arg7[%c0_17, %c0_18] : memref<1x256xbf16, #tpu.memory_space<vmem>>, vector<1x256xbf16>
    %21 = arith.truncf %16 : vector<256x256xf32> to vector<256x256xbf16>
    %cst_19 = arith.constant dense<0.000000e+00> : vector<1x256xf32>
    %22 = tpu.matmul %20, %21, %cst_19 {dimension_numbers = #tpu.dot_dimension_numbers<[1], [0], [0], [1], [0, 0, 1, 1], [], []>} : vector<1x256xbf16>, vector<256x256xbf16>, vector<1x256xf32> -> vector<1x256xf32>
    %c0_20 = arith.constant 0 : index
    %c0_21 = arith.constant 0 : index
    %23 = vector.load %arg13[%c0_20, %c0_21] : memref<256x256xf32, #tpu.memory_space<vmem>>, vector<256x256xf32>
    %cst_22 = arith.constant dense<0.000000e+00> : vector<1x256xf32>
    %24 = tpu.matmul %19, %23, %cst_22 {dimension_numbers = #tpu.dot_dimension_numbers<[1], [0], [0], [1], [0, 0, 1, 1], [], []>} : vector<1x256xf32>, vector<256x256xf32>, vector<1x256xf32> -> vector<1x256xf32>
    %c0_23 = arith.constant 0 : index
    %c0_24 = arith.constant 0 : index
    %c0_25 = arith.constant 0 : index
    %25 = vector.load %arg5[%c0_23, %c0_24, %c0_25] : memref<1x1x4xf32, #tpu.memory_space<vmem>>, vector<1x1x4xf32>
    %26 = vector.shape_cast %25 : vector<1x1x4xf32> to vector<1x4xf32>
    %c0_26 = arith.constant 0 : index
    %c0_27 = arith.constant 0 : index
    %27 = vector.load %arg14[%c0_26, %c0_27] : memref<4x256xf32, #tpu.memory_space<vmem>>, vector<4x256xf32>
    %cst_28 = arith.constant dense<0.000000e+00> : vector<1x256xf32>
    %28 = tpu.matmul %26, %27, %cst_28 {dimension_numbers = #tpu.dot_dimension_numbers<[1], [0], [0], [1], [0, 0, 1, 1], [], []>} : vector<1x4xf32>, vector<4x256xf32>, vector<1x256xf32> -> vector<1x256xf32>
    %29 = arith.addf %24, %28 : vector<1x256xf32>
    %c0_29 = arith.constant 0 : index
    %c0_30 = arith.constant 0 : index
    %30 = vector.load %arg15[%c0_29, %c0_30] : memref<1x256xf32, #tpu.memory_space<vmem>>, vector<1x256xf32>
    %31 = arith.addf %29, %30 : vector<1x256xf32>
    %cst_31 = arith.constant 0.000000e+00 : f32
    %32 = vector.broadcast %cst_31 : f32 to vector<1x256xf32>
    %33 = arith.maximumf %31, %32 : vector<1x256xf32>
    %34 = arith.mulf %22, %33 : vector<1x256xf32>
    %c0_32 = arith.constant 0 : index
    %c0_33 = arith.constant 0 : index
    %35 = vector.load %arg11[%c0_32, %c0_33] : memref<256x256xbf16, #tpu.memory_space<vmem>>, vector<256x256xbf16>
    %c0_34 = arith.constant 0 : index
    %c0_35 = arith.constant 0 : index
    %c0_36 = arith.constant 0 : index
    %36 = vector.load %arg3[%c0_34, %c0_35, %c0_36] : memref<1x64x256xbf16, #tpu.memory_space<vmem>>, vector<1x64x256xbf16>
    %37 = vector.shape_cast %36 : vector<1x64x256xbf16> to vector<64x256xbf16>
    %cst_37 = arith.constant dense<0.000000e+00> : vector<64x256xf32>
    %38 = tpu.matmul %37, %35, %cst_37 {dimension_numbers = #tpu.dot_dimension_numbers<[1], [0], [0], [1], [0, 0, 1, 1], [], []>} : vector<64x256xbf16>, vector<256x256xbf16>, vector<64x256xf32> -> vector<64x256xf32>
    %c0_38 = arith.constant 0 : index
    %c0_39 = arith.constant 0 : index
    %39 = vector.load %arg12[%c0_38, %c0_39] : memref<1x256xf32, #tpu.memory_space<vmem>>, vector<1x256xf32>
    %40 = vector.broadcast %39 : vector<1x256xf32> to vector<64x256xf32>
    %41 = arith.addf %38, %40 : vector<64x256xf32>
    %cst_40 = arith.constant 0.000000e+00 : f32
    %42 = vector.broadcast %cst_40 : f32 to vector<64x256xf32>
    %43 = arith.maximumf %41, %42 : vector<64x256xf32>
    %c0_41 = arith.constant 0 : index
    %c0_42 = arith.constant 0 : index
    %c0_43 = arith.constant 0 : index
    %44 = vector.load %arg4[%c0_41, %c0_42, %c0_43] : memref<1x64x256xbf16, #tpu.memory_space<vmem>>, vector<1x64x256xbf16>
    %45 = vector.shape_cast %44 : vector<1x64x256xbf16> to vector<64x256xbf16>
    %cst_44 = arith.constant dense<0.000000e+00> : vector<64x256xf32>
    %46 = tpu.matmul %45, %35, %cst_44 {dimension_numbers = #tpu.dot_dimension_numbers<[1], [0], [0], [1], [0, 0, 1, 1], [], []>} : vector<64x256xbf16>, vector<256x256xbf16>, vector<64x256xf32> -> vector<64x256xf32>
    %c0_45 = arith.constant 0 : index
    %c0_46 = arith.constant 0 : index
    %47 = vector.load %arg12[%c0_45, %c0_46] : memref<1x256xf32, #tpu.memory_space<vmem>>, vector<1x256xf32>
    %48 = vector.broadcast %47 : vector<1x256xf32> to vector<64x256xf32>
    %49 = arith.addf %46, %48 : vector<64x256xf32>
    %cst_47 = arith.constant 0.000000e+00 : f32
    %50 = vector.broadcast %cst_47 : f32 to vector<64x256xf32>
    %51 = arith.maximumf %49, %50 : vector<64x256xf32>
    %c0_48 = arith.constant 0 : index
    %c0_49 = arith.constant 0 : index
    %52 = vector.load %arg8[%c0_48, %c0_49] : memref<1x64xbf16, #tpu.memory_space<vmem>>, vector<1x64xbf16>
    %53 = arith.truncf %43 : vector<64x256xf32> to vector<64x256xbf16>
    %cst_50 = arith.constant dense<0.000000e+00> : vector<1x256xf32>
    %54 = tpu.matmul %52, %53, %cst_50 {dimension_numbers = #tpu.dot_dimension_numbers<[1], [0], [0], [1], [0, 0, 1, 1], [], []>} : vector<1x64xbf16>, vector<64x256xbf16>, vector<1x256xf32> -> vector<1x256xf32>
    %c0_51 = arith.constant 0 : index
    %c0_52 = arith.constant 0 : index
    %55 = vector.load %arg8[%c0_51, %c0_52] : memref<1x64xbf16, #tpu.memory_space<vmem>>, vector<1x64xbf16>
    %56 = arith.truncf %51 : vector<64x256xf32> to vector<64x256xbf16>
    %cst_53 = arith.constant dense<0.000000e+00> : vector<1x256xf32>
    %57 = tpu.matmul %55, %56, %cst_53 {dimension_numbers = #tpu.dot_dimension_numbers<[1], [0], [0], [1], [0, 0, 1, 1], [], []>} : vector<1x64xbf16>, vector<64x256xbf16>, vector<1x256xf32> -> vector<1x256xf32>
    %c0_54 = arith.constant 0 : index
    %c0_55 = arith.constant 0 : index
    %58 = vector.load %arg16[%c0_54, %c0_55] : memref<256x256xf32, #tpu.memory_space<vmem>>, vector<256x256xf32>
    %cst_56 = arith.constant dense<0.000000e+00> : vector<1x256xf32>
    %59 = tpu.matmul %54, %58, %cst_56 {dimension_numbers = #tpu.dot_dimension_numbers<[1], [0], [0], [1], [0, 0, 1, 1], [], []>} : vector<1x256xf32>, vector<256x256xf32>, vector<1x256xf32> -> vector<1x256xf32>
    %c0_57 = arith.constant 0 : index
    %c0_58 = arith.constant 0 : index
    %c0_59 = arith.constant 0 : index
    %60 = vector.load %arg5[%c0_57, %c0_58, %c0_59] : memref<1x1x4xf32, #tpu.memory_space<vmem>>, vector<1x1x4xf32>
    %61 = vector.shape_cast %60 : vector<1x1x4xf32> to vector<1x4xf32>
    %c0_60 = arith.constant 0 : index
    %c0_61 = arith.constant 0 : index
    %62 = vector.load %arg17[%c0_60, %c0_61] : memref<4x256xf32, #tpu.memory_space<vmem>>, vector<4x256xf32>
    %cst_62 = arith.constant dense<0.000000e+00> : vector<1x256xf32>
    %63 = tpu.matmul %61, %62, %cst_62 {dimension_numbers = #tpu.dot_dimension_numbers<[1], [0], [0], [1], [0, 0, 1, 1], [], []>} : vector<1x4xf32>, vector<4x256xf32>, vector<1x256xf32> -> vector<1x256xf32>
    %64 = arith.addf %59, %63 : vector<1x256xf32>
    %c0_63 = arith.constant 0 : index
    %c0_64 = arith.constant 0 : index
    %65 = vector.load %arg18[%c0_63, %c0_64] : memref<1x256xf32, #tpu.memory_space<vmem>>, vector<1x256xf32>
    %66 = arith.addf %64, %65 : vector<1x256xf32>
    %cst_65 = arith.constant 0.000000e+00 : f32
    %67 = vector.broadcast %cst_65 : f32 to vector<1x256xf32>
    %68 = arith.maximumf %66, %67 : vector<1x256xf32>
    %69 = arith.mulf %57, %68 : vector<1x256xf32>
    %c0_66 = arith.constant 0 : index
    %c0_67 = arith.constant 0 : index
    %70 = vector.load %arg19[%c0_66, %c0_67] : memref<256x1xf32, #tpu.memory_space<vmem>>, vector<256x1xf32>
    %cst_68 = arith.constant dense<0.000000e+00> : vector<1x1xf32>
    %71 = tpu.matmul %34, %70, %cst_68 {dimension_numbers = #tpu.dot_dimension_numbers<[1], [0], [0], [1], [0, 0, 1, 1], [], []>} : vector<1x256xf32>, vector<256x1xf32>, vector<1x1xf32> -> vector<1x1xf32>
    %c0_69 = arith.constant 0 : index
    %c0_70 = arith.constant 0 : index
    %72 = vector.load %arg20[%c0_69, %c0_70] : memref<256x1xf32, #tpu.memory_space<vmem>>, vector<256x1xf32>
    %cst_71 = arith.constant dense<0.000000e+00> : vector<1x1xf32>
    %73 = tpu.matmul %69, %72, %cst_71 {dimension_numbers = #tpu.dot_dimension_numbers<[1], [0], [0], [1], [0, 0, 1, 1], [], []>} : vector<1x256xf32>, vector<256x1xf32>, vector<1x1xf32> -> vector<1x1xf32>
    %74 = arith.addf %71, %73 : vector<1x1xf32>
    %c0_72 = arith.constant 0 : index
    %c0_73 = arith.constant 0 : index
    %c0_74 = arith.constant 0 : index
    %75 = vector.load %arg6[%c0_72, %c0_73, %c0_74] : memref<1x1x32xf32, #tpu.memory_space<vmem>>, vector<1x1x32xf32>
    %76 = vector.shape_cast %75 : vector<1x1x32xf32> to vector<1x32xf32>
    %c0_75 = arith.constant 0 : index
    %c0_76 = arith.constant 0 : index
    %77 = vector.load %arg21[%c0_75, %c0_76] : memref<32x128xf32, #tpu.memory_space<vmem>>, vector<32x128xf32>
    %cst_77 = arith.constant dense<0.000000e+00> : vector<1x128xf32>
    %78 = tpu.matmul %76, %77, %cst_77 {dimension_numbers = #tpu.dot_dimension_numbers<[1], [0], [0], [1], [0, 0, 1, 1], [], []>} : vector<1x32xf32>, vector<32x128xf32>, vector<1x128xf32> -> vector<1x128xf32>
    %79 = vector.broadcast %74 : vector<1x1xf32> to vector<1x128xf32>
    %80 = arith.addf %78, %79 : vector<1x128xf32>
    %c0_78 = arith.constant 0 : index
    %c0_79 = arith.constant 0 : index
    %81 = vector.load %arg22[%c0_78, %c0_79] : memref<1x1xf32, #tpu.memory_space<vmem>>, vector<1x1xf32>
    %82 = vector.broadcast %81 : vector<1x1xf32> to vector<1x128xf32>
    %83 = arith.addf %80, %82 : vector<1x128xf32>
    %c0_80 = arith.constant 0 : index
    %c0_81 = arith.constant 0 : index
    %c0_82 = arith.constant 0 : index
    %84 = vector.load %arg23[%c0_80, %c0_81, %c0_82] : memref<1x1x128xf32, #tpu.memory_space<vmem>>, vector<1x1x128xf32>
    %85 = vector.shape_cast %84 : vector<1x1x128xf32> to vector<1x128xf32>
    %86 = vector.shape_cast %83 : vector<1x128xf32> to vector<1x1x128xf32>
    tpu.vector_store %arg23[%c0_80, %c0_81, %c0_82], %86 {strides = array<i32>} : memref<1x1x128xf32, #tpu.memory_space<vmem>>, vector<1x1x128xf32>,
    return
  }
  func.func @transform_0(%arg0: i32) -> (i32, i32, i32) {
    %c0_i32 = arith.constant 0 : i32
    %c0_i32_0 = arith.constant 0 : i32
    %c0_i32_1 = arith.constant 0 : i32
    return %arg0, %c0_i32, %c0_i32_0 : i32, i32, i32
  }
  func.func @transform_1(%arg0: i32) -> (i32, i32, i32) {
    %c0_i32 = arith.constant 0 : i32
    %c0_i32_0 = arith.constant 0 : i32
    %c0_i32_1 = arith.constant 0 : i32
    return %arg0, %c0_i32, %c0_i32_0 : i32, i32, i32
  }
  func.func @transform_2(%arg0: i32) -> (i32, i32, i32) {
    %c0_i32 = arith.constant 0 : i32
    %c0_i32_0 = arith.constant 0 : i32
    %c0_i32_1 = arith.constant 0 : i32
    return %arg0, %c0_i32, %c0_i32_0 : i32, i32, i32
  }
  func.func @transform_3(%arg0: i32) -> (i32, i32, i32) {
    %c0_i32 = arith.constant 0 : i32
    %c0_i32_0 = arith.constant 0 : i32
    %c0_i32_1 = arith.constant 0 : i32
    return %arg0, %c0_i32, %c0_i32_0 : i32, i32, i32
  }
  func.func @transform_4(%arg0: i32) -> (i32, i32, i32) {
    %c0_i32 = arith.constant 0 : i32
    %c0_i32_0 = arith.constant 0 : i32
    %c0_i32_1 = arith.constant 0 : i32
    return %arg0, %c0_i32, %c0_i32_0 : i32, i32, i32
  }
  func.func @transform_5(%arg0: i32) -> (i32, i32, i32) {
    %c0_i32 = arith.constant 0 : i32
    %c0_i32_0 = arith.constant 0 : i32
    %c0_i32_1 = arith.constant 0 : i32
    return %arg0, %c0_i32, %c0_i32_0 : i32, i32, i32
  }
  func.func @transform_6(%arg0: i32) -> (i32, i32) {
    %c0_i32 = arith.constant 0 : i32
    %c0_i32_0 = arith.constant 0 : i32
    %c0_i32_1 = arith.constant 0 : i32
    return %c0_i32, %c0_i32_0 : i32, i32
  }
  func.func @transform_7(%arg0: i32) -> (i32, i32) {
    %c0_i32 = arith.constant 0 : i32
    %c0_i32_0 = arith.constant 0 : i32
    %c0_i32_1 = arith.constant 0 : i32
    return %c0_i32, %c0_i32_0 : i32, i32
  }
  func.func @transform_8(%arg0: i32) -> (i32, i32) {
    %c0_i32 = arith.constant 0 : i32
    %c0_i32_0 = arith.constant 0 : i32
    %c0_i32_1 = arith.constant 0 : i32
    return %c0_i32, %c0_i32_0 : i32, i32
  }
  func.func @transform_9(%arg0: i32) -> (i32, i32) {
    %c0_i32 = arith.constant 0 : i32
    %c0_i32_0 = arith.constant 0 : i32
    %c0_i32_1 = arith.constant 0 : i32
    return %c0_i32, %c0_i32_0 : i32, i32
  }
  func.func @transform_10(%arg0: i32) -> (i32, i32) {
    %c0_i32 = arith.constant 0 : i32
    %c0_i32_0 = arith.constant 0 : i32
    %c0_i32_1 = arith.constant 0 : i32
    return %c0_i32, %c0_i32_0 : i32, i32
  }
  func.func @transform_11(%arg0: i32) -> (i32, i32) {
    %c0_i32 = arith.constant 0 : i32
    %c0_i32_0 = arith.constant 0 : i32
    %c0_i32_1 = arith.constant 0 : i32
    return %c0_i32, %c0_i32_0 : i32, i32
  }
  func.func @transform_12(%arg0: i32) -> (i32, i32) {
    %c0_i32 = arith.constant 0 : i32
    %c0_i32_0 = arith.constant 0 : i32
    %c0_i32_1 = arith.constant 0 : i32
    return %c0_i32, %c0_i32_0 : i32, i32
  }
  func.func @transform_13(%arg0: i32) -> (i32, i32) {
    %c0_i32 = arith.constant 0 : i32
    %c0_i32_0 = arith.constant 0 : i32
    %c0_i32_1 = arith.constant 0 : i32
    return %c0_i32, %c0_i32_0 : i32, i32
  }
  func.func @transform_14(%arg0: i32) -> (i32, i32) {
    %c0_i32 = arith.constant 0 : i32
    %c0_i32_0 = arith.constant 0 : i32
    %c0_i32_1 = arith.constant 0 : i32
    return %c0_i32, %c0_i32_0 : i32, i32
  }
  func.func @transform_15(%arg0: i32) -> (i32, i32) {
    %c0_i32 = arith.constant 0 : i32
    %c0_i32_0 = arith.constant 0 : i32
    %c0_i32_1 = arith.constant 0 : i32
    return %c0_i32, %c0_i32_0 : i32, i32
  }
  func.func @transform_16(%arg0: i32) -> (i32, i32) {
    %c0_i32 = arith.constant 0 : i32
    %c0_i32_0 = arith.constant 0 : i32
    %c0_i32_1 = arith.constant 0 : i32
    return %c0_i32, %c0_i32_0 : i32, i32
  }
  func.func @transform_17(%arg0: i32) -> (i32, i32) {
    %c0_i32 = arith.constant 0 : i32
    %c0_i32_0 = arith.constant 0 : i32
    %c0_i32_1 = arith.constant 0 : i32
    return %c0_i32, %c0_i32_0 : i32, i32
  }
  func.func @transform_18(%arg0: i32) -> (i32, i32) {
    %c0_i32 = arith.constant 0 : i32
    %c0_i32_0 = arith.constant 0 : i32
    %c0_i32_1 = arith.constant 0 : i32
    return %c0_i32, %c0_i32_0 : i32, i32
  }
  func.func @transform_19(%arg0: i32) -> (i32, i32) {
    %c0_i32 = arith.constant 0 : i32
    %c0_i32_0 = arith.constant 0 : i32
    %c0_i32_1 = arith.constant 0 : i32
    return %c0_i32, %c0_i32_0 : i32, i32
  }
  func.func @transform_20(%arg0: i32) -> (i32, i32) {
    %c0_i32 = arith.constant 0 : i32
    %c0_i32_0 = arith.constant 0 : i32
    %c0_i32_1 = arith.constant 0 : i32
    return %c0_i32, %c0_i32_0 : i32, i32
  }
  func.func @transform_21(%arg0: i32) -> (i32, i32) {
    %c0_i32 = arith.constant 0 : i32
    %c0_i32_0 = arith.constant 0 : i32
    %c0_i32_1 = arith.constant 0 : i32
    return %c0_i32, %c0_i32_0 : i32, i32
  }
  func.func @transform_22(%arg0: i32) -> (i32, i32, i32) {
    %c0_i32 = arith.constant 0 : i32
    %c0_i32_0 = arith.constant 0 : i32
    %c0_i32_1 = arith.constant 0 : i32
    return %arg0, %c0_i32, %c0_i32_0 : i32, i32, i32
  }
}

</mosaic_0001>

<bundles_post_ra>
// kernel: squeeze.3
= control target key start
LH: loop header
LB: loop body
LE: loop exit
PB: predicated region body
PF: predicated region fallthrough
CT: control target
= control target key end

     0   :  { %s7_s6 = smov 3  ;;  %s21_s9 = smov 3  ;;  %vm4_vm0 = vcmask 31744   ;;  %vm11_vm1 = vcmask 261344   ;;  %vm18_vm2 = vcmask 228544   ;;  %vm25_vm3 = vcmask 195744   ;;  %s121_s0 = inlined_call_operand.vmem [shape: f32[1,2,8,4], index: 0, kind: input, shape index: {}]   ;;  %s122_s1 = inlined_call_operand.vmem [shape: f32[2,1,32], index: 1, kind: output, shape index: {}]  }
   0x1   :  { %v63_v0 = vld [vmem:[%s121_s0 + $0x7] ss:$8 sm:%s7_s6]   ;;  %s77_s10 = smov 28   ;;  %v65_v1 = vld [vmem:[%s121_s0 + $0x5] ss:$8 sm:%s21_s9]   ;;  %s14_s13 = smov 3 }
   0x2   :  { %9 = vrot.lane.b32.xlu0 %v63_v0, %s77_s10  ;;  %s78_s14 = smov 20   ;;  %v64_v2 = vld [vmem:[%s121_s0 + $0x6] ss:$8 sm:%s14_s13]   ;;  %s28_s17 = smov 3  ;;  %vm32_vm4 = vcmask 162944   ;;  %vm39_vm5 = vcmask 130144  }
   0x3   :  { %23 = vrot.lane.b32.xlu1 %v65_v1, %s78_s14  ;;  %v66_v3 = vld [vmem:[%s121_s0 + $0x4] ss:$8 sm:%s28_s17]   ;;  %s35_s20 = smov 3  ;;  %s42_s21 = smov 3  ;;  %vm46_vm6 = vcmask 97344   ;;  %vm53_vm7 = vcmask 64544  }
   0x4   :  { %s79_s22 = smov 24   ;;  %s80_s23 = smov 16   ;;  %v67_v4 = vld [vmem:[%s121_s0 + $0x3] ss:$8 sm:%s35_s20]   ;;  %v68_v5 = vld [vmem:[%s121_s0 + $0x2] ss:$8 sm:%s42_s21]  }
   0x5   :  { %s2_s26 = smov 3  ;;  %s49_s29 = smov 3 }
   0x6   :  { %16 = vrot.lane.b32.xlu0 %v64_v2, %s79_s22  ;;  %v3_v6 = vld [vmem:[%s121_s0] ss:$8 sm:%s2_s26]   ;;  %s81_s3 = smov 12   ;;  %s82_s4 = smov 8  }
   0x7   :  { %30 = vrot.lane.b32.xlu1 %v66_v3, %s80_s23  ;;  %5 = vst.msk [vmem:[#allocation0] sm:$0x3] %vm4_vm0, %v3_v6   ;;  %v69_v7 = vld [vmem:[%s121_s0 + $0x1] ss:$8 sm:%s49_s29]   ;;  %s83_s0 = smov 4  }
   0xa   :  { %37 = vrot.lane.b32.xlu0 %v67_v4, %s81_s3 }
   0xb   :  { %44 = vrot.lane.b32.xlu1 %v68_v5, %s82_s4 }
   0xe   :  { %51 = vrot.lane.b32.xlu0 %v69_v7, %s83_s0 }
  0x74   :  { %v10_v8 = vpop.permute.xlu0 %9  }
  0x75   :  { %12 = vst.msk [vmem:[#allocation0] sm:$0x3] %vm11_vm1, %v10_v8   ;;  %v24_v9 = vpop.permute.xlu1 %23  }
  0x78   :  { %v17_v10 = vpop.permute.xlu0 %16  }
  0x79   :  { %19 = vst.msk [vmem:[#allocation0] sm:$0x3] %vm18_vm2, %v17_v10   ;;  %v31_v11 = vpop.permute.xlu1 %30  }
  0x7a   :  { %26 = vst.msk [vmem:[#allocation0] sm:$0x3] %vm25_vm3, %v24_v9  }
  0x7b   :  { %33 = vst.msk [vmem:[#allocation0] sm:$0x3] %vm32_vm4, %v31_v11  }
  0x7c   :  { %v38_v12 = vpop.permute.xlu0 %37  }
  0x7d   :  { %40 = vst.msk [vmem:[#allocation0] sm:$0x3] %vm39_vm5, %v38_v12   ;;  %v45_v13 = vpop.permute.xlu1 %44  }
  0x7e   :  { %47 = vst.msk [vmem:[#allocation0] sm:$0x3] %vm46_vm6, %v45_v13  }
  0x80   :  { %v52_v14 = vpop.permute.xlu0 %51  }
  0x81   :  { %54 = vst.msk [vmem:[#allocation0] sm:$0x3] %vm53_vm7, %v52_v14  }
  0x88   :  { %v59_v15 = vld [vmem:[#allocation0] sm:$0x3] }
  0x89   :  { %62 = vst [vmem:[%s122_s1] sm:$0x3] %v59_v15 }

// kernel: drnet_forward.3
= control target key start
LH: loop header
LB: loop body
LE: loop exit
PB: predicated region body
PF: predicated region fallthrough
CT: control target
= control target key end

     0   :  { %s5265_s27 = smov 0   ;;  %s6703_s0 = inlined_call_operand.vmem [shape: bf16[4,272,3], index: 0, kind: input, shape index: {}]   ;;  %s6704_s1 = inlined_call_operand.vmem [shape: bf16[4,272,3], index: 1, kind: input, shape index: {}]   ;;  %s6705_s2 = inlined_call_operand.vmem [shape: bf16[4,272,3], index: 2, kind: input, shape index: {}]   ;;  %s6706_s3 = inlined_call_operand.vmem [shape: bf16[4,272,3], index: 3, kind: input, shape index: {}]   ;;  %s6707_s4 = inlined_call_operand.vmem [shape: bf16[4,272,3], index: 4, kind: input, shape index: {}]   ;;  %s6708_s5 = inlined_call_operand.vmem [shape: bf16[4,272,3], index: 5, kind: input, shape index: {}]   ;;  %s6709_s6 = inlined_call_operand.vmem [shape: bf16[9,3,256], index: 6, kind: input, shape index: {}]   ;;  %s6710_s7 = inlined_call_operand.vmem [shape: f32[1,256], index: 7, kind: input, shape index: {}]   ;;  %s6711_s8 = inlined_call_operand.vmem [shape: bf16[4,256,256], index: 8, kind: output, shape index: {}]  }
   0x1 LB: > { %s4668_s28 = sadd.s32 4294967295, %s5216_s27   ;;  %p4672_p0 = scmp.ge.s32.totalorder %s5216_s27, 1  ;;  %s5216_s27 = sphi %s5265_s27, %s18_s27  }
   0x2   : > { %p312_p1 = scmp.lt.s32.totalorder %s5216_s27, 5 }
   0x4   : > { %p313_p2 = pnand %p4672_p0, %p312_p1 }
   0x6   : > { %316 = sbr.rel (%p313_p2) target bundleno = 799 (0x31f), region = 52 }
   0xb   : > { %v4698_v0 = vld.sshfl [vmem:[%s6709_s6 + $0x4] sm:$0x33 pattern:$0x76325410]  ;;  %vm612_vm0 = vcmask 1040384   ;;  %vm613_vm1 = vcmask 1041408  }
   0xc   : > { %v562_v1 = vcombine.high %v4698_v0, %v4698_v0  ;;  %v4731_v2 = vld.sshfl [vmem:[%s6709_s6] sm:$0x33 pattern:$0x76325410]  ;;  %v5218_v3 = vmov 65535   ;;  %v6712_v5 = vmov 0  }
   0xd   : > { %v614_v4 = vsel %vm612_vm0, 4294967295, %v5218_v3  ;;  %654 = vmatprep.mubr.bf16.mxu0 %v6712_v5  ;;  %734 = vmatprep.mubr.bf16.mxu1 %v6712_v5  ;;  %v903_v6 = vcombine.high %v4731_v2, %v4731_v2  ;;  %p371_p3 = scmp.lt.s32.totalorder %s4668_s28, 3  ;;  %v4765_v8 = vld.sshfl [vmem:[%s6709_s6 + $0x8] sm:$0x33 pattern:$0x76325410] }
   0xe   : > { %v5281_v7 = vsel %vm613_vm1, %v614_v4, 0  ;;  %v5294_v12 = vld.sshfl [vmem:[%s6709_s6 + $0xc] sm:$0x33 pattern:$0x76325410]  ;;  %v1273_v13 = vcombine.high %v4765_v8, %v4765_v8  ;;  %vm563_vm2 = vcmask 23552  }
   0xf   : > { %v620_v9 = vand.u32 %v5281_v7, %v562_v1  ;;  %v617_v10 = vand.u32 %v4698_v0, %v5281_v7  ;;  %v956_v11 = vand.u32 %v903_v6, %v5281_v7  ;;  %s6856_s28 = smov (!%p371_p3, %s4668_s28), 3  ;;  %v5299_v14 = vld.sshfl [vmem:[%s6709_s6 + $0x10] sm:$0x33 pattern:$0x76325410]  ;;  %v1707_v15 = vcombine.high %v5294_v12, %v5294_v12 }
  0x10   : > { %s5302_s17 = smul.u32 136, %s6856_s28  ;;  %v1326_v16 = vand.u32 %v1273_v13, %v5281_v7  ;;  %v2141_v17 = vcombine.high %v5299_v14, %v5299_v14  ;;  %v1323_v18 = vand.u32 %v4765_v8, %v5281_v7  ;;  %v953_v20 = vand.u32 %v4731_v2, %v5281_v7  ;;  %v5383_v39 = vld.sshfl [vmem:[%s6709_s6 + $0x14] sm:$0x33 pattern:$0x76325410] }
  0x11   : > { %5053 = vmatprep.subr.bf16.mxu1 %v620_v9  ;;  %636 = vmatprep.subr.bf16.mxu0 %v620_v9  ;;  %v1760_v22 = vand.u32 %v1707_v15, %v5281_v7  ;;  %v2575_v41 = vcombine.high %v5383_v39, %v5383_v39  ;;  %v2191_v42 = vand.u32 %v5299_v14, %v5281_v7  ;;  %v5412_v46 = vld.sshfl [vmem:[%s6709_s6 + $0x18] sm:$0x33 pattern:$0x76325410] }
  0x12   : > { %5054 = vmatpush1.bf16.msra.mxu1 %v617_v10  ;;  %637 = vmatpush1.bf16.msra.mxu0 %v617_v10  ;;  %s5313_s20 = scalar_lea.vmem %s6704_s1, %s5302_s17  ;;  %v2194_v23 = vand.u32 %v2141_v17, %v5281_v7  ;;  %s5337_s23 = scalar_lea.vmem %s6703_s0, %s5302_s17  ;;  %v1757_v43 = vand.u32 %v5294_v12, %v5281_v7  ;;  %v3009_v48 = vcombine.high %v5412_v46, %v5412_v46 }
  0x13   : > { %972 = vmatprep.subr.bf16.mxu1 %v956_v11  ;;  %v5066_v19 = vld [vmem:[%s5313_s20] sm:$0xff]   ;;  %1342 = vmatprep.subr.bf16.mxu0 %v1326_v16  ;;  %v5068_v24 = vld [vmem:[%s5313_s20 + $0x8] sm:$0xff]   ;;  %v5070_v26 = vld [vmem:[%s5313_s20 + $0x10] sm:$0xff]   ;;  %s5343_s26 = scalar_lea.vmem %s6705_s2, %s5302_s17  ;;  %s5396_s11 = scalar_lea.vmem %s6706_s3, %s5302_s17  ;;  %v2628_v44 = vand.u32 %v2575_v41, %v5281_v7 }
  0x14   : > { %v5067_v21 = vld [vmem:[%s5313_s20 + $0x40] sm:$0xff]   ;;  %v5069_v25 = vld [vmem:[%s5313_s20 + $0x48] sm:$0xff]   ;;  %v5071_v27 = vld [vmem:[%s5313_s20 + $0x50] sm:$0xff]   ;;  %s5403_s14 = scalar_lea.vmem %s6707_s4, %s5302_s17  ;;  %v3062_v49 = vand.u32 %v3009_v48, %v5281_v7  ;;  %s5517_s21 = scalar_lea.vmem %s6708_s5, %s5302_s17 }
  0x15   : > { %4699 = vmatmul.mubr.msk.bf16.vlgmr.msra.gmra.mxu0 %vm563_vm2, %v5066_v19  ;;  %4707 = vmatmul.mubr.msk.bf16.vlgmr.msra.gmra.mxu1 %vm563_vm2, %v5067_v21  ;;  %v5072_v28 = vld [vmem:[%s5313_s20 + $0x18] sm:$0xff]   ;;  %v5074_v30 = vld [vmem:[%s5313_s20 + $0x20] sm:$0xff]   ;;  %v5076_v32 = vld [vmem:[%s5313_s20 + $0x28] sm:$0xff]   ;;  %v2625_v19 = vand.u32 %v5383_v39, %v5281_v7 }
  0x16   : > { %1343 = vmatpush1.bf16.msra.mxu0 %v1323_v18  ;;  %973 = vmatpush1.bf16.msra.mxu1 %v953_v20  ;;  %v5073_v29 = vld [vmem:[%s5313_s20 + $0x58] sm:$0xff]   ;;  %v5075_v31 = vld [vmem:[%s5313_s20 + $0x60] sm:$0xff]   ;;  %v5077_v33 = vld [vmem:[%s5313_s20 + $0x68] sm:$0xff]   ;;  %v3059_v18 = vand.u32 %v5412_v46, %v5281_v7 }
  0x17   : > { %664 = vmatprep.mubr.bf16.mxu0 %v6712_v5  ;;  %744 = vmatprep.mubr.bf16.mxu1 %v6712_v5  ;;  %v5078_v34 = vld [vmem:[%s5313_s20 + $0x30] sm:$0xff]   ;;  %v5080_v36 = vld [vmem:[%s5313_s20 + $0x38] sm:$0xff]   ;;  %v5083_v38 = vld [vmem:[%s5343_s26] sm:$0xff]  }
  0x18   : > { %1776 = vmatprep.subr.bf16.mxu1 %v1760_v22  ;;  %2210 = vmatprep.subr.bf16.mxu0 %v2194_v23  ;;  %v5079_v35 = vld [vmem:[%s5313_s20 + $0x70] sm:$0xff]   ;;  %v5081_v37 = vld [vmem:[%s5313_s20 + $0x78] sm:$0xff]   ;;  %v5082_v40 = vld [vmem:[%s5337_s23] sm:$0xff]  }
  0x19   : > { %v5085_v45 = vld [vmem:[%s5343_s26 + $0x8] sm:$0xff]   ;;  %v5087_v50 = vld [vmem:[%s5343_s26 + $0x10] sm:$0xff]   ;;  %v5089_v52 = vld [vmem:[%s5343_s26 + $0x18] sm:$0xff]  }
  0x1a   : > { %v5084_v47 = vld [vmem:[%s5337_s23 + $0x8] sm:$0xff]   ;;  %v5086_v51 = vld [vmem:[%s5337_s23 + $0x10] sm:$0xff]   ;;  %v5088_v53 = vld [vmem:[%s5337_s23 + $0x18] sm:$0xff]  }
  0x1b   : > { %v5091_v54 = vld [vmem:[%s5343_s26 + $0x20] sm:$0xff]   ;;  %v5093_v56 = vld [vmem:[%s5343_s26 + $0x28] sm:$0xff]   ;;  %v5095_v58 = vld [vmem:[%s5343_s26 + $0x30] sm:$0xff]  }
  0x1c   : > { %v5090_v55 = vld [vmem:[%s5337_s23 + $0x20] sm:$0xff]   ;;  %v5092_v57 = vld [vmem:[%s5337_s23 + $0x28] sm:$0xff]   ;;  %v5094_v59 = vld [vmem:[%s5337_s23 + $0x30] sm:$0xff]  }
  0x1d   : > { %4700 = vmatmul.mubr.msk.bf16.gmra.mxu0 %vm563_vm2, %v5068_v24  ;;  %4708 = vmatmul.mubr.msk.bf16.gmra.mxu1 %vm563_vm2, %v5069_v25  ;;  %v5097_v60 = vld [vmem:[%s5343_s26 + $0x38] sm:$0xff]   ;;  %v5099_v62 = vld [vmem:[%s5343_s26 + $0x40] sm:$0xff]   ;;  %v5101_v0 = vld [vmem:[%s5343_s26 + $0x48] sm:$0xff]  }
  0x1e   : > { %674 = vmatprep.mubr.bf16.mxu0 %v6712_v5  ;;  %754 = vmatprep.mubr.bf16.mxu1 %v6712_v5  ;;  %v5096_v61 = vld [vmem:[%s5337_s23 + $0x38] sm:$0xff]   ;;  %v5098_v63 = vld [vmem:[%s5337_s23 + $0x40] sm:$0xff]   ;;  %v5100_v1 = vld [vmem:[%s5337_s23 + $0x48] sm:$0xff]  }
  0x1f   : > { %v5103_v2 = vld [vmem:[%s5343_s26 + $0x50] sm:$0xff]   ;;  %v5105_v4 = vld [vmem:[%s5343_s26 + $0x58] sm:$0xff]   ;;  %v5107_v8 = vld [vmem:[%s5343_s26 + $0x60] sm:$0xff]  }
  0x20   : > { %v5102_v3 = vld [vmem:[%s5337_s23 + $0x50] sm:$0xff]   ;;  %v5104_v6 = vld [vmem:[%s5337_s23 + $0x58] sm:$0xff]   ;;  %v5106_v9 = vld [vmem:[%s5337_s23 + $0x60] sm:$0xff]  }
  0x21   : > { %v5109_v10 = vld [vmem:[%s5343_s26 + $0x68] sm:$0xff]   ;;  %v5111_v12 = vld [vmem:[%s5343_s26 + $0x70] sm:$0xff]   ;;  %v5113_v14 = vld [vmem:[%s5343_s26 + $0x78] sm:$0xff]  }
  0x22   : > { %v5108_v11 = vld [vmem:[%s5337_s23 + $0x68] sm:$0xff]   ;;  %v5110_v13 = vld [vmem:[%s5337_s23 + $0x70] sm:$0xff]   ;;  %v5112_v15 = vld [vmem:[%s5337_s23 + $0x78] sm:$0xff]  }
  0x23   : > { %v5115_v16 = vld [vmem:[%s5403_s14] sm:$0xff]   ;;  %v5117_v23 = vld [vmem:[%s5403_s14 + $0x8] sm:$0xff]   ;;  %v5532_v24 = vld.sshfl [vmem:[%s6709_s6 + $0x1c] sm:$0x33 pattern:$0x76325410] }
  0x24   : > { %v5114_v17 = vld [vmem:[%s5396_s11] sm:$0xff]   ;;  %v5119_v41 = vld [vmem:[%s5403_s14 + $0x10] sm:$0xff]  }
  0x25   : > { %4701 = vmatmul.mubr.msk.bf16.gmra.mxu0 %vm563_vm2, %v5070_v26  ;;  %4709 = vmatmul.mubr.msk.bf16.gmra.mxu1 %vm563_vm2, %v5071_v27  ;;  %v5116_v26 = vld [vmem:[%s5396_s11 + $0x8] sm:$0xff]   ;;  %v3443_v27 = vcombine.high %v5532_v24, %v5532_v24 }
  0x26   : > { %684 = vmatprep.mubr.bf16.mxu0 %v6712_v5  ;;  %764 = vmatprep.mubr.bf16.mxu1 %v6712_v5 }
  0x2d   : > { %4702 = vmatmul.mubr.msk.bf16.gmra.mxu0 %vm563_vm2, %v5072_v28  ;;  %4710 = vmatmul.mubr.msk.bf16.gmra.mxu1 %vm563_vm2, %v5073_v29  ;;  %v5545_v29 = vld.sshfl [vmem:[%s6709_s6 + $0x20] sm:$0x33 pattern:$0x76325410] }
  0x2e   : > { %694 = vmatprep.mubr.bf16.mxu0 %v6712_v5  ;;  %774 = vmatprep.mubr.bf16.mxu1 %v6712_v5 }
  0x35   : > { %4703 = vmatmul.mubr.msk.bf16.gmra.mxu0 %vm563_vm2, %v5074_v30  ;;  %4711 = vmatmul.mubr.msk.bf16.gmra.mxu1 %vm563_vm2, %v5075_v31  ;;  %v3496_v31 = vand.u32 %v3443_v27, %v5281_v7 }
  0x36   : > { %704 = vmatprep.mubr.bf16.mxu0 %v6712_v5  ;;  %784 = vmatprep.mubr.bf16.mxu1 %v6712_v5 }
  0x3d   : > { %4704 = vmatmul.mubr.msk.bf16.gmra.mxu0 %vm563_vm2, %v5076_v32  ;;  %4712 = vmatmul.mubr.msk.bf16.gmra.mxu1 %vm563_vm2, %v5077_v33  ;;  %v3877_v32 = vcombine.high %v5545_v29, %v5545_v29 }
  0x3e   : > { %714 = vmatprep.mubr.bf16.mxu0 %v6712_v5  ;;  %794 = vmatprep.mubr.bf16.mxu1 %v6712_v5 }
  0x45   : > { %4705 = vmatmul.mubr.msk.bf16.gmra.mxu0 %vm563_vm2, %v5078_v34  ;;  %4713 = vmatmul.mubr.msk.bf16.gmra.mxu1 %vm563_vm2, %v5079_v35  ;;  %v3930_v35 = vand.u32 %v3877_v32, %v5281_v7 }
  0x46   : > { %724 = vmatprep.mubr.bf16.mxu0 %v6712_v5  ;;  %804 = vmatprep.mubr.bf16.mxu1 %v6712_v5 }
  0x4d   : > { %4706 = vmatmul.mubr.msk.bf16.gmra.mxu0 %vm563_vm2, %v5080_v36  ;;  %4714 = vmatmul.mubr.msk.bf16.gmra.mxu1 %vm563_vm2, %v5081_v37 }
  0x4e   : > { %1360 = vmatprep.mubr.bf16.mxu0 %v6712_v5  ;;  %990 = vmatprep.mubr.bf16.mxu1 %v6712_v5 }
  0x55   : > { %4766 = vmatmul.mubr.msk.bf16.vlgmr.msra.gmra.mxu0 %vm563_vm2, %v5083_v38  ;;  %4732 = vmatmul.mubr.msk.bf16.vlgmr.msra.gmra.mxu1 %vm563_vm2, %v5082_v40 }
  0x56   : > { %2211 = vmatpush1.bf16.msra.mxu0 %v2191_v42  ;;  %1777 = vmatpush1.bf16.msra.mxu1 %v1757_v43  ;;  %v5118_v43 = vld [vmem:[%s5396_s11 + $0x10] sm:$0xff]  }
  0x57   : > { %1000 = vmatprep.mubr.bf16.mxu1 %v6712_v5  ;;  %1370 = vmatprep.mubr.bf16.mxu0 %v6712_v5 }
  0x58   : > { %2644 = vmatprep.subr.bf16.mxu1 %v2628_v44  ;;  %3078 = vmatprep.subr.bf16.mxu0 %v3062_v49 }
  0x5d   : > { %4767 = vmatmul.mubr.msk.bf16.gmra.mxu0 %vm563_vm2, %v5085_v45  ;;  %4733 = vmatmul.mubr.msk.bf16.gmra.mxu1 %vm563_vm2, %v5084_v47 }
  0x5e   : > { %1380 = vmatprep.mubr.bf16.mxu0 %v6712_v5  ;;  %1010 = vmatprep.mubr.bf16.mxu1 %v6712_v5 }
  0x65   : > { %4768 = vmatmul.mubr.msk.bf16.gmra.mxu0 %vm563_vm2, %v5087_v50  ;;  %4734 = vmatmul.mubr.msk.bf16.gmra.mxu1 %vm563_vm2, %v5086_v51  ;;  %v5121_v51 = vld [vmem:[%s5403_s14 + $0x18] sm:$0xff]  }
  0x66   : > { %1390 = vmatprep.mubr.bf16.mxu0 %v6712_v5  ;;  %1020 = vmatprep.mubr.bf16.mxu1 %v6712_v5 }
  0x6d   : > { %4769 = vmatmul.mubr.msk.bf16.gmra.mxu0 %vm563_vm2, %v5089_v52  ;;  %4735 = vmatmul.mubr.msk.bf16.gmra.mxu1 %vm563_vm2, %v5088_v53  ;;  %v5120_v53 = vld [vmem:[%s5396_s11 + $0x18] sm:$0xff]  }
  0x6e   : > { %1400 = vmatprep.mubr.bf16.mxu0 %v6712_v5  ;;  %1030 = vmatprep.mubr.bf16.mxu1 %v6712_v5 }
  0x75   : > { %4770 = vmatmul.mubr.msk.bf16.gmra.mxu0 %vm563_vm2, %v5091_v54  ;;  %4736 = vmatmul.mubr.msk.bf16.gmra.mxu1 %vm563_vm2, %v5090_v55 }
  0x76   : > { %1410 = vmatprep.mubr.bf16.mxu0 %v6712_v5  ;;  %1040 = vmatprep.mubr.bf16.mxu1 %v6712_v5 }
  0x7d   : > { %4771 = vmatmul.mubr.msk.bf16.gmra.mxu0 %vm563_vm2, %v5093_v56  ;;  %4737 = vmatmul.mubr.msk.bf16.gmra.mxu1 %vm563_vm2, %v5092_v57 }
  0x7e   : > { %1420 = vmatprep.mubr.bf16.mxu0 %v6712_v5  ;;  %1050 = vmatprep.mubr.bf16.mxu1 %v6712_v5 }
  0x85   : > { %4772 = vmatmul.mubr.msk.bf16.gmra.mxu0 %vm563_vm2, %v5095_v58  ;;  %4738 = vmatmul.mubr.msk.bf16.gmra.mxu1 %vm563_vm2, %v5094_v59 }
  0x86   : > { %1430 = vmatprep.mubr.bf16.mxu0 %v6712_v5  ;;  %1060 = vmatprep.mubr.bf16.mxu1 %v6712_v5 }
  0x8d   : > { %4773 = vmatmul.mubr.msk.bf16.gmra.mxu0 %vm563_vm2, %v5097_v60  ;;  %4739 = vmatmul.mubr.msk.bf16.gmra.mxu1 %vm563_vm2, %v5096_v61  ;;  %v5123_v61 = vld [vmem:[%s5403_s14 + $0x20] sm:$0xff]  }
  0x8e   : > { %1440 = vmatprep.mubr.bf16.mxu0 %v6712_v5  ;;  %1070 = vmatprep.mubr.bf16.mxu1 %v6712_v5 }
  0x95   : > { %4774 = vmatmul.mubr.msk.bf16.gmra.mxu0 %vm563_vm2, %v5099_v62  ;;  %4740 = vmatmul.mubr.msk.bf16.gmra.mxu1 %vm563_vm2, %v5098_v63  ;;  %v5122_v63 = vld [vmem:[%s5396_s11 + $0x20] sm:$0xff]  }
  0x96   : > { %1450 = vmatprep.mubr.bf16.mxu0 %v6712_v5  ;;  %1080 = vmatprep.mubr.bf16.mxu1 %v6712_v5 }
  0x9d   : > { %4775 = vmatmul.mubr.msk.bf16.gmra.mxu0 %vm563_vm2, %v5101_v0  ;;  %4741 = vmatmul.mubr.msk.bf16.gmra.mxu1 %vm563_vm2, %v5100_v1 }
  0x9e   : > { %1460 = vmatprep.mubr.bf16.mxu0 %v6712_v5  ;;  %1090 = vmatprep.mubr.bf16.mxu1 %v6712_v5 }
  0xa5   : > { %4776 = vmatmul.mubr.msk.bf16.gmra.mxu0 %vm563_vm2, %v5103_v2  ;;  %4742 = vmatmul.mubr.msk.bf16.gmra.mxu1 %vm563_vm2, %v5102_v3 }
  0xa6   : > { %1470 = vmatprep.mubr.bf16.mxu0 %v6712_v5  ;;  %1100 = vmatprep.mubr.bf16.mxu1 %v6712_v5 }
  0xad   : > { %4777 = vmatmul.mubr.msk.bf16.gmra.mxu0 %vm563_vm2, %v5105_v4  ;;  %4743 = vmatmul.mubr.msk.bf16.gmra.mxu1 %vm563_vm2, %v5104_v6 }
  0xae   : > { %1480 = vmatprep.mubr.bf16.mxu0 %v6712_v5  ;;  %1110 = vmatprep.mubr.bf16.mxu1 %v6712_v5 }
  0xb5   : > { %4778 = vmatmul.mubr.msk.bf16.gmra.mxu0 %vm563_vm2, %v5107_v8  ;;  %4744 = vmatmul.mubr.msk.bf16.gmra.mxu1 %vm563_vm2, %v5106_v9  ;;  %v5125_v9 = vld [vmem:[%s5403_s14 + $0x28] sm:$0xff]  }
  0xb6   : > { %1490 = vmatprep.mubr.bf16.mxu0 %v6712_v5  ;;  %1120 = vmatprep.mubr.bf16.mxu1 %v6712_v5 }
  0xbd   : > { %4779 = vmatmul.mubr.msk.bf16.gmra.mxu0 %vm563_vm2, %v5109_v10  ;;  %4745 = vmatmul.mubr.msk.bf16.gmra.mxu1 %vm563_vm2, %v5108_v11  ;;  %v5124_v11 = vld [vmem:[%s5396_s11 + $0x28] sm:$0xff]  }
  0xbe   : > { %1500 = vmatprep.mubr.bf16.mxu0 %v6712_v5  ;;  %1130 = vmatprep.mubr.bf16.mxu1 %v6712_v5 }
  0xc5   : > { %4780 = vmatmul.mubr.msk.bf16.gmra.mxu0 %vm563_vm2, %v5111_v12  ;;  %4746 = vmatmul.mubr.msk.bf16.gmra.mxu1 %vm563_vm2, %v5110_v13 }
  0xc6   : > { %1510 = vmatprep.mubr.bf16.mxu0 %v6712_v5  ;;  %1140 = vmatprep.mubr.bf16.mxu1 %v6712_v5 }
  0xcd   : > { %4781 = vmatmul.mubr.msk.bf16.gmra.mxu0 %vm563_vm2, %v5113_v14  ;;  %4747 = vmatmul.mubr.msk.bf16.gmra.mxu1 %vm563_vm2, %v5112_v15 }
  0xce   : > { %2228 = vmatprep.mubr.bf16.mxu0 %v6712_v5  ;;  %1794 = vmatprep.mubr.bf16.mxu1 %v6712_v5 }
  0xd5   : > { %v5519_v20 = vpop.f32.mrf.mxu0  ;;  %4834 = vmatmul.mubr.msk.bf16.vlgmr.msra.gmra.mxu0 %vm563_vm2, %v5115_v16  ;;  %v5522_v21 = vpop.f32.mrf.mxu1  ;;  %4800 = vmatmul.mubr.msk.bf16.vlgmr.msra.gmra.mxu1 %vm563_vm2, %v5114_v17 }
  0xd6   : > { %3079 = vmatpush1.bf16.msra.mxu0 %v3059_v18  ;;  %2645 = vmatpush1.bf16.msra.mxu1 %v2625_v19  ;;  %v5127_v19 = vld [vmem:[%s5403_s14 + $0x30] sm:$0xff]  }
  0xd7   : > { %v5525_v22 = vpop.f32.mrf.mxu0  ;;  %1804 = vmatprep.mubr.bf16.mxu1 %v6712_v5  ;;  %v5534_v25 = vpop.f32.mrf.mxu1  ;;  %2238 = vmatprep.mubr.bf16.mxu0 %v6712_v5 }
  0xd8   : > { %3512 = vmatprep.subr.bf16.mxu1 %v3496_v31  ;;  %3946 = vmatprep.subr.bf16.mxu0 %v3930_v35 }
  0xd9   : > { %v5540_v28 = vpop.f32.mrf.mxu0  ;;  %v5547_v30 = vpop.f32.mrf.mxu1 }
  0xdb   : > { %v5552_v33 = vpop.f32.mrf.mxu0  ;;  %v5554_v34 = vpop.f32.mrf.mxu1 }
  0xdd   : > { %v5557_v36 = vpop.f32.mrf.mxu0  ;;  %4835 = vmatmul.mubr.msk.bf16.gmra.mxu0 %vm563_vm2, %v5117_v23  ;;  %v5560_v37 = vpop.f32.mrf.mxu1  ;;  %4801 = vmatmul.mubr.msk.bf16.gmra.mxu1 %vm563_vm2, %v5116_v26  ;;  %v5126_v26 = vld [vmem:[%s5396_s11 + $0x30] sm:$0xff]  }
  0xde   : > { %2248 = vmatprep.mubr.bf16.mxu0 %v6712_v5  ;;  %1814 = vmatprep.mubr.bf16.mxu1 %v6712_v5 }
  0xdf   : > { %v5564_v38 = vpop.f32.mrf.mxu0  ;;  %v5567_v39 = vpop.f32.mrf.mxu1 }
  0xe1   : > { %v5569_v40 = vpop.f32.mrf.mxu0  ;;  %v5572_v42 = vpop.f32.mrf.mxu1 }
  0xe3   : > { %v5575_v44 = vpop.f32.mrf.mxu0  ;;  %v5577_v45 = vpop.f32.mrf.mxu1 }
  0xe5   : > { %v5579_v46 = vpop.f32.mrf.mxu0  ;;  %4836 = vmatmul.mubr.msk.bf16.gmra.mxu0 %vm563_vm2, %v5119_v41  ;;  %v5582_v47 = vpop.f32.mrf.mxu1  ;;  %4802 = vmatmul.mubr.msk.bf16.gmra.mxu1 %vm563_vm2, %v5118_v43 }
  0xe6   : > { %2258 = vmatprep.mubr.bf16.mxu0 %v6712_v5  ;;  %1824 = vmatprep.mubr.bf16.mxu1 %v6712_v5 }
  0xe7   : > { %v5586_v48 = vpop.f32.mrf.mxu0  ;;  %v5589_v49 = vpop.f32.mrf.mxu1 }
  0xe9   : > { %v5591_v50 = vpop.f32.mrf.mxu0  ;;  %v5594_v52 = vpop.f32.mrf.mxu1 }
  0xeb   : > { %v5597_v54 = vpop.f32.mrf.mxu0  ;;  %v5599_v55 = vpop.f32.mrf.mxu1 }
  0xed   : > { %v5601_v56 = vpop.f32.mrf.mxu0  ;;  %4837 = vmatmul.mubr.msk.bf16.gmra.mxu0 %vm563_vm2, %v5121_v51  ;;  %v5604_v57 = vpop.f32.mrf.mxu1  ;;  %4803 = vmatmul.mubr.msk.bf16.gmra.mxu1 %vm563_vm2, %v5120_v53  ;;  %v5129_v53 = vld [vmem:[%s5403_s14 + $0x38] sm:$0xff]  }
  0xee   : > { %2268 = vmatprep.mubr.bf16.mxu0 %v6712_v5  ;;  %1834 = vmatprep.mubr.bf16.mxu1 %v6712_v5 }
  0xef   : > { %v5608_v58 = vpop.f32.mrf.mxu0  ;;  %v5611_v59 = vpop.f32.mrf.mxu1 }
  0xf0   : > { %6714 = vst [vmem:[#allocation2_spill] sm:$0xff] %v5611_v59 }
  0xf1   : > { %v5613_v60 = vpop.f32.mrf.mxu0  ;;  %v5616_v62 = vpop.f32.mrf.mxu1 }
  0xf2   : > { %6715 = vst [vmem:[#allocation3_spill] sm:$0xff] %v5616_v62 }
  0xf3   : > { %v5619_v0 = vpop.f32.mrf.mxu0  ;;  %v5621_v1 = vpop.f32.mrf.mxu1 }
  0xf4   : > { %6716 = vst [vmem:[#allocation4_spill] sm:$0xff] %v5621_v1  ;;  %v5132_v1 = vld [vmem:[%s5396_s11 + $0x48] sm:$0xff]  }
  0xf5   : > { %v5623_v2 = vpop.f32.mrf.mxu0  ;;  %4838 = vmatmul.mubr.msk.bf16.gmra.mxu0 %vm563_vm2, %v5123_v61  ;;  %v5626_v3 = vpop.f32.mrf.mxu1  ;;  %4804 = vmatmul.mubr.msk.bf16.gmra.mxu1 %vm563_vm2, %v5122_v63  ;;  %v5128_v63 = vld [vmem:[%s5396_s11 + $0x38] sm:$0xff]  }
  0xf6   : > { %6717 = vst [vmem:[#allocation5_spill] sm:$0xff] %v5626_v3  ;;  %2278 = vmatprep.mubr.bf16.mxu0 %v6712_v5  ;;  %1844 = vmatprep.mubr.bf16.mxu1 %v6712_v5 }
  0xf7   : > { %v5630_v4 = vpop.f32.mrf.mxu0  ;;  %v5633_v6 = vpop.f32.mrf.mxu1 }
  0xf8   : > { %6718 = vst [vmem:[#allocation6_spill] sm:$0xff] %v5633_v6 }
  0xf9   : > { %v5635_v8 = vpop.f32.mrf.mxu0  ;;  %v5638_v10 = vpop.f32.mrf.mxu1 }
  0xfa   : > { %6719 = vst [vmem:[#allocation7_spill] sm:$0xff] %v5638_v10 }
  0xfb   : > { %v5641_v12 = vpop.f32.mrf.mxu0  ;;  %v5643_v13 = vpop.f32.mrf.mxu1 }
  0xfc   : > { %6720 = vst [vmem:[#allocation8_spill] sm:$0xff] %v5643_v13 }
  0xfd   : > { %v5645_v14 = vpop.f32.mrf.mxu0  ;;  %4839 = vmatmul.mubr.msk.bf16.gmra.mxu0 %vm563_vm2, %v5125_v9  ;;  %v5648_v15 = vpop.f32.mrf.mxu1  ;;  %4805 = vmatmul.mubr.msk.bf16.gmra.mxu1 %vm563_vm2, %v5124_v11 }
  0xfe   : > { %6721 = vst [vmem:[#allocation9_spill] sm:$0xff] %v5648_v15  ;;  %2288 = vmatprep.mubr.bf16.mxu0 %v6712_v5  ;;  %1854 = vmatprep.mubr.bf16.mxu1 %v6712_v5 }
  0xff   : > { %v5652_v16 = vpop.f32.mrf.mxu0  ;;  %v5655_v17 = vpop.f32.mrf.mxu1 }
 0x100   : > { %6722 = vst [vmem:[#allocation10_spill] sm:$0xff] %v5655_v17 }
 0x101   : > { %v5657_v18 = vpop.f32.mrf.mxu0  ;;  %v5660_v23 = vpop.f32.mrf.mxu1 }
 0x102   : > { %6723 = vst [vmem:[#allocation11_spill] sm:$0xff] %v5660_v23  ;;  %v5130_v23 = vld [vmem:[%s5396_s11 + $0x40] sm:$0xff]  }
 0x103   : > { %v5663_v27 = vpop.f32.mrf.mxu0  ;;  %v5665_v31 = vpop.f32.mrf.mxu1 }
 0x104   : > { %6724 = vst [vmem:[#allocation12_spill] sm:$0xff] %v5665_v31  ;;  %v5131_v31 = vld [vmem:[%s5403_s14 + $0x40] sm:$0xff]  }
 0x105   : > { %v5667_v32 = vpop.f32.mrf.mxu0  ;;  %4840 = vmatmul.mubr.msk.bf16.gmra.mxu0 %vm563_vm2, %v5127_v19  ;;  %v5670_v35 = vpop.f32.mrf.mxu1  ;;  %4806 = vmatmul.mubr.msk.bf16.gmra.mxu1 %vm563_vm2, %v5126_v26 }
 0x106   : > { %6725 = vst [vmem:[#allocation13_spill] sm:$0xff] %v5670_v35  ;;  %2298 = vmatprep.mubr.bf16.mxu0 %v6712_v5  ;;  %1864 = vmatprep.mubr.bf16.mxu1 %v6712_v5 }
 0x107   : > { %v5674_v41 = vpop.f32.mrf.mxu0  ;;  %v5677_v43 = vpop.f32.mrf.mxu1 }
 0x108   : > { %6726 = vst [vmem:[#allocation14_spill] sm:$0xff] %v5677_v43 }
 0x109   : > { %v5679_v51 = vpop.f32.mrf.mxu0  ;;  %v5682_v61 = vpop.f32.mrf.mxu1 }
 0x10a   : > { %6727 = vst [vmem:[#allocation15_spill] sm:$0xff] %v5682_v61 }
 0x10b   : > { %v5685_v9 = vpop.f32.mrf.mxu0  ;;  %v5687_v11 = vpop.f32.mrf.mxu1 }
 0x10c   : > { %6728 = vst [vmem:[#allocation16_spill] sm:$0xff] %v5687_v11 }
 0x10d   : > { %v5689_v19 = vpop.f32.mrf.mxu0  ;;  %4841 = vmatmul.mubr.msk.bf16.gmra.mxu0 %vm563_vm2, %v5129_v53  ;;  %v5692_v26 = vpop.f32.mrf.mxu1  ;;  %4807 = vmatmul.mubr.msk.bf16.gmra.mxu1 %vm563_vm2, %v5128_v63 }
 0x10e   : > { %6729 = vst [vmem:[#allocation17_spill] sm:$0xff] %v5692_v26  ;;  %2308 = vmatprep.mubr.bf16.mxu0 %v6712_v5  ;;  %1874 = vmatprep.mubr.bf16.mxu1 %v6712_v5 }
 0x10f   : > { %v5696_v43 = vpop.f32.mrf.mxu0  ;;  %v5699_v61 = vpop.f32.mrf.mxu1 }
 0x110   : > { %6730 = vst [vmem:[#allocation18_spill] sm:$0xff] %v5699_v61 }
 0x111   : > { %v5701_v35 = vpop.f32.mrf.mxu0  ;;  %v5704_v11 = vpop.f32.mrf.mxu1 }
 0x112   : > { %6731 = vst [vmem:[#allocation19_spill] sm:$0xff] %v5704_v11 }
 0x113   : > { %v5707_v53 = vpop.f32.mrf.mxu0  ;;  %v5709_v26 = vpop.f32.mrf.mxu1 }
 0x114   : > { %6732 = vst [vmem:[#allocation20_spill] sm:$0xff] %v5709_v26  ;;  %v5133_v26 = vld [vmem:[%s5403_s14 + $0x48] sm:$0xff]  }
 0x115   : > { %v1362_v63 = vpop.f32.mrf.mxu0  ;;  %4842 = vmatmul.mubr.msk.bf16.gmra.mxu0 %vm563_vm2, %v5131_v31  ;;  %v992_v17 = vpop.f32.mrf.mxu1  ;;  %4808 = vmatmul.mubr.msk.bf16.gmra.mxu1 %vm563_vm2, %v5130_v23 }
 0x116   : > { %2318 = vmatprep.mubr.bf16.mxu0 %v6712_v5  ;;  %v993_v61 = vadd.f32 %v992_v17, %v5519_v20  ;;  %1884 = vmatprep.mubr.bf16.mxu1 %v6712_v5 }
 0x117   : > { %v1364_v15 = vpop.f32.mrf.mxu0  ;;  %v994_v11 = vpop.f32.mrf.mxu1 }
 0x118   : > { %v5716_v13 = vadd.f32 %v1362_v63, %v993_v61  ;;  %v995_v10 = vadd.f32 %v994_v11, %v5525_v22  ;;  %v5135_v11 = vld [vmem:[%s5403_s14 + $0x50] sm:$0xff]  }
 0x119   : > { %v1366_v6 = vpop.f32.mrf.mxu0  ;;  %v996_v3 = vpop.f32.mrf.mxu1  ;;  %v5134_v63 = vld [vmem:[%s5396_s11 + $0x50] sm:$0xff]  }
 0x11a   : > { %v5721_v31 = vadd.f32 %v1364_v15, %v995_v10  ;;  %v997_v23 = vadd.f32 %v996_v3, %v5540_v28 }
 0x11b   : > { %v1368_v62 = vpop.f32.mrf.mxu0  ;;  %v998_v59 = vpop.f32.mrf.mxu1 }
 0x11c   : > { %v5724_v20 = vadd.f32 %v1366_v6, %v997_v23  ;;  %v999_v17 = vadd.f32 %v998_v59, %v5552_v33 }
 0x11d   : > { %v1372_v61 = vpop.f32.mrf.mxu0  ;;  %4843 = vmatmul.mubr.msk.bf16.gmra.mxu0 %vm563_vm2, %v5133_v26  ;;  %v1002_v22 = vpop.f32.mrf.mxu1  ;;  %4809 = vmatmul.mubr.msk.bf16.gmra.mxu1 %vm563_vm2, %v5132_v1 }
 0x11e   : > { %2328 = vmatprep.mubr.bf16.mxu0 %v6712_v5  ;;  %v5730_v10 = vadd.f32 %v1368_v62, %v999_v17  ;;  %v1003_v28 = vadd.f32 %v1002_v22, %v5557_v36  ;;  %1894 = vmatprep.mubr.bf16.mxu1 %v6712_v5 }
 0x11f   : > { %v1374_v3 = vpop.f32.mrf.mxu0  ;;  %v1004_v6 = vpop.f32.mrf.mxu1 }
 0x120   : > { %v5734_v15 = vadd.f32 %v1372_v61, %v1003_v28  ;;  %v1005_v33 = vadd.f32 %v1004_v6, %v5564_v38 }
 0x121   : > { %v1376_v59 = vpop.f32.mrf.mxu0  ;;  %v1006_v26 = vpop.f32.mrf.mxu1 }
 0x122   : > { %v5739_v23 = vadd.f32 %v1374_v3, %v1005_v33  ;;  %v1007_v1 = vadd.f32 %v1006_v26, %v5569_v40  ;;  %v5137_v26 = vld [vmem:[%s5403_s14 + $0x58] sm:$0xff]  }
 0x123   : > { %v1378_v62 = vpop.f32.mrf.mxu0  ;;  %v1008_v17 = vpop.f32.mrf.mxu1 }
 0x124   : > { %v5742_v36 = vadd.f32 %v1376_v59, %v1007_v1  ;;  %v1009_v22 = vadd.f32 %v1008_v17, %v5575_v44  ;;  %v5136_v1 = vld [vmem:[%s5396_s11 + $0x58] sm:$0xff]  }
 0x125   : > { %v1382_v61 = vpop.f32.mrf.mxu0  ;;  %4844 = vmatmul.mubr.msk.bf16.gmra.mxu0 %vm563_vm2, %v5135_v11  ;;  %v1012_v38 = vpop.f32.mrf.mxu1  ;;  %4810 = vmatmul.mubr.msk.bf16.gmra.mxu1 %vm563_vm2, %v5134_v63 }
 0x126   : > { %2338 = vmatprep.mubr.bf16.mxu0 %v6712_v5  ;;  %v5748_v28 = vadd.f32 %v1378_v62, %v1009_v22  ;;  %v1013_v40 = vadd.f32 %v1012_v38, %v5579_v46  ;;  %1904 = vmatprep.mubr.bf16.mxu1 %v6712_v5 }
 0x127   : > { %v1384_v3 = vpop.f32.mrf.mxu0  ;;  %v1014_v6 = vpop.f32.mrf.mxu1 }
 0x128   : > { %v5752_v33 = vadd.f32 %v1382_v61, %v1013_v40  ;;  %v1015_v44 = vadd.f32 %v1014_v6, %v5586_v48 }
 0x129   : > { %v1386_v59 = vpop.f32.mrf.mxu0  ;;  %v1016_v11 = vpop.f32.mrf.mxu1 }
 0x12a   : > { %v5757_v17 = vadd.f32 %v1384_v3, %v1015_v44  ;;  %v1017_v63 = vadd.f32 %v1016_v11, %v5591_v50  ;;  %v5139_v11 = vld [vmem:[%s5403_s14 + $0x60] sm:$0xff]  }
 0x12b   : > { %v1388_v62 = vpop.f32.mrf.mxu0  ;;  %v1018_v22 = vpop.f32.mrf.mxu1 }
 0x12c   : > { %v5760_v46 = vadd.f32 %v1386_v59, %v1017_v63  ;;  %v1019_v38 = vadd.f32 %v1018_v22, %v5597_v54  ;;  %v5138_v63 = vld [vmem:[%s5396_s11 + $0x60] sm:$0xff]  }
 0x12d   : > { %v1392_v61 = vpop.f32.mrf.mxu0  ;;  %4845 = vmatmul.mubr.msk.bf16.gmra.mxu0 %vm563_vm2, %v5137_v26  ;;  %v1022_v48 = vpop.f32.mrf.mxu1  ;;  %4811 = vmatmul.mubr.msk.bf16.gmra.mxu1 %vm563_vm2, %v5136_v1 }
 0x12e   : > { %2348 = vmatprep.mubr.bf16.mxu0 %v6712_v5  ;;  %v5766_v40 = vadd.f32 %v1388_v62, %v1019_v38  ;;  %v1023_v50 = vadd.f32 %v1022_v48, %v5601_v56  ;;  %1914 = vmatprep.mubr.bf16.mxu1 %v6712_v5 }
 0x12f   : > { %v1394_v3 = vpop.f32.mrf.mxu0  ;;  %v1024_v6 = vpop.f32.mrf.mxu1 }
 0x130   : > { %v5770_v44 = vadd.f32 %v1392_v61, %v1023_v50  ;;  %v1025_v54 = vadd.f32 %v1024_v6, %v5608_v58 }
 0x131   : > { %v1396_v59 = vpop.f32.mrf.mxu0  ;;  %v1026_v26 = vpop.f32.mrf.mxu1 }
 0x132   : > { %v5775_v22 = vadd.f32 %v1394_v3, %v1025_v54  ;;  %v1027_v1 = vadd.f32 %v1026_v26, %v5613_v60  ;;  %v5141_v26 = vld [vmem:[%s5403_s14 + $0x68] sm:$0xff]  }
 0x133   : > { %v1398_v62 = vpop.f32.mrf.mxu0  ;;  %v1028_v38 = vpop.f32.mrf.mxu1 }
 0x134   : > { %v5778_v56 = vadd.f32 %v1396_v59, %v1027_v1  ;;  %v1029_v48 = vadd.f32 %v1028_v38, %v5619_v0  ;;  %v5140_v1 = vld [vmem:[%s5396_s11 + $0x68] sm:$0xff]  }
 0x135   : > { %v1402_v61 = vpop.f32.mrf.mxu0  ;;  %4846 = vmatmul.mubr.msk.bf16.gmra.mxu0 %vm563_vm2, %v5139_v11  ;;  %v1032_v58 = vpop.f32.mrf.mxu1  ;;  %4812 = vmatmul.mubr.msk.bf16.gmra.mxu1 %vm563_vm2, %v5138_v63 }
 0x136   : > { %2358 = vmatprep.mubr.bf16.mxu0 %v6712_v5  ;;  %v5784_v50 = vadd.f32 %v1398_v62, %v1029_v48  ;;  %v1033_v60 = vadd.f32 %v1032_v58, %v5623_v2  ;;  %1924 = vmatprep.mubr.bf16.mxu1 %v6712_v5 }
 0x137   : > { %v1404_v3 = vpop.f32.mrf.mxu0  ;;  %v1034_v6 = vpop.f32.mrf.mxu1 }
 0x138   : > { %v5788_v54 = vadd.f32 %v1402_v61, %v1033_v60  ;;  %v1035_v0 = vadd.f32 %v1034_v6, %v5630_v4 }
 0x139   : > { %v1406_v59 = vpop.f32.mrf.mxu0  ;;  %v1036_v11 = vpop.f32.mrf.mxu1 }
 0x13a   : > { %v5793_v38 = vadd.f32 %v1404_v3, %v1035_v0  ;;  %v1037_v63 = vadd.f32 %v1036_v11, %v5635_v8  ;;  %v5143_v11 = vld [vmem:[%s5403_s14 + $0x70] sm:$0xff]  }
 0x13b   : > { %v1408_v62 = vpop.f32.mrf.mxu0  ;;  %v1038_v48 = vpop.f32.mrf.mxu1 }
 0x13c   : > { %v5796_v2 = vadd.f32 %v1406_v59, %v1037_v63  ;;  %v1039_v58 = vadd.f32 %v1038_v48, %v5641_v12  ;;  %v5142_v63 = vld [vmem:[%s5396_s11 + $0x70] sm:$0xff]  }
 0x13d   : > { %v1412_v61 = vpop.f32.mrf.mxu0  ;;  %4847 = vmatmul.mubr.msk.bf16.gmra.mxu0 %vm563_vm2, %v5141_v26  ;;  %v1042_v4 = vpop.f32.mrf.mxu1  ;;  %4813 = vmatmul.mubr.msk.bf16.gmra.mxu1 %vm563_vm2, %v5140_v1 }
 0x13e   : > { %2368 = vmatprep.mubr.bf16.mxu0 %v6712_v5  ;;  %v5802_v60 = vadd.f32 %v1408_v62, %v1039_v58  ;;  %v1043_v8 = vadd.f32 %v1042_v4, %v5645_v14  ;;  %1934 = vmatprep.mubr.bf16.mxu1 %v6712_v5 }
 0x13f   : > { %v1414_v3 = vpop.f32.mrf.mxu0  ;;  %v1044_v6 = vpop.f32.mrf.mxu1 }
 0x140   : > { %v5806_v0 = vadd.f32 %v1412_v61, %v1043_v8  ;;  %v1045_v12 = vadd.f32 %v1044_v6, %v5652_v16 }
 0x141   : > { %v1416_v59 = vpop.f32.mrf.mxu0  ;;  %v1046_v26 = vpop.f32.mrf.mxu1 }
 0x142   : > { %v5811_v48 = vadd.f32 %v1414_v3, %v1045_v12  ;;  %v1047_v1 = vadd.f32 %v1046_v26, %v5657_v18  ;;  %v5145_v26 = vld [vmem:[%s5403_s14 + $0x78] sm:$0xff]  }
 0x143   : > { %v1418_v62 = vpop.f32.mrf.mxu0  ;;  %v1048_v58 = vpop.f32.mrf.mxu1 }
 0x144   : > { %v5814_v14 = vadd.f32 %v1416_v59, %v1047_v1  ;;  %v1049_v4 = vadd.f32 %v1048_v58, %v5663_v27  ;;  %v5144_v1 = vld [vmem:[%s5396_s11 + $0x78] sm:$0xff]  }
 0x145   : > { %v1422_v61 = vpop.f32.mrf.mxu0  ;;  %4848 = vmatmul.mubr.msk.bf16.gmra.mxu0 %vm563_vm2, %v5143_v11  ;;  %v1052_v16 = vpop.f32.mrf.mxu1  ;;  %4814 = vmatmul.mubr.msk.bf16.gmra.mxu1 %vm563_vm2, %v5142_v63 }
 0x146   : > { %2378 = vmatprep.mubr.bf16.mxu0 %v6712_v5  ;;  %v5820_v8 = vadd.f32 %v1418_v62, %v1049_v4  ;;  %v1053_v18 = vadd.f32 %v1052_v16, %v5667_v32  ;;  %1944 = vmatprep.mubr.bf16.mxu1 %v6712_v5 }
 0x147   : > { %v1424_v3 = vpop.f32.mrf.mxu0  ;;  %v1054_v6 = vpop.f32.mrf.mxu1 }
 0x148   : > { %v5824_v12 = vadd.f32 %v1422_v61, %v1053_v18  ;;  %v1055_v27 = vadd.f32 %v1054_v6, %v5674_v41 }
 0x149   : > { %v1426_v59 = vpop.f32.mrf.mxu0  ;;  %v1056_v11 = vpop.f32.mrf.mxu1 }
 0x14a   : > { %v5829_v58 = vadd.f32 %v1424_v3, %v1055_v27  ;;  %v1057_v63 = vadd.f32 %v1056_v11, %v5679_v51  ;;  %v5147_v11 = vld [vmem:[%s5337_s23 + $0x8] sm:$0xff]  }
 0x14b   : > { %v1428_v62 = vpop.f32.mrf.mxu0  ;;  %v1058_v4 = vpop.f32.mrf.mxu1 }
 0x14c   : > { %v5832_v32 = vadd.f32 %v1426_v59, %v1057_v63  ;;  %v1059_v16 = vadd.f32 %v1058_v4, %v5685_v9  ;;  %v5146_v63 = vld [vmem:[%s5517_s21] sm:$0xff]  }
 0x14d   : > { %v1432_v61 = vpop.f32.mrf.mxu0  ;;  %4849 = vmatmul.mubr.msk.bf16.gmra.mxu0 %vm563_vm2, %v5145_v26  ;;  %v1062_v41 = vpop.f32.mrf.mxu1  ;;  %4815 = vmatmul.mubr.msk.bf16.gmra.mxu1 %vm563_vm2, %v5144_v1  ;;  %v3927_v1 = vand.u32 %v5545_v29, %v5281_v7 }
 0x14e   : > { %3096 = vmatprep.mubr.bf16.mxu0 %v6712_v5  ;;  %v5838_v18 = vadd.f32 %v1428_v62, %v1059_v16  ;;  %v1063_v51 = vadd.f32 %v1062_v41, %v5689_v19  ;;  %2662 = vmatprep.mubr.bf16.mxu1 %v6712_v5  ;;  %v3493_v16 = vand.u32 %v5532_v24, %v5281_v7 }
 0x14f   : > { %v1434_v3 = vpop.f32.mrf.mxu0  ;;  %v1064_v6 = vpop.f32.mrf.mxu1 }
 0x150   : > { %v5842_v27 = vadd.f32 %v1432_v61, %v1063_v51  ;;  %v1065_v9 = vadd.f32 %v1064_v6, %v5696_v43 }
 0x151   : > { %v1436_v59 = vpop.f32.mrf.mxu0  ;;  %v1066_v26 = vpop.f32.mrf.mxu1 }
 0x152   : > { %v5849_v4 = vadd.f32 %v1434_v3, %v1065_v9  ;;  %v1067_v62 = vadd.f32 %v1066_v26, %v5701_v35  ;;  %v5148_v26 = vld [vmem:[%s5517_s21 + $0x8] sm:$0xff]  }
 0x153   : > { %v1438_v19 = vpop.f32.mrf.mxu0  ;;  %v1068_v41 = vpop.f32.mrf.mxu1 }
 0x154   : > { %v5854_v61 = vadd.f32 %v1436_v59, %v1067_v62  ;;  %v1069_v43 = vadd.f32 %v1068_v41, %v5707_v53  ;;  %v5149_v59 = vld [vmem:[%s5337_s23 + $0x10] sm:$0xff]  }
 0x155   : > { %v1442_v51 = vpop.f32.mrf.mxu0  ;;  %4902 = vmatmul.mubr.msk.bf16.vlgmr.msra.gmra.mxu0 %vm563_vm2, %v5147_v11  ;;  %v1072_v6 = vpop.f32.mrf.mxu1  ;;  %4868 = vmatmul.mubr.msk.bf16.vlgmr.msra.gmra.mxu1 %vm563_vm2, %v5146_v63 }
 0x156   : > { %3947 = vmatpush1.bf16.msra.mxu0 %v3927_v1  ;;  %v5859_v29 = vadd.f32 %v1438_v19, %v1069_v43  ;;  %v1073_v35 = vadd.f32 %v1072_v6, %v5522_v21  ;;  %3513 = vmatpush1.bf16.msra.mxu1 %v3493_v16 }
 0x157   : > { %v1444_v7 = vpop.f32.mrf.mxu0  ;;  %2672 = vmatprep.mubr.bf16.mxu1 %v6712_v5  ;;  %v1074_v24 = vpop.f32.mrf.mxu1  ;;  %3106 = vmatprep.mubr.bf16.mxu0 %v6712_v5 }
 0x158   : > { %v5864_v53 = vadd.f32 %v1442_v51, %v1073_v35  ;;  %v1075_v3 = vadd.f32 %v1074_v24, %v5534_v25  ;;  %v5151_v24 = vld [vmem:[%s5337_s23 + $0x18] sm:$0xff]  }
 0x159   : > { %v1446_v9 = vpop.f32.mrf.mxu0  ;;  %v1076_v11 = vpop.f32.mrf.mxu1 }
 0x15a   : > { %v5869_v63 = vadd.f32 %v1444_v7, %v1075_v3  ;;  %v1077_v1 = vadd.f32 %v1076_v11, %v5547_v30 }
 0x15b   : > { %v1448_v21 = vpop.f32.mrf.mxu0  ;;  %v1078_v62 = vpop.f32.mrf.mxu1 }
 0x15c   : > { %v5872_v19 = vadd.f32 %v1446_v9, %v1077_v1  ;;  %v1079_v16 = vadd.f32 %v1078_v62, %v5554_v34  ;;  %v5150_v9 = vld [vmem:[%s5517_s21 + $0x10] sm:$0xff]  }
 0x15d   : > { %v1452_v41 = vpop.f32.mrf.mxu0  ;;  %4903 = vmatmul.mubr.msk.bf16.gmra.mxu0 %vm563_vm2, %v5149_v59  ;;  %v1082_v25 = vpop.f32.mrf.mxu1  ;;  %4869 = vmatmul.mubr.msk.bf16.gmra.mxu1 %vm563_vm2, %v5148_v26 }
 0x15e   : > { %3116 = vmatprep.mubr.bf16.mxu0 %v6712_v5  ;;  %v5878_v43 = vadd.f32 %v1448_v21, %v1079_v16  ;;  %v1083_v30 = vadd.f32 %v1082_v25, %v5560_v37  ;;  %2682 = vmatprep.mubr.bf16.mxu1 %v6712_v5 }
 0x15f   : > { %v1454_v51 = vpop.f32.mrf.mxu0  ;;  %v1084_v6 = vpop.f32.mrf.mxu1 }
 0x160   : > { %v5882_v35 = vadd.f32 %v1452_v41, %v1083_v30  ;;  %v1085_v34 = vadd.f32 %v1084_v6, %v5567_v39  ;;  %v5153_v6 = vld [vmem:[%s5337_s23 + $0x20] sm:$0xff]  }
 0x161   : > { %v1456_v7 = vpop.f32.mrf.mxu0  ;;  %v1086_v3 = vpop.f32.mrf.mxu1 }
 0x162   : > { %v5887_v59 = vadd.f32 %v1454_v51, %v1085_v34  ;;  %v1087_v11 = vadd.f32 %v1086_v3, %v5572_v42 }
 0x163   : > { %v1458_v26 = vpop.f32.mrf.mxu0  ;;  %v1088_v1 = vpop.f32.mrf.mxu1 }
 0x164   : > { %v5890_v37 = vadd.f32 %v1456_v7, %v1087_v11  ;;  %v1089_v21 = vadd.f32 %v1088_v1, %v5577_v45  ;;  %v5152_v7 = vld [vmem:[%s5517_s21 + $0x18] sm:$0xff]  }
 0x165   : > { %v1462_v62 = vpop.f32.mrf.mxu0  ;;  %4904 = vmatmul.mubr.msk.bf16.gmra.mxu0 %vm563_vm2, %v5151_v24  ;;  %v1092_v39 = vpop.f32.mrf.mxu1  ;;  %4870 = vmatmul.mubr.msk.bf16.gmra.mxu1 %vm563_vm2, %v5150_v9 }
 0x166   : > { %3126 = vmatprep.mubr.bf16.mxu0 %v6712_v5  ;;  %v5896_v16 = vadd.f32 %v1458_v26, %v1089_v21  ;;  %v1093_v42 = vadd.f32 %v1092_v39, %v5582_v47  ;;  %2692 = vmatprep.mubr.bf16.mxu1 %v6712_v5 }
 0x167   : > { %v1464_v41 = vpop.f32.mrf.mxu0  ;;  %v1094_v25 = vpop.f32.mrf.mxu1 }
 0x168   : > { %v5900_v30 = vadd.f32 %v1462_v62, %v1093_v42  ;;  %v1095_v45 = vadd.f32 %v1094_v25, %v5589_v49 }
 0x169   : > { %v1466_v51 = vpop.f32.mrf.mxu0  ;;  %v1096_v34 = vpop.f32.mrf.mxu1 }
 0x16a   : > { %v5905_v24 = vadd.f32 %v1464_v41, %v1095_v45  ;;  %v1097_v3 = vadd.f32 %v1096_v34, %v5594_v52  ;;  %v5155_v45 = vld [vmem:[%s5337_s23 + $0x28] sm:$0xff]  }
 0x16b   : > { %v1468_v9 = vpop.f32.mrf.mxu0  ;;  %v1098_v11 = vpop.f32.mrf.mxu1 }
 0x16c   : > { %v5908_v47 = vadd.f32 %v1466_v51, %v1097_v3  ;;  %v1099_v26 = vadd.f32 %v1098_v11, %v5599_v55  ;;  %v6734_v55 = vld [vmem:[#allocation2_spill] sm:$0xff] }
 0x16d   : > { %v1472_v1 = vpop.f32.mrf.mxu0  ;;  %4905 = vmatmul.mubr.msk.bf16.gmra.mxu0 %vm563_vm2, %v5153_v6  ;;  %v1102_v49 = vpop.f32.mrf.mxu1  ;;  %4871 = vmatmul.mubr.msk.bf16.gmra.mxu1 %vm563_vm2, %v5152_v7  ;;  %v5154_v6 = vld [vmem:[%s5517_s21 + $0x20] sm:$0xff]   ;;  %v6736_v7 = vld [vmem:[#allocation3_spill] sm:$0xff] }
 0x16e   : > { %3136 = vmatprep.mubr.bf16.mxu0 %v6712_v5  ;;  %v5914_v21 = vadd.f32 %v1468_v9, %v1099_v26  ;;  %v1103_v52 = vadd.f32 %v1102_v49, %v5604_v57  ;;  %2702 = vmatprep.mubr.bf16.mxu1 %v6712_v5  ;;  %v6738_v26 = vld [vmem:[#allocation4_spill] sm:$0xff] }
 0x16f   : > { %v1474_v62 = vpop.f32.mrf.mxu0  ;;  %v1104_v39 = vpop.f32.mrf.mxu1 }
 0x170   : > { %v5918_v42 = vadd.f32 %v1472_v1, %v1103_v52  ;;  %v1105_v41 = vadd.f32 %v1104_v39, %v6734_v55  ;;  %v6740_v39 = vld [vmem:[#allocation5_spill] sm:$0xff] }
 0x171   : > { %v1476_v25 = vpop.f32.mrf.mxu0  ;;  %v1106_v51 = vpop.f32.mrf.mxu1 }
 0x172   : > { %6733 = vst [vmem:[#allocation21_spill] sm:$0xff] %v5918_v42  ;;  %v5923_v34 = vadd.f32 %v1474_v62, %v1105_v41  ;;  %v1107_v3 = vadd.f32 %v1106_v51, %v6736_v7  ;;  %v6742_v7 = vld [vmem:[#allocation6_spill] sm:$0xff] }
 0x173   : > { %v1478_v9 = vpop.f32.mrf.mxu0  ;;  %v1108_v11 = vpop.f32.mrf.mxu1 }
 0x174   : > { %6735 = vst [vmem:[#allocation2_spill] sm:$0xff] %v5923_v34  ;;  %v5926_v57 = vadd.f32 %v1476_v25, %v1107_v3  ;;  %v1109_v49 = vadd.f32 %v1108_v11, %v6738_v26  ;;  %v5157_v26 = vld [vmem:[%s5337_s23 + $0x30] sm:$0xff]  }
 0x175   : > { %v1482_v1 = vpop.f32.mrf.mxu0  ;;  %4906 = vmatmul.mubr.msk.bf16.gmra.mxu0 %vm563_vm2, %v5155_v45  ;;  %v1112_v52 = vpop.f32.mrf.mxu1  ;;  %4872 = vmatmul.mubr.msk.bf16.gmra.mxu1 %vm563_vm2, %v5154_v6  ;;  %v6744_v6 = vld [vmem:[#allocation7_spill] sm:$0xff] }
 0x176   : > { %6737 = vst [vmem:[#allocation3_spill] sm:$0xff] %v5926_v57  ;;  %3146 = vmatprep.mubr.bf16.mxu0 %v6712_v5  ;;  %v5932_v62 = vadd.f32 %v1478_v9, %v1109_v49  ;;  %v1113_v55 = vadd.f32 %v1112_v52, %v6740_v39  ;;  %2712 = vmatprep.mubr.bf16.mxu1 %v6712_v5  ;;  %v5156_v57 = vld [vmem:[%s5517_s21 + $0x28] sm:$0xff]   ;;  %v6746_v39 = vld [vmem:[#allocation8_spill] sm:$0xff] }
 0x177   : > { %v1484_v41 = vpop.f32.mrf.mxu0  ;;  %v1114_v25 = vpop.f32.mrf.mxu1 }
 0x178   : > { %6739 = vst [vmem:[#allocation4_spill] sm:$0xff] %v5932_v62  ;;  %v5936_v51 = vadd.f32 %v1482_v1, %v1113_v55  ;;  %v1115_v3 = vadd.f32 %v1114_v25, %v6742_v7  ;;  %v6747_v25 = vmov 0   ;;  %v6749_v7 = vld [vmem:[#allocation9_spill] sm:$0xff] }
 0x179   : > { %v1486_v11 = vpop.f32.mrf.mxu0  ;;  %v1116_v45 = vpop.f32.mrf.mxu1 }
 0x17a   : > { %6741 = vst [vmem:[#allocation5_spill] sm:$0xff] %v5936_v51  ;;  %v5941_v34 = vadd.f32 %v1484_v41, %v1115_v3  ;;  %v1117_v42 = vadd.f32 %v1116_v45, %v6744_v6  ;;  %v6751_v6 = vld [vmem:[#allocation10_spill] sm:$0xff] }
 0x17b   : > { %v1488_v9 = vpop.f32.mrf.mxu0  ;;  %v1118_v49 = vpop.f32.mrf.mxu1 }
 0x17c   : > { %6743 = vst [vmem:[#allocation6_spill] sm:$0xff] %v5941_v34  ;;  %v5944_v52 = vadd.f32 %v1486_v11, %v1117_v42  ;;  %v1119_v5 = vadd.f32 %v1118_v49, %v6746_v39  ;;  %v5158_v34 = vld [vmem:[%s5517_s21 + $0x30] sm:$0xff]  }
 0x17d   : > { %v1492_v1 = vpop.f32.mrf.mxu0  ;;  %4907 = vmatmul.mubr.msk.bf16.gmra.mxu0 %vm563_vm2, %v5157_v26  ;;  %v1122_v55 = vpop.f32.mrf.mxu1  ;;  %4873 = vmatmul.mubr.msk.bf16.gmra.mxu1 %vm563_vm2, %v5156_v57  ;;  %v6753_v57 = vld [vmem:[#allocation11_spill] sm:$0xff] }
 0x17e   : > { %6745 = vst [vmem:[#allocation7_spill] sm:$0xff] %v5944_v52  ;;  %3156 = vmatprep.mubr.bf16.mxu0 %v6747_v25  ;;  %v5950_v41 = vadd.f32 %v1488_v9, %v1119_v5  ;;  %v1123_v3 = vadd.f32 %v1122_v55, %v6749_v7  ;;  %2722 = vmatprep.mubr.bf16.mxu1 %v6747_v25  ;;  %v5159_v52 = vld [vmem:[%s5337_s23 + $0x38] sm:$0xff]   ;;  %v6755_v7 = vld [vmem:[#allocation12_spill] sm:$0xff] }
 0x17f   : > { %v1494_v45 = vpop.f32.mrf.mxu0  ;;  %v1124_v42 = vpop.f32.mrf.mxu1 }
 0x180   : > { %6748 = vst [vmem:[#allocation8_spill] sm:$0xff] %v5950_v41  ;;  %v5954_v11 = vadd.f32 %v1492_v1, %v1123_v3  ;;  %v1125_v49 = vadd.f32 %v1124_v42, %v6751_v6  ;;  %v6757_v42 = vld [vmem:[#allocation13_spill] sm:$0xff] }
 0x181   : > { %v1496_v39 = vpop.f32.mrf.mxu0  ;;  %v1126_v26 = vpop.f32.mrf.mxu1 }
 0x182   : > { %6750 = vst [vmem:[#allocation9_spill] sm:$0xff] %v5954_v11  ;;  %v5959_v51 = vadd.f32 %v1494_v45, %v1125_v49  ;;  %v1127_v62 = vadd.f32 %v1126_v26, %v6753_v57  ;;  %v6759_v26 = vld [vmem:[#allocation14_spill] sm:$0xff] }
 0x183   : > { %v1498_v5 = vpop.f32.mrf.mxu0  ;;  %v1128_v9 = vpop.f32.mrf.mxu1 }
 0x184   : > { %6752 = vst [vmem:[#allocation10_spill] sm:$0xff] %v5959_v51  ;;  %v5962_v55 = vadd.f32 %v1496_v39, %v1127_v62  ;;  %v1129_v41 = vadd.f32 %v1128_v9, %v6755_v7  ;;  %v5161_v7 = vld [vmem:[%s5337_s23 + $0x40] sm:$0xff]  }
 0x185   : > { %v1502_v1 = vpop.f32.mrf.mxu0  ;;  %4908 = vmatmul.mubr.msk.bf16.gmra.mxu0 %vm563_vm2, %v5159_v52  ;;  %v1132_v3 = vpop.f32.mrf.mxu1  ;;  %4874 = vmatmul.mubr.msk.bf16.gmra.mxu1 %vm563_vm2, %v5158_v34  ;;  %v6761_v34 = vld [vmem:[#allocation15_spill] sm:$0xff] }
 0x186   : > { %6754 = vst [vmem:[#allocation11_spill] sm:$0xff] %v5962_v55  ;;  %3166 = vmatprep.mubr.bf16.mxu0 %v6747_v25  ;;  %v5968_v45 = vadd.f32 %v1498_v5, %v1129_v41  ;;  %v1133_v6 = vadd.f32 %v1132_v3, %v6757_v42  ;;  %2732 = vmatprep.mubr.bf16.mxu1 %v6747_v25  ;;  %v5160_v55 = vld [vmem:[%s5517_s21 + $0x38] sm:$0xff]   ;;  %v6763_v42 = vld [vmem:[#allocation16_spill] sm:$0xff] }
 0x187   : > { %v1504_v49 = vpop.f32.mrf.mxu0  ;;  %v1134_v62 = vpop.f32.mrf.mxu1 }
 0x188   : > { %6756 = vst [vmem:[#allocation12_spill] sm:$0xff] %v5968_v45  ;;  %v5972_v39 = vadd.f32 %v1502_v1, %v1133_v6  ;;  %v1135_v57 = vadd.f32 %v1134_v62, %v6759_v26  ;;  %v6765_v62 = vld [vmem:[#allocation17_spill] sm:$0xff] }
 0x189   : > { %v1506_v9 = vpop.f32.mrf.mxu0  ;;  %v1136_v52 = vpop.f32.mrf.mxu1 }
 0x18a   : > { %6758 = vst [vmem:[#allocation13_spill] sm:$0xff] %v5972_v39  ;;  %v5977_v51 = vadd.f32 %v1504_v49, %v1135_v57  ;;  %v1137_v11 = vadd.f32 %v1136_v52, %v6761_v34  ;;  %v6766_v52 = vld [vmem:[#allocation18_spill] sm:$0xff] }
 0x18b   : > { %v1508_v41 = vpop.f32.mrf.mxu0  ;;  %v1138_v5 = vpop.f32.mrf.mxu1 }
 0x18c   : > { %6760 = vst [vmem:[#allocation14_spill] sm:$0xff] %v5977_v51  ;;  %v5980_v3 = vadd.f32 %v1506_v9, %v1137_v11  ;;  %v1139_v45 = vadd.f32 %v1138_v5, %v6763_v42  ;;  %v5163_v42 = vld [vmem:[%s5337_s23 + $0x48] sm:$0xff]  }
 0x18d   : > { %v1512_v1 = vpop.f32.mrf.mxu0  ;;  %4909 = vmatmul.mubr.msk.bf16.gmra.mxu0 %vm563_vm2, %v5161_v7  ;;  %v1142_v6 = vpop.f32.mrf.mxu1  ;;  %4875 = vmatmul.mubr.msk.bf16.gmra.mxu1 %vm563_vm2, %v5160_v55  ;;  %v6767_v55 = vld [vmem:[#allocation19_spill] sm:$0xff] }
 0x18e   : > { %6762 = vst [vmem:[#allocation15_spill] sm:$0xff] %v5980_v3  ;;  %3176 = vmatprep.mubr.bf16.mxu0 %v6747_v25  ;;  %v5986_v49 = vadd.f32 %v1508_v41, %v1139_v45  ;;  %v1143_v26 = vadd.f32 %v1142_v6, %v6765_v62  ;;  %2742 = vmatprep.mubr.bf16.mxu1 %v6747_v25  ;;  %v5162_v3 = vld [vmem:[%s5517_s21 + $0x40] sm:$0xff]   ;;  %v6768_v62 = vld [vmem:[#allocation20_spill] sm:$0xff] }
 0x18f   : > { %v1514_v57 = vpop.f32.mrf.mxu0  ;;  %v1144_v11 = vpop.f32.mrf.mxu1 }
 0x190   : > { %6764 = vst [vmem:[#allocation16_spill] sm:$0xff] %v5986_v49  ;;  %v5990_v9 = vadd.f32 %v1512_v1, %v1143_v26  ;;  %v1145_v34 = vadd.f32 %v1144_v11, %v6766_v52 }
 0x191   : > { %v1516_v5 = vpop.f32.mrf.mxu0  ;;  %v1146_v7 = vpop.f32.mrf.mxu1 }
 0x192   : > { %v5995_v51 = vadd.f32 %v1514_v57, %v1145_v34  ;;  %v1147_v39 = vadd.f32 %v1146_v7, %v6767_v55  ;;  %v5165_v55 = vld [vmem:[%s5337_s23 + $0x50] sm:$0xff]  }
 0x193   : > { %v1518_v45 = vpop.f32.mrf.mxu0  ;;  %v1148_v41 = vpop.f32.mrf.mxu1 }
 0x194   : > { %v5998_v6 = vadd.f32 %v1516_v5, %v1147_v39  ;;  %v1149_v49 = vadd.f32 %v1148_v41, %v6768_v62  ;;  %v5164_v41 = vld [vmem:[%s5517_s21 + $0x48] sm:$0xff]  }
 0x195   : > { %v2230_v1 = vpop.f32.mrf.mxu0  ;;  %4910 = vmatmul.mubr.msk.bf16.gmra.mxu0 %vm563_vm2, %v5163_v42  ;;  %v1796_v26 = vpop.f32.mrf.mxu1  ;;  %4876 = vmatmul.mubr.msk.bf16.gmra.mxu1 %vm563_vm2, %v5162_v3 }
 0x196   : > { %3186 = vmatprep.mubr.bf16.mxu0 %v6747_v25  ;;  %v6004_v57 = vadd.f32 %v1518_v45, %v1149_v49  ;;  %v1955_v11 = vadd.f32 %v1796_v26, %v5716_v13  ;;  %2752 = vmatprep.mubr.bf16.mxu1 %v6747_v25 }
 0x197   : > { %v2232_v52 = vpop.f32.mrf.mxu0  ;;  %v1798_v39 = vpop.f32.mrf.mxu1 }
 0x198   : > { %v6008_v34 = vadd.f32 %v2230_v1, %v1955_v11  ;;  %v1956_v5 = vadd.f32 %v1798_v39, %v5721_v31 }
 0x199   : > { %v2234_v7 = vpop.f32.mrf.mxu0  ;;  %v1800_v42 = vpop.f32.mrf.mxu1 }
 0x19a   : > { %v6013_v62 = vadd.f32 %v2232_v52, %v1956_v5  ;;  %v1957_v3 = vadd.f32 %v1800_v42, %v5724_v20  ;;  %v5167_v42 = vld [vmem:[%s5337_s23 + $0x58] sm:$0xff]  }
 0x19b   : > { %v2236_v49 = vpop.f32.mrf.mxu0  ;;  %v1802_v45 = vpop.f32.mrf.mxu1 }
 0x19c   : > { %v6016_v13 = vadd.f32 %v2234_v7, %v1957_v3  ;;  %v1958_v26 = vadd.f32 %v1802_v45, %v5730_v10  ;;  %v5166_v3 = vld [vmem:[%s5517_s21 + $0x50] sm:$0xff]  }
 0x19d   : > { %v2240_v1 = vpop.f32.mrf.mxu0  ;;  %4911 = vmatmul.mubr.msk.bf16.gmra.mxu0 %vm563_vm2, %v5165_v55  ;;  %v1806_v31 = vpop.f32.mrf.mxu1  ;;  %4877 = vmatmul.mubr.msk.bf16.gmra.mxu1 %vm563_vm2, %v5164_v41 }
 0x19e   : > { %3196 = vmatprep.mubr.bf16.mxu0 %v6747_v25  ;;  %v6022_v11 = vadd.f32 %v2236_v49, %v1958_v26  ;;  %v1959_v20 = vadd.f32 %v1806_v31, %v5734_v15  ;;  %2762 = vmatprep.mubr.bf16.mxu1 %v6747_v25 }
 0x19f   : > { %v2242_v52 = vpop.f32.mrf.mxu0  ;;  %v1808_v39 = vpop.f32.mrf.mxu1 }
 0x1a0   : > { %v6026_v5 = vadd.f32 %v2240_v1, %v1959_v20  ;;  %v1960_v10 = vadd.f32 %v1808_v39, %v5739_v23 }
 0x1a1   : > { %v2244_v7 = vpop.f32.mrf.mxu0  ;;  %v1810_v55 = vpop.f32.mrf.mxu1 }
 0x1a2   : > { %v6031_v45 = vadd.f32 %v2242_v52, %v1960_v10  ;;  %v1961_v41 = vadd.f32 %v1810_v55, %v5742_v36  ;;  %v5169_v55 = vld [vmem:[%s5337_s23 + $0x60] sm:$0xff]  }
 0x1a3   : > { %v2246_v49 = vpop.f32.mrf.mxu0  ;;  %v1812_v26 = vpop.f32.mrf.mxu1 }
 0x1a4   : > { %v6034_v15 = vadd.f32 %v2244_v7, %v1961_v41  ;;  %v1962_v31 = vadd.f32 %v1812_v26, %v5748_v28  ;;  %v5168_v41 = vld [vmem:[%s5517_s21 + $0x58] sm:$0xff]  }
 0x1a5   : > { %v2250_v1 = vpop.f32.mrf.mxu0  ;;  %4912 = vmatmul.mubr.msk.bf16.gmra.mxu0 %vm563_vm2, %v5167_v42  ;;  %v1816_v23 = vpop.f32.mrf.mxu1  ;;  %4878 = vmatmul.mubr.msk.bf16.gmra.mxu1 %vm563_vm2, %v5166_v3 }
 0x1a6   : > { %3206 = vmatprep.mubr.bf16.mxu0 %v6747_v25  ;;  %v6040_v20 = vadd.f32 %v2246_v49, %v1962_v31  ;;  %v1963_v36 = vadd.f32 %v1816_v23, %v5752_v33  ;;  %2772 = vmatprep.mubr.bf16.mxu1 %v6747_v25 }
 0x1a7   : > { %v2252_v52 = vpop.f32.mrf.mxu0  ;;  %v1818_v39 = vpop.f32.mrf.mxu1 }
 0x1a8   : > { %v6044_v10 = vadd.f32 %v2250_v1, %v1963_v36  ;;  %v1964_v28 = vadd.f32 %v1818_v39, %v5757_v17 }
 0x1a9   : > { %v2254_v7 = vpop.f32.mrf.mxu0  ;;  %v1820_v42 = vpop.f32.mrf.mxu1 }
 0x1aa   : > { %v6049_v26 = vadd.f32 %v2252_v52, %v1964_v28  ;;  %v1965_v3 = vadd.f32 %v1820_v42, %v5760_v46  ;;  %v5171_v42 = vld [vmem:[%s5337_s23 + $0x68] sm:$0xff]  }
 0x1ab   : > { %v2256_v49 = vpop.f32.mrf.mxu0  ;;  %v1822_v31 = vpop.f32.mrf.mxu1 }
 0x1ac   : > { %v6052_v33 = vadd.f32 %v2254_v7, %v1965_v3  ;;  %v1966_v23 = vadd.f32 %v1822_v31, %v5766_v40  ;;  %v5170_v3 = vld [vmem:[%s5517_s21 + $0x60] sm:$0xff]  }
 0x1ad   : > { %v2260_v1 = vpop.f32.mrf.mxu0  ;;  %4913 = vmatmul.mubr.msk.bf16.gmra.mxu0 %vm563_vm2, %v5169_v55  ;;  %v1826_v17 = vpop.f32.mrf.mxu1  ;;  %4879 = vmatmul.mubr.msk.bf16.gmra.mxu1 %vm563_vm2, %v5168_v41 }
 0x1ae   : > { %3216 = vmatprep.mubr.bf16.mxu0 %v6747_v25  ;;  %v6058_v36 = vadd.f32 %v2256_v49, %v1966_v23  ;;  %v1967_v46 = vadd.f32 %v1826_v17, %v5770_v44  ;;  %2782 = vmatprep.mubr.bf16.mxu1 %v6747_v25 }
 0x1af   : > { %v2262_v52 = vpop.f32.mrf.mxu0  ;;  %v1828_v39 = vpop.f32.mrf.mxu1 }
 0x1b0   : > { %v6062_v28 = vadd.f32 %v2260_v1, %v1967_v46  ;;  %v1968_v40 = vadd.f32 %v1828_v39, %v5775_v22 }
 0x1b1   : > { %v2264_v7 = vpop.f32.mrf.mxu0  ;;  %v1830_v55 = vpop.f32.mrf.mxu1 }
 0x1b2   : > { %v6067_v31 = vadd.f32 %v2262_v52, %v1968_v40  ;;  %v1969_v41 = vadd.f32 %v1830_v55, %v5778_v56  ;;  %v5173_v55 = vld [vmem:[%s5337_s23 + $0x70] sm:$0xff]  }
 0x1b3   : > { %v2266_v49 = vpop.f32.mrf.mxu0  ;;  %v1832_v23 = vpop.f32.mrf.mxu1 }
 0x1b4   : > { %v6070_v44 = vadd.f32 %v2264_v7, %v1969_v41  ;;  %v1970_v17 = vadd.f32 %v1832_v23, %v5784_v50  ;;  %v5172_v41 = vld [vmem:[%s5517_s21 + $0x68] sm:$0xff]  }
 0x1b5   : > { %v2270_v1 = vpop.f32.mrf.mxu0  ;;  %4914 = vmatmul.mubr.msk.bf16.gmra.mxu0 %vm563_vm2, %v5171_v42  ;;  %v1836_v22 = vpop.f32.mrf.mxu1  ;;  %4880 = vmatmul.mubr.msk.bf16.gmra.mxu1 %vm563_vm2, %v5170_v3 }
 0x1b6   : > { %3226 = vmatprep.mubr.bf16.mxu0 %v6747_v25  ;;  %v6076_v46 = vadd.f32 %v2266_v49, %v1970_v17  ;;  %v1971_v56 = vadd.f32 %v1836_v22, %v5788_v54  ;;  %2792 = vmatprep.mubr.bf16.mxu1 %v6747_v25 }
 0x1b7   : > { %v2272_v52 = vpop.f32.mrf.mxu0  ;;  %v1838_v39 = vpop.f32.mrf.mxu1 }
 0x1b8   : > { %v6080_v40 = vadd.f32 %v2270_v1, %v1971_v56  ;;  %v1972_v50 = vadd.f32 %v1838_v39, %v5793_v38 }
 0x1b9   : > { %v2274_v7 = vpop.f32.mrf.mxu0  ;;  %v1840_v42 = vpop.f32.mrf.mxu1 }
 0x1ba   : > { %v6085_v23 = vadd.f32 %v2272_v52, %v1972_v50  ;;  %v1973_v3 = vadd.f32 %v1840_v42, %v5796_v2  ;;  %v5175_v42 = vld [vmem:[%s5337_s23 + $0x78] sm:$0xff]  }
 0x1bb   : > { %v2276_v49 = vpop.f32.mrf.mxu0  ;;  %v1842_v17 = vpop.f32.mrf.mxu1 }
 0x1bc   : > { %v6088_v54 = vadd.f32 %v2274_v7, %v1973_v3  ;;  %v1974_v22 = vadd.f32 %v1842_v17, %v5802_v60  ;;  %v5174_v3 = vld [vmem:[%s5517_s21 + $0x70] sm:$0xff]  }
 0x1bd   : > { %v2280_v1 = vpop.f32.mrf.mxu0  ;;  %4915 = vmatmul.mubr.msk.bf16.gmra.mxu0 %vm563_vm2, %v5173_v55  ;;  %v1846_v38 = vpop.f32.mrf.mxu1  ;;  %4881 = vmatmul.mubr.msk.bf16.gmra.mxu1 %vm563_vm2, %v5172_v41 }
 0x1be   : > { %3236 = vmatprep.mubr.bf16.mxu0 %v6747_v25  ;;  %v6094_v56 = vadd.f32 %v2276_v49, %v1974_v22  ;;  %v1975_v2 = vadd.f32 %v1846_v38, %v5806_v0  ;;  %2802 = vmatprep.mubr.bf16.mxu1 %v6747_v25 }
 0x1bf   : > { %v2282_v52 = vpop.f32.mrf.mxu0  ;;  %v1848_v39 = vpop.f32.mrf.mxu1 }
 0x1c0   : > { %v6098_v50 = vadd.f32 %v2280_v1, %v1975_v2  ;;  %v1976_v60 = vadd.f32 %v1848_v39, %v5811_v48 }
 0x1c1   : > { %v2284_v7 = vpop.f32.mrf.mxu0  ;;  %v1850_v55 = vpop.f32.mrf.mxu1 }
 0x1c2   : > { %v6103_v17 = vadd.f32 %v2282_v52, %v1976_v60  ;;  %v1977_v41 = vadd.f32 %v1850_v55, %v5814_v14  ;;  %v5177_v55 = vld [vmem:[%s5337_s23 + $0x80] sm:$0xff]  }
 0x1c3   : > { %v2286_v49 = vpop.f32.mrf.mxu0  ;;  %v1852_v22 = vpop.f32.mrf.mxu1 }
 0x1c4   : > { %v6106_v0 = vadd.f32 %v2284_v7, %v1977_v41  ;;  %v1978_v38 = vadd.f32 %v1852_v22, %v5820_v8  ;;  %v5176_v41 = vld [vmem:[%s5517_s21 + $0x78] sm:$0xff]  }
 0x1c5   : > { %v2290_v1 = vpop.f32.mrf.mxu0  ;;  %4916 = vmatmul.mubr.msk.bf16.gmra.mxu0 %vm563_vm2, %v5175_v42  ;;  %v1856_v48 = vpop.f32.mrf.mxu1  ;;  %4882 = vmatmul.mubr.msk.bf16.gmra.mxu1 %vm563_vm2, %v5174_v3 }
 0x1c6   : > { %3246 = vmatprep.mubr.bf16.mxu0 %v6747_v25  ;;  %v6112_v2 = vadd.f32 %v2286_v49, %v1978_v38  ;;  %v1979_v14 = vadd.f32 %v1856_v48, %v5824_v12  ;;  %2812 = vmatprep.mubr.bf16.mxu1 %v6747_v25 }
 0x1c7   : > { %v2292_v52 = vpop.f32.mrf.mxu0  ;;  %v1858_v39 = vpop.f32.mrf.mxu1 }
 0x1c8   : > { %v6116_v60 = vadd.f32 %v2290_v1, %v1979_v14  ;;  %v1980_v8 = vadd.f32 %v1858_v39, %v5829_v58 }
 0x1c9   : > { %v2294_v7 = vpop.f32.mrf.mxu0  ;;  %v1860_v42 = vpop.f32.mrf.mxu1 }
 0x1ca   : > { %v6121_v22 = vadd.f32 %v2292_v52, %v1980_v8  ;;  %v1981_v3 = vadd.f32 %v1860_v42, %v5832_v32  ;;  %v5179_v42 = vld [vmem:[%s5343_s26 + $0x8] sm:$0xff]  }
 0x1cb   : > { %v2296_v49 = vpop.f32.mrf.mxu0  ;;  %v1862_v38 = vpop.f32.mrf.mxu1 }
 0x1cc   : > { %v6124_v12 = vadd.f32 %v2294_v7, %v1981_v3  ;;  %v1982_v48 = vadd.f32 %v1862_v38, %v5838_v18  ;;  %v5178_v3 = vld [vmem:[%s5313_s20 + $0x8] sm:$0xff]  }
 0x1cd   : > { %v2300_v1 = vpop.f32.mrf.mxu0  ;;  %4917 = vmatmul.mubr.msk.bf16.gmra.mxu0 %vm563_vm2, %v5177_v55  ;;  %v1866_v58 = vpop.f32.mrf.mxu1  ;;  %4883 = vmatmul.mubr.msk.bf16.gmra.mxu1 %vm563_vm2, %v5176_v41 }
 0x1ce   : > { %3964 = vmatprep.mubr.bf16.mxu0 %v6747_v25  ;;  %v6130_v14 = vadd.f32 %v2296_v49, %v1982_v48  ;;  %v1983_v32 = vadd.f32 %v1866_v58, %v5842_v27  ;;  %3530 = vmatprep.mubr.bf16.mxu1 %v6747_v25 }
 0x1cf   : > { %v2302_v52 = vpop.f32.mrf.mxu0  ;;  %v1868_v39 = vpop.f32.mrf.mxu1 }
 0x1d0   : > { %v6134_v8 = vadd.f32 %v2300_v1, %v1983_v32  ;;  %v1984_v18 = vadd.f32 %v1868_v39, %v5849_v4 }
 0x1d1   : > { %v2304_v7 = vpop.f32.mrf.mxu0  ;;  %v1870_v55 = vpop.f32.mrf.mxu1 }
 0x1d2   : > { %v6139_v38 = vadd.f32 %v2302_v52, %v1984_v18  ;;  %v1985_v41 = vadd.f32 %v1870_v55, %v5854_v61  ;;  %v5181_v55 = vld [vmem:[%s5343_s26 + $0x10] sm:$0xff]  }
 0x1d3   : > { %v2306_v49 = vpop.f32.mrf.mxu0  ;;  %v1872_v48 = vpop.f32.mrf.mxu1 }
 0x1d4   : > { %v6142_v27 = vadd.f32 %v2304_v7, %v1985_v41  ;;  %v1986_v58 = vadd.f32 %v1872_v48, %v5859_v29  ;;  %v5180_v41 = vld [vmem:[%s5313_s20 + $0x10] sm:$0xff]  }
 0x1d5   : > { %v2310_v1 = vpop.f32.mrf.mxu0  ;;  %4970 = vmatmul.mubr.msk.bf16.vlgmr.msra.gmra.mxu0 %vm563_vm2, %v5179_v42  ;;  %v1876_v4 = vpop.f32.mrf.mxu1  ;;  %4936 = vmatmul.mubr.msk.bf16.vlgmr.msra.gmra.mxu1 %vm563_vm2, %v5178_v3 }
 0x1d6   : > { %3974 = vmatprep.mubr.bf16.mxu0 %v6747_v25  ;;  %v6148_v32 = vadd.f32 %v2306_v49, %v1986_v58  ;;  %v1987_v61 = vadd.f32 %v1876_v4, %v5864_v53  ;;  %3540 = vmatprep.mubr.bf16.mxu1 %v6747_v25 }
 0x1d7   : > { %v2312_v52 = vpop.f32.mrf.mxu0  ;;  %v1878_v39 = vpop.f32.mrf.mxu1 }
 0x1d8   : > { %v6152_v18 = vadd.f32 %v2310_v1, %v1987_v61  ;;  %v1988_v29 = vadd.f32 %v1878_v39, %v5869_v63 }
 0x1d9   : > { %v2314_v7 = vpop.f32.mrf.mxu0  ;;  %v1880_v42 = vpop.f32.mrf.mxu1 }
 0x1da   : > { %v6157_v48 = vadd.f32 %v2312_v52, %v1988_v29  ;;  %v1989_v3 = vadd.f32 %v1880_v42, %v5872_v19  ;;  %v5183_v42 = vld [vmem:[%s5343_s26 + $0x18] sm:$0xff]  }
 0x1db   : > { %v2316_v49 = vpop.f32.mrf.mxu0  ;;  %v1882_v58 = vpop.f32.mrf.mxu1 }
 0x1dc   : > { %v6160_v53 = vadd.f32 %v2314_v7, %v1989_v3  ;;  %v1990_v4 = vadd.f32 %v1882_v58, %v5878_v43  ;;  %v5182_v3 = vld [vmem:[%s5313_s20 + $0x18] sm:$0xff]  }
 0x1dd   : > { %v2320_v1 = vpop.f32.mrf.mxu0  ;;  %4971 = vmatmul.mubr.msk.bf16.gmra.mxu0 %vm563_vm2, %v5181_v55  ;;  %v1886_v63 = vpop.f32.mrf.mxu1  ;;  %4937 = vmatmul.mubr.msk.bf16.gmra.mxu1 %vm563_vm2, %v5180_v41 }
 0x1de   : > { %3984 = vmatprep.mubr.bf16.mxu0 %v6747_v25  ;;  %v6166_v61 = vadd.f32 %v2316_v49, %v1990_v4  ;;  %v1991_v19 = vadd.f32 %v1886_v63, %v5882_v35  ;;  %3550 = vmatprep.mubr.bf16.mxu1 %v6747_v25 }
 0x1df   : > { %v2322_v52 = vpop.f32.mrf.mxu0  ;;  %v1888_v39 = vpop.f32.mrf.mxu1 }
 0x1e0   : > { %v6170_v29 = vadd.f32 %v2320_v1, %v1991_v19  ;;  %v1992_v43 = vadd.f32 %v1888_v39, %v5887_v59 }
 0x1e1   : > { %v2324_v7 = vpop.f32.mrf.mxu0  ;;  %v1890_v55 = vpop.f32.mrf.mxu1 }
 0x1e2   : > { %v6175_v58 = vadd.f32 %v2322_v52, %v1992_v43  ;;  %v1993_v41 = vadd.f32 %v1890_v55, %v5890_v37  ;;  %v5185_v55 = vld [vmem:[%s5343_s26 + $0x20] sm:$0xff]  }
 0x1e3   : > { %v2326_v49 = vpop.f32.mrf.mxu0  ;;  %v1892_v4 = vpop.f32.mrf.mxu1 }
 0x1e4   : > { %v6178_v35 = vadd.f32 %v2324_v7, %v1993_v41  ;;  %v1994_v63 = vadd.f32 %v1892_v4, %v5896_v16  ;;  %v5184_v41 = vld [vmem:[%s5313_s20 + $0x20] sm:$0xff]  }
 0x1e5   : > { %v2330_v1 = vpop.f32.mrf.mxu0  ;;  %4972 = vmatmul.mubr.msk.bf16.gmra.mxu0 %vm563_vm2, %v5183_v42  ;;  %v1896_v59 = vpop.f32.mrf.mxu1  ;;  %4938 = vmatmul.mubr.msk.bf16.gmra.mxu1 %vm563_vm2, %v5182_v3 }
 0x1e6   : > { %3994 = vmatprep.mubr.bf16.mxu0 %v6747_v25  ;;  %v6184_v19 = vadd.f32 %v2326_v49, %v1994_v63  ;;  %v1995_v37 = vadd.f32 %v1896_v59, %v5900_v30  ;;  %3560 = vmatprep.mubr.bf16.mxu1 %v6747_v25 }
 0x1e7   : > { %v2332_v52 = vpop.f32.mrf.mxu0  ;;  %v1898_v39 = vpop.f32.mrf.mxu1 }
 0x1e8   : > { %v6188_v43 = vadd.f32 %v2330_v1, %v1995_v37  ;;  %v1996_v16 = vadd.f32 %v1898_v39, %v5905_v24 }
 0x1e9   : > { %v2334_v7 = vpop.f32.mrf.mxu0  ;;  %v1900_v42 = vpop.f32.mrf.mxu1 }
 0x1ea   : > { %6769 = vst [vmem:[#allocation17_spill] sm:$0xff] %v6188_v43  ;;  %v6193_v4 = vadd.f32 %v2332_v52, %v1996_v16  ;;  %v1997_v3 = vadd.f32 %v1900_v42, %v5908_v47  ;;  %v6773_v52 = vld [vmem:[#allocation21_spill] sm:$0xff] }
 0x1eb   : > { %v2336_v49 = vpop.f32.mrf.mxu0  ;;  %v1902_v63 = vpop.f32.mrf.mxu1 }
 0x1ec   : > { %6770 = vst [vmem:[#allocation18_spill] sm:$0xff] %v6193_v4  ;;  %v6196_v30 = vadd.f32 %v2334_v7, %v1997_v3  ;;  %v1998_v59 = vadd.f32 %v1902_v63, %v5914_v21  ;;  %v6775_v21 = vld [vmem:[#allocation2_spill] sm:$0xff]  ;;  %v5187_v63 = vld [vmem:[%s5343_s26 + $0x28] sm:$0xff]  }
 0x1ed   : > { %v2340_v1 = vpop.f32.mrf.mxu0  ;;  %4973 = vmatmul.mubr.msk.bf16.gmra.mxu0 %vm563_vm2, %v5185_v55  ;;  %v1906_v24 = vpop.f32.mrf.mxu1  ;;  %4939 = vmatmul.mubr.msk.bf16.gmra.mxu1 %vm563_vm2, %v5184_v41  ;;  %v6777_v41 = vld [vmem:[#allocation3_spill] sm:$0xff] }
 0x1ee   : > { %6771 = vst [vmem:[#allocation19_spill] sm:$0xff] %v6196_v30  ;;  %4004 = vmatprep.mubr.bf16.mxu0 %v6747_v25  ;;  %v6202_v37 = vadd.f32 %v2336_v49, %v1998_v59  ;;  %v1999_v47 = vadd.f32 %v1906_v24, %v6773_v52  ;;  %3570 = vmatprep.mubr.bf16.mxu1 %v6747_v25  ;;  %v5186_v30 = vld [vmem:[%s5313_s20 + $0x28] sm:$0xff]   ;;  %v6779_v52 = vld [vmem:[#allocation4_spill] sm:$0xff] }
 0x1ef   : > { %v2342_v39 = vpop.f32.mrf.mxu0  ;;  %v1908_v16 = vpop.f32.mrf.mxu1 }
 0x1f0   : > { %6772 = vst [vmem:[#allocation20_spill] sm:$0xff] %v6202_v37  ;;  %v6206_v7 = vadd.f32 %v2340_v1, %v1999_v47  ;;  %v2000_v42 = vadd.f32 %v1908_v16, %v6775_v21  ;;  %v6781_v16 = vld [vmem:[#allocation5_spill] sm:$0xff] }
 0x1f1   : > { %v2344_v3 = vpop.f32.mrf.mxu0  ;;  %v1910_v55 = vpop.f32.mrf.mxu1 }
 0x1f2   : > { %6774 = vst [vmem:[#allocation21_spill] sm:$0xff] %v6206_v7  ;;  %v6211_v4 = vadd.f32 %v2342_v39, %v2000_v42  ;;  %v2001_v43 = vadd.f32 %v1910_v55, %v6777_v41  ;;  %v6783_v55 = vld [vmem:[#allocation6_spill] sm:$0xff] }
 0x1f3   : > { %v2346_v49 = vpop.f32.mrf.mxu0  ;;  %v1912_v59 = vpop.f32.mrf.mxu1 }
 0x1f4   : > { %6776 = vst [vmem:[#allocation2_spill] sm:$0xff] %v6211_v4  ;;  %v6214_v24 = vadd.f32 %v2344_v3, %v2001_v43  ;;  %v2002_v37 = vadd.f32 %v1912_v59, %v6779_v52  ;;  %v5189_v52 = vld [vmem:[%s5343_s26 + $0x30] sm:$0xff]  }
 0x1f5   : > { %v2350_v1 = vpop.f32.mrf.mxu0  ;;  %4974 = vmatmul.mubr.msk.bf16.gmra.mxu0 %vm563_vm2, %v5187_v63  ;;  %v1916_v47 = vpop.f32.mrf.mxu1  ;;  %4940 = vmatmul.mubr.msk.bf16.gmra.mxu1 %vm563_vm2, %v5186_v30  ;;  %v6785_v30 = vld [vmem:[#allocation7_spill] sm:$0xff] }
 0x1f6   : > { %6778 = vst [vmem:[#allocation3_spill] sm:$0xff] %v6214_v24  ;;  %4014 = vmatprep.mubr.bf16.mxu0 %v6747_v25  ;;  %v6220_v39 = vadd.f32 %v2346_v49, %v2002_v37  ;;  %v2003_v21 = vadd.f32 %v1916_v47, %v6781_v16  ;;  %3580 = vmatprep.mubr.bf16.mxu1 %v6747_v25  ;;  %v5188_v24 = vld [vmem:[%s5313_s20 + $0x30] sm:$0xff]  }
 0x1f7   : > { %v2352_v42 = vpop.f32.mrf.mxu0  ;;  %v1918_v43 = vpop.f32.mrf.mxu1  ;;  %v6787_v16 = vld [vmem:[#allocation8_spill] sm:$0xff] }
 0x1f8   : > { %6780 = vst [vmem:[#allocation4_spill] sm:$0xff] %v6220_v39  ;;  %v6224_v3 = vadd.f32 %v2350_v1, %v2003_v21  ;;  %v2004_v41 = vadd.f32 %v1918_v43, %v6783_v55  ;;  %v6789_v43 = vld [vmem:[#allocation9_spill] sm:$0xff] }
 0x1f9   : > { %v2354_v59 = vpop.f32.mrf.mxu0  ;;  %v1920_v63 = vpop.f32.mrf.mxu1 }
 0x1fa   : > { %6782 = vst [vmem:[#allocation5_spill] sm:$0xff] %v6224_v3  ;;  %v6229_v4 = vadd.f32 %v2352_v42, %v2004_v41  ;;  %v2005_v7 = vadd.f32 %v1920_v63, %v6785_v30  ;;  %v6791_v63 = vld [vmem:[#allocation10_spill] sm:$0xff] }
 0x1fb   : > { %v2356_v37 = vpop.f32.mrf.mxu0  ;;  %v1922_v49 = vpop.f32.mrf.mxu1 }
 0x1fc   : > { %6784 = vst [vmem:[#allocation6_spill] sm:$0xff] %v6229_v4  ;;  %v6232_v47 = vadd.f32 %v2354_v59, %v2005_v7  ;;  %v2006_v39 = vadd.f32 %v1922_v49, %v6787_v16  ;;  %v5191_v16 = vld [vmem:[%s5343_s26 + $0x38] sm:$0xff]  }
 0x1fd   : > { %v2360_v1 = vpop.f32.mrf.mxu0  ;;  %4975 = vmatmul.mubr.msk.bf16.gmra.mxu0 %vm563_vm2, %v5189_v52  ;;  %v1926_v21 = vpop.f32.mrf.mxu1  ;;  %4941 = vmatmul.mubr.msk.bf16.gmra.mxu1 %vm563_vm2, %v5188_v24  ;;  %v6793_v24 = vld [vmem:[#allocation11_spill] sm:$0xff] }
 0x1fe   : > { %6786 = vst [vmem:[#allocation7_spill] sm:$0xff] %v6232_v47  ;;  %4024 = vmatprep.mubr.bf16.mxu0 %v6747_v25  ;;  %v6238_v42 = vadd.f32 %v2356_v37, %v2006_v39  ;;  %v2007_v55 = vadd.f32 %v1926_v21, %v6789_v43  ;;  %3590 = vmatprep.mubr.bf16.mxu1 %v6747_v25  ;;  %v5190_v47 = vld [vmem:[%s5313_s20 + $0x38] sm:$0xff]   ;;  %v6795_v43 = vld [vmem:[#allocation12_spill] sm:$0xff] }
 0x1ff   : > { %v2362_v41 = vpop.f32.mrf.mxu0  ;;  %v1928_v7 = vpop.f32.mrf.mxu1 }
 0x200   : > { %6788 = vst [vmem:[#allocation8_spill] sm:$0xff] %v6238_v42  ;;  %v6242_v59 = vadd.f32 %v2360_v1, %v2007_v55  ;;  %v2008_v30 = vadd.f32 %v1928_v7, %v6791_v63  ;;  %v6797_v7 = vld [vmem:[#allocation13_spill] sm:$0xff] }
 0x201   : > { %v2364_v49 = vpop.f32.mrf.mxu0  ;;  %v1930_v52 = vpop.f32.mrf.mxu1 }
 0x202   : > { %6790 = vst [vmem:[#allocation9_spill] sm:$0xff] %v6242_v59  ;;  %v6247_v4 = vadd.f32 %v2362_v41, %v2008_v30  ;;  %v2009_v3 = vadd.f32 %v1930_v52, %v6793_v24  ;;  %v6798_v52 = vld [vmem:[#allocation14_spill] sm:$0xff] }
 0x203   : > { %v2366_v39 = vpop.f32.mrf.mxu0  ;;  %v1932_v37 = vpop.f32.mrf.mxu1 }
 0x204   : > { %6792 = vst [vmem:[#allocation10_spill] sm:$0xff] %v6247_v4  ;;  %v6250_v21 = vadd.f32 %v2364_v49, %v2009_v3  ;;  %v2010_v42 = vadd.f32 %v1932_v37, %v6795_v43  ;;  %v5193_v43 = vld [vmem:[%s5343_s26 + $0x40] sm:$0xff]  }
 0x205   : > { %v2370_v1 = vpop.f32.mrf.mxu0  ;;  %4976 = vmatmul.mubr.msk.bf16.gmra.mxu0 %vm563_vm2, %v5191_v16  ;;  %v1936_v55 = vpop.f32.mrf.mxu1  ;;  %4942 = vmatmul.mubr.msk.bf16.gmra.mxu1 %vm563_vm2, %v5190_v47  ;;  %v6799_v47 = vld [vmem:[#allocation15_spill] sm:$0xff] }
 0x206   : > { %6794 = vst [vmem:[#allocation11_spill] sm:$0xff] %v6250_v21  ;;  %4034 = vmatprep.mubr.bf16.mxu0 %v6747_v25  ;;  %v6256_v41 = vadd.f32 %v2366_v39, %v2010_v42  ;;  %v2011_v63 = vadd.f32 %v1936_v55, %v6797_v7  ;;  %3600 = vmatprep.mubr.bf16.mxu1 %v6747_v25  ;;  %v5192_v21 = vld [vmem:[%s5313_s20 + $0x40] sm:$0xff]   ;;  %v6800_v7 = vld [vmem:[#allocation16_spill] sm:$0xff] }
 0x207   : > { %v2372_v30 = vpop.f32.mrf.mxu0  ;;  %v1938_v3 = vpop.f32.mrf.mxu1 }
 0x208   : > { %6796 = vst [vmem:[#allocation12_spill] sm:$0xff] %v6256_v41  ;;  %v6260_v49 = vadd.f32 %v2370_v1, %v2011_v63  ;;  %v2012_v24 = vadd.f32 %v1938_v3, %v6798_v52 }
 0x209   : > { %v2374_v37 = vpop.f32.mrf.mxu0  ;;  %v1940_v16 = vpop.f32.mrf.mxu1 }
 0x20a   : > { %v6265_v4 = vadd.f32 %v2372_v30, %v2012_v24  ;;  %v2013_v59 = vadd.f32 %v1940_v16, %v6799_v47  ;;  %v5195_v47 = vld [vmem:[%s5343_s26 + $0x48] sm:$0xff]  }
 0x20b   : > { %v2376_v42 = vpop.f32.mrf.mxu0  ;;  %v1942_v39 = vpop.f32.mrf.mxu1 }
 0x20c   : > { %v6268_v55 = vadd.f32 %v2374_v37, %v2013_v59  ;;  %v2014_v41 = vadd.f32 %v1942_v39, %v6800_v7  ;;  %v5194_v39 = vld [vmem:[%s5313_s20 + $0x48] sm:$0xff]  }
 0x20d   : > { %v2380_v1 = vpop.f32.mrf.mxu0  ;;  %4977 = vmatmul.mubr.msk.bf16.gmra.mxu0 %vm563_vm2, %v5193_v43  ;;  %v1946_v63 = vpop.f32.mrf.mxu1  ;;  %4943 = vmatmul.mubr.msk.bf16.gmra.mxu1 %vm563_vm2, %v5192_v21 }
 0x20e   : > { %4044 = vmatprep.mubr.bf16.mxu0 %v6747_v25  ;;  %v6274_v30 = vadd.f32 %v2376_v42, %v2014_v41  ;;  %v2015_v3 = vadd.f32 %v1946_v63, %v5990_v9  ;;  %3610 = vmatprep.mubr.bf16.mxu1 %v6747_v25 }
 0x20f   : > { %v2382_v52 = vpop.f32.mrf.mxu0  ;;  %v1948_v59 = vpop.f32.mrf.mxu1 }
 0x210   : > { %v6278_v24 = vadd.f32 %v2380_v1, %v2015_v3  ;;  %v2016_v37 = vadd.f32 %v1948_v59, %v5995_v51 }
 0x211   : > { %v2384_v16 = vpop.f32.mrf.mxu0  ;;  %v1950_v43 = vpop.f32.mrf.mxu1 }
 0x212   : > { %v6283_v7 = vadd.f32 %v2382_v52, %v2016_v37  ;;  %v2017_v21 = vadd.f32 %v1950_v43, %v5998_v6  ;;  %v5197_v43 = vld [vmem:[%s5343_s26 + $0x50] sm:$0xff]  }
 0x213   : > { %v2386_v41 = vpop.f32.mrf.mxu0  ;;  %v1952_v42 = vpop.f32.mrf.mxu1 }
 0x214   : > { %v6286_v9 = vadd.f32 %v2384_v16, %v2017_v21  ;;  %v2018_v63 = vadd.f32 %v1952_v42, %v6004_v57  ;;  %v5196_v21 = vld [vmem:[%s5313_s20 + $0x50] sm:$0xff]  }
 0x215   : > { %v3098_v1 = vpop.f32.mrf.mxu0  ;;  %4978 = vmatmul.mubr.msk.bf16.gmra.mxu0 %vm563_vm2, %v5195_v47  ;;  %v2664_v51 = vpop.f32.mrf.mxu1  ;;  %4944 = vmatmul.mubr.msk.bf16.gmra.mxu1 %vm563_vm2, %v5194_v39 }
 0x216   : > { %4054 = vmatprep.mubr.bf16.mxu0 %v6747_v25  ;;  %v6292_v3 = vadd.f32 %v2386_v41, %v2018_v63  ;;  %v2823_v6 = vadd.f32 %v2664_v51, %v6008_v34  ;;  %3620 = vmatprep.mubr.bf16.mxu1 %v6747_v25 }
 0x217   : > { %v3100_v52 = vpop.f32.mrf.mxu0  ;;  %v2666_v59 = vpop.f32.mrf.mxu1 }
 0x218   : > { %v6296_v37 = vadd.f32 %v3098_v1, %v2823_v6  ;;  %v2824_v57 = vadd.f32 %v2666_v59, %v6013_v62 }
 0x219   : > { %v3102_v16 = vpop.f32.mrf.mxu0  ;;  %v2668_v47 = vpop.f32.mrf.mxu1 }
 0x21a   : > { %v6301_v42 = vadd.f32 %v3100_v52, %v2824_v57  ;;  %v2825_v39 = vadd.f32 %v2668_v47, %v6016_v13  ;;  %v5199_v47 = vld [vmem:[%s5343_s26 + $0x58] sm:$0xff]  }
 0x21b   : > { %v3104_v41 = vpop.f32.mrf.mxu0  ;;  %v2670_v63 = vpop.f32.mrf.mxu1 }
 0x21c   : > { %v6304_v34 = vadd.f32 %v3102_v16, %v2825_v39  ;;  %v2826_v51 = vadd.f32 %v2670_v63, %v6022_v11  ;;  %v5198_v39 = vld [vmem:[%s5313_s20 + $0x58] sm:$0xff]  }
 0x21d   : > { %v3108_v1 = vpop.f32.mrf.mxu0  ;;  %4979 = vmatmul.mubr.msk.bf16.gmra.mxu0 %vm563_vm2, %v5197_v43  ;;  %v2674_v62 = vpop.f32.mrf.mxu1  ;;  %4945 = vmatmul.mubr.msk.bf16.gmra.mxu1 %vm563_vm2, %v5196_v21 }
 0x21e   : > { %4064 = vmatprep.mubr.bf16.mxu0 %v6747_v25  ;;  %v6310_v6 = vadd.f32 %v3104_v41, %v2826_v51  ;;  %v2827_v13 = vadd.f32 %v2674_v62, %v6026_v5  ;;  %3630 = vmatprep.mubr.bf16.mxu1 %v6747_v25 }
 0x21f   : > { %v3110_v52 = vpop.f32.mrf.mxu0  ;;  %v2676_v59 = vpop.f32.mrf.mxu1 }
 0x220   : > { %v6314_v57 = vadd.f32 %v3108_v1, %v2827_v13  ;;  %v2828_v11 = vadd.f32 %v2676_v59, %v6031_v45 }
 0x221   : > { %v3112_v16 = vpop.f32.mrf.mxu0  ;;  %v2678_v43 = vpop.f32.mrf.mxu1 }
 0x222   : > { %v6319_v63 = vadd.f32 %v3110_v52, %v2828_v11  ;;  %v2829_v21 = vadd.f32 %v2678_v43, %v6034_v15  ;;  %v5201_v43 = vld [vmem:[%s5343_s26 + $0x60] sm:$0xff]  }
 0x223   : > { %v3114_v41 = vpop.f32.mrf.mxu0  ;;  %v2680_v51 = vpop.f32.mrf.mxu1 }
 0x224   : > { %v6322_v5 = vadd.f32 %v3112_v16, %v2829_v21  ;;  %v2830_v62 = vadd.f32 %v2680_v51, %v6040_v20  ;;  %v5200_v21 = vld [vmem:[%s5313_s20 + $0x60] sm:$0xff]  }
 0x225   : > { %v3118_v1 = vpop.f32.mrf.mxu0  ;;  %4980 = vmatmul.mubr.msk.bf16.gmra.mxu0 %vm563_vm2, %v5199_v47  ;;  %v2684_v45 = vpop.f32.mrf.mxu1  ;;  %4946 = vmatmul.mubr.msk.bf16.gmra.mxu1 %vm563_vm2, %v5198_v39 }
 0x226   : > { %4074 = vmatprep.mubr.bf16.mxu0 %v6747_v25  ;;  %v6328_v13 = vadd.f32 %v3114_v41, %v2830_v62  ;;  %v2831_v15 = vadd.f32 %v2684_v45, %v6044_v10  ;;  %3640 = vmatprep.mubr.bf16.mxu1 %v6747_v25 }
 0x227   : > { %v3120_v52 = vpop.f32.mrf.mxu0  ;;  %v2686_v59 = vpop.f32.mrf.mxu1 }
 0x228   : > { %v6332_v11 = vadd.f32 %v3118_v1, %v2831_v15  ;;  %v2832_v20 = vadd.f32 %v2686_v59, %v6049_v26 }
 0x229   : > { %v3122_v16 = vpop.f32.mrf.mxu0  ;;  %v2688_v47 = vpop.f32.mrf.mxu1 }
 0x22a   : > { %v6337_v51 = vadd.f32 %v3120_v52, %v2832_v20  ;;  %v2833_v39 = vadd.f32 %v2688_v47, %v6052_v33  ;;  %v5203_v47 = vld [vmem:[%s5343_s26 + $0x68] sm:$0xff]  }
 0x22b   : > { %v3124_v41 = vpop.f32.mrf.mxu0  ;;  %v2690_v62 = vpop.f32.mrf.mxu1 }
 0x22c   : > { %v6340_v10 = vadd.f32 %v3122_v16, %v2833_v39  ;;  %v2834_v45 = vadd.f32 %v2690_v62, %v6058_v36  ;;  %v5202_v39 = vld [vmem:[%s5313_s20 + $0x68] sm:$0xff]  }
 0x22d   : > { %v3128_v1 = vpop.f32.mrf.mxu0  ;;  %4981 = vmatmul.mubr.msk.bf16.gmra.mxu0 %vm563_vm2, %v5201_v43  ;;  %v2694_v26 = vpop.f32.mrf.mxu1  ;;  %4947 = vmatmul.mubr.msk.bf16.gmra.mxu1 %vm563_vm2, %v5200_v21 }
 0x22e   : > { %4084 = vmatprep.mubr.bf16.mxu0 %v6747_v25  ;;  %v6346_v15 = vadd.f32 %v3124_v41, %v2834_v45  ;;  %v2835_v33 = vadd.f32 %v2694_v26, %v6062_v28  ;;  %3650 = vmatprep.mubr.bf16.mxu1 %v6747_v25 }
 0x22f   : > { %v3130_v52 = vpop.f32.mrf.mxu0  ;;  %v2696_v59 = vpop.f32.mrf.mxu1 }
 0x230   : > { %v6350_v20 = vadd.f32 %v3128_v1, %v2835_v33  ;;  %v2836_v36 = vadd.f32 %v2696_v59, %v6067_v31 }
 0x231   : > { %v3132_v16 = vpop.f32.mrf.mxu0  ;;  %v2698_v43 = vpop.f32.mrf.mxu1 }
 0x232   : > { %v6355_v62 = vadd.f32 %v3130_v52, %v2836_v36  ;;  %v2837_v21 = vadd.f32 %v2698_v43, %v6070_v44  ;;  %v5205_v43 = vld [vmem:[%s5343_s26 + $0x70] sm:$0xff]  }
 0x233   : > { %v3134_v41 = vpop.f32.mrf.mxu0  ;;  %v2700_v45 = vpop.f32.mrf.mxu1 }
 0x234   : > { %v6358_v28 = vadd.f32 %v3132_v16, %v2837_v21  ;;  %v2838_v26 = vadd.f32 %v2700_v45, %v6076_v46  ;;  %v5204_v21 = vld [vmem:[%s5313_s20 + $0x70] sm:$0xff]  }
 0x235   : > { %v3138_v1 = vpop.f32.mrf.mxu0  ;;  %4982 = vmatmul.mubr.msk.bf16.gmra.mxu0 %vm563_vm2, %v5203_v47  ;;  %v2704_v31 = vpop.f32.mrf.mxu1  ;;  %4948 = vmatmul.mubr.msk.bf16.gmra.mxu1 %vm563_vm2, %v5202_v39 }
 0x236   : > { %4094 = vmatprep.mubr.bf16.mxu0 %v6747_v25  ;;  %v6364_v33 = vadd.f32 %v3134_v41, %v2838_v26  ;;  %v2839_v44 = vadd.f32 %v2704_v31, %v6080_v40  ;;  %3660 = vmatprep.mubr.bf16.mxu1 %v6747_v25 }
 0x237   : > { %v3140_v52 = vpop.f32.mrf.mxu0  ;;  %v2706_v59 = vpop.f32.mrf.mxu1 }
 0x238   : > { %v6368_v36 = vadd.f32 %v3138_v1, %v2839_v44  ;;  %v2840_v46 = vadd.f32 %v2706_v59, %v6085_v23 }
 0x239   : > { %v3142_v16 = vpop.f32.mrf.mxu0  ;;  %v2708_v47 = vpop.f32.mrf.mxu1 }
 0x23a   : > { %v6373_v45 = vadd.f32 %v3140_v52, %v2840_v46  ;;  %v2841_v39 = vadd.f32 %v2708_v47, %v6088_v54  ;;  %v5207_v47 = vld [vmem:[%s5343_s26 + $0x78] sm:$0xff]  }
 0x23b   : > { %v3144_v41 = vpop.f32.mrf.mxu0  ;;  %v2710_v26 = vpop.f32.mrf.mxu1 }
 0x23c   : > { %v6376_v40 = vadd.f32 %v3142_v16, %v2841_v39  ;;  %v2842_v31 = vadd.f32 %v2710_v26, %v6094_v56  ;;  %v5206_v39 = vld [vmem:[%s5313_s20 + $0x78] sm:$0xff]  }
 0x23d   : > { %v3148_v1 = vpop.f32.mrf.mxu0  ;;  %4983 = vmatmul.mubr.msk.bf16.gmra.mxu0 %vm563_vm2, %v5205_v43  ;;  %v2714_v23 = vpop.f32.mrf.mxu1  ;;  %4949 = vmatmul.mubr.msk.bf16.gmra.mxu1 %vm563_vm2, %v5204_v21 }
 0x23e   : > { %4104 = vmatprep.mubr.bf16.mxu0 %v6747_v25  ;;  %v6382_v44 = vadd.f32 %v3144_v41, %v2842_v31  ;;  %v2843_v54 = vadd.f32 %v2714_v23, %v6098_v50  ;;  %3670 = vmatprep.mubr.bf16.mxu1 %v6747_v25 }
 0x23f   : > { %v3150_v52 = vpop.f32.mrf.mxu0  ;;  %v2716_v59 = vpop.f32.mrf.mxu1 }
 0x240   : > { %v6386_v46 = vadd.f32 %v3148_v1, %v2843_v54  ;;  %v2844_v56 = vadd.f32 %v2716_v59, %v6103_v17 }
 0x241   : > { %v3152_v16 = vpop.f32.mrf.mxu0  ;;  %v2718_v43 = vpop.f32.mrf.mxu1 }
 0x242   : > { %v6391_v26 = vadd.f32 %v3150_v52, %v2844_v56  ;;  %v2845_v21 = vadd.f32 %v2718_v43, %v6106_v0  ;;  %v5209_v43 = vld [vmem:[%s5343_s26 + $0x80] sm:$0xff]   ;;  %s5020_s26 = sshll.u32 %s6856_s28, 8 }
 0x243   : > { %v3154_v41 = vpop.f32.mrf.mxu0  ;;  %v2720_v31 = vpop.f32.mrf.mxu1  ;;  %s6546_s9 = scalar_lea.vmem %s6711_s8, %s5020_s26 }
 0x244   : > { %v6394_v50 = vadd.f32 %v3152_v16, %v2845_v21  ;;  %v2846_v23 = vadd.f32 %v2720_v31, %v6112_v2  ;;  %v5208_v21 = vld [vmem:[%s5313_s20 + $0x80] sm:$0xff]  }
 0x245   : > { %v3158_v1 = vpop.f32.mrf.mxu0  ;;  %4984 = vmatmul.mubr.msk.bf16.gmra.mxu0 %vm563_vm2, %v5207_v47  ;;  %v2724_v17 = vpop.f32.mrf.mxu1  ;;  %4950 = vmatmul.mubr.msk.bf16.gmra.mxu1 %vm563_vm2, %v5206_v39 }
 0x246   : > { %4114 = vmatprep.mubr.bf16.mxu0 %v6747_v25  ;;  %v6400_v54 = vadd.f32 %v3154_v41, %v2846_v23  ;;  %v2847_v0 = vadd.f32 %v2724_v17, %v6116_v60  ;;  %3680 = vmatprep.mubr.bf16.mxu1 %v6747_v25 }
 0x247   : > { %v3160_v52 = vpop.f32.mrf.mxu0  ;;  %v2726_v59 = vpop.f32.mrf.mxu1 }
 0x248   : > { %6801 = vst [vmem:[#allocation13_spill] sm:$0xff] %v6400_v54  ;;  %v6404_v56 = vadd.f32 %v3158_v1, %v2847_v0  ;;  %v2848_v2 = vadd.f32 %v2726_v59, %v6121_v22 }
 0x249   : > { %v3162_v16 = vpop.f32.mrf.mxu0  ;;  %v2728_v47 = vpop.f32.mrf.mxu1 }
 0x24a   : > { %v6409_v31 = vadd.f32 %v3160_v52, %v2848_v2  ;;  %v2849_v39 = vadd.f32 %v2728_v47, %v6124_v12 }
 0x24b   : > { %v3164_v41 = vpop.f32.mrf.mxu0  ;;  %v2730_v23 = vpop.f32.mrf.mxu1 }
 0x24c   : > { %v6412_v54 = vadd.f32 %v3162_v16, %v2849_v39  ;;  %v2850_v60 = vadd.f32 %v2730_v23, %v6130_v14 }
 0x24d   : > { %v3168_v25 = vpop.f32.mrf.mxu0  ;;  %4985 = vmatmul.mubr.msk.bf16.gmra.mxu0 %vm563_vm2, %v5209_v43  ;;  %v2734_v1 = vpop.f32.mrf.mxu1  ;;  %4951 = vmatmul.mubr.msk.bf16.gmra.mxu1 %vm563_vm2, %v5208_v21 }
 0x24e   : > { %v6417_v22 = vadd.f32 %v3164_v41, %v2850_v60  ;;  %v2851_v17 = vadd.f32 %v2734_v1, %v6134_v8 }
 0x24f   : > { %v3170_v0 = vpop.f32.mrf.mxu0  ;;  %v2736_v52 = vpop.f32.mrf.mxu1 }
 0x250   : > { %v6420_v59 = vadd.f32 %v3168_v25, %v2851_v17  ;;  %v2852_v12 = vadd.f32 %v2736_v52, %v6139_v38 }
 0x251   : > { %v3172_v2 = vpop.f32.mrf.mxu0  ;;  %v2738_v16 = vpop.f32.mrf.mxu1 }
 0x252   : > { %v6423_v47 = vadd.f32 %v3170_v0, %v2852_v12  ;;  %v2853_v14 = vadd.f32 %v2738_v16, %v6142_v27 }
 0x253   : > { %v3174_v43 = vpop.f32.mrf.mxu0  ;;  %v2740_v39 = vpop.f32.mrf.mxu1 }
 0x254   : > { %v6426_v23 = vadd.f32 %v3172_v2, %v2853_v14  ;;  %v2854_v21 = vadd.f32 %v2740_v39, %v6148_v32 }
 0x255   : > { %v3178_v41 = vpop.f32.mrf.mxu0  ;;  %v2744_v8 = vpop.f32.mrf.mxu1 }
 0x256   : > { %v6429_v60 = vadd.f32 %v3174_v43, %v2854_v21  ;;  %v2855_v25 = vadd.f32 %v2744_v8, %v6152_v18 }
 0x257   : > { %v3180_v1 = vpop.f32.mrf.mxu0  ;;  %v2746_v38 = vpop.f32.mrf.mxu1 }
 0x258   : > { %v6432_v17 = vadd.f32 %v3178_v41, %v2855_v25  ;;  %v2856_v0 = vadd.f32 %v2746_v38, %v6157_v48 }
 0x259   : > { %v3182_v52 = vpop.f32.mrf.mxu0  ;;  %v2748_v27 = vpop.f32.mrf.mxu1 }
 0x25a   : > { %v6435_v12 = vadd.f32 %v3180_v1, %v2856_v0  ;;  %v2857_v2 = vadd.f32 %v2748_v27, %v6160_v53 }
 0x25b   : > { %v3184_v16 = vpop.f32.mrf.mxu0  ;;  %v2750_v32 = vpop.f32.mrf.mxu1 }
 0x25c   : > { %v6438_v14 = vadd.f32 %v3182_v52, %v2857_v2  ;;  %v2858_v43 = vadd.f32 %v2750_v32, %v6166_v61 }
 0x25d   : > { %v3188_v39 = vpop.f32.mrf.mxu0  ;;  %v2754_v18 = vpop.f32.mrf.mxu1 }
 0x25e   : > { %v6441_v21 = vadd.f32 %v3184_v16, %v2858_v43  ;;  %v2859_v41 = vadd.f32 %v2754_v18, %v6170_v29 }
 0x25f   : > { %v3190_v8 = vpop.f32.mrf.mxu0  ;;  %v2756_v48 = vpop.f32.mrf.mxu1 }
 0x260   : > { %v6444_v25 = vadd.f32 %v3188_v39, %v2859_v41  ;;  %v2860_v1 = vadd.f32 %v2756_v48, %v6175_v58  ;;  %v6805_v39 = vld [vmem:[#allocation17_spill] sm:$0xff] }
 0x261   : > { %v3192_v38 = vpop.f32.mrf.mxu0  ;;  %v2758_v53 = vpop.f32.mrf.mxu1 }
 0x262   : > { %v6447_v0 = vadd.f32 %v3190_v8, %v2860_v1  ;;  %v2861_v52 = vadd.f32 %v2758_v53, %v6178_v35  ;;  %v6807_v8 = vld [vmem:[#allocation18_spill] sm:$0xff] }
 0x263   : > { %v3194_v27 = vpop.f32.mrf.mxu0  ;;  %v2760_v61 = vpop.f32.mrf.mxu1 }
 0x264   : > { %6802 = vst [vmem:[#allocation14_spill] sm:$0xff] %v6447_v0  ;;  %v6450_v2 = vadd.f32 %v3192_v38, %v2861_v52  ;;  %v2862_v16 = vadd.f32 %v2760_v61, %v6184_v19  ;;  %v6809_v38 = vld [vmem:[#allocation19_spill] sm:$0xff] }
 0x265   : > { %v3198_v32 = vpop.f32.mrf.mxu0  ;;  %v2764_v29 = vpop.f32.mrf.mxu1 }
 0x266   : > { %6803 = vst [vmem:[#allocation15_spill] sm:$0xff] %v6450_v2  ;;  %v6453_v43 = vadd.f32 %v3194_v27, %v2862_v16  ;;  %v2863_v18 = vadd.f32 %v2764_v29, %v6805_v39  ;;  %v6811_v27 = vld [vmem:[#allocation20_spill] sm:$0xff] }
 0x267   : > { %v3200_v41 = vpop.f32.mrf.mxu0  ;;  %v2766_v58 = vpop.f32.mrf.mxu1 }
 0x268   : > { %6804 = vst [vmem:[#allocation16_spill] sm:$0xff] %v6453_v43  ;;  %v6456_v48 = vadd.f32 %v3198_v32, %v2863_v18  ;;  %v2864_v1 = vadd.f32 %v2766_v58, %v6807_v8  ;;  %v6813_v32 = vld [vmem:[#allocation21_spill] sm:$0xff] }
 0x269   : > { %v3202_v0 = vpop.f32.mrf.mxu0  ;;  %v2768_v35 = vpop.f32.mrf.mxu1 }
 0x26a   : > { %6806 = vst [vmem:[#allocation17_spill] sm:$0xff] %v6456_v48  ;;  %v6459_v53 = vadd.f32 %v3200_v41, %v2864_v1  ;;  %v2865_v52 = vadd.f32 %v2768_v35, %v6809_v38  ;;  %v6815_v41 = vld [vmem:[#allocation2_spill] sm:$0xff] }
 0x26b   : > { %v3204_v2 = vpop.f32.mrf.mxu0  ;;  %v2770_v19 = vpop.f32.mrf.mxu1 }
 0x26c   : > { %6808 = vst [vmem:[#allocation18_spill] sm:$0xff] %v6459_v53  ;;  %v6462_v61 = vadd.f32 %v3202_v0, %v2865_v52  ;;  %v2866_v16 = vadd.f32 %v2770_v19, %v6811_v27  ;;  %v6817_v0 = vld [vmem:[#allocation3_spill] sm:$0xff] }
 0x26d   : > { %v3208_v43 = vpop.f32.mrf.mxu0  ;;  %v2774_v29 = vpop.f32.mrf.mxu1 }
 0x26e   : > { %6810 = vst [vmem:[#allocation19_spill] sm:$0xff] %v6462_v61  ;;  %v6465_v39 = vadd.f32 %v3204_v2, %v2866_v16  ;;  %v2867_v18 = vadd.f32 %v2774_v29, %v6813_v32  ;;  %v6819_v2 = vld [vmem:[#allocation4_spill] sm:$0xff] }
 0x26f   : > { %v3210_v48 = vpop.f32.mrf.mxu0  ;;  %v2776_v58 = vpop.f32.mrf.mxu1 }
 0x270   : > { %6812 = vst [vmem:[#allocation20_spill] sm:$0xff] %v6465_v39  ;;  %v6468_v8 = vadd.f32 %v3208_v43, %v2867_v18  ;;  %v2868_v1 = vadd.f32 %v2776_v58, %v6815_v41  ;;  %v6821_v43 = vld [vmem:[#allocation5_spill] sm:$0xff] }
 0x271   : > { %v3212_v53 = vpop.f32.mrf.mxu0  ;;  %v2778_v35 = vpop.f32.mrf.mxu1 }
 0x272   : > { %6814 = vst [vmem:[#allocation21_spill] sm:$0xff] %v6468_v8  ;;  %v6471_v38 = vadd.f32 %v3210_v48, %v2868_v1  ;;  %v2869_v52 = vadd.f32 %v2778_v35, %v6817_v0  ;;  %v6823_v48 = vld [vmem:[#allocation6_spill] sm:$0xff] }
 0x273   : > { %v3214_v61 = vpop.f32.mrf.mxu0  ;;  %v2780_v19 = vpop.f32.mrf.mxu1 }
 0x274   : > { %6816 = vst [vmem:[#allocation2_spill] sm:$0xff] %v6471_v38  ;;  %v6474_v27 = vadd.f32 %v3212_v53, %v2869_v52  ;;  %v2870_v16 = vadd.f32 %v2780_v19, %v6819_v2  ;;  %v6825_v53 = vld [vmem:[#allocation7_spill] sm:$0xff] }
 0x275   : > { %v3218_v39 = vpop.f32.mrf.mxu0  ;;  %v2784_v29 = vpop.f32.mrf.mxu1 }
 0x276   : > { %6818 = vst [vmem:[#allocation3_spill] sm:$0xff] %v6474_v27  ;;  %v6477_v32 = vadd.f32 %v3214_v61, %v2870_v16  ;;  %v2871_v18 = vadd.f32 %v2784_v29, %v6821_v43  ;;  %v6827_v61 = vld [vmem:[#allocation8_spill] sm:$0xff] }
 0x277   : > { %v3220_v8 = vpop.f32.mrf.mxu0  ;;  %v2786_v58 = vpop.f32.mrf.mxu1 }
 0x278   : > { %6820 = vst [vmem:[#allocation4_spill] sm:$0xff] %v6477_v32  ;;  %v6480_v41 = vadd.f32 %v3218_v39, %v2871_v18  ;;  %v2872_v1 = vadd.f32 %v2786_v58, %v6823_v48  ;;  %v6829_v39 = vld [vmem:[#allocation9_spill] sm:$0xff] }
 0x279   : > { %v3222_v38 = vpop.f32.mrf.mxu0  ;;  %v2788_v35 = vpop.f32.mrf.mxu1 }
 0x27a   : > { %6822 = vst [vmem:[#allocation5_spill] sm:$0xff] %v6480_v41  ;;  %v6483_v0 = vadd.f32 %v3220_v8, %v2872_v1  ;;  %v2873_v52 = vadd.f32 %v2788_v35, %v6825_v53  ;;  %v6830_v8 = vld [vmem:[#allocation10_spill] sm:$0xff] }
 0x27b   : > { %v3224_v27 = vpop.f32.mrf.mxu0  ;;  %v2790_v19 = vpop.f32.mrf.mxu1 }
 0x27c   : > { %6824 = vst [vmem:[#allocation6_spill] sm:$0xff] %v6483_v0  ;;  %v6486_v2 = vadd.f32 %v3222_v38, %v2873_v52  ;;  %v2874_v16 = vadd.f32 %v2790_v19, %v6827_v61  ;;  %v6831_v38 = vld [vmem:[#allocation11_spill] sm:$0xff] }
 0x27d   : > { %v3228_v32 = vpop.f32.mrf.mxu0  ;;  %v2794_v29 = vpop.f32.mrf.mxu1 }
 0x27e   : > { %6826 = vst [vmem:[#allocation7_spill] sm:$0xff] %v6486_v2  ;;  %v6489_v43 = vadd.f32 %v3224_v27, %v2874_v16  ;;  %v2875_v18 = vadd.f32 %v2794_v29, %v6829_v39  ;;  %v6833_v27 = vld [vmem:[#allocation12_spill] sm:$0xff] }
 0x27f   : > { %v3230_v41 = vpop.f32.mrf.mxu0  ;;  %v2796_v58 = vpop.f32.mrf.mxu1 }
 0x280   : > { %6828 = vst [vmem:[#allocation8_spill] sm:$0xff] %v6489_v43  ;;  %v6492_v48 = vadd.f32 %v3228_v32, %v2875_v18  ;;  %v2876_v1 = vadd.f32 %v2796_v58, %v6830_v8 }
 0x281   : > { %v3232_v0 = vpop.f32.mrf.mxu0  ;;  %v2798_v35 = vpop.f32.mrf.mxu1 }
 0x282   : > { %v6495_v53 = vadd.f32 %v3230_v41, %v2876_v1  ;;  %v2877_v52 = vadd.f32 %v2798_v35, %v6831_v38 }
 0x283   : > { %v3234_v2 = vpop.f32.mrf.mxu0  ;;  %v2800_v19 = vpop.f32.mrf.mxu1 }
 0x284   : > { %v6498_v61 = vadd.f32 %v3232_v0, %v2877_v52  ;;  %v2878_v16 = vadd.f32 %v2800_v19, %v6833_v27  ;;  %v4191_v19 = vlaneseq }
 0x285   : > { %v3238_v43 = vpop.f32.mrf.mxu0  ;;  %v2804_v29 = vpop.f32.mrf.mxu1 }
 0x286   : > { %6832 = vst [vmem:[#allocation9_spill] sm:$0xff] %v6498_v61  ;;  %v6501_v39 = vadd.f32 %v3234_v2, %v2878_v16  ;;  %v2879_v32 = vadd.f32 %v2804_v29, %v6260_v49 }
 0x287   : > { %v3240_v18 = vpop.f32.mrf.mxu0  ;;  %v2806_v58 = vpop.f32.mrf.mxu1 }
 0x288   : > { %v6504_v8 = vadd.f32 %v3238_v43, %v2879_v32  ;;  %v2880_v41 = vadd.f32 %v2806_v58, %v6265_v4  ;;  %v4192_v32 = vshrl.u32 %v4191_v19, 7 }
 0x289   : > { %v3242_v1 = vpop.f32.mrf.mxu0  ;;  %v2808_v35 = vpop.f32.mrf.mxu1 }
 0x28a   : > { %v6507_v38 = vadd.f32 %v3240_v18, %v2880_v41  ;;  %v2881_v0 = vadd.f32 %v2808_v35, %v6268_v55 }
 0x28b   : > { %v3244_v52 = vpop.f32.mrf.mxu0  ;;  %v2810_v27 = vpop.f32.mrf.mxu1 }
 0x28c   : > { %6834 = vst [vmem:[#allocation10_spill] sm:$0xff] %v6507_v38  ;;  %v6510_v61 = vadd.f32 %v3242_v1, %v2881_v0  ;;  %v2882_v2 = vadd.f32 %v2810_v27, %v6274_v30  ;;  %v4193_v0 = vsub.s32 0, %v4192_v32 }
 0x28d   : > { %v3248_v49 = vpop.f32.mrf.mxu0  ;;  %v2814_v16 = vpop.f32.mrf.mxu1 }
 0x28e   : > { %v6513_v29 = vadd.f32 %v3244_v52, %v2882_v2  ;;  %v2883_v43 = vadd.f32 %v2814_v16, %v6278_v24  ;;  %v4189_v24 = vld [vmem:[%s6710_s7] sm:$0x3] }
 0x28f   : > { %v3250_v4 = vpop.f32.mrf.mxu0  ;;  %v2816_v58 = vpop.f32.mrf.mxu1 }
 0x290   : > { %v6516_v18 = vadd.f32 %v3248_v49, %v2883_v43  ;;  %v2884_v55 = vadd.f32 %v2816_v58, %v6283_v7  ;;  %v4197_v49 = vsub.s32 1, %v4192_v32 }
 0x291   : > { %v3252_v41 = vpop.f32.mrf.mxu0  ;;  %v2818_v35 = vpop.f32.mrf.mxu1 }
 0x292   : > { %v6519_v38 = vadd.f32 %v3250_v4, %v2884_v55  ;;  %v2885_v1 = vadd.f32 %v2818_v35, %v6286_v9  ;;  %v6531_v9 = vrot.slane %v4189_v24, %v4193_v0 }
 0x293   : > { %v3254_v30 = vpop.f32.mrf.mxu0  ;;  %v2820_v27 = vpop.f32.mrf.mxu1 }
 0x294   : > { %6835 = vst [vmem:[#allocation11_spill] sm:$0xff] %v6519_v38  ;;  %v6525_v52 = vadd.f32 %v3252_v41, %v2885_v1  ;;  %v2886_v19 = vadd.f32 %v2820_v27, %v6292_v3  ;;  %v6534_v38 = vrot.slane %v4189_v24, %v4197_v49 }
 0x295   : > { %v3966_v2 = vpop.f32.mrf.mxu0  ;;  %v3532_v7 = vpop.f32.mrf.mxu1 }
 0x296   : > { %v6528_v16 = vadd.f32 %v3254_v30, %v2886_v19  ;;  %v3691_v43 = vadd.f32 %v3532_v7, %v6296_v37 }
 0x297   : > { %v3968_v4 = vpop.f32.mrf.mxu0  ;;  %v3534_v58 = vpop.f32.mrf.mxu1 }
 0x298   : > { %v4125_v55 = vadd.f32 %v3966_v2, %v3691_v43  ;;  %v3692_v35 = vadd.f32 %v3534_v58, %v6301_v42 }
 0x299   : > { %v3970_v41 = vpop.f32.mrf.mxu0  ;;  %v3536_v1 = vpop.f32.mrf.mxu1 }
 0x29a   : > { %v4201_v3 = vadd.f32 %v6531_v9, %v4125_v55  ;;  %v4126_v32 = vadd.f32 %v3968_v4, %v3692_v35  ;;  %v3693_v27 = vadd.f32 %v3536_v1, %v6304_v34 }
 0x29b   : > { %v3972_v30 = vpop.f32.mrf.mxu0  ;;  %v3538_v19 = vpop.f32.mrf.mxu1 }
 0x29c   : > { %v4202_v37 = vadd.f32 %v6534_v38, %v4126_v32  ;;  %v4127_v0 = vadd.f32 %v3970_v41, %v3693_v27  ;;  %v3694_v7 = vadd.f32 %v3538_v19, %v6310_v6  ;;  %v4265_v43 = vmax.f32 %v4201_v3, 0.0 }
 0x29d   : > { %v3976_v2 = vpop.f32.mrf.mxu0  ;;  %v3542_v42 = vpop.f32.mrf.mxu1 }
 0x29e   : > { %v4266_v24 = vmax.f32 %v4202_v37, 0.0  ;;  %v4203_v49 = vadd.f32 %v6531_v9, %v4127_v0  ;;  %v4128_v58 = vadd.f32 %v3972_v30, %v3694_v7  ;;  %v3695_v55 = vadd.f32 %v3542_v42, %v6314_v57 }
 0x29f   : > { %v3978_v4 = vpop.f32.mrf.mxu0  ;;  %v3544_v34 = vpop.f32.mrf.mxu1 }
 0x2a0   : > { %v5021_v35 = vpack.c.bf16 %v4266_v24, %v4265_v43  ;;  %v4204_v6 = vadd.f32 %v6534_v38, %v4128_v58  ;;  %v4129_v41 = vadd.f32 %v3976_v2, %v3695_v55  ;;  %v3696_v3 = vadd.f32 %v3544_v34, %v6319_v63 }
 0x2a1   : > { %v3980_v1 = vpop.f32.mrf.mxu0  ;;  %v3546_v32 = vpop.f32.mrf.mxu1  ;;  %v4267_v27 = vmax.f32 %v4203_v49, 0.0 }
 0x2a2   : > { %4521 = vst [vmem:[%s6546_s9] sm:$0xff] %v5021_v35  ;;  %v4268_v57 = vmax.f32 %v4204_v6, 0.0  ;;  %v3697_v30 = vadd.f32 %v3546_v32, %v6322_v5  ;;  %v4205_v37 = vadd.f32 %v6531_v9, %v4129_v41  ;;  %v4130_v0 = vadd.f32 %v3978_v4, %v3696_v3 }
 0x2a3   : > { %v3982_v19 = vpop.f32.mrf.mxu0  ;;  %v3548_v7 = vpop.f32.mrf.mxu1 }
 0x2a4   : > { %v5022_v42 = vpack.c.bf16 %v4268_v57, %v4267_v27  ;;  %v4131_v43 = vadd.f32 %v3980_v1, %v3697_v30  ;;  %v3698_v24 = vadd.f32 %v3548_v7, %v6328_v13  ;;  %v4206_v58 = vadd.f32 %v6534_v38, %v4130_v0 }
 0x2a5   : > { %v3986_v2 = vpop.f32.mrf.mxu0  ;;  %v3552_v63 = vpop.f32.mrf.mxu1  ;;  %v4269_v35 = vmax.f32 %v4205_v37, 0.0 }
 0x2a6   : > { %4522 = vst [vmem:[%s6546_s9 + $0x8] sm:$0xff] %v5022_v42  ;;  %v4207_v55 = vadd.f32 %v6531_v9, %v4131_v43  ;;  %v4132_v49 = vadd.f32 %v3982_v19, %v3698_v24  ;;  %v3699_v34 = vadd.f32 %v3552_v63, %v6332_v11  ;;  %v4270_v6 = vmax.f32 %v4206_v58, 0.0 }
 0x2a7   : > { %v3988_v5 = vpop.f32.mrf.mxu0  ;;  %v3554_v4 = vpop.f32.mrf.mxu1 }
 0x2a8   : > { %v4208_v41 = vadd.f32 %v6534_v38, %v4132_v49  ;;  %v4133_v1 = vadd.f32 %v3986_v2, %v3699_v34  ;;  %v3700_v13 = vadd.f32 %v3554_v4, %v6337_v51  ;;  %v5023_v32 = vpack.c.bf16 %v4270_v6, %v4269_v35 }
 0x2a9   : > { %v3990_v3 = vpop.f32.mrf.mxu0  ;;  %v4271_v27 = vmax.f32 %v4207_v55, 0.0  ;;  %v3556_v57 = vpop.f32.mrf.mxu1 }
 0x2aa   : > { %v4272_v30 = vmax.f32 %v4208_v41, 0.0  ;;  %v4209_v19 = vadd.f32 %v6531_v9, %v4133_v1  ;;  %v4134_v0 = vadd.f32 %v3988_v5, %v3700_v13  ;;  %v3701_v11 = vadd.f32 %v3556_v57, %v6340_v10  ;;  %4523 = vst [vmem:[%s6546_s9 + $0x10] sm:$0xff] %v5023_v32 }
 0x2ab   : > { %v3992_v7 = vpop.f32.mrf.mxu0  ;;  %v3558_v37 = vpop.f32.mrf.mxu1 }
 0x2ac   : > { %v5024_v42 = vpack.c.bf16 %v4272_v30, %v4271_v27  ;;  %v4210_v43 = vadd.f32 %v6534_v38, %v4134_v0  ;;  %v4135_v24 = vadd.f32 %v3990_v3, %v3701_v11  ;;  %v3702_v51 = vadd.f32 %v3558_v37, %v6346_v15 }
 0x2ad   : > { %v3996_v2 = vpop.f32.mrf.mxu0  ;;  %v3562_v58 = vpop.f32.mrf.mxu1  ;;  %v4273_v63 = vmax.f32 %v4209_v19, 0.0 }
 0x2ae   : > { %4524 = vst [vmem:[%s6546_s9 + $0x18] sm:$0xff] %v5024_v42  ;;  %v4274_v55 = vmax.f32 %v4210_v43, 0.0  ;;  %v3703_v49 = vadd.f32 %v3562_v58, %v6350_v20  ;;  %v4211_v10 = vadd.f32 %v6531_v9, %v4135_v24  ;;  %v4136_v5 = vadd.f32 %v3992_v7, %v3702_v51 }
 0x2af   : > { %v3998_v34 = vpop.f32.mrf.mxu0  ;;  %v3564_v35 = vpop.f32.mrf.mxu1 }
 0x2b0   : > { %v5025_v6 = vpack.c.bf16 %v4274_v55, %v4273_v63  ;;  %v4137_v4 = vadd.f32 %v3996_v2, %v3703_v49  ;;  %v3704_v41 = vadd.f32 %v3564_v35, %v6355_v62  ;;  %v4212_v13 = vadd.f32 %v6534_v38, %v4136_v5 }
 0x2b1   : > { %v4000_v1 = vpop.f32.mrf.mxu0  ;;  %v3566_v15 = vpop.f32.mrf.mxu1  ;;  %v4275_v57 = vmax.f32 %v4211_v10, 0.0 }
 0x2b2   : > { %4525 = vst [vmem:[%s6546_s9 + $0x20] sm:$0xff] %v5025_v6  ;;  %v4213_v3 = vadd.f32 %v6531_v9, %v4137_v4  ;;  %v4138_v32 = vadd.f32 %v3998_v34, %v3704_v41  ;;  %v3705_v27 = vadd.f32 %v3566_v15, %v6358_v28  ;;  %v4276_v30 = vmax.f32 %v4212_v13, 0.0 }
 0x2b3   : > { %v4002_v20 = vpop.f32.mrf.mxu0  ;;  %v3568_v19 = vpop.f32.mrf.mxu1 }
 0x2b4   : > { %v4214_v0 = vadd.f32 %v6534_v38, %v4138_v32  ;;  %v4139_v11 = vadd.f32 %v4000_v1, %v3705_v27  ;;  %v3706_v62 = vadd.f32 %v3568_v19, %v6364_v33  ;;  %v5026_v37 = vpack.c.bf16 %v4276_v30, %v4275_v57 }
 0x2b5   : > { %v4006_v7 = vpop.f32.mrf.mxu0  ;;  %v4277_v42 = vmax.f32 %v4213_v3, 0.0  ;;  %v3572_v43 = vpop.f32.mrf.mxu1 }
 0x2b6   : > { %v4278_v24 = vmax.f32 %v4214_v0, 0.0  ;;  %v4215_v2 = vadd.f32 %v6531_v9, %v4139_v11  ;;  %v4140_v51 = vadd.f32 %v4002_v20, %v3706_v62  ;;  %v3707_v28 = vadd.f32 %v3572_v43, %v6368_v36  ;;  %4526 = vst [vmem:[%s6546_s9 + $0x28] sm:$0xff] %v5026_v37 }
 0x2b7   : > { %v4008_v58 = vpop.f32.mrf.mxu0  ;;  %v3574_v63 = vpop.f32.mrf.mxu1 }
 0x2b8   : > { %v5027_v55 = vpack.c.bf16 %v4278_v24, %v4277_v42  ;;  %v4216_v49 = vadd.f32 %v6534_v38, %v4140_v51  ;;  %v4141_v34 = vadd.f32 %v4006_v7, %v3707_v28  ;;  %v3708_v33 = vadd.f32 %v3574_v63, %v6373_v45 }
 0x2b9   : > { %v4010_v10 = vpop.f32.mrf.mxu0  ;;  %v3576_v5 = vpop.f32.mrf.mxu1  ;;  %v4279_v35 = vmax.f32 %v4215_v2, 0.0 }
 0x2ba   : > { %4527 = vst [vmem:[%s6546_s9 + $0x30] sm:$0xff] %v5027_v55  ;;  %v4280_v6 = vmax.f32 %v4216_v49, 0.0  ;;  %v3709_v4 = vadd.f32 %v3576_v5, %v6376_v40  ;;  %v4217_v36 = vadd.f32 %v6531_v9, %v4141_v34  ;;  %v4142_v1 = vadd.f32 %v4008_v58, %v3708_v33 }
 0x2bb   : > { %v4012_v41 = vpop.f32.mrf.mxu0  ;;  %v3578_v13 = vpop.f32.mrf.mxu1 }
 0x2bc   : > { %v5028_v15 = vpack.c.bf16 %v4280_v6, %v4279_v35  ;;  %v4143_v3 = vadd.f32 %v4010_v10, %v3709_v4  ;;  %v3710_v32 = vadd.f32 %v3578_v13, %v6382_v44  ;;  %v4218_v20 = vadd.f32 %v6534_v38, %v4142_v1 }
 0x2bd   : > { %v4016_v27 = vpop.f32.mrf.mxu0  ;;  %v3582_v45 = vpop.f32.mrf.mxu1  ;;  %v4281_v0 = vmax.f32 %v4217_v36, 0.0 }
 0x2be   : > { %4528 = vst [vmem:[%s6546_s9 + $0x38] sm:$0xff] %v5028_v15  ;;  %v4219_v57 = vadd.f32 %v6531_v9, %v4143_v3  ;;  %v4144_v30 = vadd.f32 %v4012_v41, %v3710_v32  ;;  %v3711_v19 = vadd.f32 %v3582_v45, %v6386_v46  ;;  %v4282_v11 = vmax.f32 %v4218_v20, 0.0 }
 0x2bf   : > { %v4018_v40 = vpop.f32.mrf.mxu0  ;;  %v3584_v62 = vpop.f32.mrf.mxu1 }
 0x2c0   : > { %v4220_v7 = vadd.f32 %v6534_v38, %v4144_v30  ;;  %v4145_v37 = vadd.f32 %v4016_v27, %v3711_v19  ;;  %v3712_v44 = vadd.f32 %v3584_v62, %v6391_v26  ;;  %v5029_v43 = vpack.c.bf16 %v4282_v11, %v4281_v0  ;;  %v6836_v26 = vld [vmem:[#allocation13_spill] sm:$0xff] }
 0x2c1   : > { %v4020_v42 = vpop.f32.mrf.mxu0  ;;  %v4283_v24 = vmax.f32 %v4219_v57, 0.0  ;;  %v3586_v2 = vpop.f32.mrf.mxu1 }
 0x2c2   : > { %v4284_v51 = vmax.f32 %v4220_v7, 0.0  ;;  %v4221_v28 = vadd.f32 %v6531_v9, %v4145_v37  ;;  %v4146_v58 = vadd.f32 %v4018_v40, %v3712_v44  ;;  %v3713_v46 = vadd.f32 %v3586_v2, %v6394_v50  ;;  %4529 = vst [vmem:[%s6546_s9 + $0x40] sm:$0xff] %v5029_v43 }
 0x2c3   : > { %v4022_v63 = vpop.f32.mrf.mxu0  ;;  %v3588_v55 = vpop.f32.mrf.mxu1 }
 0x2c4   : > { %v5030_v49 = vpack.c.bf16 %v4284_v51, %v4283_v24  ;;  %v4222_v34 = vadd.f32 %v6534_v38, %v4146_v58  ;;  %v4147_v10 = vadd.f32 %v4020_v42, %v3713_v46  ;;  %v3714_v5 = vadd.f32 %v3588_v55, %v6836_v26 }
 0x2c5   : > { %v4026_v33 = vpop.f32.mrf.mxu0  ;;  %v3592_v35 = vpop.f32.mrf.mxu1  ;;  %v4285_v6 = vmax.f32 %v4221_v28, 0.0 }
 0x2c6   : > { %4530 = vst [vmem:[%s6546_s9 + $0x48] sm:$0xff] %v5030_v49  ;;  %v4286_v4 = vmax.f32 %v4222_v34, 0.0  ;;  %v3715_v41 = vadd.f32 %v3592_v35, %v6404_v56  ;;  %v4223_v50 = vadd.f32 %v6531_v9, %v4147_v10  ;;  %v4148_v1 = vadd.f32 %v4022_v63, %v3714_v5 }
 0x2c7   : > { %v4028_v36 = vpop.f32.mrf.mxu0  ;;  %v3594_v13 = vpop.f32.mrf.mxu1 }
 0x2c8   : > { %v5031_v15 = vpack.c.bf16 %v4286_v4, %v4285_v6  ;;  %v4149_v3 = vadd.f32 %v4026_v33, %v3715_v41  ;;  %v3716_v32 = vadd.f32 %v3594_v13, %v6409_v31  ;;  %v4224_v20 = vadd.f32 %v6534_v38, %v4148_v1 }
 0x2c9   : > { %v4030_v27 = vpop.f32.mrf.mxu0  ;;  %v3596_v45 = vpop.f32.mrf.mxu1  ;;  %v4287_v40 = vmax.f32 %v4223_v50, 0.0 }
 0x2ca   : > { %4531 = vst [vmem:[%s6546_s9 + $0x50] sm:$0xff] %v5031_v15  ;;  %v4225_v57 = vadd.f32 %v6531_v9, %v4149_v3  ;;  %v4150_v30 = vadd.f32 %v4028_v36, %v3716_v32  ;;  %v3717_v19 = vadd.f32 %v3596_v45, %v6412_v54  ;;  %v4288_v0 = vmax.f32 %v4224_v20, 0.0 }
 0x2cb   : > { %v4032_v56 = vpop.f32.mrf.mxu0  ;;  %v3598_v11 = vpop.f32.mrf.mxu1 }
 0x2cc   : > { %v4226_v62 = vadd.f32 %v6534_v38, %v4150_v30  ;;  %v4151_v7 = vadd.f32 %v4030_v27, %v3717_v19  ;;  %v3718_v31 = vadd.f32 %v3598_v11, %v6417_v22  ;;  %v5032_v44 = vpack.c.bf16 %v4288_v0, %v4287_v40 }
 0x2cd   : > { %v4036_v37 = vpop.f32.mrf.mxu0  ;;  %v4289_v42 = vmax.f32 %v4225_v57, 0.0  ;;  %v3602_v43 = vpop.f32.mrf.mxu1 }
 0x2ce   : > { %v4290_v24 = vmax.f32 %v4226_v62, 0.0  ;;  %v4227_v2 = vadd.f32 %v6531_v9, %v4151_v7  ;;  %v4152_v51 = vadd.f32 %v4032_v56, %v3718_v31  ;;  %v3719_v54 = vadd.f32 %v3602_v43, %v6420_v59  ;;  %4532 = vst [vmem:[%s6546_s9 + $0x58] sm:$0xff] %v5032_v44 }
 0x2cf   : > { %v4038_v28 = vpop.f32.mrf.mxu0  ;;  %v3604_v58 = vpop.f32.mrf.mxu1 }
 0x2d0   : > { %v5033_v46 = vpack.c.bf16 %v4290_v24, %v4289_v42  ;;  %v4228_v63 = vadd.f32 %v6534_v38, %v4152_v51  ;;  %v4153_v55 = vadd.f32 %v4036_v37, %v3719_v54  ;;  %v3720_v22 = vadd.f32 %v3604_v58, %v6423_v47 }
 0x2d1   : > { %v4040_v49 = vpop.f32.mrf.mxu0  ;;  %v3606_v34 = vpop.f32.mrf.mxu1  ;;  %v4291_v10 = vmax.f32 %v4227_v2, 0.0 }
 0x2d2   : > { %4533 = vst [vmem:[%s6546_s9 + $0x60] sm:$0xff] %v5033_v46  ;;  %v4292_v33 = vmax.f32 %v4228_v63, 0.0  ;;  %v3721_v26 = vadd.f32 %v3606_v34, %v6426_v23  ;;  %v4229_v59 = vadd.f32 %v6531_v9, %v4153_v55  ;;  %v4154_v35 = vadd.f32 %v4038_v28, %v3720_v22 }
 0x2d3   : > { %v4042_v5 = vpop.f32.mrf.mxu0  ;;  %v3608_v6 = vpop.f32.mrf.mxu1 }
 0x2d4   : > { %v5034_v4 = vpack.c.bf16 %v4292_v33, %v4291_v10  ;;  %v4155_v41 = vadd.f32 %v4040_v49, %v3721_v26  ;;  %v3722_v36 = vadd.f32 %v3608_v6, %v6429_v60  ;;  %v4230_v1 = vadd.f32 %v6534_v38, %v4154_v35  ;;  %v6837_v49 = vld [vmem:[#allocation14_spill] sm:$0xff] }
 0x2d5   : > { %v4046_v50 = vpop.f32.mrf.mxu0  ;;  %v3612_v47 = vpop.f32.mrf.mxu1  ;;  %v4293_v32 = vmax.f32 %v4229_v59, 0.0 }
 0x2d6   : > { %4534 = vst [vmem:[%s6546_s9 + $0x68] sm:$0xff] %v5034_v4  ;;  %v4231_v13 = vadd.f32 %v6531_v9, %v4155_v41  ;;  %v4156_v15 = vadd.f32 %v4042_v5, %v3722_v36  ;;  %v3723_v3 = vadd.f32 %v3612_v47, %v6432_v17  ;;  %v4294_v27 = vmax.f32 %v4230_v1, 0.0  ;;  %v6838_v5 = vld [vmem:[#allocation15_spill] sm:$0xff] }
 0x2d7   : > { %v4048_v23 = vpop.f32.mrf.mxu0  ;;  %v3614_v20 = vpop.f32.mrf.mxu1 }
 0x2d8   : > { %v4232_v45 = vadd.f32 %v6534_v38, %v4156_v15  ;;  %v4157_v57 = vadd.f32 %v4046_v50, %v3723_v3  ;;  %v3724_v60 = vadd.f32 %v3614_v20, %v6435_v12  ;;  %v5035_v19 = vpack.c.bf16 %v4294_v27, %v4293_v32  ;;  %v6839_v50 = vld [vmem:[#allocation16_spill] sm:$0xff]  ;;  %v6840_v20 = vld [vmem:[#allocation17_spill] sm:$0xff] }
 0x2d9   : > { %v4050_v30 = vpop.f32.mrf.mxu0  ;;  %v4295_v56 = vmax.f32 %v4231_v13, 0.0  ;;  %v3616_v40 = vpop.f32.mrf.mxu1 }
 0x2da   : > { %v4296_v0 = vmax.f32 %v4232_v45, 0.0  ;;  %v4233_v11 = vadd.f32 %v6531_v9, %v4157_v57  ;;  %v4158_v62 = vadd.f32 %v4048_v23, %v3724_v60  ;;  %v3725_v17 = vadd.f32 %v3616_v40, %v6438_v14  ;;  %4535 = vst [vmem:[%s6546_s9 + $0x70] sm:$0xff] %v5035_v19 }
 0x2db   : > { %v4052_v7 = vpop.f32.mrf.mxu0  ;;  %v3618_v31 = vpop.f32.mrf.mxu1 }
 0x2dc   : > { %v5036_v37 = vpack.c.bf16 %v4296_v0, %v4295_v56  ;;  %v4234_v44 = vadd.f32 %v6534_v38, %v4158_v62  ;;  %v4159_v42 = vadd.f32 %v4050_v30, %v3725_v17  ;;  %v3726_v12 = vadd.f32 %v3618_v31, %v6441_v21  ;;  %v6841_v0 = vld [vmem:[#allocation18_spill] sm:$0xff]  ;;  %v6842_v31 = vld [vmem:[#allocation19_spill] sm:$0xff] }
 0x2dd   : > { %v4056_v43 = vpop.f32.mrf.mxu0  ;;  %v3622_v24 = vpop.f32.mrf.mxu1  ;;  %v4297_v2 = vmax.f32 %v4233_v11, 0.0 }
 0x2de   : > { %4536 = vst [vmem:[%s6546_s9 + $0x78] sm:$0xff] %v5036_v37  ;;  %v4298_v51 = vmax.f32 %v4234_v44, 0.0  ;;  %v3727_v54 = vadd.f32 %v3622_v24, %v6444_v25  ;;  %v4235_v14 = vadd.f32 %v6531_v9, %v4159_v42  ;;  %v4160_v58 = vadd.f32 %v4052_v7, %v3726_v12 }
 0x2df   : > { %v4058_v28 = vpop.f32.mrf.mxu0  ;;  %v3624_v46 = vpop.f32.mrf.mxu1 }
 0x2e0   : > { %v5037_v63 = vpack.c.bf16 %v4298_v51, %v4297_v2  ;;  %v4161_v55 = vadd.f32 %v4056_v43, %v3727_v54  ;;  %v3728_v22 = vadd.f32 %v3624_v46, %v6837_v49  ;;  %v4236_v10 = vadd.f32 %v6534_v38, %v4160_v58  ;;  %v6843_v51 = vld [vmem:[#allocation20_spill] sm:$0xff] }
 0x2e1   : > { %v4060_v34 = vpop.f32.mrf.mxu0  ;;  %v3626_v21 = vpop.f32.mrf.mxu1  ;;  %v4299_v35 = vmax.f32 %v4235_v14, 0.0 }
 0x2e2   : > { %4537 = vst [vmem:[%s6546_s9 + $0x80] sm:$0xff] %v5037_v63  ;;  %v4237_v33 = vadd.f32 %v6531_v9, %v4161_v55  ;;  %v4162_v26 = vadd.f32 %v4058_v28, %v3728_v22  ;;  %v3729_v59 = vadd.f32 %v3626_v21, %v6838_v5  ;;  %v4300_v6 = vmax.f32 %v4236_v10, 0.0  ;;  %v6844_v55 = vld [vmem:[#allocation21_spill] sm:$0xff]  ;;  %v6845_v5 = vld [vmem:[#allocation2_spill] sm:$0xff] }
 0x2e3   : > { %v4062_v25 = vpop.f32.mrf.mxu0  ;;  %v3628_v4 = vpop.f32.mrf.mxu1 }
 0x2e4   : > { %v4238_v41 = vadd.f32 %v6534_v38, %v4162_v26  ;;  %v4163_v36 = vadd.f32 %v4060_v34, %v3729_v59  ;;  %v3730_v1 = vadd.f32 %v3628_v4, %v6839_v50  ;;  %v5038_v13 = vpack.c.bf16 %v4300_v6, %v4299_v35 }
 0x2e5   : > { %v4066_v47 = vpop.f32.mrf.mxu0  ;;  %v4301_v15 = vmax.f32 %v4237_v33, 0.0  ;;  %v3632_v3 = vpop.f32.mrf.mxu1 }
 0x2e6   : > { %v4302_v23 = vmax.f32 %v4238_v41, 0.0  ;;  %v4239_v32 = vadd.f32 %v6531_v9, %v4163_v36  ;;  %v4164_v27 = vadd.f32 %v4062_v25, %v3730_v1  ;;  %v3731_v45 = vadd.f32 %v3632_v3, %v6840_v20  ;;  %4538 = vst [vmem:[%s6546_s9 + $0x88] sm:$0xff] %v5038_v13  ;;  %v6846_v1 = vld [vmem:[#allocation3_spill] sm:$0xff]  ;;  %v6847_v20 = vld [vmem:[#allocation4_spill] sm:$0xff] }
 0x2e7   : > { %v4068_v57 = vpop.f32.mrf.mxu0  ;;  %v3634_v60 = vpop.f32.mrf.mxu1 }
 0x2e8   : > { %v5039_v30 = vpack.c.bf16 %v4302_v23, %v4301_v15  ;;  %v4240_v19 = vadd.f32 %v6534_v38, %v4164_v27  ;;  %v4165_v56 = vadd.f32 %v4066_v47, %v3731_v45  ;;  %v3732_v11 = vadd.f32 %v3634_v60, %v6841_v0 }
 0x2e9   : > { %v4070_v40 = vpop.f32.mrf.mxu0  ;;  %v3636_v62 = vpop.f32.mrf.mxu1  ;;  %v4303_v17 = vmax.f32 %v4239_v32, 0.0 }
 0x2ea   : > { %4539 = vst [vmem:[%s6546_s9 + $0x90] sm:$0xff] %v5039_v30  ;;  %v4304_v7 = vmax.f32 %v4240_v19, 0.0  ;;  %v3733_v37 = vadd.f32 %v3636_v62, %v6842_v31  ;;  %v4241_v42 = vadd.f32 %v6531_v9, %v4165_v56  ;;  %v4166_v43 = vadd.f32 %v4068_v57, %v3732_v11  ;;  %v6848_v19 = vld [vmem:[#allocation5_spill] sm:$0xff]  ;;  %v6849_v31 = vld [vmem:[#allocation6_spill] sm:$0xff] }
 0x2eb   : > { %v4072_v44 = vpop.f32.mrf.mxu0  ;;  %v3638_v12 = vpop.f32.mrf.mxu1 }
 0x2ec   : > { %v5040_v24 = vpack.c.bf16 %v4304_v7, %v4303_v17  ;;  %v4167_v2 = vadd.f32 %v4070_v40, %v3733_v37  ;;  %v3734_v54 = vadd.f32 %v3638_v12, %v6843_v51  ;;  %v4242_v14 = vadd.f32 %v6534_v38, %v4166_v43 }
 0x2ed   : > { %v4076_v28 = vpop.f32.mrf.mxu0  ;;  %v3642_v58 = vpop.f32.mrf.mxu1  ;;  %v4305_v34 = vmax.f32 %v4241_v42, 0.0 }
 0x2ee   : > { %4540 = vst [vmem:[%s6546_s9 + $0x98] sm:$0xff] %v5040_v24  ;;  %v4243_v46 = vadd.f32 %v6531_v9, %v4167_v2  ;;  %v4168_v63 = vadd.f32 %v4072_v44, %v3734_v54  ;;  %v3735_v49 = vadd.f32 %v3642_v58, %v6844_v55  ;;  %v4306_v10 = vmax.f32 %v4242_v14, 0.0  ;;  %v6850_v2 = vld [vmem:[#allocation7_spill] sm:$0xff]  ;;  %v6851_v55 = vld [vmem:[#allocation8_spill] sm:$0xff] }
 0x2ef   : > { %v4078_v22 = vpop.f32.mrf.mxu0  ;;  %v3644_v21 = vpop.f32.mrf.mxu1 }
 0x2f0   : > { %v4244_v33 = vadd.f32 %v6534_v38, %v4168_v63  ;;  %v4169_v26 = vadd.f32 %v4076_v28, %v3735_v49  ;;  %v3736_v59 = vadd.f32 %v3644_v21, %v6845_v5  ;;  %v5041_v35 = vpack.c.bf16 %v4306_v10, %v4305_v34 }
 0x2f1   : > { %v4080_v25 = vpop.f32.mrf.mxu0  ;;  %v4307_v6 = vmax.f32 %v4243_v46, 0.0  ;;  %v3646_v4 = vpop.f32.mrf.mxu1 }
 0x2f2   : > { %v4308_v41 = vmax.f32 %v4244_v33, 0.0  ;;  %v4245_v36 = vadd.f32 %v6531_v9, %v4169_v26  ;;  %v4170_v50 = vadd.f32 %v4078_v22, %v3736_v59  ;;  %v3737_v47 = vadd.f32 %v3646_v4, %v6846_v1  ;;  %4541 = vst [vmem:[%s6546_s9 + $0xa0] sm:$0xff] %v5041_v35 }
 0x2f3   : > { %v4082_v13 = vpop.f32.mrf.mxu0  ;;  %v3648_v15 = vpop.f32.mrf.mxu1 }
 0x2f4   : > { %v5042_v3 = vpack.c.bf16 %v4308_v41, %v4307_v6  ;;  %v4246_v23 = vadd.f32 %v6534_v38, %v4170_v50  ;;  %v4171_v32 = vadd.f32 %v4080_v25, %v3737_v47  ;;  %v3738_v45 = vadd.f32 %v3648_v15, %v6847_v20  ;;  %v6852_v15 = vld [vmem:[#allocation9_spill] sm:$0xff] }
 0x2f5   : > { %v4086_v27 = vpop.f32.mrf.mxu0  ;;  %v3652_v57 = vpop.f32.mrf.mxu1  ;;  %v4309_v60 = vmax.f32 %v4245_v36, 0.0 }
 0x2f6   : > { %4542 = vst [vmem:[%s6546_s9 + $0xa8] sm:$0xff] %v5042_v3  ;;  %v4310_v30 = vmax.f32 %v4246_v23, 0.0  ;;  %v3739_v56 = vadd.f32 %v3652_v57, %v6848_v19  ;;  %v4247_v0 = vadd.f32 %v6531_v9, %v4171_v32  ;;  %v4172_v11 = vadd.f32 %v4082_v13, %v3738_v45 }
 0x2f7   : > { %v4088_v40 = vpop.f32.mrf.mxu0  ;;  %v3654_v62 = vpop.f32.mrf.mxu1 }
 0x2f8   : > { %v5043_v17 = vpack.c.bf16 %v4310_v30, %v4309_v60  ;;  %v4173_v7 = vadd.f32 %v4086_v27, %v3739_v56  ;;  %v3740_v37 = vadd.f32 %v3654_v62, %v6849_v31  ;;  %v4248_v42 = vadd.f32 %v6534_v38, %v4172_v11 }
 0x2f9   : > { %v4090_v44 = vpop.f32.mrf.mxu0  ;;  %v3656_v43 = vpop.f32.mrf.mxu1  ;;  %v4311_v28 = vmax.f32 %v4247_v0, 0.0 }
 0x2fa   : > { %4543 = vst [vmem:[%s6546_s9 + $0xb0] sm:$0xff] %v5043_v17  ;;  %v4249_v12 = vadd.f32 %v6531_v9, %v4173_v7  ;;  %v4174_v24 = vadd.f32 %v4088_v40, %v3740_v37  ;;  %v3741_v51 = vadd.f32 %v3656_v43, %v6850_v2  ;;  %v4312_v14 = vmax.f32 %v4248_v42, 0.0  ;;  %v6853_v37 = vld [vmem:[#allocation10_spill] sm:$0xff] }
 0x2fb   : > { %v4092_v54 = vpop.f32.mrf.mxu0  ;;  %v3658_v58 = vpop.f32.mrf.mxu1 }
 0x2fc   : > { %v4250_v46 = vadd.f32 %v6534_v38, %v4174_v24  ;;  %v4175_v63 = vadd.f32 %v4090_v44, %v3741_v51  ;;  %v3742_v49 = vadd.f32 %v3658_v58, %v6851_v55  ;;  %v5044_v34 = vpack.c.bf16 %v4312_v14, %v4311_v28 }
 0x2fd   : > { %v4096_v22 = vpop.f32.mrf.mxu0  ;;  %v4313_v10 = vmax.f32 %v4249_v12, 0.0  ;;  %v3662_v21 = vpop.f32.mrf.mxu1 }
 0x2fe   : > { %v4314_v33 = vmax.f32 %v4250_v46, 0.0  ;;  %v4251_v26 = vadd.f32 %v6531_v9, %v4175_v63  ;;  %v4176_v5 = vadd.f32 %v4092_v54, %v3742_v49  ;;  %v3743_v59 = vadd.f32 %v3662_v21, %v6492_v48  ;;  %4544 = vst [vmem:[%s6546_s9 + $0xb8] sm:$0xff] %v5044_v34 }
 0x2ff   : > { %v4098_v25 = vpop.f32.mrf.mxu0  ;;  %v3664_v35 = vpop.f32.mrf.mxu1 }
 0x300   : > { %v5045_v6 = vpack.c.bf16 %v4314_v33, %v4313_v10  ;;  %v4252_v4 = vadd.f32 %v6534_v38, %v4176_v5  ;;  %v4177_v41 = vadd.f32 %v4096_v22, %v3743_v59  ;;  %v3744_v50 = vadd.f32 %v3664_v35, %v6495_v53 }
 0x301   : > { %v4100_v36 = vpop.f32.mrf.mxu0  ;;  %v3666_v1 = vpop.f32.mrf.mxu1  ;;  %v4315_v47 = vmax.f32 %v4251_v26, 0.0 }
 0x302   : > { %4545 = vst [vmem:[%s6546_s9 + $0xc0] sm:$0xff] %v5045_v6  ;;  %v4316_v13 = vmax.f32 %v4252_v4, 0.0  ;;  %v3745_v3 = vadd.f32 %v3666_v1, %v6852_v15  ;;  %v4253_v48 = vadd.f32 %v6531_v9, %v4177_v41  ;;  %v4178_v32 = vadd.f32 %v4098_v25, %v3744_v50  ;;  %v6854_v25 = vld [vmem:[#allocation11_spill] sm:$0xff] }
 0x303   : > { %v4102_v23 = vpop.f32.mrf.mxu0  ;;  %v3668_v27 = vpop.f32.mrf.mxu1 }
 0x304   : > { %v5046_v20 = vpack.c.bf16 %v4316_v13, %v4315_v47  ;;  %v4179_v45 = vadd.f32 %v4100_v36, %v3745_v3  ;;  %v3746_v57 = vadd.f32 %v3668_v27, %v6501_v39  ;;  %v4254_v30 = vadd.f32 %v6534_v38, %v4178_v32 }
 0x305   : > { %v4106_v60 = vpop.f32.mrf.mxu0  ;;  %v3672_v53 = vpop.f32.mrf.mxu1  ;;  %v4317_v11 = vmax.f32 %v4253_v48, 0.0 }
 0x306   : > { %4546 = vst [vmem:[%s6546_s9 + $0xc8] sm:$0xff] %v5046_v20  ;;  %v4255_v19 = vadd.f32 %v6531_v9, %v4179_v45  ;;  %v4180_v56 = vadd.f32 %v4102_v23, %v3746_v57  ;;  %v3747_v40 = vadd.f32 %v3672_v53, %v6504_v8  ;;  %v4318_v62 = vmax.f32 %v4254_v30, 0.0 }
 0x307   : > { %v4108_v0 = vpop.f32.mrf.mxu0  ;;  %v3674_v17 = vpop.f32.mrf.mxu1 }
 0x308   : > { %v4256_v7 = vadd.f32 %v6534_v38, %v4180_v56  ;;  %v4181_v31 = vadd.f32 %v4106_v60, %v3747_v40  ;;  %v3748_v39 = vadd.f32 %v3674_v17, %v6853_v37  ;;  %v5047_v42 = vpack.c.bf16 %v4318_v62, %v4317_v11 }
 0x309   : > { %v4110_v44 = vpop.f32.mrf.mxu0  ;;  %v4319_v43 = vmax.f32 %v4255_v19, 0.0  ;;  %v3676_v12 = vpop.f32.mrf.mxu1 }
 0x30a   : > { %v4320_v24 = vmax.f32 %v4256_v7, 0.0  ;;  %v4257_v2 = vadd.f32 %v6531_v9, %v4181_v31  ;;  %v4182_v51 = vadd.f32 %v4108_v0, %v3748_v39  ;;  %v3749_v8 = vadd.f32 %v3676_v12, %v6510_v61  ;;  %4547 = vst [vmem:[%s6546_s9 + $0xd0] sm:$0xff] %v5047_v42 }
 0x30b   : > { %v4112_v54 = vpop.f32.mrf.mxu0  ;;  %v3678_v28 = vpop.f32.mrf.mxu1 }
 0x30c   : > { %v5048_v14 = vpack.c.bf16 %v4320_v24, %v4319_v43  ;;  %v4258_v58 = vadd.f32 %v6534_v38, %v4182_v51  ;;  %v4183_v46 = vadd.f32 %v4110_v44, %v3749_v8  ;;  %v3750_v55 = vadd.f32 %v3678_v28, %v6513_v29 }
 0x30d   : > { %v4116_v63 = vpop.f32.mrf.mxu0  ;;  %v3682_v49 = vpop.f32.mrf.mxu1  ;;  %v4321_v22 = vmax.f32 %v4257_v2, 0.0 }
 0x30e   : > { %4548 = vst [vmem:[%s6546_s9 + $0xd8] sm:$0xff] %v5048_v14  ;;  %v4322_v34 = vmax.f32 %v4258_v58, 0.0  ;;  %v3751_v10 = vadd.f32 %v3682_v49, %v6516_v18  ;;  %v4259_v61 = vadd.f32 %v6531_v9, %v4183_v46  ;;  %v4184_v33 = vadd.f32 %v4112_v54, %v3750_v55 }
 0x30f   : > { %v4118_v21 = vpop.f32.mrf.mxu0  ;;  %v3684_v26 = vpop.f32.mrf.mxu1 }
 0x310   : > { %v5049_v5 = vpack.c.bf16 %v4322_v34, %v4321_v22  ;;  %v4185_v59 = vadd.f32 %v4116_v63, %v3751_v10  ;;  %v3752_v35 = vadd.f32 %v3684_v26, %v6854_v25  ;;  %v4260_v6 = vadd.f32 %v6534_v38, %v4184_v33 }
 0x311   : > { %v3686_v4 = vpop.f32.mrf.mxu1  ;;  %v4120_v29 = vpop.f32.mrf.mxu0  ;;  %v4323_v50 = vmax.f32 %v4259_v61, 0.0 }
 0x312   : > { %4549 = vst [vmem:[%s6546_s9 + $0xe0] sm:$0xff] %v5049_v5  ;;  %v4261_v41 = vadd.f32 %v6531_v9, %v4185_v59  ;;  %v4186_v36 = vadd.f32 %v4118_v21, %v3752_v35  ;;  %v3753_v18 = vadd.f32 %v3686_v4, %v6525_v52  ;;  %v4324_v1 = vmax.f32 %v4260_v6, 0.0 }
 0x313   : > { %v3688_v47 = vpop.f32.mrf.mxu1  ;;  %v4122_v48 = vpop.f32.mrf.mxu0 }
 0x314   : > { %v4262_v13 = vadd.f32 %v6534_v38, %v4186_v36  ;;  %v4187_v15 = vadd.f32 %v4120_v29, %v3753_v18  ;;  %v3754_v3 = vadd.f32 %v3688_v47, %v6528_v16  ;;  %v5050_v23 = vpack.c.bf16 %v4324_v1, %v4323_v50 }
 0x315   : > { %v4325_v32 = vmax.f32 %v4261_v41, 0.0 }
 0x316   : > { %v4326_v27 = vmax.f32 %v4262_v13, 0.0  ;;  %v4263_v20 = vadd.f32 %v6531_v9, %v4187_v15  ;;  %v4188_v45 = vadd.f32 %v4122_v48, %v3754_v3  ;;  %4550 = vst [vmem:[%s6546_s9 + $0xe8] sm:$0xff] %v5050_v23 }
 0x318   : > { %v5051_v57 = vpack.c.bf16 %v4326_v27, %v4325_v32  ;;  %v4264_v52 = vadd.f32 %v6534_v38, %v4188_v45  ;;  %v4327_v60 = vmax.f32 %v4263_v20, 0.0 }
 0x31a   : > { %4551 = vst [vmem:[%s6546_s9 + $0xf0] sm:$0xff] %v5051_v57  ;;  %v4328_v30 = vmax.f32 %v4264_v52, 0.0 }
 0x31c   : > { %v5052_v53 = vpack.c.bf16 %v4328_v30, %v4327_v60 }
 0x31e   : > { %4552 = vst [vmem:[%s6546_s9 + $0xf8] sm:$0xff] %v5052_v53 }
 0x31f PF: > { %s18_s27 = sadd.s32 1, %s5216_s27  }
 0x320   : > { %p15_p4 = scmp.ge.s32.totalorder %s18_s27, 6  }
 0x322   :  { %17 = sbr.rel (!%p15_p4) target bundleno = 1 (0x1), region = 105 }

// kernel: drnet_forward.4
= control target key start
LH: loop header
LB: loop body
LE: loop exit
PB: predicated region body
PF: predicated region fallthrough
CT: control target
= control target key end

     0   :  { %s4840_s27 = smov 0   ;;  %s6100_s0 = inlined_call_operand.vmem [shape: bf16[4,72,256], index: 0, kind: input, shape index: {}]   ;;  %s6101_s1 = inlined_call_operand.vmem [shape: bf16[4,72,256], index: 1, kind: input, shape index: {}]   ;;  %s6102_s2 = inlined_call_operand.vmem [shape: bf16[4,72,256], index: 2, kind: input, shape index: {}]   ;;  %s6103_s3 = inlined_call_operand.vmem [shape: bf16[4,72,256], index: 3, kind: input, shape index: {}]   ;;  %s6104_s4 = inlined_call_operand.vmem [shape: bf16[4,72,256], index: 4, kind: input, shape index: {}]   ;;  %s6105_s5 = inlined_call_operand.vmem [shape: bf16[4,72,256], index: 5, kind: input, shape index: {}]   ;;  %s6106_s6 = inlined_call_operand.vmem [shape: bf16[9,256,256], index: 6, kind: input, shape index: {}]   ;;  %s6107_s7 = inlined_call_operand.vmem [shape: f32[1,256], index: 7, kind: input, shape index: {}]   ;;  %s6108_s8 = inlined_call_operand.vmem [shape: bf16[4,64,256], index: 8, kind: output, shape index: {}]  }
   0x1 LB: > { %s3558_s28 = sadd.s32 4294967295, %s4793_s27   ;;  %p3562_p0 = scmp.ge.s32.totalorder %s4793_s27, 1  ;;  %s4793_s27 = sphi %s4840_s27, %s18_s27  }
   0x2   : > { %p312_p1 = scmp.lt.s32.totalorder %s4793_s27, 5 }
   0x4   : > { %p313_p2 = pnand %p3562_p0, %p312_p1 }
   0x6   : > { %316 = sbr.rel (%p313_p2) target bundleno = 549 (0x225), region = 52 }
   0xb   : > { %v4247_v0 = vld [vmem:[%s6106_s6 + $0x174] ss:$8 sps:$4 sm:$0xff]   ;;  %v4251_v2 = vld [vmem:[%s6106_s6 + $0x170] ss:$8 sps:$4 sm:$0xff]   ;;  %v4253_v4 = vld [vmem:[%s6106_s6 + $0x164] ss:$8 sps:$4 sm:$0xff]  }
   0xc   : > { %v4249_v1 = vld [vmem:[%s6106_s6 + $0x74] ss:$8 sps:$4 sm:$0xff]   ;;  %687 = vmatprep.subr.bf16.mxu0 %v4247_v0  ;;  %v4252_v3 = vld [vmem:[%s6106_s6 + $0x70] ss:$8 sps:$4 sm:$0xff]   ;;  %v4255_v5 = vld [vmem:[%s6106_s6 + $0x64] ss:$8 sps:$4 sm:$0xff]  }
   0xd   : > { %960 = vmatprep.subr.bf16.mxu1 %v4249_v1  ;;  %688 = vmatpush1.bf16.msra.mxu0 %v4251_v2  ;;  %v4257_v6 = vld [vmem:[%s6106_s6 + $0x160] ss:$8 sps:$4 sm:$0xff]   ;;  %v4259_v8 = vld [vmem:[%s6106_s6 + $0x154] ss:$8 sps:$4 sm:$0xff]   ;;  %v4263_v10 = vld [vmem:[%s6106_s6 + $0x150] ss:$8 sps:$4 sm:$0xff]  }
   0xe   : > { %961 = vmatpush1.bf16.msra.mxu1 %v4252_v3  ;;  %689 = vmatprep.subr.bf16.mxu0 %v4253_v4  ;;  %v4258_v7 = vld [vmem:[%s6106_s6 + $0x60] ss:$8 sps:$4 sm:$0xff]   ;;  %v4261_v9 = vld [vmem:[%s6106_s6 + $0x54] ss:$8 sps:$4 sm:$0xff]   ;;  %v4264_v11 = vld [vmem:[%s6106_s6 + $0x50] ss:$8 sps:$4 sm:$0xff]  }
   0xf   : > { %962 = vmatprep.subr.bf16.mxu1 %v4255_v5  ;;  %v4265_v12 = vld [vmem:[%s6106_s6 + $0x144] ss:$8 sps:$4 sm:$0xff]   ;;  %v4269_v14 = vld [vmem:[%s6106_s6 + $0x140] ss:$8 sps:$4 sm:$0xff]   ;;  %v4271_v16 = vld [vmem:[%s6106_s6 + $0x134] ss:$8 sps:$4 sm:$0xff]  }
  0x10   : > { %v4267_v13 = vld [vmem:[%s6106_s6 + $0x44] ss:$8 sps:$4 sm:$0xff]   ;;  %v4270_v15 = vld [vmem:[%s6106_s6 + $0x40] ss:$8 sps:$4 sm:$0xff]   ;;  %v4273_v17 = vld [vmem:[%s6106_s6 + $0x34] ss:$8 sps:$4 sm:$0xff]  }
  0x11   : > { %690 = vmatpush1.bf16.msra.mxu0 %v4257_v6  ;;  %v4275_v18 = vld [vmem:[%s6106_s6 + $0x130] ss:$8 sps:$4 sm:$0xff]   ;;  %v4277_v20 = vld [vmem:[%s6106_s6 + $0x124] ss:$8 sps:$4 sm:$0xff]   ;;  %v4281_v22 = vld [vmem:[%s6106_s6 + $0x120] ss:$8 sps:$4 sm:$0xff]  }
  0x12   : > { %963 = vmatpush1.bf16.msra.mxu1 %v4258_v7  ;;  %691 = vmatprep.subr.bf16.mxu0 %v4259_v8  ;;  %v4276_v19 = vld [vmem:[%s6106_s6 + $0x30] ss:$8 sps:$4 sm:$0xff]   ;;  %v4279_v21 = vld [vmem:[%s6106_s6 + $0x24] ss:$8 sps:$4 sm:$0xff]   ;;  %v4282_v23 = vld [vmem:[%s6106_s6 + $0x20] ss:$8 sps:$4 sm:$0xff]  }
  0x13   : > { %964 = vmatprep.subr.bf16.mxu1 %v4261_v9  ;;  %v4283_v24 = vld [vmem:[%s6106_s6 + $0x114] ss:$8 sps:$4 sm:$0xff]   ;;  %v4287_v26 = vld [vmem:[%s6106_s6 + $0x110] ss:$8 sps:$4 sm:$0xff]   ;;  %v4289_v28 = vld [vmem:[%s6106_s6 + $0x104] ss:$8 sps:$4 sm:$0xff]  }
  0x14   : > { %v4285_v25 = vld [vmem:[%s6106_s6 + $0x14] ss:$8 sps:$4 sm:$0xff]   ;;  %v4288_v27 = vld [vmem:[%s6106_s6 + $0x10] ss:$8 sps:$4 sm:$0xff]   ;;  %v4291_v29 = vld [vmem:[%s6106_s6 + $0x4] ss:$8 sps:$4 sm:$0xff]  }
  0x15   : > { %692 = vmatpush1.bf16.msra.mxu0 %v4263_v10  ;;  %v4293_v30 = vld [vmem:[%s6106_s6 + $0x100] ss:$8 sps:$4 sm:$0xff]   ;;  %v4295_v32 = vld [vmem:[%s6106_s6 + $0x1f4] ss:$8 sps:$4 sm:$0xff]   ;;  %p371_p3 = scmp.lt.s32.totalorder %s3558_s28, 3 }
  0x16   : > { %965 = vmatpush1.bf16.msra.mxu1 %v4264_v11  ;;  %693 = vmatprep.subr.bf16.mxu0 %v4265_v12  ;;  %v4294_v31 = vld [vmem:[%s6106_s6] ss:$8 sps:$4 sm:$0xff]   ;;  %v4297_v33 = vld [vmem:[%s6106_s6 + $0xf4] ss:$8 sps:$4 sm:$0xff]   ;;  %v4299_v34 = vld [vmem:[%s6106_s6 + $0x1f0] ss:$8 sps:$4 sm:$0xff]  }
  0x17   : > { %966 = vmatprep.subr.bf16.mxu1 %v4267_v13  ;;  %v4300_v35 = vld [vmem:[%s6106_s6 + $0xf0] ss:$8 sps:$4 sm:$0xff]   ;;  %v4301_v36 = vld [vmem:[%s6106_s6 + $0x1e4] ss:$8 sps:$4 sm:$0xff]   ;;  %s6158_s28 = smov (!%p371_p3, %s3558_s28), 3 }
  0x18   : > { %v4303_v37 = vld [vmem:[%s6106_s6 + $0xe4] ss:$8 sps:$4 sm:$0xff]   ;;  %v4305_v38 = vld [vmem:[%s6106_s6 + $0x1e0] ss:$8 sps:$4 sm:$0xff]   ;;  %v4307_v40 = vld [vmem:[%s6106_s6 + $0x1d4] ss:$8 sps:$4 sm:$0xff]  }
  0x19   : > { %694 = vmatpush1.bf16.msra.mxu0 %v4269_v14  ;;  %v4306_v39 = vld [vmem:[%s6106_s6 + $0xe0] ss:$8 sps:$4 sm:$0xff]   ;;  %s4978_s9 = smul.u32 72, %s6158_s28  ;;  %v4309_v41 = vld [vmem:[%s6106_s6 + $0xd4] ss:$8 sps:$4 sm:$0xff]   ;;  %s4197_s22 = sshll.u32 %s6158_s28, 6 }
  0x1a   : > { %967 = vmatpush1.bf16.msra.mxu1 %v4270_v15  ;;  %695 = vmatprep.subr.bf16.mxu0 %v4271_v16  ;;  %v4311_v42 = vld [vmem:[%s6106_s6 + $0x1d0] ss:$8 sps:$4 sm:$0xff]   ;;  %v4313_v44 = vld [vmem:[%s6106_s6 + $0x1c4] ss:$8 sps:$4 sm:$0xff]   ;;  %v4317_v46 = vld [vmem:[%s6106_s6 + $0x1c0] ss:$8 sps:$4 sm:$0xff]   ;;  %s6071_s28 = scalar_lea.vmem %s6108_s8, %s4197_s22 }
  0x1b   : > { %968 = vmatprep.subr.bf16.mxu1 %v4273_v17  ;;  %v4312_v43 = vld [vmem:[%s6106_s6 + $0xd0] ss:$8 sps:$4 sm:$0xff]   ;;  %s4996_s20 = scalar_lea.vmem %s6101_s1, %s4978_s9  ;;  %v4315_v45 = vld [vmem:[%s6106_s6 + $0xc4] ss:$8 sps:$4 sm:$0xff]   ;;  %v4318_v47 = vld [vmem:[%s6106_s6 + $0xc0] ss:$8 sps:$4 sm:$0xff]   ;;  %s5011_s10 = scalar_lea.vmem %s6100_s0, %s4978_s9 }
  0x1c   : > { %v4319_v48 = vld [vmem:[%s6106_s6 + $0x1b4] ss:$8 sps:$4 sm:$0xff]   ;;  %v4345_v49 = vld [vmem:[%s4996_s20 + $0x4] ss:$8 sps:$4 sm:$0xff]   ;;  %v4323_v52 = vld [vmem:[%s6106_s6 + $0x1b0] ss:$8 sps:$4 sm:$0xff]   ;;  %s5186_s13 = scalar_lea.vmem %s6102_s2, %s4978_s9  ;;  %s5198_s21 = scalar_lea.vmem %s6103_s3, %s4978_s9 }
  0x1d   : > { %696 = vmatpush1.bf16.msra.mxu0 %v4275_v18  ;;  %v4321_v50 = vld [vmem:[%s6106_s6 + $0xb4] ss:$8 sps:$4 sm:$0xff]   ;;  %v4348_v51 = vld [vmem:[%s5011_s10 + $0x4] ss:$8 sps:$4 sm:$0xff]   ;;  %719 = vmatprep.mubr.bf16.mxu0 %v4345_v49  ;;  %v4324_v53 = vld [vmem:[%s6106_s6 + $0xb0] ss:$8 sps:$4 sm:$0xff]   ;;  %s5374_s23 = scalar_lea.vmem %s6104_s4, %s4978_s9  ;;  %s5383_s30 = scalar_lea.vmem %s6105_s5, %s4978_s9 }
  0x1e   : > { %969 = vmatpush1.bf16.msra.mxu1 %v4276_v19  ;;  %697 = vmatprep.subr.bf16.mxu0 %v4277_v20  ;;  %v4325_v54 = vld [vmem:[%s6106_s6 + $0x1a4] ss:$8 sps:$4 sm:$0xff]   ;;  %v4329_v56 = vld [vmem:[%s6106_s6 + $0x1a0] ss:$8 sps:$4 sm:$0xff]   ;;  %v4331_v58 = vld [vmem:[%s6106_s6 + $0x194] ss:$8 sps:$4 sm:$0xff]  }
  0x1f   : > { %970 = vmatprep.subr.bf16.mxu1 %v4279_v21  ;;  %992 = vmatprep.mubr.bf16.mxu1 %v4348_v51  ;;  %v4327_v55 = vld [vmem:[%s6106_s6 + $0xa4] ss:$8 sps:$4 sm:$0xff]   ;;  %v4330_v57 = vld [vmem:[%s6106_s6 + $0xa0] ss:$8 sps:$4 sm:$0xff]   ;;  %v4333_v59 = vld [vmem:[%s6106_s6 + $0x94] ss:$8 sps:$4 sm:$0xff]  }
  0x20   : > { %v4335_v60 = vld [vmem:[%s6106_s6 + $0x190] ss:$8 sps:$4 sm:$0xff]   ;;  %v4337_v62 = vld [vmem:[%s6106_s6 + $0x184] ss:$8 sps:$4 sm:$0xff]   ;;  %v4341_v0 = vld [vmem:[%s6106_s6 + $0x180] ss:$8 sps:$4 sm:$0xff]  }
  0x21   : > { %698 = vmatpush1.bf16.msra.mxu0 %v4281_v22  ;;  %v4336_v61 = vld [vmem:[%s6106_s6 + $0x90] ss:$8 sps:$4 sm:$0xff]   ;;  %v4339_v63 = vld [vmem:[%s6106_s6 + $0x84] ss:$8 sps:$4 sm:$0xff]   ;;  %v4342_v1 = vld [vmem:[%s6106_s6 + $0x80] ss:$8 sps:$4 sm:$0xff]  }
  0x22   : > { %971 = vmatpush1.bf16.msra.mxu1 %v4282_v23  ;;  %699 = vmatprep.subr.bf16.mxu0 %v4283_v24  ;;  %v4351_v2 = vld [vmem:[%s6106_s6 + $0x274] ss:$8 sps:$4 sm:$0xff]   ;;  %v4343_v4 = vld [vmem:[%s4996_s20] ss:$8 sps:$4 sm:$0xff]   ;;  %v4349_v6 = vld [vmem:[%s6106_s6 + $0x270] ss:$8 sps:$4 sm:$0xff]  }
  0x23   : > { %972 = vmatprep.subr.bf16.mxu1 %v4285_v25  ;;  %v4354_v3 = vld [vmem:[%s6106_s6 + $0x374] ss:$8 sps:$4 sm:$0xff]   ;;  %v4346_v5 = vld [vmem:[%s5011_s10] ss:$8 sps:$4 sm:$0xff]   ;;  %v4352_v7 = vld [vmem:[%s6106_s6 + $0x370] ss:$8 sps:$4 sm:$0xff]  }
  0x24   : > { %v4357_v8 = vld [vmem:[%s6106_s6 + $0x264] ss:$8 sps:$4 sm:$0xff]   ;;  %v4355_v10 = vld [vmem:[%s6106_s6 + $0x260] ss:$8 sps:$4 sm:$0xff]   ;;  %v4363_v12 = vld [vmem:[%s6106_s6 + $0x254] ss:$8 sps:$4 sm:$0xff]  }
  0x25   : > { %700 = vmatpush1.bf16.msra.mxu0 %v4287_v26  ;;  %v4360_v9 = vld [vmem:[%s6106_s6 + $0x364] ss:$8 sps:$4 sm:$0xff]   ;;  %v4358_v11 = vld [vmem:[%s6106_s6 + $0x360] ss:$8 sps:$4 sm:$0xff]   ;;  %v4366_v13 = vld [vmem:[%s6106_s6 + $0x354] ss:$8 sps:$4 sm:$0xff]  }
  0x26   : > { %973 = vmatpush1.bf16.msra.mxu1 %v4288_v27  ;;  %701 = vmatprep.subr.bf16.mxu0 %v4289_v28  ;;  %v4361_v14 = vld [vmem:[%s6106_s6 + $0x250] ss:$8 sps:$4 sm:$0xff]   ;;  %v4403_v16 = vld [vmem:[%s4996_s20 + $0x14] ss:$8 sps:$4 sm:$0xff]   ;;  %v4369_v20 = vld [vmem:[%s6106_s6 + $0x244] ss:$8 sps:$4 sm:$0xff]  }
  0x27   : > { %974 = vmatprep.subr.bf16.mxu1 %v4291_v29  ;;  %v4364_v15 = vld [vmem:[%s6106_s6 + $0x350] ss:$8 sps:$4 sm:$0xff]   ;;  %v4405_v17 = vld [vmem:[%s5011_s10 + $0x14] ss:$8 sps:$4 sm:$0xff]   ;;  %v4372_v21 = vld [vmem:[%s6106_s6 + $0x344] ss:$8 sps:$4 sm:$0xff]  }
  0x28   : > { %v4407_v18 = vld [vmem:[%s4996_s20 + $0x10] ss:$8 sps:$4 sm:$0xff]   ;;  %v4367_v22 = vld [vmem:[%s6106_s6 + $0x240] ss:$8 sps:$4 sm:$0xff]   ;;  %v4375_v24 = vld [vmem:[%s6106_s6 + $0x234] ss:$8 sps:$4 sm:$0xff]  }
  0x29   : > { %702 = vmatpush1.bf16.msra.mxu0 %v4293_v30  ;;  %v4408_v19 = vld [vmem:[%s5011_s10 + $0x10] ss:$8 sps:$4 sm:$0xff]   ;;  %v4370_v23 = vld [vmem:[%s6106_s6 + $0x340] ss:$8 sps:$4 sm:$0xff]   ;;  %v4378_v25 = vld [vmem:[%s6106_s6 + $0x334] ss:$8 sps:$4 sm:$0xff]  }
  0x2a   : > { %975 = vmatpush1.bf16.msra.mxu1 %v4294_v31  ;;  %703 = vmatprep.subr.bf16.mxu0 %v4295_v32  ;;  %v4373_v26 = vld [vmem:[%s6106_s6 + $0x230] ss:$8 sps:$4 sm:$0xff]   ;;  %v4421_v28 = vld [vmem:[%s4996_s20 + $0x24] ss:$8 sps:$4 sm:$0xff]   ;;  %v4425_v30 = vld [vmem:[%s4996_s20 + $0x20] ss:$8 sps:$4 sm:$0xff]  }
  0x2b   : > { %976 = vmatprep.subr.bf16.mxu1 %v4297_v33  ;;  %v4376_v27 = vld [vmem:[%s6106_s6 + $0x330] ss:$8 sps:$4 sm:$0xff]   ;;  %v4423_v29 = vld [vmem:[%s5011_s10 + $0x24] ss:$8 sps:$4 sm:$0xff]   ;;  %v4426_v31 = vld [vmem:[%s5011_s10 + $0x20] ss:$8 sps:$4 sm:$0xff]  }
  0x2c   : > { %v4381_v32 = vld [vmem:[%s6106_s6 + $0x224] ss:$8 sps:$4 sm:$0xff]   ;;  %v4402_v49 = vld [vmem:[%s6106_s6 + $0x3f4] ss:$8 sps:$4 sm:$0xff]   ;;  %v4400_v51 = vld [vmem:[%s6106_s6 + $0x3f0] ss:$8 sps:$4 sm:$0xff]  }
  0x2d   : > { %704 = vmatpush2.bf16.msra.mxu0 %v4299_v34  ;;  %v4384_v33 = vld [vmem:[%s6106_s6 + $0x324] ss:$8 sps:$4 sm:$0xff]   ;;  %v4379_v34 = vld [vmem:[%s6106_s6 + $0x220] ss:$8 sps:$4 sm:$0xff]  }
  0x2e   : > { %977 = vmatpush2.bf16.msra.mxu1 %v4300_v35  ;;  %705 = vmatprep.subr.bf16.mxu0 %v4301_v36  ;;  %v4382_v35 = vld [vmem:[%s6106_s6 + $0x320] ss:$8 sps:$4 sm:$0xff]   ;;  %v4387_v36 = vld [vmem:[%s6106_s6 + $0x214] ss:$8 sps:$4 sm:$0xff]  }
  0x2f   : > { %978 = vmatprep.subr.bf16.mxu1 %v4303_v37  ;;  %v4390_v37 = vld [vmem:[%s6106_s6 + $0x314] ss:$8 sps:$4 sm:$0xff]  }
  0x31   : > { %706 = vmatpush2.bf16.msra.mxu0 %v4305_v38  ;;  %v4385_v38 = vld [vmem:[%s6106_s6 + $0x210] ss:$8 sps:$4 sm:$0xff]  }
  0x32   : > { %979 = vmatpush2.bf16.msra.mxu1 %v4306_v39  ;;  %707 = vmatprep.subr.bf16.mxu0 %v4307_v40  ;;  %v4388_v39 = vld [vmem:[%s6106_s6 + $0x310] ss:$8 sps:$4 sm:$0xff]   ;;  %v4439_v40 = vld [vmem:[%s4996_s20 + $0x34] ss:$8 sps:$4 sm:$0xff]  }
  0x33   : > { %980 = vmatprep.subr.bf16.mxu1 %v4309_v41  ;;  %v4441_v41 = vld [vmem:[%s5011_s10 + $0x34] ss:$8 sps:$4 sm:$0xff]  }
  0x35   : > { %708 = vmatpush2.bf16.msra.mxu0 %v4311_v42  ;;  %v4443_v42 = vld [vmem:[%s4996_s20 + $0x30] ss:$8 sps:$4 sm:$0xff]  }
  0x36   : > { %981 = vmatpush2.bf16.msra.mxu1 %v4312_v43  ;;  %709 = vmatprep.subr.bf16.mxu0 %v4313_v44  ;;  %v4444_v43 = vld [vmem:[%s5011_s10 + $0x30] ss:$8 sps:$4 sm:$0xff]   ;;  %v4393_v44 = vld [vmem:[%s6106_s6 + $0x204] ss:$8 sps:$4 sm:$0xff]  }
  0x37   : > { %982 = vmatprep.subr.bf16.mxu1 %v4315_v45  ;;  %v4396_v45 = vld [vmem:[%s6106_s6 + $0x304] ss:$8 sps:$4 sm:$0xff]  }
  0x39   : > { %710 = vmatpush2.bf16.msra.mxu0 %v4317_v46  ;;  %v4391_v46 = vld [vmem:[%s6106_s6 + $0x200] ss:$8 sps:$4 sm:$0xff]  }
  0x3a   : > { %983 = vmatpush2.bf16.msra.mxu1 %v4318_v47  ;;  %711 = vmatprep.subr.bf16.mxu0 %v4319_v48  ;;  %v4394_v47 = vld [vmem:[%s6106_s6 + $0x300] ss:$8 sps:$4 sm:$0xff]   ;;  %v4399_v48 = vld [vmem:[%s6106_s6 + $0x2f4] ss:$8 sps:$4 sm:$0xff]  }
  0x3b   : > { %984 = vmatprep.subr.bf16.mxu1 %v4321_v50  ;;  %v4397_v50 = vld [vmem:[%s6106_s6 + $0x2f0] ss:$8 sps:$4 sm:$0xff]  }
  0x3d   : > { %712 = vmatpush2.bf16.msra.mxu0 %v4323_v52  ;;  %v4411_v52 = vld [vmem:[%s6106_s6 + $0x2e4] ss:$8 sps:$4 sm:$0xff]  }
  0x3e   : > { %985 = vmatpush2.bf16.msra.mxu1 %v4324_v53  ;;  %713 = vmatprep.subr.bf16.mxu0 %v4325_v54  ;;  %v4414_v53 = vld [vmem:[%s6106_s6 + $0x3e4] ss:$8 sps:$4 sm:$0xff]  }
  0x3f   : > { %986 = vmatprep.subr.bf16.mxu1 %v4327_v55  ;;  %v4465_v54 = vld [vmem:[%s5186_s13 + $0x4] ss:$8 sps:$4 sm:$0xff]  }
  0x40   : > { %v4468_v55 = vld [vmem:[%s5198_s21 + $0x4] ss:$8 sps:$4 sm:$0xff]  }
  0x41   : > { %714 = vmatpush2.bf16.msra.mxu0 %v4329_v56  ;;  %v4409_v56 = vld [vmem:[%s6106_s6 + $0x2e0] ss:$8 sps:$4 sm:$0xff]  }
  0x42   : > { %987 = vmatpush2.bf16.msra.mxu1 %v4330_v57  ;;  %715 = vmatprep.subr.bf16.mxu0 %v4331_v58  ;;  %v4412_v57 = vld [vmem:[%s6106_s6 + $0x3e0] ss:$8 sps:$4 sm:$0xff]   ;;  %v4417_v58 = vld [vmem:[%s6106_s6 + $0x2d4] ss:$8 sps:$4 sm:$0xff]  }
  0x43   : > { %988 = vmatprep.subr.bf16.mxu1 %v4333_v59  ;;  %v4420_v59 = vld [vmem:[%s6106_s6 + $0x3d4] ss:$8 sps:$4 sm:$0xff]  }
  0x45   : > { %716 = vmatpush2.bf16.msra.mxu0 %v4335_v60  ;;  %v4415_v60 = vld [vmem:[%s6106_s6 + $0x2d0] ss:$8 sps:$4 sm:$0xff]  }
  0x46   : > { %989 = vmatpush2.bf16.msra.mxu1 %v4336_v61  ;;  %717 = vmatprep.subr.bf16.mxu0 %v4337_v62  ;;  %v4418_v61 = vld [vmem:[%s6106_s6 + $0x3d0] ss:$8 sps:$4 sm:$0xff]   ;;  %v4429_v62 = vld [vmem:[%s6106_s6 + $0x2c4] ss:$8 sps:$4 sm:$0xff]  }
  0x47   : > { %990 = vmatprep.subr.bf16.mxu1 %v4339_v63  ;;  %v4432_v63 = vld [vmem:[%s6106_s6 + $0x3c4] ss:$8 sps:$4 sm:$0xff]  }
  0x49   : > { %718 = vmatpush2.bf16.msra.mxu0 %v4341_v0  ;;  %v4427_v0 = vld [vmem:[%s6106_s6 + $0x2c0] ss:$8 sps:$4 sm:$0xff]  }
  0x4a   : > { %991 = vmatpush2.bf16.msra.mxu1 %v4342_v1  ;;  %1274 = vmatprep.subr.bf16.mxu0 %v4351_v2  ;;  %v4430_v1 = vld [vmem:[%s6106_s6 + $0x3c0] ss:$8 sps:$4 sm:$0xff]   ;;  %v4435_v2 = vld [vmem:[%s6106_s6 + $0x2b4] ss:$8 sps:$4 sm:$0xff]  }
  0x4b   : > { %1604 = vmatprep.subr.bf16.mxu1 %v4354_v3  ;;  %v4438_v3 = vld [vmem:[%s6106_s6 + $0x3b4] ss:$8 sps:$4 sm:$0xff]  }
  0x4c   : > { %720 = vmatmul.mubr.bf16.vlgmr.msra.gmra.mxu0 %v4343_v4  ;;  %v4433_v4 = vld [vmem:[%s6106_s6 + $0x2b0] ss:$8 sps:$4 sm:$0xff]  }
  0x4d   : > { %993 = vmatmul.mubr.bf16.vlgmr.msra.gmra.mxu1 %v4346_v5  ;;  %1275 = vmatpush1.bf16.msra.mxu0 %v4349_v6  ;;  %v4436_v5 = vld [vmem:[%s6106_s6 + $0x3b0] ss:$8 sps:$4 sm:$0xff]   ;;  %v4447_v6 = vld [vmem:[%s6106_s6 + $0x2a4] ss:$8 sps:$4 sm:$0xff]  }
  0x4e   : > { %1605 = vmatpush1.bf16.msra.mxu1 %v4352_v7  ;;  %1276 = vmatprep.subr.bf16.mxu0 %v4357_v8  ;;  %v4450_v7 = vld [vmem:[%s6106_s6 + $0x3a4] ss:$8 sps:$4 sm:$0xff]   ;;  %v4445_v8 = vld [vmem:[%s6106_s6 + $0x2a0] ss:$8 sps:$4 sm:$0xff]  }
  0x4f   : > { %1606 = vmatprep.subr.bf16.mxu1 %v4360_v9  ;;  %729 = vmatprep.mubr.bf16.mxu0 %v4403_v16  ;;  %v4448_v9 = vld [vmem:[%s6106_s6 + $0x3a0] ss:$8 sps:$4 sm:$0xff]  }
  0x50   : > { %1002 = vmatprep.mubr.bf16.mxu1 %v4405_v17  ;;  %v4457_v16 = vld [vmem:[%s6106_s6 + $0x280] ss:$8 sps:$4 sm:$0xff]  }
  0x51   : > { %1277 = vmatpush1.bf16.msra.mxu0 %v4355_v10  ;;  %v4453_v10 = vld [vmem:[%s6106_s6 + $0x294] ss:$8 sps:$4 sm:$0xff]   ;;  %v4460_v17 = vld [vmem:[%s6106_s6 + $0x380] ss:$8 sps:$4 sm:$0xff]  }
  0x52   : > { %1607 = vmatpush1.bf16.msra.mxu1 %v4358_v11  ;;  %1278 = vmatprep.subr.bf16.mxu0 %v4363_v12  ;;  %v4456_v11 = vld [vmem:[%s6106_s6 + $0x394] ss:$8 sps:$4 sm:$0xff]   ;;  %v4451_v12 = vld [vmem:[%s6106_s6 + $0x290] ss:$8 sps:$4 sm:$0xff]  }
  0x53   : > { %1608 = vmatprep.subr.bf16.mxu1 %v4366_v13  ;;  %v4454_v13 = vld [vmem:[%s6106_s6 + $0x390] ss:$8 sps:$4 sm:$0xff]  }
  0x54   : > { %730 = vmatmul.mubr.bf16.gmra.mxu0 %v4407_v18  ;;  %v4471_v18 = vld [vmem:[%s6106_s6 + $0x474] ss:$8 sps:$4 sm:$0xff]  }
  0x55   : > { %1003 = vmatmul.mubr.bf16.gmra.mxu1 %v4408_v19  ;;  %1279 = vmatpush1.bf16.msra.mxu0 %v4361_v14  ;;  %v4459_v14 = vld [vmem:[%s6106_s6 + $0x284] ss:$8 sps:$4 sm:$0xff]   ;;  %v4474_v19 = vld [vmem:[%s6106_s6 + $0x574] ss:$8 sps:$4 sm:$0xff]  }
  0x56   : > { %1609 = vmatpush1.bf16.msra.mxu1 %v4364_v15  ;;  %1280 = vmatprep.subr.bf16.mxu0 %v4369_v20  ;;  %v4462_v15 = vld [vmem:[%s6106_s6 + $0x384] ss:$8 sps:$4 sm:$0xff]   ;;  %v4463_v20 = vld [vmem:[%s5186_s13] ss:$8 sps:$4 sm:$0xff]  }
  0x57   : > { %1610 = vmatprep.subr.bf16.mxu1 %v4372_v21  ;;  %739 = vmatprep.mubr.bf16.mxu0 %v4421_v28  ;;  %v4466_v21 = vld [vmem:[%s5198_s21] ss:$8 sps:$4 sm:$0xff]  }
  0x58   : > { %1012 = vmatprep.mubr.bf16.mxu1 %v4423_v29  ;;  %v4475_v28 = vld [vmem:[%s6106_s6 + $0x460] ss:$8 sps:$4 sm:$0xff]  }
  0x59   : > { %1281 = vmatpush1.bf16.msra.mxu0 %v4367_v22  ;;  %v4469_v22 = vld [vmem:[%s6106_s6 + $0x470] ss:$8 sps:$4 sm:$0xff]   ;;  %v4478_v29 = vld [vmem:[%s6106_s6 + $0x560] ss:$8 sps:$4 sm:$0xff]  }
  0x5a   : > { %1611 = vmatpush1.bf16.msra.mxu1 %v4370_v23  ;;  %1282 = vmatprep.subr.bf16.mxu0 %v4375_v24  ;;  %v4472_v23 = vld [vmem:[%s6106_s6 + $0x570] ss:$8 sps:$4 sm:$0xff]   ;;  %v4477_v24 = vld [vmem:[%s6106_s6 + $0x464] ss:$8 sps:$4 sm:$0xff]  }
  0x5b   : > { %1612 = vmatprep.subr.bf16.mxu1 %v4378_v25  ;;  %v4480_v25 = vld [vmem:[%s6106_s6 + $0x564] ss:$8 sps:$4 sm:$0xff]  }
  0x5c   : > { %740 = vmatmul.mubr.bf16.gmra.mxu0 %v4425_v30  ;;  %v4486_v30 = vld [vmem:[%s6106_s6 + $0x454] ss:$8 sps:$4 sm:$0xff]  }
  0x5d   : > { %1013 = vmatmul.mubr.bf16.gmra.mxu1 %v4426_v31  ;;  %1283 = vmatpush1.bf16.msra.mxu0 %v4373_v26  ;;  %v4481_v26 = vld [vmem:[%s5186_s13 + $0x14] ss:$8 sps:$4 sm:$0xff]  }
  0x5e   : > { %1613 = vmatpush1.bf16.msra.mxu1 %v4376_v27  ;;  %1284 = vmatprep.subr.bf16.mxu0 %v4381_v32  ;;  %v4490_v27 = vld [vmem:[%s5198_s21 + $0x14] ss:$8 sps:$4 sm:$0xff]   ;;  %v4483_v32 = vld [vmem:[%s5186_s13 + $0x10] ss:$8 sps:$4 sm:$0xff]  }
  0x5f   : > { %1614 = vmatprep.subr.bf16.mxu1 %v4384_v33  ;;  %749 = vmatprep.mubr.bf16.mxu0 %v4439_v40  ;;  %v4489_v31 = vld [vmem:[%s6106_s6 + $0x554] ss:$8 sps:$4 sm:$0xff]   ;;  %v4484_v33 = vld [vmem:[%s6106_s6 + $0x450] ss:$8 sps:$4 sm:$0xff]   ;;  %v4493_v40 = vld [vmem:[%s6106_s6 + $0x440] ss:$8 sps:$4 sm:$0xff]  }
  0x60   : > { %1022 = vmatprep.mubr.bf16.mxu1 %v4441_v41  ;;  %v4496_v41 = vld [vmem:[%s6106_s6 + $0x540] ss:$8 sps:$4 sm:$0xff]  }
  0x61   : > { %1285 = vmatpush1.bf16.msra.mxu0 %v4379_v34  ;;  %v4487_v34 = vld [vmem:[%s6106_s6 + $0x550] ss:$8 sps:$4 sm:$0xff]  }
  0x62   : > { %1615 = vmatpush1.bf16.msra.mxu1 %v4382_v35  ;;  %1286 = vmatprep.subr.bf16.mxu0 %v4387_v36  ;;  %v4492_v35 = vld [vmem:[%s5198_s21 + $0x10] ss:$8 sps:$4 sm:$0xff]   ;;  %v4495_v36 = vld [vmem:[%s6106_s6 + $0x444] ss:$8 sps:$4 sm:$0xff]  }
  0x63   : > { %1616 = vmatprep.subr.bf16.mxu1 %v4390_v37  ;;  %v4498_v37 = vld [vmem:[%s6106_s6 + $0x544] ss:$8 sps:$4 sm:$0xff]  }
  0x64   : > { %750 = vmatmul.mubr.bf16.gmra.mxu0 %v4443_v42  ;;  %v4504_v42 = vld [vmem:[%s6106_s6 + $0x434] ss:$8 sps:$4 sm:$0xff]  }
  0x65   : > { %1023 = vmatmul.mubr.bf16.gmra.mxu1 %v4444_v43  ;;  %1287 = vmatpush1.bf16.msra.mxu0 %v4385_v38  ;;  %v4499_v38 = vld [vmem:[%s5186_s13 + $0x24] ss:$8 sps:$4 sm:$0xff]   ;;  %v4507_v43 = vld [vmem:[%s6106_s6 + $0x534] ss:$8 sps:$4 sm:$0xff]  }
  0x66   : > { %1617 = vmatpush1.bf16.msra.mxu1 %v4388_v39  ;;  %1288 = vmatprep.subr.bf16.mxu0 %v4393_v44  ;;  %v4508_v39 = vld [vmem:[%s5198_s21 + $0x24] ss:$8 sps:$4 sm:$0xff]   ;;  %v4501_v44 = vld [vmem:[%s5186_s13 + $0x20] ss:$8 sps:$4 sm:$0xff]  }
  0x67   : > { %1618 = vmatprep.subr.bf16.mxu1 %v4396_v45  ;;  %1306 = vmatprep.mubr.bf16.mxu0 %v4465_v54  ;;  %v4502_v45 = vld [vmem:[%s6106_s6 + $0x430] ss:$8 sps:$4 sm:$0xff]   ;;  %v4522_v54 = vld [vmem:[%s6106_s6 + $0x414] ss:$8 sps:$4 sm:$0xff]  }
  0x68   : > { %1636 = vmatprep.mubr.bf16.mxu1 %v4468_v55  ;;  %v4525_v55 = vld [vmem:[%s6106_s6 + $0x514] ss:$8 sps:$4 sm:$0xff]  }
  0x69   : > { %1289 = vmatpush1.bf16.msra.mxu0 %v4391_v46  ;;  %v4505_v46 = vld [vmem:[%s6106_s6 + $0x530] ss:$8 sps:$4 sm:$0xff]  }
  0x6a   : > { %1619 = vmatpush1.bf16.msra.mxu1 %v4394_v47  ;;  %1290 = vmatprep.subr.bf16.mxu0 %v4399_v48  ;;  %v4510_v47 = vld [vmem:[%s5198_s21 + $0x20] ss:$8 sps:$4 sm:$0xff]   ;;  %v4513_v48 = vld [vmem:[%s6106_s6 + $0x424] ss:$8 sps:$4 sm:$0xff]  }
  0x6b   : > { %1620 = vmatprep.subr.bf16.mxu1 %v4402_v49  ;;  %v4516_v49 = vld [vmem:[%s6106_s6 + $0x524] ss:$8 sps:$4 sm:$0xff]  }
  0x6d   : > { %1291 = vmatpush2.bf16.msra.mxu0 %v4397_v50  ;;  %v4517_v50 = vld [vmem:[%s5186_s13 + $0x34] ss:$8 sps:$4 sm:$0xff]  }
  0x6e   : > { %1621 = vmatpush2.bf16.msra.mxu1 %v4400_v51  ;;  %1292 = vmatprep.subr.bf16.mxu0 %v4411_v52  ;;  %v4526_v51 = vld [vmem:[%s5198_s21 + $0x34] ss:$8 sps:$4 sm:$0xff]   ;;  %v4511_v52 = vld [vmem:[%s6106_s6 + $0x420] ss:$8 sps:$4 sm:$0xff]  }
  0x6f   : > { %1622 = vmatprep.subr.bf16.mxu1 %v4414_v53  ;;  %v4514_v53 = vld [vmem:[%s6106_s6 + $0x520] ss:$8 sps:$4 sm:$0xff]  }
  0x71   : > { %1293 = vmatpush2.bf16.msra.mxu0 %v4409_v56  ;;  %v4519_v56 = vld [vmem:[%s5186_s13 + $0x30] ss:$8 sps:$4 sm:$0xff]  }
  0x72   : > { %1623 = vmatpush2.bf16.msra.mxu1 %v4412_v57  ;;  %1294 = vmatprep.subr.bf16.mxu0 %v4417_v58  ;;  %v4520_v57 = vld [vmem:[%s6106_s6 + $0x410] ss:$8 sps:$4 sm:$0xff]  }
  0x73   : > { %1624 = vmatprep.subr.bf16.mxu1 %v4420_v59  ;;  %v4523_v58 = vld [vmem:[%s6106_s6 + $0x510] ss:$8 sps:$4 sm:$0xff]  }
  0x74   : > { %v4528_v59 = vld [vmem:[%s5198_s21 + $0x30] ss:$8 sps:$4 sm:$0xff]  }
  0x75   : > { %1295 = vmatpush2.bf16.msra.mxu0 %v4415_v60  ;;  %v4531_v60 = vld [vmem:[%s6106_s6 + $0x404] ss:$8 sps:$4 sm:$0xff]  }
  0x76   : > { %1625 = vmatpush2.bf16.msra.mxu1 %v4418_v61  ;;  %1296 = vmatprep.subr.bf16.mxu0 %v4429_v62  ;;  %v4534_v61 = vld [vmem:[%s6106_s6 + $0x504] ss:$8 sps:$4 sm:$0xff]  }
  0x77   : > { %1626 = vmatprep.subr.bf16.mxu1 %v4432_v63  ;;  %v4585_v62 = vld [vmem:[%s5374_s23 + $0x4] ss:$8 sps:$4 sm:$0xff]  }
  0x78   : > { %v4588_v63 = vld [vmem:[%s5383_s30 + $0x4] ss:$8 sps:$4 sm:$0xff]  }
  0x79   : > { %1297 = vmatpush2.bf16.msra.mxu0 %v4427_v0  ;;  %v4529_v0 = vld [vmem:[%s6106_s6 + $0x400] ss:$8 sps:$4 sm:$0xff]  }
  0x7a   : > { %1627 = vmatpush2.bf16.msra.mxu1 %v4430_v1  ;;  %1298 = vmatprep.subr.bf16.mxu0 %v4435_v2  ;;  %v4532_v1 = vld [vmem:[%s6106_s6 + $0x500] ss:$8 sps:$4 sm:$0xff]   ;;  %v4537_v2 = vld [vmem:[%s6106_s6 + $0x4f4] ss:$8 sps:$4 sm:$0xff]  }
  0x7b   : > { %1628 = vmatprep.subr.bf16.mxu1 %v4438_v3  ;;  %v4540_v3 = vld [vmem:[%s6106_s6 + $0x5f4] ss:$8 sps:$4 sm:$0xff]  }
  0x7d   : > { %1299 = vmatpush2.bf16.msra.mxu0 %v4433_v4  ;;  %v4535_v4 = vld [vmem:[%s6106_s6 + $0x4f0] ss:$8 sps:$4 sm:$0xff]  }
  0x7e   : > { %1629 = vmatpush2.bf16.msra.mxu1 %v4436_v5  ;;  %1300 = vmatprep.subr.bf16.mxu0 %v4447_v6  ;;  %v4538_v5 = vld [vmem:[%s6106_s6 + $0x5f0] ss:$8 sps:$4 sm:$0xff]   ;;  %v4543_v6 = vld [vmem:[%s6106_s6 + $0x4e4] ss:$8 sps:$4 sm:$0xff]  }
  0x7f   : > { %1630 = vmatprep.subr.bf16.mxu1 %v4450_v7  ;;  %v4546_v7 = vld [vmem:[%s6106_s6 + $0x5e4] ss:$8 sps:$4 sm:$0xff]  }
  0x81   : > { %1301 = vmatpush2.bf16.msra.mxu0 %v4445_v8  ;;  %v4541_v8 = vld [vmem:[%s6106_s6 + $0x4e0] ss:$8 sps:$4 sm:$0xff]  }
  0x82   : > { %1631 = vmatpush2.bf16.msra.mxu1 %v4448_v9  ;;  %1302 = vmatprep.subr.bf16.mxu0 %v4453_v10  ;;  %v4544_v9 = vld [vmem:[%s6106_s6 + $0x5e0] ss:$8 sps:$4 sm:$0xff]   ;;  %v4549_v10 = vld [vmem:[%s6106_s6 + $0x4d4] ss:$8 sps:$4 sm:$0xff]  }
  0x83   : > { %1632 = vmatprep.subr.bf16.mxu1 %v4456_v11  ;;  %v4552_v11 = vld [vmem:[%s6106_s6 + $0x5d4] ss:$8 sps:$4 sm:$0xff]  }
  0x85   : > { %1303 = vmatpush2.bf16.msra.mxu0 %v4451_v12  ;;  %v4547_v12 = vld [vmem:[%s6106_s6 + $0x4d0] ss:$8 sps:$4 sm:$0xff]  }
  0x86   : > { %1633 = vmatpush2.bf16.msra.mxu1 %v4454_v13  ;;  %1304 = vmatprep.subr.bf16.mxu0 %v4459_v14  ;;  %v4550_v13 = vld [vmem:[%s6106_s6 + $0x5d0] ss:$8 sps:$4 sm:$0xff]   ;;  %v4555_v14 = vld [vmem:[%s6106_s6 + $0x4c4] ss:$8 sps:$4 sm:$0xff]  }
  0x87   : > { %1634 = vmatprep.subr.bf16.mxu1 %v4462_v15  ;;  %v4558_v15 = vld [vmem:[%s6106_s6 + $0x5c4] ss:$8 sps:$4 sm:$0xff]  }
  0x89   : > { %1305 = vmatpush2.bf16.msra.mxu0 %v4457_v16  ;;  %v4553_v16 = vld [vmem:[%s6106_s6 + $0x4c0] ss:$8 sps:$4 sm:$0xff]  }
  0x8a   : > { %1635 = vmatpush2.bf16.msra.mxu1 %v4460_v17  ;;  %1934 = vmatprep.subr.bf16.mxu0 %v4471_v18  ;;  %v4556_v17 = vld [vmem:[%s6106_s6 + $0x5c0] ss:$8 sps:$4 sm:$0xff]   ;;  %v4561_v18 = vld [vmem:[%s6106_s6 + $0x4b4] ss:$8 sps:$4 sm:$0xff]  }
  0x8b   : > { %2264 = vmatprep.subr.bf16.mxu1 %v4474_v19  ;;  %v4564_v19 = vld [vmem:[%s6106_s6 + $0x5b4] ss:$8 sps:$4 sm:$0xff]  }
  0x8c   : > { %1307 = vmatmul.mubr.bf16.vlgmr.msra.gmra.mxu0 %v4463_v20  ;;  %v4559_v20 = vld [vmem:[%s6106_s6 + $0x4b0] ss:$8 sps:$4 sm:$0xff]  }
  0x8d   : > { %1637 = vmatmul.mubr.bf16.vlgmr.msra.gmra.mxu1 %v4466_v21  ;;  %1935 = vmatpush1.bf16.msra.mxu0 %v4469_v22  ;;  %v4562_v21 = vld [vmem:[%s6106_s6 + $0x5b0] ss:$8 sps:$4 sm:$0xff]   ;;  %v4567_v22 = vld [vmem:[%s6106_s6 + $0x4a4] ss:$8 sps:$4 sm:$0xff]  }
  0x8e   : > { %2265 = vmatpush1.bf16.msra.mxu1 %v4472_v23  ;;  %1936 = vmatprep.subr.bf16.mxu0 %v4477_v24  ;;  %v4570_v23 = vld [vmem:[%s6106_s6 + $0x5a4] ss:$8 sps:$4 sm:$0xff]   ;;  %v4565_v24 = vld [vmem:[%s6106_s6 + $0x4a0] ss:$8 sps:$4 sm:$0xff]  }
  0x8f   : > { %2266 = vmatprep.subr.bf16.mxu1 %v4480_v25  ;;  %1316 = vmatprep.mubr.bf16.mxu0 %v4481_v26  ;;  %v4568_v25 = vld [vmem:[%s6106_s6 + $0x5a0] ss:$8 sps:$4 sm:$0xff]   ;;  %v4573_v26 = vld [vmem:[%s6106_s6 + $0x494] ss:$8 sps:$4 sm:$0xff]  }
  0x90   : > { %1646 = vmatprep.mubr.bf16.mxu1 %v4490_v27  ;;  %v4576_v27 = vld [vmem:[%s6106_s6 + $0x594] ss:$8 sps:$4 sm:$0xff]  }
  0x91   : > { %1937 = vmatpush1.bf16.msra.mxu0 %v4475_v28  ;;  %v4571_v28 = vld [vmem:[%s6106_s6 + $0x490] ss:$8 sps:$4 sm:$0xff]  }
  0x92   : > { %2267 = vmatpush1.bf16.msra.mxu1 %v4478_v29  ;;  %1938 = vmatprep.subr.bf16.mxu0 %v4486_v30  ;;  %v4574_v29 = vld [vmem:[%s6106_s6 + $0x590] ss:$8 sps:$4 sm:$0xff]   ;;  %v4579_v30 = vld [vmem:[%s6106_s6 + $0x484] ss:$8 sps:$4 sm:$0xff]  }
  0x93   : > { %2268 = vmatprep.subr.bf16.mxu1 %v4489_v31  ;;  %v4582_v31 = vld [vmem:[%s6106_s6 + $0x584] ss:$8 sps:$4 sm:$0xff]  }
  0x94   : > { %1317 = vmatmul.mubr.bf16.gmra.mxu0 %v4483_v32  ;;  %v4577_v32 = vld [vmem:[%s6106_s6 + $0x480] ss:$8 sps:$4 sm:$0xff]  }
  0x95   : > { %1647 = vmatmul.mubr.bf16.gmra.mxu1 %v4492_v35  ;;  %1939 = vmatpush1.bf16.msra.mxu0 %v4484_v33  ;;  %v4580_v33 = vld [vmem:[%s6106_s6 + $0x580] ss:$8 sps:$4 sm:$0xff]   ;;  %v4594_v35 = vld [vmem:[%s6106_s6 + $0x774] ss:$8 sps:$4 sm:$0xff]  }
  0x96   : > { %2269 = vmatpush1.bf16.msra.mxu1 %v4487_v34  ;;  %1940 = vmatprep.subr.bf16.mxu0 %v4495_v36  ;;  %v4591_v34 = vld [vmem:[%s6106_s6 + $0x674] ss:$8 sps:$4 sm:$0xff]   ;;  %v4583_v36 = vld [vmem:[%s5374_s23] ss:$8 sps:$4 sm:$0xff]  }
  0x97   : > { %2270 = vmatprep.subr.bf16.mxu1 %v4498_v37  ;;  %1326 = vmatprep.mubr.bf16.mxu0 %v4499_v38  ;;  %v4586_v37 = vld [vmem:[%s5383_s30] ss:$8 sps:$4 sm:$0xff]   ;;  %v4589_v38 = vld [vmem:[%s6106_s6 + $0x670] ss:$8 sps:$4 sm:$0xff]  }
  0x98   : > { %1656 = vmatprep.mubr.bf16.mxu1 %v4508_v39  ;;  %v4592_v39 = vld [vmem:[%s6106_s6 + $0x770] ss:$8 sps:$4 sm:$0xff]  }
  0x99   : > { %1941 = vmatpush1.bf16.msra.mxu0 %v4493_v40  ;;  %v4597_v40 = vld [vmem:[%s6106_s6 + $0x664] ss:$8 sps:$4 sm:$0xff]  }
  0x9a   : > { %2271 = vmatpush1.bf16.msra.mxu1 %v4496_v41  ;;  %1942 = vmatprep.subr.bf16.mxu0 %v4504_v42  ;;  %v4600_v41 = vld [vmem:[%s6106_s6 + $0x764] ss:$8 sps:$4 sm:$0xff]   ;;  %v4601_v42 = vld [vmem:[%s5374_s23 + $0x14] ss:$8 sps:$4 sm:$0xff]  }
  0x9b   : > { %2272 = vmatprep.subr.bf16.mxu1 %v4507_v43  ;;  %v4610_v43 = vld [vmem:[%s5383_s30 + $0x14] ss:$8 sps:$4 sm:$0xff]  }
  0x9c   : > { %1327 = vmatmul.mubr.bf16.gmra.mxu0 %v4501_v44  ;;  %v4595_v44 = vld [vmem:[%s6106_s6 + $0x660] ss:$8 sps:$4 sm:$0xff]  }
  0x9d   : > { %1657 = vmatmul.mubr.bf16.gmra.mxu1 %v4510_v47  ;;  %1943 = vmatpush1.bf16.msra.mxu0 %v4502_v45  ;;  %v4598_v45 = vld [vmem:[%s6106_s6 + $0x760] ss:$8 sps:$4 sm:$0xff]   ;;  %v4609_v47 = vld [vmem:[%s6106_s6 + $0x754] ss:$8 sps:$4 sm:$0xff]  }
  0x9e   : > { %2273 = vmatpush1.bf16.msra.mxu1 %v4505_v46  ;;  %1944 = vmatprep.subr.bf16.mxu0 %v4513_v48  ;;  %v4606_v46 = vld [vmem:[%s6106_s6 + $0x654] ss:$8 sps:$4 sm:$0xff]   ;;  %v4603_v48 = vld [vmem:[%s5374_s23 + $0x10] ss:$8 sps:$4 sm:$0xff]  }
  0x9f   : > { %2274 = vmatprep.subr.bf16.mxu1 %v4516_v49  ;;  %1336 = vmatprep.mubr.bf16.mxu0 %v4517_v50  ;;  %v4604_v49 = vld [vmem:[%s6106_s6 + $0x650] ss:$8 sps:$4 sm:$0xff]  }
  0xa0   : > { %1666 = vmatprep.mubr.bf16.mxu1 %v4526_v51  ;;  %v4607_v50 = vld [vmem:[%s6106_s6 + $0x750] ss:$8 sps:$4 sm:$0xff]  }
  0xa1   : > { %1945 = vmatpush1.bf16.msra.mxu0 %v4511_v52  ;;  %v4612_v51 = vld [vmem:[%s5383_s30 + $0x10] ss:$8 sps:$4 sm:$0xff]   ;;  %v4615_v52 = vld [vmem:[%s6106_s6 + $0x644] ss:$8 sps:$4 sm:$0xff]  }
  0xa2   : > { %2275 = vmatpush1.bf16.msra.mxu1 %v4514_v53  ;;  %1946 = vmatprep.subr.bf16.mxu0 %v4522_v54  ;;  %v4618_v53 = vld [vmem:[%s6106_s6 + $0x744] ss:$8 sps:$4 sm:$0xff]  }
  0xa3   : > { %2276 = vmatprep.subr.bf16.mxu1 %v4525_v55  ;;  %v4619_v54 = vld [vmem:[%s5374_s23 + $0x24] ss:$8 sps:$4 sm:$0xff]  }
  0xa4   : > { %1337 = vmatmul.mubr.bf16.gmra.mxu0 %v4519_v56  ;;  %v4628_v55 = vld [vmem:[%s5383_s30 + $0x24] ss:$8 sps:$4 sm:$0xff]   ;;  %v4613_v56 = vld [vmem:[%s6106_s6 + $0x640] ss:$8 sps:$4 sm:$0xff]  }
  0xa5   : > { %1667 = vmatmul.mubr.bf16.gmra.mxu1 %v4528_v59  ;;  %1947 = vmatpush1.bf16.msra.mxu0 %v4520_v57  ;;  %v4616_v57 = vld [vmem:[%s6106_s6 + $0x740] ss:$8 sps:$4 sm:$0xff]   ;;  %v4627_v59 = vld [vmem:[%s6106_s6 + $0x734] ss:$8 sps:$4 sm:$0xff]  }
  0xa6   : > { %2277 = vmatpush1.bf16.msra.mxu1 %v4523_v58  ;;  %1948 = vmatprep.subr.bf16.mxu0 %v4531_v60  ;;  %v4624_v58 = vld [vmem:[%s6106_s6 + $0x634] ss:$8 sps:$4 sm:$0xff]   ;;  %v4621_v60 = vld [vmem:[%s5374_s23 + $0x20] ss:$8 sps:$4 sm:$0xff]  }
  0xa7   : > { %2278 = vmatprep.subr.bf16.mxu1 %v4534_v61  ;;  %1966 = vmatprep.mubr.bf16.mxu0 %v4585_v62  ;;  %v4622_v61 = vld [vmem:[%s6106_s6 + $0x630] ss:$8 sps:$4 sm:$0xff]  }
  0xa8   : > { %2296 = vmatprep.mubr.bf16.mxu1 %v4588_v63  ;;  %v4625_v62 = vld [vmem:[%s6106_s6 + $0x730] ss:$8 sps:$4 sm:$0xff]   ;;  %v4630_v63 = vld [vmem:[%s5383_s30 + $0x20] ss:$8 sps:$4 sm:$0xff]  }
  0xa9   : > { %1949 = vmatpush1.bf16.msra.mxu0 %v4529_v0  ;;  %v4633_v0 = vld [vmem:[%s6106_s6 + $0x624] ss:$8 sps:$4 sm:$0xff]  }
  0xaa   : > { %2279 = vmatpush1.bf16.msra.mxu1 %v4532_v1  ;;  %1950 = vmatprep.subr.bf16.mxu0 %v4537_v2  ;;  %v4636_v1 = vld [vmem:[%s6106_s6 + $0x724] ss:$8 sps:$4 sm:$0xff]   ;;  %v4637_v2 = vld [vmem:[%s5374_s23 + $0x34] ss:$8 sps:$4 sm:$0xff]  }
  0xab   : > { %2280 = vmatprep.subr.bf16.mxu1 %v4540_v3  ;;  %v4646_v3 = vld [vmem:[%s5383_s30 + $0x34] ss:$8 sps:$4 sm:$0xff]  }
  0xad   : > { %1951 = vmatpush2.bf16.msra.mxu0 %v4535_v4  ;;  %v4631_v4 = vld [vmem:[%s6106_s6 + $0x620] ss:$8 sps:$4 sm:$0xff]  }
  0xae   : > { %2281 = vmatpush2.bf16.msra.mxu1 %v4538_v5  ;;  %1952 = vmatprep.subr.bf16.mxu0 %v4543_v6  ;;  %v4634_v5 = vld [vmem:[%s6106_s6 + $0x720] ss:$8 sps:$4 sm:$0xff]   ;;  %v4642_v6 = vld [vmem:[%s6106_s6 + $0x614] ss:$8 sps:$4 sm:$0xff]  }
  0xaf   : > { %2282 = vmatprep.subr.bf16.mxu1 %v4546_v7  ;;  %v4645_v7 = vld [vmem:[%s6106_s6 + $0x714] ss:$8 sps:$4 sm:$0xff]  }
  0xb1   : > { %1953 = vmatpush2.bf16.msra.mxu0 %v4541_v8  ;;  %v4639_v8 = vld [vmem:[%s5374_s23 + $0x30] ss:$8 sps:$4 sm:$0xff]  }
  0xb2   : > { %2283 = vmatpush2.bf16.msra.mxu1 %v4544_v9  ;;  %1954 = vmatprep.subr.bf16.mxu0 %v4549_v10  ;;  %v4640_v9 = vld [vmem:[%s6106_s6 + $0x610] ss:$8 sps:$4 sm:$0xff]  }
  0xb3   : > { %2284 = vmatprep.subr.bf16.mxu1 %v4552_v11  ;;  %v4643_v10 = vld [vmem:[%s6106_s6 + $0x710] ss:$8 sps:$4 sm:$0xff]  }
  0xb4   : > { %v4648_v11 = vld [vmem:[%s5383_s30 + $0x30] ss:$8 sps:$4 sm:$0xff]  }
  0xb5   : > { %1955 = vmatpush2.bf16.msra.mxu0 %v4547_v12  ;;  %v4651_v12 = vld [vmem:[%s6106_s6 + $0x604] ss:$8 sps:$4 sm:$0xff]  }
  0xb6   : > { %2285 = vmatpush2.bf16.msra.mxu1 %v4550_v13  ;;  %1956 = vmatprep.subr.bf16.mxu0 %v4555_v14  ;;  %v4654_v13 = vld [vmem:[%s6106_s6 + $0x704] ss:$8 sps:$4 sm:$0xff]  }
  0xb7   : > { %2286 = vmatprep.subr.bf16.mxu1 %v4558_v15  ;;  %v4705_v14 = vld [vmem:[%s5011_s10 + $0xc] ss:$8 sps:$4 sm:$0xff]  }
  0xb8   : > { %v4708_v15 = vld [vmem:[%s4996_s20 + $0xc] ss:$8 sps:$4 sm:$0xff]  }
  0xb9   : > { %1957 = vmatpush2.bf16.msra.mxu0 %v4553_v16  ;;  %v4649_v16 = vld [vmem:[%s6106_s6 + $0x600] ss:$8 sps:$4 sm:$0xff]  }
  0xba   : > { %2287 = vmatpush2.bf16.msra.mxu1 %v4556_v17  ;;  %1958 = vmatprep.subr.bf16.mxu0 %v4561_v18  ;;  %v4652_v17 = vld [vmem:[%s6106_s6 + $0x700] ss:$8 sps:$4 sm:$0xff]   ;;  %v4657_v18 = vld [vmem:[%s6106_s6 + $0x6f4] ss:$8 sps:$4 sm:$0xff]  }
  0xbb   : > { %2288 = vmatprep.subr.bf16.mxu1 %v4564_v19  ;;  %v4660_v19 = vld [vmem:[%s6106_s6 + $0x7f4] ss:$8 sps:$4 sm:$0xff]  }
  0xbd   : > { %1959 = vmatpush2.bf16.msra.mxu0 %v4559_v20  ;;  %v4655_v20 = vld [vmem:[%s6106_s6 + $0x6f0] ss:$8 sps:$4 sm:$0xff]  }
  0xbe   : > { %2289 = vmatpush2.bf16.msra.mxu1 %v4562_v21  ;;  %1960 = vmatprep.subr.bf16.mxu0 %v4567_v22  ;;  %v4658_v21 = vld [vmem:[%s6106_s6 + $0x7f0] ss:$8 sps:$4 sm:$0xff]   ;;  %v4663_v22 = vld [vmem:[%s6106_s6 + $0x6e4] ss:$8 sps:$4 sm:$0xff]  }
  0xbf   : > { %2290 = vmatprep.subr.bf16.mxu1 %v4570_v23  ;;  %v4666_v23 = vld [vmem:[%s6106_s6 + $0x7e4] ss:$8 sps:$4 sm:$0xff]  }
  0xc1   : > { %1961 = vmatpush2.bf16.msra.mxu0 %v4565_v24  ;;  %v4661_v24 = vld [vmem:[%s6106_s6 + $0x6e0] ss:$8 sps:$4 sm:$0xff]  }
  0xc2   : > { %2291 = vmatpush2.bf16.msra.mxu1 %v4568_v25  ;;  %1962 = vmatprep.subr.bf16.mxu0 %v4573_v26  ;;  %v4664_v25 = vld [vmem:[%s6106_s6 + $0x7e0] ss:$8 sps:$4 sm:$0xff]   ;;  %v4669_v26 = vld [vmem:[%s6106_s6 + $0x6d4] ss:$8 sps:$4 sm:$0xff]  }
  0xc3   : > { %2292 = vmatprep.subr.bf16.mxu1 %v4576_v27  ;;  %v4672_v27 = vld [vmem:[%s6106_s6 + $0x7d4] ss:$8 sps:$4 sm:$0xff]  }
  0xc5   : > { %1963 = vmatpush2.bf16.msra.mxu0 %v4571_v28  ;;  %v4667_v28 = vld [vmem:[%s6106_s6 + $0x6d0] ss:$8 sps:$4 sm:$0xff]  }
  0xc6   : > { %2293 = vmatpush2.bf16.msra.mxu1 %v4574_v29  ;;  %1964 = vmatprep.subr.bf16.mxu0 %v4579_v30  ;;  %v4670_v29 = vld [vmem:[%s6106_s6 + $0x7d0] ss:$8 sps:$4 sm:$0xff]   ;;  %v4675_v30 = vld [vmem:[%s6106_s6 + $0x6c4] ss:$8 sps:$4 sm:$0xff]  }
  0xc7   : > { %2294 = vmatprep.subr.bf16.mxu1 %v4582_v31  ;;  %v4678_v31 = vld [vmem:[%s6106_s6 + $0x7c4] ss:$8 sps:$4 sm:$0xff]  }
  0xc9   : > { %1965 = vmatpush2.bf16.msra.mxu0 %v4577_v32  ;;  %v4673_v32 = vld [vmem:[%s6106_s6 + $0x6c0] ss:$8 sps:$4 sm:$0xff]  }
  0xca   : > { %2295 = vmatpush2.bf16.msra.mxu1 %v4580_v33  ;;  %2594 = vmatprep.subr.bf16.mxu0 %v4591_v34  ;;  %v4676_v33 = vld [vmem:[%s6106_s6 + $0x7c0] ss:$8 sps:$4 sm:$0xff]   ;;  %v4681_v34 = vld [vmem:[%s6106_s6 + $0x6b4] ss:$8 sps:$4 sm:$0xff]  }
  0xcb   : > { %2924 = vmatprep.subr.bf16.mxu1 %v4594_v35  ;;  %v4684_v35 = vld [vmem:[%s6106_s6 + $0x7b4] ss:$8 sps:$4 sm:$0xff]  }
  0xcc   : > { %1967 = vmatmul.mubr.bf16.vlgmr.msra.gmra.mxu0 %v4583_v36  ;;  %v4679_v36 = vld [vmem:[%s6106_s6 + $0x6b0] ss:$8 sps:$4 sm:$0xff]  }
  0xcd   : > { %2297 = vmatmul.mubr.bf16.vlgmr.msra.gmra.mxu1 %v4586_v37  ;;  %2595 = vmatpush1.bf16.msra.mxu0 %v4589_v38  ;;  %v4682_v37 = vld [vmem:[%s6106_s6 + $0x7b0] ss:$8 sps:$4 sm:$0xff]   ;;  %v4687_v38 = vld [vmem:[%s6106_s6 + $0x6a4] ss:$8 sps:$4 sm:$0xff]  }
  0xce   : > { %2925 = vmatpush1.bf16.msra.mxu1 %v4592_v39  ;;  %2596 = vmatprep.subr.bf16.mxu0 %v4597_v40  ;;  %v4690_v39 = vld [vmem:[%s6106_s6 + $0x7a4] ss:$8 sps:$4 sm:$0xff]   ;;  %v4685_v40 = vld [vmem:[%s6106_s6 + $0x6a0] ss:$8 sps:$4 sm:$0xff]  }
  0xcf   : > { %2926 = vmatprep.subr.bf16.mxu1 %v4600_v41  ;;  %1976 = vmatprep.mubr.bf16.mxu0 %v4601_v42  ;;  %v4688_v41 = vld [vmem:[%s6106_s6 + $0x7a0] ss:$8 sps:$4 sm:$0xff]   ;;  %v4693_v42 = vld [vmem:[%s6106_s6 + $0x694] ss:$8 sps:$4 sm:$0xff]  }
  0xd0   : > { %2306 = vmatprep.mubr.bf16.mxu1 %v4610_v43  ;;  %v4696_v43 = vld [vmem:[%s6106_s6 + $0x794] ss:$8 sps:$4 sm:$0xff]  }
  0xd1   : > { %2597 = vmatpush1.bf16.msra.mxu0 %v4595_v44  ;;  %v4691_v44 = vld [vmem:[%s6106_s6 + $0x690] ss:$8 sps:$4 sm:$0xff]  }
  0xd2   : > { %2927 = vmatpush1.bf16.msra.mxu1 %v4598_v45  ;;  %2598 = vmatprep.subr.bf16.mxu0 %v4606_v46  ;;  %v4694_v45 = vld [vmem:[%s6106_s6 + $0x790] ss:$8 sps:$4 sm:$0xff]   ;;  %v4699_v46 = vld [vmem:[%s6106_s6 + $0x684] ss:$8 sps:$4 sm:$0xff]  }
  0xd3   : > { %2928 = vmatprep.subr.bf16.mxu1 %v4609_v47  ;;  %v4702_v47 = vld [vmem:[%s6106_s6 + $0x784] ss:$8 sps:$4 sm:$0xff]  }
  0xd4   : > { %1977 = vmatmul.mubr.bf16.gmra.mxu0 %v4603_v48  ;;  %v4697_v48 = vld [vmem:[%s6106_s6 + $0x680] ss:$8 sps:$4 sm:$0xff]  }
  0xd5   : > { %2307 = vmatmul.mubr.bf16.gmra.mxu1 %v4612_v51  ;;  %2599 = vmatpush1.bf16.msra.mxu0 %v4604_v49  ;;  %v4700_v49 = vld [vmem:[%s6106_s6 + $0x780] ss:$8 sps:$4 sm:$0xff]  }
  0xd6   : > { %2929 = vmatpush1.bf16.msra.mxu1 %v4607_v50  ;;  %2600 = vmatprep.subr.bf16.mxu0 %v4615_v52  ;;  %v4711_v50 = vld [vmem:[%s6106_s6 + $0x874] ss:$8 sps:$4 sm:$0xff]   ;;  %v4703_v51 = vld [vmem:[%s5011_s10 + $0x8] ss:$8 sps:$4 sm:$0xff]  }
  0xd7   : > { %2930 = vmatprep.subr.bf16.mxu1 %v4618_v53  ;;  %1986 = vmatprep.mubr.bf16.mxu0 %v4619_v54  ;;  %v4706_v52 = vld [vmem:[%s4996_s20 + $0x8] ss:$8 sps:$4 sm:$0xff]   ;;  %v4714_v54 = vld [vmem:[%s6106_s6 + $0x864] ss:$8 sps:$4 sm:$0xff]  }
  0xd8   : > { %2316 = vmatprep.mubr.bf16.mxu1 %v4628_v55  ;;  %v4709_v53 = vld [vmem:[%s6106_s6 + $0x870] ss:$8 sps:$4 sm:$0xff]   ;;  %v4715_v55 = vld [vmem:[%s5011_s10 + $0x1c] ss:$8 sps:$4 sm:$0xff]  }
  0xd9   : > { %2601 = vmatpush1.bf16.msra.mxu0 %v4613_v56  ;;  %v4721_v56 = vld [vmem:[%s4996_s20 + $0x1c] ss:$8 sps:$4 sm:$0xff]  }
  0xda   : > { %2931 = vmatpush1.bf16.msra.mxu1 %v4616_v57  ;;  %2602 = vmatprep.subr.bf16.mxu0 %v4624_v58 }
  0xdb   : > { %2932 = vmatprep.subr.bf16.mxu1 %v4627_v59 }
  0xdc   : > { %1987 = vmatmul.mubr.bf16.gmra.mxu0 %v4621_v60  ;;  %v4712_v60 = vld [vmem:[%s6106_s6 + $0x860] ss:$8 sps:$4 sm:$0xff]  }
  0xdd   : > { %2317 = vmatmul.mubr.bf16.gmra.mxu1 %v4630_v63  ;;  %2603 = vmatpush1.bf16.msra.mxu0 %v4622_v61  ;;  %v4720_v63 = vld [vmem:[%s6106_s6 + $0x854] ss:$8 sps:$4 sm:$0xff]  }
  0xde   : > { %2933 = vmatpush1.bf16.msra.mxu1 %v4625_v62  ;;  %2604 = vmatprep.subr.bf16.mxu0 %v4633_v0 }
  0xdf   : > { %2934 = vmatprep.subr.bf16.mxu1 %v4636_v1  ;;  %1996 = vmatprep.mubr.bf16.mxu0 %v4637_v2 }
  0xe0   : > { %2326 = vmatprep.mubr.bf16.mxu1 %v4646_v3  ;;  %v4717_v3 = vld [vmem:[%s5011_s10 + $0x18] ss:$8 sps:$4 sm:$0xff]  }
  0xe1   : > { %2605 = vmatpush1.bf16.msra.mxu0 %v4631_v4  ;;  %v4723_v4 = vld [vmem:[%s4996_s20 + $0x18] ss:$8 sps:$4 sm:$0xff]  }
  0xe2   : > { %2935 = vmatpush1.bf16.msra.mxu1 %v4634_v5  ;;  %2606 = vmatprep.subr.bf16.mxu0 %v4642_v6  ;;  %v4718_v6 = vld [vmem:[%s6106_s6 + $0x850] ss:$8 sps:$4 sm:$0xff]  }
  0xe3   : > { %2936 = vmatprep.subr.bf16.mxu1 %v4645_v7 }
  0xe4   : > { %1997 = vmatmul.mubr.bf16.gmra.mxu0 %v4639_v8 }
  0xe5   : > { %2327 = vmatmul.mubr.bf16.gmra.mxu1 %v4648_v11  ;;  %2607 = vmatpush1.bf16.msra.mxu0 %v4640_v9  ;;  %v4726_v9 = vld [vmem:[%s6106_s6 + $0x844] ss:$8 sps:$4 sm:$0xff]  }
  0xe6   : > { %2937 = vmatpush1.bf16.msra.mxu1 %v4643_v10  ;;  %2608 = vmatprep.subr.bf16.mxu0 %v4651_v12  ;;  %v4727_v11 = vld [vmem:[%s5011_s10 + $0x2c] ss:$8 sps:$4 sm:$0xff]  }
  0xe7   : > { %2938 = vmatprep.subr.bf16.mxu1 %v4654_v13  ;;  %2626 = vmatprep.mubr.bf16.mxu0 %v4705_v14  ;;  %v4733_v12 = vld [vmem:[%s4996_s20 + $0x2c] ss:$8 sps:$4 sm:$0xff]  }
  0xe8   : > { %2956 = vmatprep.mubr.bf16.mxu1 %v4708_v15  ;;  %v4724_v15 = vld [vmem:[%s6106_s6 + $0x840] ss:$8 sps:$4 sm:$0xff]  }
  0xe9   : > { %2609 = vmatpush1.bf16.msra.mxu0 %v4649_v16 }
  0xea   : > { %2939 = vmatpush1.bf16.msra.mxu1 %v4652_v17  ;;  %2610 = vmatprep.subr.bf16.mxu0 %v4657_v18  ;;  %v4732_v17 = vld [vmem:[%s6106_s6 + $0x834] ss:$8 sps:$4 sm:$0xff]  }
  0xeb   : > { %2940 = vmatprep.subr.bf16.mxu1 %v4660_v19 }
  0xed   : > { %2611 = vmatpush2.bf16.msra.mxu0 %v4655_v20 }
  0xee   : > { %2941 = vmatpush2.bf16.msra.mxu1 %v4658_v21  ;;  %2612 = vmatprep.subr.bf16.mxu0 %v4663_v22  ;;  %v4729_v21 = vld [vmem:[%s5011_s10 + $0x28] ss:$8 sps:$4 sm:$0xff]  }
  0xef   : > { %2942 = vmatprep.subr.bf16.mxu1 %v4666_v23  ;;  %v4735_v22 = vld [vmem:[%s4996_s20 + $0x28] ss:$8 sps:$4 sm:$0xff]  }
  0xf1   : > { %2613 = vmatpush2.bf16.msra.mxu0 %v4661_v24 }
  0xf2   : > { %2943 = vmatpush2.bf16.msra.mxu1 %v4664_v25  ;;  %2614 = vmatprep.subr.bf16.mxu0 %v4669_v26  ;;  %v4730_v25 = vld [vmem:[%s6106_s6 + $0x830] ss:$8 sps:$4 sm:$0xff]  }
  0xf3   : > { %2944 = vmatprep.subr.bf16.mxu1 %v4672_v27  ;;  %v4738_v27 = vld [vmem:[%s6106_s6 + $0x824] ss:$8 sps:$4 sm:$0xff]  }
  0xf5   : > { %2615 = vmatpush2.bf16.msra.mxu0 %v4667_v28 }
  0xf6   : > { %2945 = vmatpush2.bf16.msra.mxu1 %v4670_v29  ;;  %2616 = vmatprep.subr.bf16.mxu0 %v4675_v30  ;;  %v4739_v30 = vld [vmem:[%s5011_s10 + $0x3c] ss:$8 sps:$4 sm:$0xff]  }
  0xf7   : > { %2946 = vmatprep.subr.bf16.mxu1 %v4678_v31  ;;  %v4745_v31 = vld [vmem:[%s4996_s20 + $0x3c] ss:$8 sps:$4 sm:$0xff]  }
  0xf9   : > { %2617 = vmatpush2.bf16.msra.mxu0 %v4673_v32 }
  0xfa   : > { %2947 = vmatpush2.bf16.msra.mxu1 %v4676_v33  ;;  %2618 = vmatprep.subr.bf16.mxu0 %v4681_v34 }
  0xfb   : > { %2948 = vmatprep.subr.bf16.mxu1 %v4684_v35  ;;  %v4736_v35 = vld [vmem:[%s6106_s6 + $0x820] ss:$8 sps:$4 sm:$0xff]  }
  0xfd   : > { %2619 = vmatpush2.bf16.msra.mxu0 %v4679_v36 }
  0xfe   : > { %2949 = vmatpush2.bf16.msra.mxu1 %v4682_v37  ;;  %2620 = vmatprep.subr.bf16.mxu0 %v4687_v38  ;;  %v4744_v37 = vld [vmem:[%s6106_s6 + $0x814] ss:$8 sps:$4 sm:$0xff]  }
  0xff   : > { %2950 = vmatprep.subr.bf16.mxu1 %v4690_v39 }
 0x101   : > { %2621 = vmatpush2.bf16.msra.mxu0 %v4685_v40 }
 0x102   : > { %2951 = vmatpush2.bf16.msra.mxu1 %v4688_v41  ;;  %2622 = vmatprep.subr.bf16.mxu0 %v4693_v42  ;;  %v4741_v41 = vld [vmem:[%s5011_s10 + $0x38] ss:$8 sps:$4 sm:$0xff]  }
 0x103   : > { %2952 = vmatprep.subr.bf16.mxu1 %v4696_v43  ;;  %v4747_v42 = vld [vmem:[%s4996_s20 + $0x38] ss:$8 sps:$4 sm:$0xff]  }
 0x105   : > { %2623 = vmatpush2.bf16.msra.mxu0 %v4691_v44 }
 0x106   : > { %2953 = vmatpush2.bf16.msra.mxu1 %v4694_v45  ;;  %2624 = vmatprep.subr.bf16.mxu0 %v4699_v46  ;;  %v4742_v45 = vld [vmem:[%s6106_s6 + $0x810] ss:$8 sps:$4 sm:$0xff]  }
 0x107   : > { %2954 = vmatprep.subr.bf16.mxu1 %v4702_v47  ;;  %v4750_v47 = vld [vmem:[%s6106_s6 + $0x804] ss:$8 sps:$4 sm:$0xff]  }
 0x109   : > { %2625 = vmatpush2.bf16.msra.mxu0 %v4697_v48 }
 0x10a   : > { %2955 = vmatpush2.bf16.msra.mxu1 %v4700_v49  ;;  %3254 = vmatprep.subr.bf16.mxu0 %v4711_v50 }
 0x10b   : > { %4206 = vmatprep.subr.bf16.mxu1 %v4711_v50 }
 0x10c   : > { %v721_v57 = vpop.f32.mrf.mxu0  ;;  %2627 = vmatmul.mubr.bf16.vlgmr.msra.gmra.mxu0 %v4703_v51  ;;  %v4777_v51 = vld [vmem:[%s5186_s13 + $0xc] ss:$8 sps:$4 sm:$0xff]  }
 0x10d   : > { %v994_v58 = vpop.f32.mrf.mxu1  ;;  %2957 = vmatmul.mubr.bf16.vlgmr.msra.gmra.mxu1 %v4706_v52  ;;  %3255 = vmatpush1.bf16.msra.mxu0 %v4709_v53  ;;  %v4780_v52 = vld [vmem:[%s5186_s13 + $0x2c] ss:$8 sps:$4 sm:$0xff]  }
 0x10e   : > { %v5724_v59 = vadd.f32 %v994_v58, %v721_v57  ;;  %4222 = vmatpush1.bf16.msra.mxu1 %v4709_v53  ;;  %v723_v61 = vpop.f32.mrf.mxu0  ;;  %3256 = vmatprep.subr.bf16.mxu0 %v4714_v54  ;;  %v4753_v57 = vld [vmem:[%s6106_s6 + $0x8f4] ss:$8 sps:$4 sm:$0xff]  }
 0x10f   : > { %v996_v62 = vpop.f32.mrf.mxu1  ;;  %4207 = vmatprep.subr.bf16.mxu1 %v4714_v54  ;;  %2636 = vmatprep.mubr.bf16.mxu0 %v4715_v55  ;;  %v4748_v55 = vld [vmem:[%s6106_s6 + $0x800] ss:$8 sps:$4 sm:$0xff]  }
 0x110   : > { %v5732_v0 = vadd.f32 %v996_v62, %v723_v61  ;;  %2966 = vmatprep.mubr.bf16.mxu1 %v4721_v56  ;;  %v725_v1 = vpop.f32.mrf.mxu0 }
 0x111   : > { %v998_v2 = vpop.f32.mrf.mxu1  ;;  %3257 = vmatpush1.bf16.msra.mxu0 %v4712_v60 }
 0x112   : > { %v5736_v5 = vadd.f32 %v998_v2, %v725_v1  ;;  %4223 = vmatpush1.bf16.msra.mxu1 %v4712_v60  ;;  %v727_v7 = vpop.f32.mrf.mxu0  ;;  %3258 = vmatprep.subr.bf16.mxu0 %v4720_v63  ;;  %v4751_v1 = vld [vmem:[%s6106_s6 + $0x8f0] ss:$8 sps:$4 sm:$0xff]  }
 0x113   : > { %v1000_v8 = vpop.f32.mrf.mxu1  ;;  %4208 = vmatprep.subr.bf16.mxu1 %v4720_v63 }
 0x114   : > { %v5744_v10 = vadd.f32 %v1000_v8, %v727_v7  ;;  %2637 = vmatmul.mubr.bf16.gmra.mxu0 %v4717_v3  ;;  %v731_v13 = vpop.f32.mrf.mxu0  ;;  %v4756_v3 = vld [vmem:[%s6106_s6 + $0x8e4] ss:$8 sps:$4 sm:$0xff]   ;;  %v4754_v8 = vld [vmem:[%s6106_s6 + $0x8e0] ss:$8 sps:$4 sm:$0xff]  }
 0x115   : > { %2967 = vmatmul.mubr.bf16.gmra.mxu1 %v4723_v4  ;;  %v1004_v14 = vpop.f32.mrf.mxu1  ;;  %3259 = vmatpush1.bf16.msra.mxu0 %v4718_v6 }
 0x116   : > { %4224 = vmatpush1.bf16.msra.mxu1 %v4718_v6  ;;  %v5751_v16 = vadd.f32 %v1004_v14, %v731_v13  ;;  %3260 = vmatprep.subr.bf16.mxu0 %v4726_v9  ;;  %v733_v18 = vpop.f32.mrf.mxu0  ;;  %v4760_v13 = vld [vmem:[%s6106_s6 + $0x8c0] ss:$8 sps:$4 sm:$0xff]   ;;  %v4765_v14 = vld [vmem:[%s6106_s6 + $0x8b4] ss:$8 sps:$4 sm:$0xff]  }
 0x117   : > { %4209 = vmatprep.subr.bf16.mxu1 %v4726_v9  ;;  %v1006_v19 = vpop.f32.mrf.mxu1  ;;  %2646 = vmatprep.mubr.bf16.mxu0 %v4727_v11  ;;  %v4759_v9 = vld [vmem:[%s6106_s6 + $0x8d4] ss:$8 sps:$4 sm:$0xff]   ;;  %v4757_v11 = vld [vmem:[%s6106_s6 + $0x8d0] ss:$8 sps:$4 sm:$0xff]  }
 0x118   : > { %2976 = vmatprep.mubr.bf16.mxu1 %v4733_v12  ;;  %v5756_v20 = vadd.f32 %v1006_v19, %v733_v18  ;;  %v735_v23 = vpop.f32.mrf.mxu0  ;;  %v4762_v12 = vld [vmem:[%s6106_s6 + $0x8c4] ss:$8 sps:$4 sm:$0xff]   ;;  %v4766_v18 = vld [vmem:[%s6106_s6 + $0x8a0] ss:$8 sps:$4 sm:$0xff]   ;;  %v4771_v19 = vld [vmem:[%s6106_s6 + $0x894] ss:$8 sps:$4 sm:$0xff]  }
 0x119   : > { %v1008_v24 = vpop.f32.mrf.mxu1  ;;  %3261 = vmatpush1.bf16.msra.mxu0 %v4724_v15 }
 0x11a   : > { %4225 = vmatpush1.bf16.msra.mxu1 %v4724_v15  ;;  %v5763_v26 = vadd.f32 %v1008_v24, %v735_v23  ;;  %3262 = vmatprep.subr.bf16.mxu0 %v4732_v17  ;;  %v737_v28 = vpop.f32.mrf.mxu0  ;;  %v4763_v15 = vld [vmem:[%s6106_s6 + $0x8b0] ss:$8 sps:$4 sm:$0xff]   ;;  %v4772_v23 = vld [vmem:[%s6106_s6 + $0x880] ss:$8 sps:$4 sm:$0xff]  }
 0x11b   : > { %4210 = vmatprep.subr.bf16.mxu1 %v4732_v17  ;;  %v1010_v29 = vpop.f32.mrf.mxu1  ;;  %v4768_v17 = vld [vmem:[%s6106_s6 + $0x8a4] ss:$8 sps:$4 sm:$0xff]   ;;  %v4775_v24 = vld [vmem:[%s5186_s13 + $0x8] ss:$8 sps:$4 sm:$0xff]  }
 0x11c   : > { %v5770_v32 = vadd.f32 %v1010_v29, %v737_v28  ;;  %2647 = vmatmul.mubr.bf16.gmra.mxu0 %v4729_v21  ;;  %v741_v33 = vpop.f32.mrf.mxu0  ;;  %v4769_v21 = vld [vmem:[%s6106_s6 + $0x890] ss:$8 sps:$4 sm:$0xff]   ;;  %v4783_v28 = vld [vmem:[%s5186_s13 + $0x3c] ss:$8 sps:$4 sm:$0xff]  }
 0x11d   : > { %2977 = vmatmul.mubr.bf16.gmra.mxu1 %v4735_v22  ;;  %v1014_v34 = vpop.f32.mrf.mxu1  ;;  %3263 = vmatpush1.bf16.msra.mxu0 %v4730_v25  ;;  %v4774_v22 = vld [vmem:[%s6106_s6 + $0x884] ss:$8 sps:$4 sm:$0xff]  }
 0x11e   : > { %4226 = vmatpush1.bf16.msra.mxu1 %v4730_v25  ;;  %v5775_v36 = vadd.f32 %v1014_v34, %v741_v33  ;;  %3264 = vmatprep.subr.bf16.mxu0 %v4738_v27  ;;  %v743_v38 = vpop.f32.mrf.mxu0  ;;  %v4778_v25 = vld [vmem:[%s5186_s13 + $0x28] ss:$8 sps:$4 sm:$0xff]  }
 0x11f   : > { %4211 = vmatprep.subr.bf16.mxu1 %v4738_v27  ;;  %v1016_v39 = vpop.f32.mrf.mxu1  ;;  %2656 = vmatprep.mubr.bf16.mxu0 %v4739_v30  ;;  %v4781_v27 = vld [vmem:[%s5186_s13 + $0x1c] ss:$8 sps:$4 sm:$0xff]  }
 0x120   : > { %2986 = vmatprep.mubr.bf16.mxu1 %v4745_v31  ;;  %v5780_v40 = vadd.f32 %v1016_v39, %v743_v38  ;;  %v745_v43 = vpop.f32.mrf.mxu0 }
 0x121   : > { %v1018_v44 = vpop.f32.mrf.mxu1  ;;  %3265 = vmatpush1.bf16.msra.mxu0 %v4736_v35 }
 0x122   : > { %4227 = vmatpush1.bf16.msra.mxu1 %v4736_v35  ;;  %v5787_v46 = vadd.f32 %v1018_v44, %v745_v43  ;;  %3266 = vmatprep.subr.bf16.mxu0 %v4744_v37  ;;  %v747_v48 = vpop.f32.mrf.mxu0 }
 0x123   : > { %4212 = vmatprep.subr.bf16.mxu1 %v4744_v37  ;;  %v1020_v49 = vpop.f32.mrf.mxu1 }
 0x124   : > { %v5792_v50 = vadd.f32 %v1020_v49, %v747_v48  ;;  %2657 = vmatmul.mubr.bf16.gmra.mxu0 %v4741_v41  ;;  %v751_v53 = vpop.f32.mrf.mxu0  ;;  %v4785_v41 = vld [vmem:[%s5186_s13 + $0x18] ss:$8 sps:$4 sm:$0xff]  }
 0x125   : > { %2987 = vmatmul.mubr.bf16.gmra.mxu1 %v4747_v42  ;;  %v1024_v54 = vpop.f32.mrf.mxu1  ;;  %3267 = vmatpush1.bf16.msra.mxu0 %v4742_v45  ;;  %v4786_v42 = vld [vmem:[%s5186_s13 + $0x38] ss:$8 sps:$4 sm:$0xff]  }
 0x126   : > { %4228 = vmatpush1.bf16.msra.mxu1 %v4742_v45  ;;  %v5799_v56 = vadd.f32 %v1024_v54, %v751_v53  ;;  %3268 = vmatprep.subr.bf16.mxu0 %v4750_v47  ;;  %v753_v58 = vpop.f32.mrf.mxu0 }
 0x127   : > { %4213 = vmatprep.subr.bf16.mxu1 %v4750_v47  ;;  %v1026_v60 = vpop.f32.mrf.mxu1  ;;  %3286 = vmatprep.mubr.bf16.mxu0 %v4777_v51 }
 0x128   : > { %v5804_v61 = vadd.f32 %v1026_v60, %v753_v58  ;;  %3306 = vmatprep.mubr.bf16.mxu1 %v4780_v52  ;;  %v755_v62 = vpop.f32.mrf.mxu0 }
 0x129   : > { %v1028_v63 = vpop.f32.mrf.mxu1  ;;  %3269 = vmatpush1.bf16.msra.mxu0 %v4748_v55 }
 0x12a   : > { %4229 = vmatpush1.bf16.msra.mxu1 %v4748_v55  ;;  %v5809_v2 = vadd.f32 %v1028_v63, %v755_v62  ;;  %3270 = vmatprep.subr.bf16.mxu0 %v4753_v57  ;;  %v757_v4 = vpop.f32.mrf.mxu0 }
 0x12b   : > { %4214 = vmatprep.subr.bf16.mxu1 %v4753_v57  ;;  %v1030_v6 = vpop.f32.mrf.mxu1 }
 0x12c   : > { %v5814_v7 = vadd.f32 %v1030_v6, %v757_v4 }
 0x12d   : > { %3271 = vmatpush2.bf16.msra.mxu0 %v4751_v1 }
 0x12e   : > { %4230 = vmatpush2.bf16.msra.mxu1 %v4751_v1  ;;  %3272 = vmatprep.subr.bf16.mxu0 %v4756_v3 }
 0x12f   : > { %4215 = vmatprep.subr.bf16.mxu1 %v4756_v3 }
 0x131   : > { %3273 = vmatpush2.bf16.msra.mxu0 %v4754_v8 }
 0x132   : > { %4231 = vmatpush2.bf16.msra.mxu1 %v4754_v8  ;;  %3274 = vmatprep.subr.bf16.mxu0 %v4759_v9 }
 0x133   : > { %4216 = vmatprep.subr.bf16.mxu1 %v4759_v9 }
 0x135   : > { %3275 = vmatpush2.bf16.msra.mxu0 %v4757_v11 }
 0x136   : > { %4232 = vmatpush2.bf16.msra.mxu1 %v4757_v11  ;;  %3276 = vmatprep.subr.bf16.mxu0 %v4762_v12 }
 0x137   : > { %4217 = vmatprep.subr.bf16.mxu1 %v4762_v12 }
 0x139   : > { %3277 = vmatpush2.bf16.msra.mxu0 %v4760_v13 }
 0x13a   : > { %4233 = vmatpush2.bf16.msra.mxu1 %v4760_v13  ;;  %3278 = vmatprep.subr.bf16.mxu0 %v4765_v14 }
 0x13b   : > { %4218 = vmatprep.subr.bf16.mxu1 %v4765_v14 }
 0x13d   : > { %3279 = vmatpush2.bf16.msra.mxu0 %v4763_v15 }
 0x13e   : > { %4234 = vmatpush2.bf16.msra.mxu1 %v4763_v15  ;;  %3280 = vmatprep.subr.bf16.mxu0 %v4768_v17 }
 0x13f   : > { %4219 = vmatprep.subr.bf16.mxu1 %v4768_v17 }
 0x141   : > { %3281 = vmatpush2.bf16.msra.mxu0 %v4766_v18 }
 0x142   : > { %4235 = vmatpush2.bf16.msra.mxu1 %v4766_v18  ;;  %3282 = vmatprep.subr.bf16.mxu0 %v4771_v19 }
 0x143   : > { %4220 = vmatprep.subr.bf16.mxu1 %v4771_v19 }
 0x145   : > { %3283 = vmatpush2.bf16.msra.mxu0 %v4769_v21 }
 0x146   : > { %4236 = vmatpush2.bf16.msra.mxu1 %v4769_v21  ;;  %3284 = vmatprep.subr.bf16.mxu0 %v4774_v22 }
 0x147   : > { %4221 = vmatprep.subr.bf16.mxu1 %v4774_v22 }
 0x149   : > { %3285 = vmatpush2.bf16.msra.mxu0 %v4772_v23 }
 0x14a   : > { %4237 = vmatpush2.bf16.msra.mxu1 %v4772_v23 }
 0x14c   : > { %v1308_v29 = vpop.f32.mrf.mxu0  ;;  %3287 = vmatmul.mubr.bf16.vlgmr.msra.gmra.mxu0 %v4775_v24 }
 0x14d   : > { %v1638_v30 = vpop.f32.mrf.mxu1  ;;  %3307 = vmatmul.mubr.bf16.vlgmr.msra.gmra.mxu1 %v4778_v25  ;;  %v1347_v31 = vadd.f32 %v1308_v29, %v5724_v59  ;;  %3296 = vmatprep.mubr.bf16.mxu0 %v4781_v27 }
 0x14e   : > { %3316 = vmatprep.mubr.bf16.mxu1 %v4783_v28  ;;  %v1310_v33 = vpop.f32.mrf.mxu0 }
 0x14f   : > { %v1640_v34 = vpop.f32.mrf.mxu1  ;;  %v5860_v35 = vadd.f32 %v1638_v30, %v1347_v31  ;;  %v1348_v37 = vadd.f32 %v1310_v33, %v5732_v0 }
 0x150   : > { %v1312_v38 = vpop.f32.mrf.mxu0 }
 0x151   : > { %v1642_v39 = vpop.f32.mrf.mxu1  ;;  %v5865_v43 = vadd.f32 %v1640_v34, %v1348_v37  ;;  %v1349_v44 = vadd.f32 %v1312_v38, %v5736_v5 }
 0x152   : > { %v1314_v45 = vpop.f32.mrf.mxu0 }
 0x153   : > { %v1644_v47 = vpop.f32.mrf.mxu1  ;;  %v5868_v48 = vadd.f32 %v1642_v39, %v1349_v44  ;;  %v1350_v59 = vadd.f32 %v1314_v45, %v5744_v10 }
 0x154   : > { %v1318_v49 = vpop.f32.mrf.mxu0  ;;  %3297 = vmatmul.mubr.bf16.gmra.mxu0 %v4785_v41 }
 0x155   : > { %3317 = vmatmul.mubr.bf16.gmra.mxu1 %v4786_v42  ;;  %v1648_v51 = vpop.f32.mrf.mxu1  ;;  %v5871_v52 = vadd.f32 %v1644_v47, %v1350_v59  ;;  %v1351_v0 = vadd.f32 %v1318_v49, %v5751_v16 }
 0x156   : > { %v1320_v53 = vpop.f32.mrf.mxu0 }
 0x157   : > { %v1650_v54 = vpop.f32.mrf.mxu1  ;;  %v1352_v55 = vadd.f32 %v1320_v53, %v5756_v20  ;;  %v5875_v57 = vadd.f32 %v1648_v51, %v1351_v0 }
 0x158   : > { %v1322_v5 = vpop.f32.mrf.mxu0 }
 0x159   : > { %v1652_v58 = vpop.f32.mrf.mxu1  ;;  %v1353_v60 = vadd.f32 %v1322_v5, %v5763_v26  ;;  %v5878_v62 = vadd.f32 %v1650_v54, %v1352_v55 }
 0x15a   : > { %v1324_v10 = vpop.f32.mrf.mxu0 }
 0x15b   : > { %v1654_v63 = vpop.f32.mrf.mxu1  ;;  %v1354_v1 = vadd.f32 %v1324_v10, %v5770_v32  ;;  %v5881_v3 = vadd.f32 %v1652_v58, %v1353_v60 }
 0x15c   : > { %v1328_v4 = vpop.f32.mrf.mxu0 }
 0x15d   : > { %v1658_v16 = vpop.f32.mrf.mxu1  ;;  %v1355_v6 = vadd.f32 %v1328_v4, %v5775_v36  ;;  %v5884_v8 = vadd.f32 %v1654_v63, %v1354_v1 }
 0x15e   : > { %v1330_v20 = vpop.f32.mrf.mxu0 }
 0x15f   : > { %v1660_v9 = vpop.f32.mrf.mxu1  ;;  %v1356_v11 = vadd.f32 %v1330_v20, %v5780_v40  ;;  %v5887_v12 = vadd.f32 %v1658_v16, %v1355_v6 }
 0x160   : > { %v1332_v26 = vpop.f32.mrf.mxu0 }
 0x161   : > { %v1662_v13 = vpop.f32.mrf.mxu1  ;;  %v1357_v14 = vadd.f32 %v1332_v26, %v5787_v46  ;;  %v5890_v15 = vadd.f32 %v1660_v9, %v1356_v11 }
 0x162   : > { %v1334_v32 = vpop.f32.mrf.mxu0 }
 0x163   : > { %v1664_v17 = vpop.f32.mrf.mxu1  ;;  %v1358_v18 = vadd.f32 %v1334_v32, %v5792_v50  ;;  %v5893_v19 = vadd.f32 %v1662_v13, %v1357_v14 }
 0x164   : > { %v1338_v36 = vpop.f32.mrf.mxu0 }
 0x165   : > { %v1668_v21 = vpop.f32.mrf.mxu1  ;;  %v1359_v22 = vadd.f32 %v1338_v36, %v5799_v56  ;;  %v5896_v23 = vadd.f32 %v1664_v17, %v1358_v18 }
 0x166   : > { %v1340_v40 = vpop.f32.mrf.mxu0 }
 0x167   : > { %v1670_v24 = vpop.f32.mrf.mxu1  ;;  %v1360_v25 = vadd.f32 %v1340_v40, %v5804_v61  ;;  %v5899_v27 = vadd.f32 %v1668_v21, %v1359_v22 }
 0x168   : > { %v1342_v46 = vpop.f32.mrf.mxu0 }
 0x169   : > { %v1672_v28 = vpop.f32.mrf.mxu1  ;;  %v1361_v29 = vadd.f32 %v1342_v46, %v5809_v2  ;;  %v5902_v30 = vadd.f32 %v1670_v24, %v1360_v25 }
 0x16a   : > { %v1344_v50 = vpop.f32.mrf.mxu0 }
 0x16b   : > { %v1674_v31 = vpop.f32.mrf.mxu1  ;;  %v1362_v33 = vadd.f32 %v1344_v50, %v5814_v7  ;;  %v5905_v34 = vadd.f32 %v1672_v28, %v1361_v29 }
 0x16d   : > { %v5907_v56 = vadd.f32 %v1674_v31, %v1362_v33 }
 0x18c   : > { %v1968_v37 = vpop.f32.mrf.mxu0 }
 0x18d   : > { %v5909_v38 = vpop.f32.mrf.mxu1 }
 0x18e   : > { %v1970_v61 = vpop.f32.mrf.mxu0 }
 0x18f   : > { %v5911_v39 = vpop.f32.mrf.mxu1 }
 0x190   : > { %v1972_v41 = vpop.f32.mrf.mxu0 }
 0x191   : > { %v5913_v42 = vpop.f32.mrf.mxu1 }
 0x192   : > { %v1974_v2 = vpop.f32.mrf.mxu0 }
 0x193   : > { %v5915_v44 = vpop.f32.mrf.mxu1 }
 0x194   : > { %v1978_v45 = vpop.f32.mrf.mxu0 }
 0x195   : > { %v5917_v47 = vpop.f32.mrf.mxu1 }
 0x196   : > { %v1980_v7 = vpop.f32.mrf.mxu0 }
 0x197   : > { %v5919_v59 = vpop.f32.mrf.mxu1 }
 0x198   : > { %v1982_v49 = vpop.f32.mrf.mxu0 }
 0x199   : > { %v5921_v51 = vpop.f32.mrf.mxu1 }
 0x19a   : > { %v5923_v0 = vpop.f32.mrf.mxu0 }
 0x19b   : > { %v5925_v53 = vpop.f32.mrf.mxu1 }
 0x19c   : > { %v1988_v54 = vpop.f32.mrf.mxu0 }
 0x19d   : > { %v5927_v55 = vpop.f32.mrf.mxu1 }
 0x19e   : > { %v1990_v5 = vpop.f32.mrf.mxu0 }
 0x19f   : > { %v5929_v58 = vpop.f32.mrf.mxu1 }
 0x1a0   : > { %v1992_v60 = vpop.f32.mrf.mxu0 }
 0x1a1   : > { %v5931_v10 = vpop.f32.mrf.mxu1 }
 0x1a2   : > { %v1994_v63 = vpop.f32.mrf.mxu0 }
 0x1a3   : > { %v5933_v1 = vpop.f32.mrf.mxu1 }
 0x1a4   : > { %v1998_v4 = vpop.f32.mrf.mxu0 }
 0x1a5   : > { %v5935_v16 = vpop.f32.mrf.mxu1 }
 0x1a6   : > { %6109 = vst [vmem:[#allocation2_spill] sm:$0xff] %v5935_v16  ;;  %v2000_v6 = vpop.f32.mrf.mxu0  ;;  %v2016_v16 = vadd.f32 %v1990_v5, %v5890_v15  ;;  %v2018_v15 = vadd.f32 %v1994_v63, %v5896_v23 }
 0x1a7   : > { %v5937_v20 = vpop.f32.mrf.mxu1 }
 0x1a8   : > { %6110 = vst [vmem:[#allocation3_spill] sm:$0xff] %v5937_v20  ;;  %v2002_v9 = vpop.f32.mrf.mxu0  ;;  %v2013_v20 = vadd.f32 %v1982_v49, %v5881_v3  ;;  %v2017_v3 = vadd.f32 %v1992_v60, %v5893_v19 }
 0x1a9   : > { %v5939_v11 = vpop.f32.mrf.mxu1 }
 0x1aa   : > { %6111 = vst [vmem:[#allocation4_spill] sm:$0xff] %v5939_v11  ;;  %v5941_v26 = vpop.f32.mrf.mxu0 }
 0x1ab   : > { %v5943_v13 = vpop.f32.mrf.mxu1  ;;  %v2022_v23 = vadd.f32 %v5941_v26, %v5907_v56 }
 0x1ac   : > { %6112 = vst [vmem:[#allocation5_spill] sm:$0xff] %v5943_v13  ;;  %v3345_v13 = vlaneseq }
 0x1b1   : > { %v6135_v5 = vld [vmem:[#allocation4_spill] sm:$0xff] }
 0x1cc   : > { %v2628_v14 = vpop.f32.mrf.mxu0 }
 0x1cd   : > { %v5945_v32 = vpop.f32.mrf.mxu1 }
 0x1ce   : > { %6113 = vst [vmem:[#allocation6_spill] sm:$0xff] %v5945_v32  ;;  %v2630_v17 = vpop.f32.mrf.mxu0 }
 0x1cf   : > { %v5947_v18 = vpop.f32.mrf.mxu1 }
 0x1d0   : > { %6114 = vst [vmem:[#allocation7_spill] sm:$0xff] %v5947_v18  ;;  %v5949_v36 = vpop.f32.mrf.mxu0 }
 0x1d1   : > { %v5951_v21 = vpop.f32.mrf.mxu1 }
 0x1d2   : > { %6115 = vst [vmem:[#allocation8_spill] sm:$0xff] %v5951_v21  ;;  %v5953_v22 = vpop.f32.mrf.mxu0 }
 0x1d3   : > { %6116 = vst [vmem:[#allocation9_spill] sm:$0xff] %v5953_v22  ;;  %v5955_v40 = vpop.f32.mrf.mxu1 }
 0x1d4   : > { %6117 = vst [vmem:[#allocation10_spill] sm:$0xff] %v5955_v40  ;;  %v5957_v24 = vpop.f32.mrf.mxu0 }
 0x1d5   : > { %6118 = vst [vmem:[#allocation11_spill] sm:$0xff] %v5957_v24  ;;  %v5959_v25 = vpop.f32.mrf.mxu1 }
 0x1d6   : > { %6119 = vst [vmem:[#allocation12_spill] sm:$0xff] %v5959_v25  ;;  %v5961_v46 = vpop.f32.mrf.mxu0 }
 0x1d7   : > { %6120 = vst [vmem:[#allocation13_spill] sm:$0xff] %v5961_v46  ;;  %v5963_v28 = vpop.f32.mrf.mxu1 }
 0x1d8   : > { %6121 = vst [vmem:[#allocation14_spill] sm:$0xff] %v5963_v28  ;;  %v5965_v29 = vpop.f32.mrf.mxu0  ;;  %v3346_v28 = vshrl.u32 %v3345_v13, 7  ;;  %v2010_v13 = vadd.f32 %v1974_v2, %v5871_v52 }
 0x1d9   : > { %6122 = vst [vmem:[#allocation15_spill] sm:$0xff] %v5965_v29  ;;  %v5967_v50 = vpop.f32.mrf.mxu1 }
 0x1da   : > { %6123 = vst [vmem:[#allocation16_spill] sm:$0xff] %v5967_v50  ;;  %v5969_v31 = vpop.f32.mrf.mxu0  ;;  %v3347_v50 = vsub.s32 0, %v3346_v28  ;;  %v6136_v63 = vld [vmem:[#allocation9_spill] sm:$0xff] }
 0x1db   : > { %6124 = vst [vmem:[#allocation17_spill] sm:$0xff] %v5969_v31  ;;  %v5971_v33 = vpop.f32.mrf.mxu1 }
 0x1dc   : > { %6125 = vst [vmem:[#allocation18_spill] sm:$0xff] %v5971_v33  ;;  %v2648_v21 = vpop.f32.mrf.mxu0  ;;  %v3343_v33 = vld [vmem:[%s6107_s7] sm:$0x3] }
 0x1dd   : > { %v5973_v18 = vpop.f32.mrf.mxu1  ;;  %v5995_v11 = vrot.slane %v3343_v33, %v3347_v50 }
 0x1de   : > { %6126 = vst [vmem:[#allocation19_spill] sm:$0xff] %v5973_v18  ;;  %v2650_v40 = vpop.f32.mrf.mxu0  ;;  %v2008_v18 = vadd.f32 %v1970_v61, %v5865_v43 }
 0x1df   : > { %v5975_v32 = vpop.f32.mrf.mxu1 }
 0x1e0   : > { %6127 = vst [vmem:[#allocation20_spill] sm:$0xff] %v5975_v32  ;;  %v5977_v25 = vpop.f32.mrf.mxu0  ;;  %v2007_v32 = vadd.f32 %v1968_v37, %v5860_v35  ;;  %v2338_v52 = vadd.f32 %v5911_v39, %v2008_v18  ;;  %v2021_v39 = vadd.f32 %v2002_v9, %v5905_v34  ;;  %v2347_v34 = vadd.f32 %v5931_v10, %v2017_v3  ;;  %v6142_v18 = vld [vmem:[#allocation7_spill] sm:$0xff] }
 0x1e1   : > { %6128 = vst [vmem:[#allocation21_spill] sm:$0xff] %v5977_v25  ;;  %v5979_v46 = vpop.f32.mrf.mxu1  ;;  %v2009_v25 = vadd.f32 %v1972_v41, %v5868_v48  ;;  %v2019_v41 = vadd.f32 %v1998_v4, %v5899_v27  ;;  %v6137_v4 = vld [vmem:[#allocation11_spill] sm:$0xff] }
 0x1e2   : > { %6129 = vst [vmem:[#allocation22_spill] sm:$0xff] %v5979_v46  ;;  %v2654_v24 = vpop.f32.mrf.mxu0  ;;  %v3351_v46 = vsub.s32 1, %v3346_v28  ;;  %v2337_v48 = vadd.f32 %v5909_v38, %v2007_v32  ;;  %v2020_v38 = vadd.f32 %v2000_v6, %v5902_v30  ;;  %v2668_v27 = vadd.f32 %v2630_v17, %v2338_v52  ;;  %v6138_v6 = vld [vmem:[#allocation13_spill] sm:$0xff]  ;;  %v6141_v32 = vld [vmem:[#allocation6_spill] sm:$0xff] }
 0x1e3   : > { %v5981_v29 = vpop.f32.mrf.mxu1 }
 0x1e4   : > { %6130 = vst [vmem:[#allocation23_spill] sm:$0xff] %v5981_v29  ;;  %v5983_v22 = vpop.f32.mrf.mxu0  ;;  %v2015_v29 = vadd.f32 %v1988_v54, %v5887_v12  ;;  %v2339_v12 = vadd.f32 %v5913_v42, %v2009_v25  ;;  %v6008_v37 = vrot.slane %v3343_v33, %v3351_v46  ;;  %v6134_v54 = vld [vmem:[#allocation3_spill] sm:$0xff]  ;;  %v6145_v46 = vld [vmem:[#allocation17_spill] sm:$0xff] }
 0x1e5   : > { %6131 = vst [vmem:[#allocation24_spill] sm:$0xff] %v5983_v22  ;;  %v5985_v31 = vpop.f32.mrf.mxu1  ;;  %v2011_v22 = vadd.f32 %v1978_v45, %v5875_v57  ;;  %v2340_v57 = vadd.f32 %v5915_v44, %v2010_v13  ;;  %v2343_v44 = vadd.f32 %v5921_v51, %v2013_v20  ;;  %v6133_v51 = vld [vmem:[#allocation2_spill] sm:$0xff] }
 0x1e6   : > { %6132 = vst [vmem:[#allocation25_spill] sm:$0xff] %v5985_v31  ;;  %v2012_v31 = vadd.f32 %v1980_v7, %v5878_v62  ;;  %v6001_v35 = vpop.f32.mrf.mxu0  ;;  %v2014_v62 = vadd.f32 %v5923_v0, %v5884_v8  ;;  %v2345_v61 = vadd.f32 %v5927_v55, %v2015_v29  ;;  %v2346_v8 = vadd.f32 %v5929_v58, %v2016_v16 }
 0x1e7   : > { %v6003_v43 = vpop.f32.mrf.mxu1  ;;  %v2341_v42 = vadd.f32 %v5917_v47, %v2011_v22  ;;  %v2667_v7 = vadd.f32 %v2628_v14, %v2337_v48  ;;  %v2348_v47 = vadd.f32 %v5933_v1, %v2018_v15  ;;  %v2349_v0 = vadd.f32 %v6133_v51, %v2019_v41  ;;  %v6140_v1 = vld [vmem:[#allocation5_spill] sm:$0xff]  ;;  %v6147_v48 = vld [vmem:[#allocation20_spill] sm:$0xff]  ;;  %v6149_v15 = vld [vmem:[#allocation10_spill] sm:$0xff] }
 0x1e8   : > { %v2342_v2 = vadd.f32 %v5919_v59, %v2012_v31  ;;  %v2662_v45 = vpop.f32.mrf.mxu0  ;;  %v2675_v49 = vadd.f32 %v2648_v21, %v2345_v61  ;;  %v2344_v30 = vadd.f32 %v5925_v53, %v2014_v62  ;;  %v2669_v59 = vadd.f32 %v5949_v36, %v2339_v12  ;;  %v6139_v53 = vld [vmem:[#allocation15_spill] sm:$0xff]  ;;  %v6146_v29 = vld [vmem:[#allocation21_spill] sm:$0xff]  ;;  %v6150_v41 = vld [vmem:[#allocation12_spill] sm:$0xff] }
 0x1e9   : > { %v6023_v19 = vpop.f32.mrf.mxu1  ;;  %v2350_v55 = vadd.f32 %v6134_v54, %v2020_v38  ;;  %v2351_v58 = vadd.f32 %v6135_v5, %v2021_v39  ;;  %v2676_v60 = vadd.f32 %v2650_v40, %v2346_v8  ;;  %v2670_v56 = vadd.f32 %v6136_v63, %v2340_v57  ;;  %v6143_v21 = vld [vmem:[#allocation19_spill] sm:$0xff]  ;;  %v6144_v40 = vld [vmem:[#allocation8_spill] sm:$0xff]  ;;  %v6151_v39 = vld [vmem:[#allocation14_spill] sm:$0xff] }
 0x1ea   : > { %v2671_v16 = vadd.f32 %v6137_v4, %v2341_v42  ;;  %v2672_v20 = vadd.f32 %v6138_v6, %v2342_v2  ;;  %v2673_v9 = vadd.f32 %v6139_v53, %v2343_v44  ;;  %v2664_v10 = vpop.f32.mrf.mxu0  ;;  %v2352_v14 = vadd.f32 %v6140_v1, %v2022_v23  ;;  %v6152_v2 = vld [vmem:[#allocation16_spill] sm:$0xff] }
 0x1eb   : > { %v6038_v26 = vpop.f32.mrf.mxu1  ;;  %v2997_v17 = vadd.f32 %v6141_v32, %v2667_v7  ;;  %v2998_v36 = vadd.f32 %v6142_v18, %v2668_v27  ;;  %v3005_v22 = vadd.f32 %v6143_v21, %v2675_v49  ;;  %v2999_v25 = vadd.f32 %v6144_v40, %v2669_v59  ;;  %v6155_v51 = vld [vmem:[#allocation23_spill] sm:$0xff] }
 0x1ec   : > { %v2674_v28 = vadd.f32 %v6145_v46, %v2344_v30  ;;  %v2677_v50 = vadd.f32 %v6146_v29, %v2347_v34  ;;  %v2678_v31 = vadd.f32 %v2654_v24, %v2348_v47  ;;  %v3006_v52 = vadd.f32 %v6147_v48, %v2676_v60  ;;  %v6148_v12 = vld [vmem:[#allocation24_spill] sm:$0xff]  ;;  %v6153_v30 = vld [vmem:[#allocation18_spill] sm:$0xff] }
 0x1ed   : > { %v2679_v57 = vadd.f32 %v6148_v12, %v2349_v0  ;;  %v3000_v61 = vadd.f32 %v6149_v15, %v2670_v56  ;;  %v3001_v38 = vadd.f32 %v6150_v41, %v2671_v16  ;;  %v3002_v42 = vadd.f32 %v6151_v39, %v2672_v20  ;;  %v6154_v47 = vld [vmem:[#allocation22_spill] sm:$0xff]  ;;  %v6156_v63 = vld [vmem:[#allocation25_spill] sm:$0xff] }
 0x1ee   : > { %v6053_v44 = vadd.f32 %v6152_v2, %v2673_v9  ;;  %v6058_v34 = vadd.f32 %v6153_v30, %v2674_v28  ;;  %v3007_v59 = vadd.f32 %v6154_v47, %v2677_v50  ;;  %v3008_v0 = vadd.f32 %v6155_v51, %v2678_v31 }
 0x1ef   : > { %v2680_v54 = vadd.f32 %v6001_v35, %v2350_v55  ;;  %v3009_v56 = vadd.f32 %v6156_v63, %v2679_v57  ;;  %v2681_v4 = vadd.f32 %v2662_v45, %v2351_v58 }
 0x1f1   : > { %v3010_v55 = vadd.f32 %v6003_v43, %v2680_v54 }
 0x20c   : > { %v3288_v33 = vpop.f32.mrf.mxu0 }
 0x20d   : > { %v3308_v13 = vpop.f32.mrf.mxu1  ;;  %v3327_v62 = vadd.f32 %v3288_v33, %v2997_v17 }
 0x20e   : > { %v3335_v3 = vadd.f32 %v3308_v13, %v3005_v22  ;;  %v3290_v8 = vpop.f32.mrf.mxu0  ;;  %v2682_v22 = vadd.f32 %v2664_v10, %v2352_v14 }
 0x20f   : > { %v3310_v24 = vpop.f32.mrf.mxu1  ;;  %v3355_v23 = vadd.f32 %v5995_v11, %v3327_v62  ;;  %v3328_v27 = vadd.f32 %v3290_v8, %v2998_v36  ;;  %v3011_v62 = vadd.f32 %v6023_v19, %v2681_v4 }
 0x210   : > { %v3363_v7 = vadd.f32 %v5995_v11, %v3335_v3  ;;  %v3336_v49 = vadd.f32 %v3310_v24, %v3006_v52  ;;  %v3292_v5 = vpop.f32.mrf.mxu0  ;;  %v3012_v3 = vadd.f32 %v6038_v26, %v2682_v22 }
 0x211   : > { %v3312_v60 = vpop.f32.mrf.mxu1  ;;  %v3356_v16 = vadd.f32 %v6008_v37, %v3328_v27  ;;  %v3371_v20 = vmax.f32 %v3355_v23, 0.0  ;;  %v3329_v9 = vadd.f32 %v3292_v5, %v2999_v25 }
 0x212   : > { %v3364_v6 = vadd.f32 %v6008_v37, %v3336_v49  ;;  %v3379_v53 = vmax.f32 %v3363_v7, 0.0  ;;  %v3337_v1 = vadd.f32 %v3312_v60, %v3007_v59  ;;  %v3294_v32 = vpop.f32.mrf.mxu0 }
 0x213   : > { %v3314_v17 = vpop.f32.mrf.mxu1  ;;  %v3372_v18 = vmax.f32 %v3356_v16, 0.0  ;;  %v3330_v21 = vadd.f32 %v3294_v32, %v3000_v61  ;;  %v3357_v45 = vadd.f32 %v5995_v11, %v3329_v9 }
 0x214   : > { %v3380_v36 = vmax.f32 %v3364_v6, 0.0  ;;  %v3338_v35 = vadd.f32 %v3314_v17, %v3008_v0  ;;  %v3365_v58 = vadd.f32 %v5995_v11, %v3337_v1  ;;  %v3298_v40 = vpop.f32.mrf.mxu0 }
 0x215   : > { %v3318_v25 = vpop.f32.mrf.mxu1  ;;  %v4198_v46 = vpack.c.bf16 %v3372_v18, %v3371_v20  ;;  %v3358_v29 = vadd.f32 %v6008_v37, %v3330_v21  ;;  %v3373_v10 = vmax.f32 %v3357_v45, 0.0  ;;  %v3331_v50 = vadd.f32 %v3298_v40, %v3001_v38 }
 0x216   : > { %v4202_v28 = vpack.c.bf16 %v3380_v36, %v3379_v53  ;;  %v3366_v43 = vadd.f32 %v6008_v37, %v3338_v35  ;;  %v3381_v14 = vmax.f32 %v3365_v58, 0.0  ;;  %v3339_v31 = vadd.f32 %v3318_v25, %v3009_v56  ;;  %v3300_v33 = vpop.f32.mrf.mxu0 }
 0x217   : > { %v3320_v13 = vpop.f32.mrf.mxu1  ;;  %3435 = vst [vmem:[%s6071_s28] sm:$0xff] %v4198_v46  ;;  %v3374_v48 = vmax.f32 %v3358_v29, 0.0  ;;  %v3332_v12 = vadd.f32 %v3300_v33, %v3002_v42  ;;  %v3359_v15 = vadd.f32 %v5995_v11, %v3331_v50 }
 0x218   : > { %3439 = vst [vmem:[%s6071_s28 + $0x20] sm:$0xff] %v4202_v28  ;;  %v3382_v52 = vmax.f32 %v3366_v43, 0.0  ;;  %v3340_v57 = vadd.f32 %v3320_v13, %v3010_v55  ;;  %v3367_v61 = vadd.f32 %v5995_v11, %v3339_v31  ;;  %v3302_v41 = vpop.f32.mrf.mxu0 }
 0x219   : > { %v3322_v38 = vpop.f32.mrf.mxu1  ;;  %v4199_v39 = vpack.c.bf16 %v3374_v48, %v3373_v10  ;;  %v3360_v8 = vadd.f32 %v6008_v37, %v3332_v12  ;;  %v3375_v42 = vmax.f32 %v3359_v15, 0.0  ;;  %v3333_v19 = vadd.f32 %v3302_v41, %v6053_v44 }
 0x21a   : > { %v4203_v2 = vpack.c.bf16 %v3382_v52, %v3381_v14  ;;  %v3368_v24 = vadd.f32 %v6008_v37, %v3340_v57  ;;  %v3383_v23 = vmax.f32 %v3367_v61, 0.0  ;;  %v3341_v7 = vadd.f32 %v3322_v38, %v3011_v62  ;;  %v3304_v26 = vpop.f32.mrf.mxu0 }
 0x21b   : > { %v3324_v27 = vpop.f32.mrf.mxu1  ;;  %3436 = vst [vmem:[%s6071_s28 + $0x8] sm:$0xff] %v4199_v39  ;;  %v3376_v49 = vmax.f32 %v3360_v8, 0.0  ;;  %v3334_v47 = vadd.f32 %v3304_v26, %v6058_v34  ;;  %v3361_v51 = vadd.f32 %v5995_v11, %v3333_v19 }
 0x21c   : > { %3440 = vst [vmem:[%s6071_s28 + $0x28] sm:$0xff] %v4203_v2  ;;  %v3384_v30 = vmax.f32 %v3368_v24, 0.0  ;;  %v3342_v59 = vadd.f32 %v3324_v27, %v3012_v3  ;;  %v3369_v0 = vadd.f32 %v5995_v11, %v3341_v7 }
 0x21d   : > { %v4200_v54 = vpack.c.bf16 %v3376_v49, %v3375_v42  ;;  %v3362_v5 = vadd.f32 %v6008_v37, %v3334_v47  ;;  %v3377_v63 = vmax.f32 %v3361_v51, 0.0 }
 0x21e   : > { %v4204_v44 = vpack.c.bf16 %v3384_v30, %v3383_v23  ;;  %v3370_v60 = vadd.f32 %v6008_v37, %v3342_v59  ;;  %v3385_v56 = vmax.f32 %v3369_v0, 0.0 }
 0x21f   : > { %3437 = vst [vmem:[%s6071_s28 + $0x10] sm:$0xff] %v4200_v54  ;;  %v3378_v4 = vmax.f32 %v3362_v5, 0.0 }
 0x220   : > { %3441 = vst [vmem:[%s6071_s28 + $0x30] sm:$0xff] %v4204_v44  ;;  %v3386_v16 = vmax.f32 %v3370_v60, 0.0 }
 0x221   : > { %v4201_v34 = vpack.c.bf16 %v3378_v4, %v3377_v63 }
 0x222   : > { %v4205_v6 = vpack.c.bf16 %v3386_v16, %v3385_v56 }
 0x223   : > { %3438 = vst [vmem:[%s6071_s28 + $0x18] sm:$0xff] %v4201_v34 }
 0x224   : > { %3442 = vst [vmem:[%s6071_s28 + $0x38] sm:$0xff] %v4205_v6 }
 0x225 PF: > { %s18_s27 = sadd.s32 1, %s4793_s27  }
 0x226   : > { %p15_p4 = scmp.ge.s32.totalorder %s18_s27, 6  }
 0x228   :  { %17 = sbr.rel (!%p15_p4) target bundleno = 1 (0x1), region = 105 }

// kernel: drnet_forward.5
= control target key start
LH: loop header
LB: loop body
LE: loop exit
PB: predicated region body
PF: predicated region fallthrough
CT: control target
= control target key end

     0   :  { %s4115_s29 = smov 0   ;;  %s5710_s0 = inlined_call_operand.vmem [shape: bf16[2,256,256], index: 0, kind: input, shape index: {}]   ;;  %s5711_s1 = inlined_call_operand.vmem [shape: bf16[2,256,256], index: 1, kind: input, shape index: {}]   ;;  %s5712_s2 = inlined_call_operand.vmem [shape: bf16[2,64,256], index: 2, kind: input, shape index: {}]   ;;  %s5713_s3 = inlined_call_operand.vmem [shape: bf16[2,64,256], index: 3, kind: input, shape index: {}]   ;;  %s5714_s4 = inlined_call_operand.vmem [shape: f32[2,1,4], index: 4, kind: input, shape index: {}]   ;;  %s5715_s5 = inlined_call_operand.vmem [shape: f32[2,1,32], index: 5, kind: input, shape index: {}]   ;;  %s5716_s6 = inlined_call_operand.vmem [shape: bf16[1,256], index: 6, kind: input, shape index: {}]   ;;  %s5717_s7 = inlined_call_operand.vmem [shape: bf16[1,64], index: 7, kind: input, shape index: {}]   ;;  %s5718_s8 = inlined_call_operand.vmem [shape: bf16[256,256], index: 8, kind: input, shape index: {}]   ;;  %s5719_s9 = inlined_call_operand.vmem [shape: f32[1,256], index: 9, kind: input, shape index: {}]   ;;  %s5720_s10 = inlined_call_operand.vmem [shape: bf16[256,256], index: 10, kind: input, shape index: {}]   ;;  %s5721_s11 = inlined_call_operand.vmem [shape: f32[1,256], index: 11, kind: input, shape index: {}]   ;;  %s5722_s12 = inlined_call_operand.vmem [shape: f32[256,256], index: 12, kind: input, shape index: {}]   ;;  %s5723_s13 = inlined_call_operand.vmem [shape: f32[4,256], index: 13, kind: input, shape index: {}]   ;;  %s5724_s14 = inlined_call_operand.vmem [shape: f32[1,256], index: 14, kind: input, shape index: {}]   ;;  %s5725_s15 = inlined_call_operand.vmem [shape: f32[256,256], index: 15, kind: input, shape index: {}]   ;;  %s5726_s16 = inlined_call_operand.vmem [shape: f32[4,256], index: 16, kind: input, shape index: {}]   ;;  %s5727_s17 = inlined_call_operand.vmem [shape: f32[1,256], index: 17, kind: input, shape index: {}]   ;;  %s5728_s18 = inlined_call_operand.vmem [shape: f32[256,1], index: 18, kind: input, shape index: {}]   ;;  %s5729_s19 = inlined_call_operand.vmem [shape: f32[256,1], index: 19, kind: input, shape index: {}]   ;;  %s5730_s20 = inlined_call_operand.vmem [shape: f32[32,128], index: 20, kind: input, shape index: {}]   ;;  %s5731_s21 = inlined_call_operand.<no memory space> [shape: f32[1,1], index: 21, kind: input, shape index: {}]   ;;  %s5732_s22 = inlined_call_operand.vmem [shape: f32[2,1,128], index: 22, kind: output, shape index: {}]  }
   0x1   :  { %5742 = sst [smem:[#allocation27_spill]] %s5710_s0  ;;  %v27_v0 = vstv %s5731_s21 }
   0x2   :  { %5743 = sst [smem:[#allocation28_spill]] %s5711_s1  ;;  %28 = vst [vmem:[#allocation2] sm:$0x1] %v27_v0 }
   0x3   :  { %5744 = sst [smem:[#allocation29_spill]] %s5712_s2 }
   0x4   :  { %5745 = sst [smem:[#allocation30_spill]] %s5713_s3 }
   0x5   :  { %5746 = sst [smem:[#allocation31_spill]] %s5714_s4 }
   0x6   :  { %5747 = sst [smem:[#allocation32_spill]] %s5715_s5 }
   0x7   :  { %5748 = sst [smem:[#allocation33_spill]] %s5716_s6 }
   0x8 LB: > { %s3495_s30 = sadd.s32 4294967295, %s3991_s29   ;;  %p3499_p0 = scmp.ge.s32.totalorder %s3991_s29, 1  ;;  %s3991_s29 = sphi %s4115_s29, %s34_s29  }
   0x9   : > { %p660_p1 = scmp.lt.s32.totalorder %s3991_s29, 3 }
   0xb   : > { %p661_p2 = pnand %p3499_p0, %p660_p1 }
   0xd   : > { %664 = sbr.rel (%p661_p2) target bundleno = 1585 (0x631), region = 108 }
  0x12   : > { %v3767_v1 = vld [vmem:[%s5718_s8 + $0x74] ss:$8 sps:$4 sm:$0xff]   ;;  %v3769_v2 = vld [vmem:[%s5718_s8 + $0x70] ss:$8 sps:$4 sm:$0xff]   ;;  %v3770_v3 = vld [vmem:[%s5718_s8 + $0x64] ss:$8 sps:$4 sm:$0xff]  }
  0x13   : > { %1167 = vmatprep.subr.bf16.mxu0 %v3767_v1  ;;  %1616 = vmatprep.subr.bf16.mxu1 %v3767_v1  ;;  %v3772_v4 = vld [vmem:[%s5718_s8 + $0x60] ss:$8 sps:$4 sm:$0xff]   ;;  %v3773_v5 = vld [vmem:[%s5718_s8 + $0x54] ss:$8 sps:$4 sm:$0xff]   ;;  %v3775_v6 = vld [vmem:[%s5718_s8 + $0x50] ss:$8 sps:$4 sm:$0xff]  }
  0x14   : > { %1168 = vmatpush1.bf16.msra.mxu0 %v3769_v2  ;;  %1617 = vmatpush1.bf16.msra.mxu1 %v3769_v2  ;;  %v3776_v7 = vld [vmem:[%s5718_s8 + $0x44] ss:$8 sps:$4 sm:$0xff]   ;;  %p741_p3 = scmp.lt.s32.totalorder %s3495_s30, 1  ;;  %v3778_v8 = vld [vmem:[%s5718_s8 + $0x40] ss:$8 sps:$4 sm:$0xff]   ;;  %s5749_s28 = sld [smem:[#allocation27_spill]] }
  0x15   : > { %1169 = vmatprep.subr.bf16.mxu0 %v3770_v3  ;;  %1618 = vmatprep.subr.bf16.mxu1 %v3770_v3  ;;  %v3779_v9 = vld [vmem:[%s5718_s8 + $0x34] ss:$8 sps:$4 sm:$0xff]   ;;  %v3781_v10 = vld [vmem:[%s5718_s8 + $0x30] ss:$8 sps:$4 sm:$0xff]   ;;  %v3782_v11 = vld [vmem:[%s5718_s8 + $0x24] ss:$8 sps:$4 sm:$0xff]  }
  0x16   : > { %s5834_s30 = smov (!%p741_p3, %s3495_s30), 1  ;;  %v3784_v12 = vld [vmem:[%s5718_s8 + $0x20] ss:$8 sps:$4 sm:$0xff]   ;;  %v3785_v13 = vld [vmem:[%s5718_s8 + $0x14] ss:$8 sps:$4 sm:$0xff]   ;;  %s5750_s3 = sld [smem:[#allocation28_spill]] }
  0x17   : > { %s3664_s25 = sshll.u32 %s5834_s30, 8  ;;  %v3787_v15 = vld [vmem:[%s5718_s8 + $0x10] ss:$8 sps:$4 sm:$0xff]   ;;  %v3788_v16 = vld [vmem:[%s5718_s8 + $0x4] ss:$8 sps:$4 sm:$0xff]   ;;  %s5762_s27 = sld [smem:[#allocation33_spill]] }
  0x18   : > { %1170 = vmatpush1.bf16.msra.mxu0 %v3772_v4  ;;  %1619 = vmatpush1.bf16.msra.mxu1 %v3772_v4  ;;  %v3790_v17 = vld [vmem:[%s5718_s8] ss:$8 sps:$4 sm:$0xff]   ;;  %v3791_v18 = vld [vmem:[%s5718_s8 + $0xf4] ss:$8 sps:$4 sm:$0xff]   ;;  %v3793_v20 = vld [vmem:[%s5718_s8 + $0xf0] ss:$8 sps:$4 sm:$0xff]  }
  0x19   : > { %1171 = vmatprep.subr.bf16.mxu0 %v3773_v5  ;;  %1620 = vmatprep.subr.bf16.mxu1 %v3773_v5  ;;  %v3794_v21 = vld [vmem:[%s5718_s8 + $0xe4] ss:$8 sps:$4 sm:$0xff]   ;;  %v3796_v22 = vld [vmem:[%s5718_s8 + $0xe0] ss:$8 sps:$4 sm:$0xff]   ;;  %v3797_v23 = vld [vmem:[%s5718_s8 + $0xd4] ss:$8 sps:$4 sm:$0xff]  }
  0x1a   : > { %s4165_s4 = scalar_lea.vmem %s5749_s28, %s3664_s25  ;;  %v3799_v24 = vld [vmem:[%s5718_s8 + $0xd0] ss:$8 sps:$4 sm:$0xff]   ;;  %v3800_v25 = vld [vmem:[%s5718_s8 + $0xc4] ss:$8 sps:$4 sm:$0xff]   ;;  %v3802_v26 = vld [vmem:[%s5718_s8 + $0xc0] ss:$8 sps:$4 sm:$0xff]  }
  0x1b   : > { %v3817_v14 = vld [vmem:[%s4165_s4 + $0x4] ss:$8 sps:$4 sm:$0xff]   ;;  %v3803_v27 = vld [vmem:[%s5718_s8 + $0xb4] ss:$8 sps:$4 sm:$0xff]   ;;  %v3805_v28 = vld [vmem:[%s5718_s8 + $0xb0] ss:$8 sps:$4 sm:$0xff]  }
  0x1c   : > { %1172 = vmatpush1.bf16.msra.mxu0 %v3775_v6  ;;  %1621 = vmatpush1.bf16.msra.mxu1 %v3775_v6  ;;  %s4183_s28 = scalar_lea.vmem %s5750_s3, %s3664_s25  ;;  %v3806_v29 = vld [vmem:[%s5718_s8 + $0xa4] ss:$8 sps:$4 sm:$0xff]   ;;  %v3808_v30 = vld [vmem:[%s5718_s8 + $0xa0] ss:$8 sps:$4 sm:$0xff]   ;;  %v3809_v31 = vld [vmem:[%s5718_s8 + $0x94] ss:$8 sps:$4 sm:$0xff]  }
  0x1d   : > { %1173 = vmatprep.subr.bf16.mxu0 %v3776_v7  ;;  %1622 = vmatprep.subr.bf16.mxu1 %v3776_v7  ;;  %v3835_v19 = vld [vmem:[%s4183_s28 + $0x4] ss:$8 sps:$4 sm:$0xff]   ;;  %v3811_v32 = vld [vmem:[%s5718_s8 + $0x90] ss:$8 sps:$4 sm:$0xff]   ;;  %v3814_v34 = vld [vmem:[%s5718_s8 + $0x80] ss:$8 sps:$4 sm:$0xff]  }
  0x1e   : > { %1199 = vmatprep.mubr.bf16.mxu0 %v3817_v14  ;;  %1648 = vmatprep.mubr.bf16.mxu1 %v3835_v19  ;;  %v3812_v33 = vld [vmem:[%s5718_s8 + $0x84] ss:$8 sps:$4 sm:$0xff]   ;;  %v3815_v35 = vld [vmem:[%s4165_s4] ss:$8 sps:$4 sm:$0xff]   ;;  %v3818_v37 = vld [vmem:[%s4165_s4 + $0x14] ss:$8 sps:$4 sm:$0xff]  }
  0x1f   : > { %v3833_v36 = vld [vmem:[%s4183_s28] ss:$8 sps:$4 sm:$0xff]   ;;  %v3839_v38 = vld [vmem:[%s4183_s28 + $0x14] ss:$8 sps:$4 sm:$0xff]   ;;  %v3820_v39 = vld [vmem:[%s4165_s4 + $0x10] ss:$8 sps:$4 sm:$0xff]  }
  0x20   : > { %1174 = vmatpush1.bf16.msra.mxu0 %v3778_v8  ;;  %1623 = vmatpush1.bf16.msra.mxu1 %v3778_v8  ;;  %v3841_v40 = vld [vmem:[%s4183_s28 + $0x10] ss:$8 sps:$4 sm:$0xff]   ;;  %v3821_v41 = vld [vmem:[%s4165_s4 + $0x24] ss:$8 sps:$4 sm:$0xff]   ;;  %v3823_v43 = vld [vmem:[%s4165_s4 + $0x20] ss:$8 sps:$4 sm:$0xff]  }
  0x21   : > { %1175 = vmatprep.subr.bf16.mxu0 %v3779_v9  ;;  %1624 = vmatprep.subr.bf16.mxu1 %v3779_v9  ;;  %v3845_v42 = vld [vmem:[%s4183_s28 + $0x24] ss:$8 sps:$4 sm:$0xff]   ;;  %v3847_v44 = vld [vmem:[%s4183_s28 + $0x20] ss:$8 sps:$4 sm:$0xff]   ;;  %v3824_v45 = vld [vmem:[%s4165_s4 + $0x34] ss:$8 sps:$4 sm:$0xff]  }
  0x22   : > { %v3851_v46 = vld [vmem:[%s4183_s28 + $0x34] ss:$8 sps:$4 sm:$0xff]   ;;  %v3826_v47 = vld [vmem:[%s4165_s4 + $0x30] ss:$8 sps:$4 sm:$0xff]   ;;  %v3827_v49 = vld [vmem:[%s4165_s4 + $0x44] ss:$8 sps:$4 sm:$0xff]  }
  0x23   : > { %v3853_v48 = vld [vmem:[%s4183_s28 + $0x30] ss:$8 sps:$4 sm:$0xff]   ;;  %v3857_v50 = vld [vmem:[%s4183_s28 + $0x44] ss:$8 sps:$4 sm:$0xff]   ;;  %v3829_v51 = vld [vmem:[%s4165_s4 + $0x40] ss:$8 sps:$4 sm:$0xff]  }
  0x24   : > { %1176 = vmatpush1.bf16.msra.mxu0 %v3781_v10  ;;  %1625 = vmatpush1.bf16.msra.mxu1 %v3781_v10  ;;  %v3859_v52 = vld [vmem:[%s4183_s28 + $0x40] ss:$8 sps:$4 sm:$0xff]   ;;  %v3830_v53 = vld [vmem:[%s4165_s4 + $0x54] ss:$8 sps:$4 sm:$0xff]   ;;  %v3832_v55 = vld [vmem:[%s4165_s4 + $0x50] ss:$8 sps:$4 sm:$0xff]  }
  0x25   : > { %1177 = vmatprep.subr.bf16.mxu0 %v3782_v11  ;;  %1626 = vmatprep.subr.bf16.mxu1 %v3782_v11  ;;  %v3863_v54 = vld [vmem:[%s4183_s28 + $0x54] ss:$8 sps:$4 sm:$0xff]   ;;  %v3865_v56 = vld [vmem:[%s4183_s28 + $0x50] ss:$8 sps:$4 sm:$0xff]   ;;  %v3836_v57 = vld [vmem:[%s4165_s4 + $0x64] ss:$8 sps:$4 sm:$0xff]  }
  0x26   : > { %v3869_v58 = vld [vmem:[%s4183_s28 + $0x64] ss:$8 sps:$4 sm:$0xff]   ;;  %v3838_v59 = vld [vmem:[%s4165_s4 + $0x60] ss:$8 sps:$4 sm:$0xff]   ;;  %v3842_v61 = vld [vmem:[%s4165_s4 + $0x74] ss:$8 sps:$4 sm:$0xff]  }
  0x27   : > { %v3871_v60 = vld [vmem:[%s4183_s28 + $0x60] ss:$8 sps:$4 sm:$0xff]   ;;  %v3875_v62 = vld [vmem:[%s4183_s28 + $0x74] ss:$8 sps:$4 sm:$0xff]   ;;  %v3844_v63 = vld [vmem:[%s4165_s4 + $0x70] ss:$8 sps:$4 sm:$0xff]  }
  0x28   : > { %1178 = vmatpush1.bf16.msra.mxu0 %v3784_v12  ;;  %1627 = vmatpush1.bf16.msra.mxu1 %v3784_v12  ;;  %v3877_v0 = vld [vmem:[%s4183_s28 + $0x70] ss:$8 sps:$4 sm:$0xff]   ;;  %v3848_v1 = vld [vmem:[%s4165_s4 + $0x84] ss:$8 sps:$4 sm:$0xff]   ;;  %v3850_v3 = vld [vmem:[%s4165_s4 + $0x80] ss:$8 sps:$4 sm:$0xff]  }
  0x29   : > { %1179 = vmatprep.subr.bf16.mxu0 %v3785_v13  ;;  %1628 = vmatprep.subr.bf16.mxu1 %v3785_v13  ;;  %v3881_v2 = vld [vmem:[%s4183_s28 + $0x84] ss:$8 sps:$4 sm:$0xff]   ;;  %v3883_v4 = vld [vmem:[%s4183_s28 + $0x80] ss:$8 sps:$4 sm:$0xff]   ;;  %v3854_v5 = vld [vmem:[%s4165_s4 + $0x94] ss:$8 sps:$4 sm:$0xff]  }
  0x2a   : > { %v3887_v6 = vld [vmem:[%s4183_s28 + $0x94] ss:$8 sps:$4 sm:$0xff]   ;;  %v3856_v7 = vld [vmem:[%s4165_s4 + $0x90] ss:$8 sps:$4 sm:$0xff]   ;;  %v3860_v9 = vld [vmem:[%s4165_s4 + $0xa4] ss:$8 sps:$4 sm:$0xff]  }
  0x2b   : > { %v3889_v8 = vld [vmem:[%s4183_s28 + $0x90] ss:$8 sps:$4 sm:$0xff]   ;;  %v3893_v10 = vld [vmem:[%s4183_s28 + $0xa4] ss:$8 sps:$4 sm:$0xff]   ;;  %v3862_v11 = vld [vmem:[%s4165_s4 + $0xa0] ss:$8 sps:$4 sm:$0xff]  }
  0x2c   : > { %1180 = vmatpush1.bf16.msra.mxu0 %v3787_v15  ;;  %1629 = vmatpush1.bf16.msra.mxu1 %v3787_v15  ;;  %v3895_v12 = vld [vmem:[%s4183_s28 + $0xa0] ss:$8 sps:$4 sm:$0xff]   ;;  %v3866_v13 = vld [vmem:[%s4165_s4 + $0xb4] ss:$8 sps:$4 sm:$0xff]   ;;  %v3868_v15 = vld [vmem:[%s4165_s4 + $0xb0] ss:$8 sps:$4 sm:$0xff]  }
  0x2d   : > { %1181 = vmatprep.subr.bf16.mxu0 %v3788_v16  ;;  %1630 = vmatprep.subr.bf16.mxu1 %v3788_v16  ;;  %v3896_v14 = vld [vmem:[%s4183_s28 + $0xb4] ss:$8 sps:$4 sm:$0xff]   ;;  %v3898_v16 = vld [vmem:[%s4183_s28 + $0xb0] ss:$8 sps:$4 sm:$0xff]   ;;  %v3874_v19 = vld [vmem:[%s4165_s4 + $0xc0] ss:$8 sps:$4 sm:$0xff]  }
  0x2e   : > { %s3666_s3 = sshll.u32 %s5834_s30, 6  ;;  %s5812_s23 = sld [smem:[#allocation29_spill]]  ;;  %vm2117_vm0 = vcmask 1043456   ;;  %vm2113_vm1 = vcmask 31744   ;;  %vm2769_vm2 = vcmask 523264   ;;  %vm3996_vm3 = vmmov 0  }
  0x2f   : > { %s5828_s25 = sld [smem:[#allocation31_spill]]  ;;  %vm3308_vm4 = vcmask 261120  }
  0x30   : > { %1182 = vmatpush1.bf16.msra.mxu0 %v3790_v17  ;;  %1631 = vmatpush1.bf16.msra.mxu1 %v3790_v17  ;;  %v3872_v17 = vld [vmem:[%s4165_s4 + $0xc4] ss:$8 sps:$4 sm:$0xff]  }
  0x31   : > { %1183 = vmatprep.subr.bf16.mxu0 %v3791_v18  ;;  %1632 = vmatprep.subr.bf16.mxu1 %v3791_v18  ;;  %v3899_v18 = vld [vmem:[%s4183_s28 + $0xc4] ss:$8 sps:$4 sm:$0xff]  }
  0x34   : > { %1184 = vmatpush2.bf16.msra.mxu0 %v3793_v20  ;;  %1633 = vmatpush2.bf16.msra.mxu1 %v3793_v20  ;;  %v3901_v20 = vld [vmem:[%s4183_s28 + $0xc0] ss:$8 sps:$4 sm:$0xff]   ;;  %s4618_s1 = scalar_lea.vmem %s5812_s23, %s3666_s3 }
  0x35   : > { %1185 = vmatprep.subr.bf16.mxu0 %v3794_v21  ;;  %1634 = vmatprep.subr.bf16.mxu1 %v3794_v21  ;;  %v3878_v21 = vld [vmem:[%s4165_s4 + $0xd4] ss:$8 sps:$4 sm:$0xff]   ;;  %s763_s6 = scalar_lea.vmem %s5828_s25, %s5834_s30 }
  0x38   : > { %1186 = vmatpush2.bf16.msra.mxu0 %v3796_v22  ;;  %1635 = vmatpush2.bf16.msra.mxu1 %v3796_v22  ;;  %v3902_v22 = vld [vmem:[%s4183_s28 + $0xd4] ss:$8 sps:$4 sm:$0xff]  }
  0x39   : > { %1187 = vmatprep.subr.bf16.mxu0 %v3797_v23  ;;  %1636 = vmatprep.subr.bf16.mxu1 %v3797_v23  ;;  %v3880_v23 = vld [vmem:[%s4165_s4 + $0xd0] ss:$8 sps:$4 sm:$0xff]  }
  0x3c   : > { %1188 = vmatpush2.bf16.msra.mxu0 %v3799_v24  ;;  %1637 = vmatpush2.bf16.msra.mxu1 %v3799_v24  ;;  %v3904_v24 = vld [vmem:[%s4183_s28 + $0xd0] ss:$8 sps:$4 sm:$0xff]  }
  0x3d   : > { %1189 = vmatprep.subr.bf16.mxu0 %v3800_v25  ;;  %1638 = vmatprep.subr.bf16.mxu1 %v3800_v25  ;;  %v3884_v25 = vld [vmem:[%s4165_s4 + $0xe4] ss:$8 sps:$4 sm:$0xff]  }
  0x40   : > { %1190 = vmatpush2.bf16.msra.mxu0 %v3802_v26  ;;  %1639 = vmatpush2.bf16.msra.mxu1 %v3802_v26  ;;  %v3905_v26 = vld [vmem:[%s4183_s28 + $0xe4] ss:$8 sps:$4 sm:$0xff]  }
  0x41   : > { %1191 = vmatprep.subr.bf16.mxu0 %v3803_v27  ;;  %1640 = vmatprep.subr.bf16.mxu1 %v3803_v27  ;;  %v3886_v27 = vld [vmem:[%s4165_s4 + $0xe0] ss:$8 sps:$4 sm:$0xff]  }
  0x44   : > { %1192 = vmatpush2.bf16.msra.mxu0 %v3805_v28  ;;  %1641 = vmatpush2.bf16.msra.mxu1 %v3805_v28  ;;  %v3907_v28 = vld [vmem:[%s4183_s28 + $0xe0] ss:$8 sps:$4 sm:$0xff]  }
  0x45   : > { %1193 = vmatprep.subr.bf16.mxu0 %v3806_v29  ;;  %1642 = vmatprep.subr.bf16.mxu1 %v3806_v29  ;;  %v3890_v29 = vld [vmem:[%s4165_s4 + $0xf4] ss:$8 sps:$4 sm:$0xff]  }
  0x48   : > { %1194 = vmatpush2.bf16.msra.mxu0 %v3808_v30  ;;  %1643 = vmatpush2.bf16.msra.mxu1 %v3808_v30  ;;  %v3908_v30 = vld [vmem:[%s4183_s28 + $0xf4] ss:$8 sps:$4 sm:$0xff]  }
  0x49   : > { %1195 = vmatprep.subr.bf16.mxu0 %v3809_v31  ;;  %1644 = vmatprep.subr.bf16.mxu1 %v3809_v31  ;;  %v3892_v31 = vld [vmem:[%s4165_s4 + $0xf0] ss:$8 sps:$4 sm:$0xff]  }
  0x4c   : > { %1196 = vmatpush2.bf16.msra.mxu0 %v3811_v32  ;;  %1645 = vmatpush2.bf16.msra.mxu1 %v3811_v32  ;;  %v3910_v32 = vld [vmem:[%s4183_s28 + $0xf0] ss:$8 sps:$4 sm:$0xff]  }
  0x4d   : > { %1197 = vmatprep.subr.bf16.mxu0 %v3812_v33  ;;  %1646 = vmatprep.subr.bf16.mxu1 %v3812_v33  ;;  %v837_v33 = vlaneseq }
  0x50   : > { %1198 = vmatpush2.bf16.msra.mxu0 %v3814_v34  ;;  %1647 = vmatpush2.bf16.msra.mxu1 %v3814_v34  ;;  %v4296_v34 = vshrl.u32 %v837_v33, 7 }
  0x53   : > { %1200 = vmatmul.mubr.bf16.vlgmr.msra.gmra.mxu0 %v3815_v35  ;;  %1649 = vmatmul.mubr.bf16.vlgmr.msra.gmra.mxu1 %v3833_v36  ;;  %v4299_v35 = vsub.s32 0, %v4296_v34  ;;  %v835_v36 = vld [vmem:[%s5719_s9] sm:$0x3] }
  0x54   : > { %1209 = vmatprep.mubr.bf16.mxu0 %v3818_v37  ;;  %1658 = vmatprep.mubr.bf16.mxu1 %v3839_v38  ;;  %v4305_v37 = vsub.s32 1, %v4296_v34 }
  0x55   : > { %5751 = vst [vmem:[#allocation3_spill] sm:$0xff] %v4299_v35  ;;  %v4308_v38 = vrot.slane %v835_v36, %v4299_v35 }
  0x56   : > { %5752 = vst [vmem:[#allocation4_spill] sm:$0xff] %v4305_v37 }
  0x5b   : > { %1210 = vmatmul.mubr.bf16.gmra.mxu0 %v3820_v39  ;;  %1659 = vmatmul.mubr.bf16.gmra.mxu1 %v3841_v40 }
  0x5c   : > { %1219 = vmatprep.mubr.bf16.mxu0 %v3821_v41  ;;  %1668 = vmatprep.mubr.bf16.mxu1 %v3845_v42  ;;  %v4311_v41 = vrot.slane %v835_v36, %v4305_v37 }
  0x63   : > { %1220 = vmatmul.mubr.bf16.gmra.mxu0 %v3823_v43  ;;  %1669 = vmatmul.mubr.bf16.gmra.mxu1 %v3847_v44 }
  0x64   : > { %1229 = vmatprep.mubr.bf16.mxu0 %v3824_v45  ;;  %1678 = vmatprep.mubr.bf16.mxu1 %v3851_v46 }
  0x6b   : > { %1230 = vmatmul.mubr.bf16.gmra.mxu0 %v3826_v47  ;;  %1679 = vmatmul.mubr.bf16.gmra.mxu1 %v3853_v48 }
  0x6c   : > { %1239 = vmatprep.mubr.bf16.mxu0 %v3827_v49  ;;  %1688 = vmatprep.mubr.bf16.mxu1 %v3857_v50 }
  0x73   : > { %1240 = vmatmul.mubr.bf16.gmra.mxu0 %v3829_v51  ;;  %1689 = vmatmul.mubr.bf16.gmra.mxu1 %v3859_v52 }
  0x74   : > { %1249 = vmatprep.mubr.bf16.mxu0 %v3830_v53  ;;  %1698 = vmatprep.mubr.bf16.mxu1 %v3863_v54 }
  0x7b   : > { %1250 = vmatmul.mubr.bf16.gmra.mxu0 %v3832_v55  ;;  %1699 = vmatmul.mubr.bf16.gmra.mxu1 %v3865_v56 }
  0x7c   : > { %1259 = vmatprep.mubr.bf16.mxu0 %v3836_v57  ;;  %1708 = vmatprep.mubr.bf16.mxu1 %v3869_v58 }
  0x83   : > { %1260 = vmatmul.mubr.bf16.gmra.mxu0 %v3838_v59  ;;  %1709 = vmatmul.mubr.bf16.gmra.mxu1 %v3871_v60 }
  0x84   : > { %1269 = vmatprep.mubr.bf16.mxu0 %v3842_v61  ;;  %1718 = vmatprep.mubr.bf16.mxu1 %v3875_v62 }
  0x8b   : > { %1270 = vmatmul.mubr.bf16.gmra.mxu0 %v3844_v63  ;;  %1719 = vmatmul.mubr.bf16.gmra.mxu1 %v3877_v0 }
  0x8c   : > { %1279 = vmatprep.mubr.bf16.mxu0 %v3848_v1  ;;  %1728 = vmatprep.mubr.bf16.mxu1 %v3881_v2 }
  0x93   : > { %1280 = vmatmul.mubr.bf16.gmra.mxu0 %v3850_v3  ;;  %1729 = vmatmul.mubr.bf16.gmra.mxu1 %v3883_v4 }
  0x94   : > { %1289 = vmatprep.mubr.bf16.mxu0 %v3854_v5  ;;  %1738 = vmatprep.mubr.bf16.mxu1 %v3887_v6 }
  0x9b   : > { %1290 = vmatmul.mubr.bf16.gmra.mxu0 %v3856_v7  ;;  %1739 = vmatmul.mubr.bf16.gmra.mxu1 %v3889_v8 }
  0x9c   : > { %1299 = vmatprep.mubr.bf16.mxu0 %v3860_v9  ;;  %1748 = vmatprep.mubr.bf16.mxu1 %v3893_v10 }
  0xa3   : > { %1300 = vmatmul.mubr.bf16.gmra.mxu0 %v3862_v11  ;;  %1749 = vmatmul.mubr.bf16.gmra.mxu1 %v3895_v12 }
  0xa4   : > { %1309 = vmatprep.mubr.bf16.mxu0 %v3866_v13  ;;  %1758 = vmatprep.mubr.bf16.mxu1 %v3896_v14 }
  0xab   : > { %1310 = vmatmul.mubr.bf16.gmra.mxu0 %v3868_v15  ;;  %1759 = vmatmul.mubr.bf16.gmra.mxu1 %v3898_v16 }
  0xac   : > { %1319 = vmatprep.mubr.bf16.mxu0 %v3872_v17  ;;  %1768 = vmatprep.mubr.bf16.mxu1 %v3899_v18 }
  0xb3   : > { %1320 = vmatmul.mubr.bf16.gmra.mxu0 %v3874_v19  ;;  %1769 = vmatmul.mubr.bf16.gmra.mxu1 %v3901_v20 }
  0xb4   : > { %1329 = vmatprep.mubr.bf16.mxu0 %v3878_v21  ;;  %1778 = vmatprep.mubr.bf16.mxu1 %v3902_v22 }
  0xbb   : > { %1330 = vmatmul.mubr.bf16.gmra.mxu0 %v3880_v23  ;;  %1779 = vmatmul.mubr.bf16.gmra.mxu1 %v3904_v24 }
  0xbc   : > { %1339 = vmatprep.mubr.bf16.mxu0 %v3884_v25  ;;  %1788 = vmatprep.mubr.bf16.mxu1 %v3905_v26 }
  0xc3   : > { %1340 = vmatmul.mubr.bf16.gmra.mxu0 %v3886_v27  ;;  %1789 = vmatmul.mubr.bf16.gmra.mxu1 %v3907_v28 }
  0xc4   : > { %1349 = vmatprep.mubr.bf16.mxu0 %v3890_v29  ;;  %1798 = vmatprep.mubr.bf16.mxu1 %v3908_v30 }
  0xcb   : > { %1350 = vmatmul.mubr.bf16.gmra.mxu0 %v3892_v31  ;;  %1799 = vmatmul.mubr.bf16.gmra.mxu1 %v3910_v32 }
 0x113   : > { %v1201_v39 = vpop.f32.mrf.mxu0  ;;  %v1650_v40 = vpop.f32.mrf.mxu1 }
 0x114   : > { %v1651_v42 = vadd.f32 %v1650_v40, %v4308_v38  ;;  %v1202_v43 = vadd.f32 %v1201_v39, %v4308_v38 }
 0x115   : > { %v1203_v44 = vpop.f32.mrf.mxu0  ;;  %v1652_v45 = vpop.f32.mrf.mxu1 }
 0x116   : > { %v1653_v47 = vadd.f32 %v1652_v45, %v4311_v41  ;;  %v1204_v49 = vadd.f32 %v1203_v44, %v4311_v41  ;;  %v1809_v51 = vmax.f32 %v1651_v42, 0.0  ;;  %v1360_v53 = vmax.f32 %v1202_v43, 0.0 }
 0x117   : > { %v1205_v46 = vpop.f32.mrf.mxu0  ;;  %v1654_v48 = vpop.f32.mrf.mxu1 }
 0x118   : > { %v1206_v50 = vadd.f32 %v1205_v46, %v4308_v38  ;;  %v1655_v52 = vadd.f32 %v1654_v48, %v4308_v38  ;;  %v1810_v61 = vmax.f32 %v1653_v47, 0.0  ;;  %v1361_v63 = vmax.f32 %v1204_v49, 0.0 }
 0x119   : > { %v1207_v54 = vpop.f32.mrf.mxu0  ;;  %v1656_v55 = vpop.f32.mrf.mxu1 }
 0x11a   : > { %v1362_v56 = vmax.f32 %v1206_v50, 0.0  ;;  %v1208_v57 = vadd.f32 %v1207_v54, %v4311_v41  ;;  %v1811_v58 = vmax.f32 %v1655_v52, 0.0  ;;  %v1657_v59 = vadd.f32 %v1656_v55, %v4311_v41 }
 0x11b   : > { %v1211_v60 = vpop.f32.mrf.mxu0  ;;  %v1660_v62 = vpop.f32.mrf.mxu1 }
 0x11c   : > { %v4321_v0 = vpack.c.bf16 %v1362_v56, %v1360_v53  ;;  %v1363_v1 = vmax.f32 %v1208_v57, 0.0  ;;  %v4323_v2 = vpack.c.bf16 %v1811_v58, %v1809_v51  ;;  %v1212_v3 = vadd.f32 %v1211_v60, %v4308_v38  ;;  %v3604_v60 = vld.sshfl [vmem:[%s5762_s27] sm:$0x11 pattern:$0x75316420]  ;;  %s5829_s27 = sld [smem:[#allocation30_spill]] }
 0x11d   : > { %v1213_v4 = vpop.f32.mrf.mxu0  ;;  %v1812_v5 = vmax.f32 %v1657_v59, 0.0  ;;  %v1661_v6 = vadd.f32 %v1660_v62, %v4308_v38  ;;  %v1662_v7 = vpop.f32.mrf.mxu1  ;;  %v3993_v58 = vmov 1966171168  }
 0x11e   : > { %5753 = vst [vmem:[#allocation5_spill] sm:$0xff] %v4321_v0  ;;  %5754 = vst [vmem:[#allocation6_spill] sm:$0xff] %v4323_v2  ;;  %v4327_v8 = vpack.c.bf16 %v1363_v1, %v1361_v63  ;;  %v1663_v11 = vadd.f32 %v1662_v7, %v4311_v41  ;;  %v1214_v13 = vadd.f32 %v1213_v4, %v4311_v41  ;;  %v1364_v17 = vmax.f32 %v1212_v3, 0.0 }
 0x11f   : > { %v1215_v9 = vpop.f32.mrf.mxu0  ;;  %v4329_v10 = vpack.c.bf16 %v1812_v5, %v1810_v61  ;;  %v1664_v12 = vpop.f32.mrf.mxu1  ;;  %v1813_v15 = vmax.f32 %v1661_v6, 0.0  ;;  %v1916_v59 = vunpack.c.l.s4 %v3993_v58  ;;  %v1914_v63 = vcombine.high %v3604_v60, %v3604_v60 }
 0x120   : > { %5755 = vst [vmem:[#allocation7_spill] sm:$0xff] %v4327_v8  ;;  %v1216_v14 = vadd.f32 %v1215_v9, %v4308_v38  ;;  %v1665_v16 = vadd.f32 %v1664_v12, %v4308_v38  ;;  %v1814_v25 = vmax.f32 %v1663_v11, 0.0  ;;  %v1365_v27 = vmax.f32 %v1214_v13, 0.0 }
 0x121   : > { %5756 = vst [vmem:[#allocation8_spill] sm:$0xff] %v4329_v10  ;;  %v1217_v18 = vpop.f32.mrf.mxu0  ;;  %v1666_v19 = vpop.f32.mrf.mxu1  ;;  %v1917_v1 = vunpack.c.0.s8 %v1916_v59 }
 0x122   : > { %v1366_v20 = vmax.f32 %v1216_v14, 0.0  ;;  %v1218_v21 = vadd.f32 %v1217_v18, %v4311_v41  ;;  %v1815_v22 = vmax.f32 %v1665_v16, 0.0  ;;  %v1667_v23 = vadd.f32 %v1666_v19, %v4311_v41  ;;  %s5160_s0 = scalar_lea.vmem %s5829_s27, %s3666_s3  ;;  %s5832_s27 = sld [smem:[#allocation32_spill]] }
 0x123   : > { %v4337_v24 = vpop.f32.mrf.mxu0  ;;  %v1670_v26 = vpop.f32.mrf.mxu1  ;;  %v1920_v5 = vsub.s32 %v1917_v1, %v4296_v34  ;;  %s769_s3 = scalar_lea.vmem %s5732_s22, %s5834_s30 }
 0x124   : > { %v4339_v28 = vpack.c.bf16 %v1366_v20, %v1364_v17  ;;  %v1367_v29 = vmax.f32 %v1218_v21, 0.0  ;;  %v4341_v30 = vpack.c.bf16 %v1815_v22, %v1813_v15  ;;  %v1816_v32 = vmax.f32 %v1667_v23, 0.0 }
 0x125   : > { %v1223_v31 = vpop.f32.mrf.mxu0  ;;  %v1671_v33 = vadd.f32 %v1670_v26, %v4308_v38  ;;  %v1672_v36 = vpop.f32.mrf.mxu1  ;;  %v4355_v9 = vrot.slane %v3604_v60, %v1920_v5  ;;  %v1928_v11 = vrot.slane %v1914_v63, %v1920_v5 }
 0x126   : > { %5757 = vst [vmem:[#allocation9_spill] sm:$0xff] %v4339_v28  ;;  %5758 = vst [vmem:[#allocation10_spill] sm:$0xff] %v4341_v30  ;;  %v4344_v39 = vpack.c.bf16 %v1367_v29, %v1365_v27  ;;  %v4346_v42 = vpack.c.bf16 %v1816_v32, %v1814_v25  ;;  %v4361_v34 = vadd.f32 %v1672_v36, %v4311_v41 }
 0x127   : > { %v1225_v40 = vpop.f32.mrf.mxu0  ;;  %v1674_v43 = vpop.f32.mrf.mxu1  ;;  %v1817_v44 = vmax.f32 %v1671_v33, 0.0  ;;  %5763 = vst [vmem:[#allocation14_spill] sm:$0xff] %v4355_v9  ;;  %1963 = vmatprep.mubr.bf16.mxu0 %v1928_v11  ;;  %2036 = vmatprep.mubr.bf16.mxu1 %v1928_v11  ;;  %v4379_v32 = vadd.f32 %v1223_v31, %v4311_v41 }
 0x128   : > { %5759 = vst [vmem:[#allocation11_spill] sm:$0xff] %v4344_v39  ;;  %5760 = vst [vmem:[#allocation12_spill] sm:$0xff] %v4346_v42  ;;  %v1675_v45 = vadd.f32 %v1674_v43, %v4308_v38  ;;  %v4382_v33 = vadd.f32 %v1225_v40, %v4308_v38 }
 0x129   : > { %v1227_v46 = vpop.f32.mrf.mxu0  ;;  %v1676_v47 = vpop.f32.mrf.mxu1  ;;  %5765 = vst [vmem:[#allocation16_spill] sm:$0xff] %v4361_v34 }
 0x12a   : > { %v1819_v48 = vmax.f32 %v1675_v45, 0.0  ;;  %v4358_v20 = vadd.f32 %v1227_v46, %v4311_v41  ;;  %v4364_v21 = vadd.f32 %v1676_v47, %v4311_v41 }
 0x12b   : > { %v1231_v49 = vpop.f32.mrf.mxu0  ;;  %v1680_v50 = vpop.f32.mrf.mxu1 }
 0x12c   : > { %v4349_v51 = vpack.c.bf16 %v1819_v48, %v1817_v44  ;;  %5764 = vst [vmem:[#allocation15_spill] sm:$0xff] %v4358_v20  ;;  %5766 = vst [vmem:[#allocation17_spill] sm:$0xff] %v4364_v21  ;;  %v4370_v25 = vadd.f32 %v1680_v50, %v4308_v38  ;;  %v4389_v46 = vadd.f32 %v1231_v49, %v4308_v38 }
 0x12d   : > { %v1233_v52 = vpop.f32.mrf.mxu0  ;;  %v1682_v53 = vpop.f32.mrf.mxu1 }
 0x12e   : > { %5761 = vst [vmem:[#allocation13_spill] sm:$0xff] %v4349_v51  ;;  %v4367_v22 = vadd.f32 %v1233_v52, %v4311_v41  ;;  %v4376_v29 = vadd.f32 %v1682_v53, %v4311_v41 }
 0x12f   : > { %v1235_v54 = vpop.f32.mrf.mxu0  ;;  %v1684_v55 = vpop.f32.mrf.mxu1 }
 0x130   : > { %v4373_v27 = vadd.f32 %v1235_v54, %v4308_v38  ;;  %v4407_v59 = vadd.f32 %v1684_v55, %v4308_v38 }
 0x131   : > { %v1237_v56 = vpop.f32.mrf.mxu0  ;;  %v1686_v57 = vpop.f32.mrf.mxu1 }
 0x132   : > { %5767 = vst [vmem:[#allocation18_spill] sm:$0xff] %v4373_v27  ;;  %v4385_v36 = vadd.f32 %v1237_v56, %v4311_v41  ;;  %v4396_v52 = vadd.f32 %v1686_v57, %v4311_v41 }
 0x133   : > { %v1241_v61 = vpop.f32.mrf.mxu0  ;;  %v1690_v62 = vpop.f32.mrf.mxu1 }
 0x134   : > { %v4399_v53 = vadd.f32 %v1690_v62, %v4308_v38  ;;  %v4432_v45 = vadd.f32 %v1241_v61, %v4308_v38 }
 0x135   : > { %v1243_v3 = vpop.f32.mrf.mxu0  ;;  %v1692_v4 = vpop.f32.mrf.mxu1 }
 0x136   : > { %v4403_v49 = vadd.f32 %v1243_v3, %v4311_v41  ;;  %v4414_v62 = vadd.f32 %v1692_v4, %v4311_v41 }
 0x137   : > { %v1245_v6 = vpop.f32.mrf.mxu0  ;;  %v1694_v7 = vpop.f32.mrf.mxu1 }
 0x138   : > { %v4417_v1 = vadd.f32 %v1694_v7, %v4308_v38 }
 0x139   : > { %v1247_v12 = vpop.f32.mrf.mxu0  ;;  %v1696_v13 = vpop.f32.mrf.mxu1 }
 0x13a   : > { %v4411_v63 = vadd.f32 %v1247_v12, %v4311_v41  ;;  %v4423_v11 = vadd.f32 %v1696_v13, %v4311_v41 }
 0x13b   : > { %v1251_v14 = vpop.f32.mrf.mxu0  ;;  %v1700_v15 = vpop.f32.mrf.mxu1 }
 0x13c   : > { %v4426_v55 = vadd.f32 %v1700_v15, %v4308_v38  ;;  %v4441_v15 = vadd.f32 %v1245_v6, %v4308_v38  ;;  %v4451_v56 = vadd.f32 %v1251_v14, %v4308_v38 }
 0x13d   : > { %v1253_v16 = vpop.f32.mrf.mxu0  ;;  %v1702_v17 = vpop.f32.mrf.mxu1 }
 0x13e   : > { %v4420_v3 = vadd.f32 %v1253_v16, %v4311_v41  ;;  %v4429_v12 = vadd.f32 %v1702_v17, %v4311_v41 }
 0x13f   : > { %v1255_v18 = vpop.f32.mrf.mxu0  ;;  %v1704_v19 = vpop.f32.mrf.mxu1 }
 0x140   : > { %v4435_v4 = vadd.f32 %v1255_v18, %v4308_v38  ;;  %v4462_v13 = vadd.f32 %v1704_v19, %v4308_v38 }
 0x141   : > { %v1257_v23 = vpop.f32.mrf.mxu0  ;;  %v1706_v26 = vpop.f32.mrf.mxu1 }
 0x142   : > { %v4444_v17 = vadd.f32 %v1257_v23, %v4311_v41  ;;  %v4447_v61 = vadd.f32 %v1706_v26, %v4311_v41 }
 0x143   : > { %v1261_v43 = vpop.f32.mrf.mxu0  ;;  %v1710_v44 = vpop.f32.mrf.mxu1 }
 0x144   : > { %v4465_v48 = vadd.f32 %v1710_v44, %v4308_v38  ;;  %v4469_v31 = vadd.f32 %v1261_v43, %v4308_v38 }
 0x145   : > { %v1263_v50 = vpop.f32.mrf.mxu0  ;;  %v1712_v54 = vpop.f32.mrf.mxu1 }
 0x146   : > { %v1264_v16 = vadd.f32 %v1263_v50, %v4311_v41  ;;  %v1713_v37 = vadd.f32 %v1712_v54, %v4311_v41  ;;  %v1833_v54 = vmax.f32 %v4465_v48, 0.0 }
 0x147   : > { %v1265_v57 = vpop.f32.mrf.mxu0  ;;  %v1714_v5 = vpop.f32.mrf.mxu1 }
 0x148   : > { %v1715_v43 = vadd.f32 %v1714_v5, %v4308_v38  ;;  %v1834_v5 = vmax.f32 %v1713_v37, 0.0 }
 0x149   : > { %v1267_v7 = vpop.f32.mrf.mxu0  ;;  %v1716_v47 = vpop.f32.mrf.mxu1 }
 0x14a   : > { %v1268_v18 = vadd.f32 %v1267_v7, %v4311_v41  ;;  %v1717_v19 = vadd.f32 %v1716_v47, %v4311_v41 }
 0x14b   : > { %v1271_v40 = vpop.f32.mrf.mxu0  ;;  %v1720_v60 = vpop.f32.mrf.mxu1 }
 0x14c   : > { %v1721_v26 = vadd.f32 %v1720_v60, %v4308_v38  ;;  %v1266_v60 = vadd.f32 %v1265_v57, %v4308_v38  ;;  %v1387_v2 = vmax.f32 %v1268_v18, 0.0  ;;  %v1272_v50 = vadd.f32 %v1271_v40, %v4308_v38 }
 0x14d   : > { %v1273_v14 = vpop.f32.mrf.mxu0  ;;  %v1722_v58 = vpop.f32.mrf.mxu1  ;;  %v1836_v28 = vmax.f32 %v1717_v19, 0.0  ;;  %v1385_v57 = vmax.f32 %v1264_v16, 0.0  ;;  %v1835_v40 = vmax.f32 %v1715_v43, 0.0 }
 0x14e   : > { %v1723_v44 = vadd.f32 %v1722_v58, %v4311_v41  ;;  %v1274_v9 = vadd.f32 %v1273_v14, %v4311_v41  ;;  %v1837_v10 = vmax.f32 %v1721_v26, 0.0  ;;  %v1388_v39 = vmax.f32 %v1272_v50, 0.0 }
 0x14f   : > { %v1275_v7 = vpop.f32.mrf.mxu0  ;;  %v1724_v35 = vpop.f32.mrf.mxu1  ;;  %v1386_v26 = vmax.f32 %v1266_v60, 0.0  ;;  %v1384_v60 = vmax.f32 %v4469_v31, 0.0  ;;  %v5769_v31 = vmax.f32 %v4444_v17, 0.0 }
 0x150   : > { %v1276_v6 = vadd.f32 %v1275_v7, %v4308_v38  ;;  %v1725_v23 = vadd.f32 %v1724_v35, %v4308_v38  ;;  %v1838_v35 = vmax.f32 %v1723_v44, 0.0  ;;  %v1389_v18 = vmax.f32 %v1274_v9, 0.0 }
 0x151   : > { %v1277_v0 = vpop.f32.mrf.mxu0  ;;  %v1726_v47 = vpop.f32.mrf.mxu1  ;;  %v1985_v44 = vpack.c.bf16 %v1836_v28, %v1834_v5  ;;  %v1984_v28 = vpack.c.bf16 %v1835_v40, %v1833_v54  ;;  %v1886_v5 = vpack.c.bf16 %v1386_v26, %v1384_v60 }
 0x152   : > { %v1278_v58 = vadd.f32 %v1277_v0, %v4311_v41  ;;  %v1839_v30 = vmax.f32 %v1725_v23, 0.0  ;;  %v1727_v14 = vadd.f32 %v1726_v47, %v4311_v41  ;;  %v1390_v7 = vmax.f32 %v1276_v6, 0.0 }
 0x153   : > { %v1281_v8 = vpop.f32.mrf.mxu0  ;;  %v1730_v42 = vpop.f32.mrf.mxu1  ;;  %v1887_v47 = vpack.c.bf16 %v1387_v2, %v1385_v57 }
 0x154   : > { %v1391_v51 = vmax.f32 %v1278_v58, 0.0  ;;  %v1282_v48 = vadd.f32 %v1281_v8, %v4308_v38  ;;  %v1840_v21 = vmax.f32 %v1727_v14, 0.0  ;;  %v1731_v0 = vadd.f32 %v1730_v42, %v4308_v38 }
 0x155   : > { %v1283_v20 = vpop.f32.mrf.mxu0  ;;  %v1732_v23 = vpop.f32.mrf.mxu1  ;;  %v1986_v34 = vpack.c.bf16 %v1839_v30, %v1837_v10  ;;  %v1888_v37 = vpack.c.bf16 %v1390_v7, %v1388_v39  ;;  %v1831_v10 = vmax.f32 %v4462_v13, 0.0  ;;  %v5768_v14 = vmax.f32 %v4420_v3, 0.0 }
 0x156   : > { %v1889_v6 = vpack.c.bf16 %v1391_v51, %v1389_v18  ;;  %v1987_v27 = vpack.c.bf16 %v1840_v21, %v1838_v35  ;;  %v1733_v9 = vadd.f32 %v1732_v23, %v4311_v41  ;;  %v1284_v43 = vadd.f32 %v1283_v20, %v4311_v41 }
 0x157   : > { %v1285_v19 = vpop.f32.mrf.mxu0  ;;  %v1734_v16 = vpop.f32.mrf.mxu1  ;;  %v1841_v50 = vmax.f32 %v1731_v0, 0.0  ;;  %v1392_v2 = vmax.f32 %v1282_v48, 0.0  ;;  %v1885_v7 = vpack.c.bf16 %v5769_v31, %v5768_v14  ;;  %v5770_v13 = vmax.f32 %v4429_v12, 0.0 }
 0x158   : > { %v1286_v8 = vadd.f32 %v1285_v19, %v4308_v38  ;;  %1931 = vmatprep.subr.bf16.mxu0 %v1889_v6  ;;  %v1735_v42 = vadd.f32 %v1734_v16, %v4308_v38  ;;  %2004 = vmatprep.subr.bf16.mxu1 %v1987_v27  ;;  %v5771_v27 = vmax.f32 %v4447_v61, 0.0  ;;  %v1842_v57 = vmax.f32 %v1733_v9, 0.0 }
 0x159   : > { %v1287_v51 = vpop.f32.mrf.mxu0  ;;  %1932 = vmatpush1.bf16.msra.mxu0 %v1888_v37  ;;  %v1736_v30 = vpop.f32.mrf.mxu1  ;;  %2005 = vmatpush1.bf16.msra.mxu1 %v1986_v34  ;;  %v1393_v40 = vmax.f32 %v1284_v43, 0.0  ;;  %v1380_v3 = vmax.f32 %v4451_v56, 0.0  ;;  %v5774_v6 = vmax.f32 %v4403_v49, 0.0  ;;  %v5775_v37 = vmax.f32 %v4411_v63, 0.0 }
 0x15a   : > { %v1394_v39 = vmax.f32 %v1286_v8, 0.0  ;;  %v1288_v21 = vadd.f32 %v1287_v51, %v4311_v41  ;;  %1933 = vmatprep.subr.bf16.mxu0 %v1887_v47  ;;  %v1843_v20 = vmax.f32 %v1735_v42, 0.0  ;;  %v1737_v58 = vadd.f32 %v1736_v30, %v4311_v41  ;;  %2006 = vmatprep.subr.bf16.mxu1 %v1985_v44 }
 0x15b   : > { %v1291_v35 = vpop.f32.mrf.mxu0  ;;  %v1983_v54 = vpack.c.bf16 %v5771_v27, %v5770_v13  ;;  %v1740_v18 = vpop.f32.mrf.mxu1  ;;  %v1378_v47 = vmax.f32 %v4441_v15, 0.0  ;;  %v1883_v19 = vpack.c.bf16 %v5775_v37, %v5774_v6  ;;  %v5777_v56 = vmax.f32 %v4426_v55, 0.0  ;;  %v5795_v37 = vld [vmem:[#allocation16_spill] sm:$0xff] }
 0x15c   : > { %v4504_v48 = vpack.c.bf16 %v1394_v39, %v1392_v2  ;;  %v1395_v0 = vmax.f32 %v1288_v21, 0.0  ;;  %v4506_v34 = vpack.c.bf16 %v1843_v20, %v1841_v50  ;;  %v1292_v17 = vadd.f32 %v1291_v35, %v4308_v38 }
 0x15d   : > { %v1293_v23 = vpop.f32.mrf.mxu0  ;;  %1934 = vmatpush1.bf16.msra.mxu0 %v1886_v5  ;;  %v1844_v26 = vmax.f32 %v1737_v58, 0.0  ;;  %v1741_v12 = vadd.f32 %v1740_v18, %v4308_v38  ;;  %v1742_v61 = vpop.f32.mrf.mxu1  ;;  %v1982_v9 = vpack.c.bf16 %v1831_v10, %v5777_v56  ;;  %2007 = vmatpush1.bf16.msra.mxu1 %v1984_v28  ;;  %v5778_v16 = vmax.f32 %v4435_v4, 0.0  ;;  %v5797_v56 = vld [vmem:[#allocation17_spill] sm:$0xff] }
 0x15e   : > { %5772 = vst [vmem:[#allocation19_spill] sm:$0xff] %v4504_v48  ;;  %5773 = vst [vmem:[#allocation20_spill] sm:$0xff] %v4506_v34  ;;  %v4516_v44 = vpack.c.bf16 %v1395_v0, %v1393_v40  ;;  %1935 = vmatprep.subr.bf16.mxu0 %v1885_v7  ;;  %v5779_v50 = vmax.f32 %v4414_v62, 0.0  ;;  %v5780_v15 = vmax.f32 %v4423_v11, 0.0  ;;  %v1743_v63 = vadd.f32 %v1742_v61, %v4311_v41 }
 0x15f   : > { %v1884_v43 = vpack.c.bf16 %v5778_v16, %v1380_v3  ;;  %v1295_v8 = vpop.f32.mrf.mxu0  ;;  %v4526_v49 = vpack.c.bf16 %v1844_v26, %v1842_v57  ;;  %v1744_v60 = vpop.f32.mrf.mxu1  ;;  %2008 = vmatprep.subr.bf16.mxu1 %v1983_v54  ;;  %v1294_v2 = vadd.f32 %v1293_v23, %v4311_v41  ;;  %v1845_v51 = vmax.f32 %v1741_v12, 0.0 }
 0x160   : > { %5776 = vst [vmem:[#allocation21_spill] sm:$0xff] %v4516_v44  ;;  %v1981_v42 = vpack.c.bf16 %v5780_v15, %v5779_v50  ;;  %v1296_v55 = vadd.f32 %v1295_v8, %v4308_v38  ;;  %v1745_v4 = vadd.f32 %v1744_v60, %v4308_v38  ;;  %v1376_v10 = vmax.f32 %v4432_v45, 0.0  ;;  %v5801_v8 = vld [vmem:[#allocation15_spill] sm:$0xff] }
 0x161   : > { %5781 = vst [vmem:[#allocation22_spill] sm:$0xff] %v4526_v49  ;;  %v1823_v62 = vmax.f32 %v4407_v59, 0.0  ;;  %v1396_v28 = vmax.f32 %v1292_v17, 0.0  ;;  %v5782_v11 = vmax.f32 %v4399_v53, 0.0  ;;  %v5783_v30 = vmax.f32 %v4417_v1, 0.0  ;;  %v1297_v21 = vpop.f32.mrf.mxu0  ;;  %1936 = vmatpush1.bf16.msra.mxu0 %v1884_v43  ;;  %v1746_v20 = vpop.f32.mrf.mxu1  ;;  %2009 = vmatpush1.bf16.msra.mxu1 %v1982_v9 }
 0x162   : > { %v1398_v58 = vmax.f32 %v1296_v55, 0.0  ;;  %v1298_v14 = vadd.f32 %v1297_v21, %v4311_v41  ;;  %1937 = vmatprep.subr.bf16.mxu0 %v1883_v19  ;;  %v1847_v31 = vmax.f32 %v1745_v4, 0.0  ;;  %v1747_v7 = vadd.f32 %v1746_v20, %v4311_v41  ;;  %2010 = vmatprep.subr.bf16.mxu1 %v1981_v42  ;;  %v5806_v21 = vld [vmem:[#allocation9_spill] sm:$0xff] }
 0x163   : > { %v1980_v39 = vpack.c.bf16 %v5783_v30, %v5782_v11  ;;  %v5784_v45 = vmax.f32 %v4367_v22, 0.0  ;;  %v5785_v59 = vmax.f32 %v4385_v36, 0.0  ;;  %v1882_v53 = vpack.c.bf16 %v1378_v47, %v1376_v10  ;;  %v4548_v27 = vpop.f32.mrf.mxu0  ;;  %v4550_v57 = vpop.f32.mrf.mxu1  ;;  %v5803_v10 = vld [vmem:[#allocation11_spill] sm:$0xff]  ;;  %v5805_v30 = vld [vmem:[#allocation12_spill] sm:$0xff] }
 0x164   : > { %v5786_v1 = vmax.f32 %v4376_v29, 0.0  ;;  %v5787_v35 = vmax.f32 %v4396_v52, 0.0  ;;  %5788 = vst [vmem:[#allocation23_spill] sm:$0xff] %v4548_v27  ;;  %v1846_v54 = vmax.f32 %v1743_v63, 0.0  ;;  %v1397_v18 = vmax.f32 %v1294_v2, 0.0 }
 0x165   : > { %v1881_v5 = vpack.c.bf16 %v5785_v59, %v5784_v45  ;;  %v4552_v40 = vpack.c.bf16 %v1398_v58, %v1396_v28  ;;  %v1399_v0 = vmax.f32 %v1298_v14, 0.0  ;;  %v4554_v22 = vpack.c.bf16 %v1847_v31, %v1845_v51  ;;  %v4559_v3 = vpop.f32.mrf.mxu0  ;;  %1938 = vmatpush1.bf16.msra.mxu0 %v1882_v53  ;;  %v4561_v17 = vpop.f32.mrf.mxu1  ;;  %2011 = vmatpush1.bf16.msra.mxu1 %v1980_v39  ;;  %v5807_v58 = vld [vmem:[#allocation7_spill] sm:$0xff]  ;;  %v5808_v14 = vld [vmem:[#allocation10_spill] sm:$0xff]  ;;  %v5809_v45 = vld [vmem:[#allocation8_spill] sm:$0xff] }
 0x166   : > { %v1979_v13 = vpack.c.bf16 %v5787_v35, %v5786_v1  ;;  %v1222_v36 = vadd.f32 %v4337_v24, %v4308_v38  ;;  %v1372_v29 = vmax.f32 %v4389_v46, 0.0  ;;  %v1848_v52 = vmax.f32 %v1747_v7, 0.0  ;;  %v5793_v24 = vld [vmem:[#allocation18_spill] sm:$0xff] }
 0x167   : > { %5789 = vst [vmem:[#allocation24_spill] sm:$0xff] %v4552_v40  ;;  %5790 = vst [vmem:[#allocation25_spill] sm:$0xff] %v4554_v22  ;;  %v1369_v23 = vmax.f32 %v4379_v32, 0.0  ;;  %v5791_v26 = vmax.f32 %v4370_v25, 0.0  ;;  %v4566_v61 = vpack.c.bf16 %v1399_v0, %v1397_v18  ;;  %1939 = vmatprep.subr.bf16.mxu0 %v1881_v5  ;;  %v1370_v47 = vmax.f32 %v4382_v33, 0.0  ;;  %v4575_v43 = vpop.f32.mrf.mxu0  ;;  %v4579_v25 = vpop.f32.mrf.mxu1  ;;  %v5810_v5 = vld [vmem:[#allocation5_spill] sm:$0xff] }
 0x168   : > { %v5794_v6 = vmax.f32 %v5793_v24, 0.0  ;;  %v5796_v19 = vmax.f32 %v5795_v37, 0.0  ;;  %v5798_v9 = vmax.f32 %v5797_v56, 0.0  ;;  %5799 = vst [vmem:[#allocation18_spill] sm:$0xff] %v4575_v43  ;;  %v4577_v32 = vpack.c.bf16 %v1848_v52, %v1846_v54  ;;  %2012 = vmatprep.subr.bf16.mxu1 %v1979_v13  ;;  %v5811_v1 = vld [vmem:[#allocation6_spill] sm:$0xff] }
 0x169   : > { %v1978_v12 = vpack.c.bf16 %v1823_v62, %v5791_v26  ;;  %5792 = vst [vmem:[#allocation26_spill] sm:$0xff] %v4566_v61  ;;  %v5802_v50 = vmax.f32 %v5801_v8, 0.0  ;;  %v1368_v42 = vmax.f32 %v1222_v36, 0.0  ;;  %v4583_v33 = vpop.f32.mrf.mxu0  ;;  %v1756_v63 = vpop.f32.mrf.mxu1  ;;  %v5804_v62 = vld [vmem:[#allocation13_spill] sm:$0xff]  ;;  %v4628_v8 = vadd.f32 %v4550_v57, %v4308_v38 }
 0x16a   : > { %v1880_v46 = vpack.c.bf16 %v5794_v6, %v1372_v29  ;;  %v1977_v16 = vpack.c.bf16 %v5798_v9, %v5796_v19  ;;  %5800 = vst [vmem:[#allocation16_spill] sm:$0xff] %v4577_v32  ;;  %v4624_v9 = vadd.f32 %v4559_v3, %v4311_v41 }
 0x16b   : > { %v1879_v15 = vpack.c.bf16 %v5802_v50, %v1369_v23  ;;  %2013 = vmatpush1.bf16.msra.mxu1 %v1978_v12  ;;  %v1878_v60 = vpack.c.bf16 %v1370_v47, %v1368_v42  ;;  %v4585_v2 = vpop.f32.mrf.mxu0  ;;  %v1760_v55 = vpop.f32.mrf.mxu1  ;;  %5814 = vst [vmem:[#allocation15_spill] sm:$0xff] %v4628_v8  ;;  %v4635_v42 = vadd.f32 %v1756_v63, %v4311_v41 }
 0x16c   : > { %1940 = vmatpush1.bf16.msra.mxu0 %v1880_v46  ;;  %2014 = vmatprep.subr.bf16.mxu1 %v1977_v16  ;;  %5813 = vst [vmem:[#allocation17_spill] sm:$0xff] %v4624_v9 }
 0x16d   : > { %1941 = vmatprep.subr.bf16.mxu0 %v1879_v15  ;;  %v1313_v51 = vpop.f32.mrf.mxu0  ;;  %v1762_v4 = vpop.f32.mrf.mxu1  ;;  %v4632_v15 = vadd.f32 %v4561_v17, %v4311_v41 }
 0x16e   : > { %v4644_v3 = vadd.f32 %v1313_v51, %v4311_v41  ;;  %v4647_v57 = vadd.f32 %v1762_v4, %v4311_v41 }
 0x16f   : > { %2015 = vmatpush1.bf16.msra.mxu1 %v5804_v62  ;;  %v4589_v28 = vpop.f32.mrf.mxu0  ;;  %v4591_v11 = vpop.f32.mrf.mxu1 }
 0x170   : > { %1942 = vmatpush1.bf16.msra.mxu0 %v1878_v60  ;;  %2016 = vmatprep.subr.bf16.mxu1 %v5805_v30  ;;  %v4638_v60 = vadd.f32 %v1760_v55, %v4308_v38 }
 0x171   : > { %1943 = vmatprep.subr.bf16.mxu0 %v5803_v10  ;;  %v4594_v39 = vpop.f32.mrf.mxu0  ;;  %v1766_v20 = vpop.f32.mrf.mxu1 }
 0x172   : > { %v4650_v30 = vadd.f32 %v1766_v20, %v4311_v41 }
 0x173   : > { %2017 = vmatpush1.bf16.msra.mxu1 %v5808_v14  ;;  %v4599_v31 = vpop.f32.mrf.mxu0  ;;  %v1770_v7 = vpop.f32.mrf.mxu1 }
 0x174   : > { %1944 = vmatpush1.bf16.msra.mxu0 %v5806_v21  ;;  %2018 = vmatprep.subr.bf16.mxu1 %v5809_v45  ;;  %v4657_v55 = vadd.f32 %v1770_v7, %v4308_v38 }
 0x175   : > { %1945 = vmatprep.subr.bf16.mxu0 %v5807_v58  ;;  %v1323_v59 = vpop.f32.mrf.mxu0  ;;  %v1772_v53 = vpop.f32.mrf.mxu1 }
 0x176   : > { %v4654_v21 = vadd.f32 %v1323_v59, %v4311_v41  ;;  %v4660_v58 = vadd.f32 %v1772_v53, %v4311_v41 }
 0x177   : > { %2019 = vmatpush1.bf16.msra.mxu1 %v5811_v1  ;;  %v4604_v35 = vpop.f32.mrf.mxu0  ;;  %v4606_v13 = vpop.f32.mrf.mxu1 }
 0x178   : > { %1946 = vmatpush1.bf16.msra.mxu0 %v5810_v5 }
 0x179   : > { %v4608_v54 = vpop.f32.mrf.mxu0  ;;  %v1776_v18 = vpop.f32.mrf.mxu1 }
 0x17a   : > { %v4663_v51 = vadd.f32 %v1776_v18, %v4311_v41 }
 0x17b   : > { %v4610_v0 = vpop.f32.mrf.mxu0  ;;  %v1780_v36 = vpop.f32.mrf.mxu1 }
 0x17c   : > { %v4669_v14 = vadd.f32 %v1780_v36, %v4308_v38 }
 0x17d   : > { %v1333_v29 = vpop.f32.mrf.mxu0  ;;  %v1782_v52 = vpop.f32.mrf.mxu1 }
 0x17e   : > { %v4641_v10 = vadd.f32 %v1782_v52, %v4311_v41  ;;  %v4666_v4 = vadd.f32 %v1333_v29, %v4311_v41 }
 0x17f   : > { %v4620_v23 = vpop.f32.mrf.mxu0  ;;  %v1784_v26 = vpop.f32.mrf.mxu1 }
 0x180   : > { %v1862_v53 = vmax.f32 %v4641_v10, 0.0  ;;  %v4678_v1 = vadd.f32 %v1784_v26, %v4308_v38 }
 0x181   : > { %v1337_v12 = vpop.f32.mrf.mxu0  ;;  %v1786_v47 = vpop.f32.mrf.mxu1 }
 0x182   : > { %v4674_v7 = vadd.f32 %v1337_v12, %v4311_v41  ;;  %v1787_v36 = vadd.f32 %v1786_v47, %v4311_v41 }
 0x183   : > { %v1341_v24 = vpop.f32.mrf.mxu0  ;;  %v1790_v6 = vpop.f32.mrf.mxu1 }
 0x185   : > { %v1343_v46 = vpop.f32.mrf.mxu0  ;;  %v1792_v37 = vpop.f32.mrf.mxu1 }
 0x186   : > { %v1793_v17 = vadd.f32 %v1792_v37, %v4311_v41  ;;  %v1344_v29 = vadd.f32 %v1343_v46, %v4311_v41  ;;  %v1791_v37 = vadd.f32 %v1790_v6, %v4308_v38 }
 0x187   : > { %v1345_v19 = vpop.f32.mrf.mxu0  ;;  %v1794_v56 = vpop.f32.mrf.mxu1 }
 0x188   : > { %v1795_v46 = vadd.f32 %v1794_v56, %v4308_v38  ;;  %v1417_v27 = vmax.f32 %v1344_v29, 0.0 }
 0x189   : > { %v1347_v16 = vpop.f32.mrf.mxu0  ;;  %v1796_v50 = vpop.f32.mrf.mxu1 }
 0x18a   : > { %v1797_v45 = vadd.f32 %v1796_v50, %v4311_v41  ;;  %v1866_v50 = vmax.f32 %v1793_v17, 0.0  ;;  %v1348_v34 = vadd.f32 %v1347_v16, %v4311_v41 }
 0x18b   : > { %v1351_v62 = vpop.f32.mrf.mxu0  ;;  %v1800_v63 = vpop.f32.mrf.mxu1 }
 0x18c   : > { %v1801_v59 = vadd.f32 %v1800_v63, %v4308_v38  ;;  %v1352_v48 = vadd.f32 %v1351_v62, %v4308_v38  ;;  %v1868_v49 = vmax.f32 %v1797_v45, 0.0  ;;  %v1419_v32 = vmax.f32 %v1348_v34, 0.0 }
 0x18d   : > { %v1353_v20 = vpop.f32.mrf.mxu0  ;;  %v1802_v5 = vpop.f32.mrf.mxu1  ;;  %v1865_v45 = vmax.f32 %v1791_v37, 0.0  ;;  %v1328_v34 = vadd.f32 %v4608_v54, %v4311_v41  ;;  %v1858_v54 = vmax.f32 %v4660_v58, 0.0 }
 0x18e   : > { %v1803_v18 = vadd.f32 %v1802_v5, %v4311_v41  ;;  %v1354_v12 = vadd.f32 %v1353_v20, %v4311_v41  ;;  %v1869_v44 = vmax.f32 %v1801_v59, 0.0  ;;  %v1342_v20 = vadd.f32 %v1341_v24, %v4308_v38 }
 0x18f   : > { %v1355_v52 = vpop.f32.mrf.mxu0  ;;  %v1804_v63 = vpop.f32.mrf.mxu1  ;;  %v1420_v56 = vmax.f32 %v1352_v48, 0.0  ;;  %v1867_v59 = vmax.f32 %v1795_v46, 0.0  ;;  %v1332_v48 = vadd.f32 %v4610_v0, %v4308_v38  ;;  %v1860_v0 = vmax.f32 %v4663_v51, 0.0 }
 0x190   : > { %v1356_v10 = vadd.f32 %v1355_v52, %v4308_v38  ;;  %v1805_v26 = vadd.f32 %v1804_v63, %v4308_v38  ;;  %v1870_v17 = vmax.f32 %v1803_v18, 0.0  ;;  %v1346_v52 = vadd.f32 %v1345_v19, %v4308_v38 }
 0x191   : > { %v1357_v5 = vpop.f32.mrf.mxu0  ;;  %v1806_v47 = vpop.f32.mrf.mxu1  ;;  %v1864_v63 = vmax.f32 %v1787_v36, 0.0  ;;  %v1421_v62 = vmax.f32 %v1354_v12, 0.0  ;;  %v2001_v18 = vpack.c.bf16 %v1868_v49, %v1866_v50  ;;  %v1775_v19 = vadd.f32 %v4606_v13, %v4308_v38 }
 0x192   : > { %v1358_v6 = vadd.f32 %v1357_v5, %v4311_v41  ;;  %v1871_v22 = vmax.f32 %v1805_v26, 0.0  ;;  %v1807_v16 = vadd.f32 %v1806_v47, %v4311_v41  ;;  %v1422_v40 = vmax.f32 %v1356_v10, 0.0 }
 0x193   : > { %v1336_v47 = vadd.f32 %v4620_v23, %v4308_v38  ;;  %v1418_v24 = vmax.f32 %v1346_v52, 0.0  ;;  %v1416_v49 = vmax.f32 %v1342_v20, 0.0  ;;  %v2000_v23 = vpack.c.bf16 %v1867_v59, %v1865_v45  ;;  %v5817_v59 = vld [vmem:[#allocation15_spill] sm:$0xff] }
 0x194   : > { %v1423_v61 = vmax.f32 %v1358_v6, 0.0  ;;  %v1872_v9 = vmax.f32 %v1807_v16, 0.0  ;;  %v2002_v8 = vpack.c.bf16 %v1871_v22, %v1869_v44  ;;  %v1904_v43 = vpack.c.bf16 %v1422_v40, %v1420_v56 }
 0x195   : > { %v1415_v44 = vmax.f32 %v4674_v7, 0.0  ;;  %v1903_v22 = vpack.c.bf16 %v1419_v32, %v1417_v27  ;;  %v1863_v40 = vmax.f32 %v4678_v1, 0.0  ;;  %v1413_v13 = vmax.f32 %v4666_v4, 0.0 }
 0x196   : > { %v1905_v5 = vpack.c.bf16 %v1423_v61, %v1421_v62  ;;  %v2003_v26 = vpack.c.bf16 %v1872_v9, %v1870_v17  ;;  %v1861_v61 = vmax.f32 %v4669_v14, 0.0  ;;  %v1999_v9 = vpack.c.bf16 %v1864_v63, %v1862_v53 }
 0x197   : > { %v1326_v27 = vadd.f32 %v4604_v35, %v4308_v38  ;;  %v1414_v32 = vmax.f32 %v1336_v47, 0.0  ;;  %v1765_v14 = vadd.f32 %v4591_v11, %v4308_v38  ;;  %v1322_v4 = vadd.f32 %v4599_v31, %v4308_v38 }
 0x198   : > { %1947 = vmatprep.subr.bf16.mxu0 %v1905_v5  ;;  %2020 = vmatprep.subr.bf16.mxu1 %v2003_v26  ;;  %v1411_v7 = vmax.f32 %v1328_v34, 0.0  ;;  %v1901_v58 = vpack.c.bf16 %v1415_v44, %v1413_v13  ;;  %v1412_v1 = vmax.f32 %v1332_v48, 0.0  ;;  %v1857_v51 = vmax.f32 %v4657_v55, 0.0  ;;  %v5819_v44 = vld [vmem:[#allocation26_spill] sm:$0xff] }
 0x199   : > { %1948 = vmatpush2.bf16.msra.mxu0 %v1904_v43  ;;  %2021 = vmatpush2.bf16.msra.mxu1 %v2002_v8  ;;  %v1902_v43 = vpack.c.bf16 %v1418_v24, %v1416_v49  ;;  %v1318_v8 = vadd.f32 %v4594_v39, %v4311_v41  ;;  %v1859_v53 = vmax.f32 %v1775_v19, 0.0  ;;  %v1998_v29 = vpack.c.bf16 %v1863_v40, %v1861_v61  ;;  %v2110_v49 = vld [vmem:[%s5723_s13] sm:$0xff]  ;;  %v5821_v61 = vld [vmem:[#allocation24_spill] sm:$0xff]  ;;  %v5822_v40 = vld [vmem:[#allocation25_spill] sm:$0xff] }
 0x19a   : > { %1949 = vmatprep.subr.bf16.mxu0 %v1903_v22  ;;  %2022 = vmatprep.subr.bf16.mxu1 %v2001_v18  ;;  %v1409_v35 = vmax.f32 %v4654_v21, 0.0  ;;  %v1854_v36 = vmax.f32 %v4647_v57, 0.0  ;;  %v1856_v11 = vmax.f32 %v4650_v30, 0.0  ;;  %v1997_v39 = vpack.c.bf16 %v1860_v0, %v1858_v54  ;;  %v5820_v22 = vld [vmem:[#allocation16_spill] sm:$0xff]  ;;  %v5824_v13 = vld [vmem:[#allocation22_spill] sm:$0xff] }
 0x19b   : > { %v1316_v31 = vadd.f32 %v4589_v28, %v4308_v38  ;;  %v1410_v37 = vmax.f32 %v1326_v27, 0.0  ;;  %v1900_v50 = vpack.c.bf16 %v1414_v32, %v1412_v1  ;;  %v1755_v55 = vadd.f32 %v4579_v25, %v4308_v38  ;;  %v2076_v0 = vld [vmem:[%s5722_s12 + $0xf8] sm:$0xff]  ;;  %v5826_v27 = vld [vmem:[#allocation20_spill] sm:$0xff] }
 0x19c   : > { %v1308_v12 = vadd.f32 %v4583_v33, %v4311_v41  ;;  %v1312_v21 = vadd.f32 %v4585_v2, %v4308_v38  ;;  %v1407_v57 = vmax.f32 %v1318_v8, 0.0  ;;  %v1899_v10 = vpack.c.bf16 %v1411_v7, %v1409_v35  ;;  %v5815_v41 = vld [vmem:[#allocation18_spill] sm:$0xff]  ;;  %v2074_v8 = vld [vmem:[%s5722_s12 + $0xe8] sm:$0xff]  ;;  %v2071_v1 = vld [vmem:[%s5722_s12 + $0xd0] sm:$0xff] }
 0x19d   : > { %1950 = vmatpush2.bf16.msra.mxu0 %v1902_v43  ;;  %2023 = vmatpush2.bf16.msra.mxu1 %v2000_v23  ;;  %v1408_v30 = vmax.f32 %v1322_v4, 0.0  ;;  %v1853_v46 = vmax.f32 %v4638_v60, 0.0  ;;  %v1855_v6 = vmax.f32 %v1765_v14, 0.0  ;;  %v1996_v17 = vpack.c.bf16 %v1859_v53, %v1857_v51  ;;  %v5816_v60 = vld [vmem:[#allocation23_spill] sm:$0xff]  ;;  %v5823_v23 = vld [vmem:[#allocation21_spill] sm:$0xff]  ;;  %v5827_v14 = vld [vmem:[#allocation14_spill] sm:$0xff] }
 0x19e   : > { %1951 = vmatprep.subr.bf16.mxu0 %v1901_v58  ;;  %2024 = vmatprep.subr.bf16.mxu1 %v1999_v9  ;;  %v1405_v28 = vmax.f32 %v4644_v3, 0.0  ;;  %v1850_v16 = vmax.f32 %v4632_v15, 0.0  ;;  %v1852_v25 = vmax.f32 %v4635_v42, 0.0  ;;  %v1995_v20 = vpack.c.bf16 %v1856_v11, %v1854_v36  ;;  %v5818_v42 = vld [vmem:[#allocation17_spill] sm:$0xff]  ;;  %v5825_v9 = vld [vmem:[#allocation19_spill] sm:$0xff] }
 0x19f   : > { %v1306_v33 = vadd.f32 %v5815_v41, %v4308_v38  ;;  %v1406_v2 = vmax.f32 %v1316_v31, 0.0  ;;  %v1898_v52 = vpack.c.bf16 %v1410_v37, %v1408_v30  ;;  %v1302_v63 = vadd.f32 %v5816_v60, %v4308_v38  ;;  %v4756_v32 = vld [vmem:[%s5720_s10 + $0x74] ss:$8 sps:$4 sm:$0xff]   ;;  %v2073_v7 = vld [vmem:[%s5722_s12 + $0xe0] sm:$0xff]  ;;  %v4785_v51 = vld [vmem:[%s5720_s10 + $0x70] ss:$8 sps:$4 sm:$0xff]  }
 0x1a0   : > { %v1403_v62 = vmax.f32 %v1308_v12, 0.0  ;;  %v1897_v56 = vpack.c.bf16 %v1407_v57, %v1405_v28  ;;  %v1404_v45 = vmax.f32 %v1312_v21, 0.0  ;;  %v1849_v3 = vmax.f32 %v5817_v59, 0.0  ;;  %v2075_v43 = vld [vmem:[%s5722_s12 + $0xf0] sm:$0xff]  ;;  %v2072_v58 = vld [vmem:[%s5722_s12 + $0xd8] sm:$0xff]  ;;  %v2070_v53 = vld [vmem:[%s5722_s12 + $0xc8] sm:$0xff] }
 0x1a1   : > { %1952 = vmatpush2.bf16.msra.mxu0 %v1900_v50  ;;  %2025 = vmatpush2.bf16.msra.mxu1 %v1998_v29  ;;  %v1851_v5 = vmax.f32 %v1755_v55, 0.0  ;;  %v1994_v15 = vpack.c.bf16 %v1855_v6, %v1853_v46  ;;  %v1401_v18 = vmax.f32 %v5818_v42, 0.0  ;;  %v1993_v26 = vpack.c.bf16 %v1852_v25, %v1850_v16  ;;  %v4790_v29 = vld [vmem:[%s763_s6] sm:$0x1]  ;;  %v3962_v35 = vld [vmem:[%s4618_s1 + $0x4] ss:$8 sps:$4 sm:$0xff]  }
 0x1a2   : > { %1953 = vmatprep.subr.bf16.mxu0 %v1899_v10  ;;  %2026 = vmatprep.subr.bf16.mxu1 %v1997_v39  ;;  %v1402_v47 = vmax.f32 %v1306_v33, 0.0  ;;  %v1896_v24 = vpack.c.bf16 %v1406_v2, %v1404_v45  ;;  %v1400_v34 = vmax.f32 %v1302_v63, 0.0  ;;  %v2112_v54 = vcombine.high %v2110_v49, %v2110_v49  ;;  %v2069_v36 = vld [vmem:[%s5722_s12 + $0xc0] sm:$0xff]  ;;  %v2068_v39 = vld [vmem:[%s5722_s12 + $0xb8] sm:$0xff]  ;;  %v2067_v31 = vld [vmem:[%s5722_s12 + $0xb0] sm:$0xff] }
 0x1a3   : > { %v1895_v19 = vpack.c.bf16 %v1403_v62, %v1401_v18  ;;  %v1992_v48 = vpack.c.bf16 %v1851_v5, %v1849_v3  ;;  %v3994_v4 = vmov 0.0   ;;  %v4799_v11 = vld [vmem:[%s5720_s10 + $0x64] ss:$8 sps:$4 sm:$0xff]   ;;  %v4813_v37 = vld [vmem:[%s5720_s10 + $0x60] ss:$8 sps:$4 sm:$0xff]   ;;  %v2064_v21 = vld [vmem:[%s5722_s12 + $0x98] sm:$0xff] }
 0x1a4   : > { %v1894_v38 = vpack.c.bf16 %v1402_v47, %v1400_v34  ;;  %v2066_v50 = vld [vmem:[%s5722_s12 + $0xa8] sm:$0xff]  ;;  %v4822_v55 = vld [vmem:[%s5720_s10 + $0x54] ss:$8 sps:$4 sm:$0xff]   ;;  %v2065_v12 = vld [vmem:[%s5722_s12 + $0xa0] sm:$0xff] }
 0x1a5   : > { %1954 = vmatpush2.bf16.msra.mxu0 %v1898_v52  ;;  %2027 = vmatpush2.bf16.msra.mxu1 %v1996_v17  ;;  %v2063_v57 = vld [vmem:[%s5722_s12 + $0x90] sm:$0xff]  ;;  %v2062_v30 = vld [vmem:[%s5722_s12 + $0x88] sm:$0xff]  ;;  %v2061_v6 = vld [vmem:[%s5722_s12 + $0x80] sm:$0xff] }
 0x1a6   : > { %1955 = vmatprep.subr.bf16.mxu0 %v1897_v56  ;;  %2028 = vmatprep.subr.bf16.mxu1 %v1995_v20  ;;  %v4837_v10 = vld [vmem:[%s5720_s10 + $0x50] ss:$8 sps:$4 sm:$0xff]   ;;  %v4846_v46 = vld [vmem:[%s5720_s10 + $0x44] ss:$8 sps:$4 sm:$0xff]   ;;  %v4861_v16 = vld [vmem:[%s5720_s10 + $0x40] ss:$8 sps:$4 sm:$0xff]  }
 0x1a7   : > { %v2060_v17 = vld [vmem:[%s5722_s12 + $0x78] sm:$0xff]  ;;  %v2059_v28 = vld [vmem:[%s5722_s12 + $0x70] sm:$0xff]  ;;  %v2058_v25 = vld [vmem:[%s5722_s12 + $0x68] sm:$0xff] }
 0x1a8   : > { %v4870_v20 = vld [vmem:[%s5720_s10 + $0x34] ss:$8 sps:$4 sm:$0xff]   ;;  %v2057_v41 = vld [vmem:[%s5722_s12 + $0x60] sm:$0xff]  ;;  %v4885_v52 = vld [vmem:[%s5720_s10 + $0x30] ss:$8 sps:$4 sm:$0xff]  }
 0x1a9   : > { %1956 = vmatpush2.bf16.msra.mxu0 %v1896_v24  ;;  %2029 = vmatpush2.bf16.msra.mxu1 %v1994_v15  ;;  %v2056_v33 = vld [vmem:[%s5722_s12 + $0x58] sm:$0xff]  ;;  %v2055_v2 = vld [vmem:[%s5722_s12 + $0x50] sm:$0xff]  ;;  %v2054_v60 = vld [vmem:[%s5722_s12 + $0x48] sm:$0xff] }
 0x1aa   : > { %1957 = vmatprep.subr.bf16.mxu0 %v1895_v19  ;;  %2030 = vmatprep.subr.bf16.mxu1 %v1993_v26  ;;  %v4894_v63 = vld [vmem:[%s5720_s10 + $0x24] ss:$8 sps:$4 sm:$0xff]   ;;  %v2052_v56 = vld [vmem:[%s5722_s12 + $0x38] sm:$0xff]  ;;  %v2051_v45 = vld [vmem:[%s5722_s12 + $0x30] sm:$0xff] }
 0x1ab   : > { %v2053_v62 = vld [vmem:[%s5722_s12 + $0x40] sm:$0xff]  ;;  %v2050_v3 = vld [vmem:[%s5722_s12 + $0x28] sm:$0xff]  ;;  %v4918_v5 = vld [vmem:[%s5720_s10 + $0x14] ss:$8 sps:$4 sm:$0xff]  }
 0x1ac   : > { %v4909_v59 = vld [vmem:[%s5720_s10 + $0x20] ss:$8 sps:$4 sm:$0xff]   ;;  %v2048_v42 = vld [vmem:[%s5722_s12 + $0x18] sm:$0xff]  ;;  %v2047_v18 = vld [vmem:[%s5722_s12 + $0x10] sm:$0xff] }
 0x1ad   : > { %1958 = vmatpush2.bf16.msra.mxu0 %v1894_v38  ;;  %2031 = vmatpush2.bf16.msra.mxu1 %v1992_v48  ;;  %v2049_v15 = vld [vmem:[%s5722_s12 + $0x20] sm:$0xff]  ;;  %v4933_v26 = vld [vmem:[%s5720_s10 + $0x10] ss:$8 sps:$4 sm:$0xff]   ;;  %v2046_v47 = vld [vmem:[%s5722_s12 + $0x8] sm:$0xff] }
 0x1ae   : > { %1959 = vmatprep.subr.bf16.mxu0 %v5819_v44  ;;  %2032 = vmatprep.subr.bf16.mxu1 %v5820_v22  ;;  %v4942_v24 = vld [vmem:[%s5720_s10 + $0x4] ss:$8 sps:$4 sm:$0xff]   ;;  %v2108_v34 = vld [vmem:[%s5722_s12 + $0x1f8] sm:$0xff]  ;;  %v2107_v48 = vld [vmem:[%s5722_s12 + $0x1f0] sm:$0xff] }
 0x1af   : > { %v2045_v19 = vld [vmem:[%s5722_s12] sm:$0xff]  ;;  %v2106_v44 = vld [vmem:[%s5722_s12 + $0x1e8] sm:$0xff]  ;;  %v4966_v22 = vld [vmem:[%s5720_s10 + $0xf4] ss:$8 sps:$4 sm:$0xff]  }
 0x1b0   : > { %v4957_v38 = vld [vmem:[%s5720_s10] ss:$8 sps:$4 sm:$0xff]  }
 0x1b1   : > { %1960 = vmatpush2.bf16.msra.mxu0 %v5821_v61  ;;  %2033 = vmatpush2.bf16.msra.mxu1 %v5822_v40  ;;  %v2104_v61 = vld [vmem:[%s5722_s12 + $0x1d8] sm:$0xff]  ;;  %v2103_v40 = vld [vmem:[%s5722_s12 + $0x1d0] sm:$0xff] }
 0x1b2   : > { %1961 = vmatprep.subr.bf16.mxu0 %v5823_v23  ;;  %2034 = vmatprep.subr.bf16.mxu1 %v5824_v13  ;;  %v4981_v23 = vld [vmem:[%s5720_s10 + $0xf0] ss:$8 sps:$4 sm:$0xff]   ;;  %v2102_v13 = vld [vmem:[%s5722_s12 + $0x1c8] sm:$0xff] }
 0x1b5   : > { %1962 = vmatpush2.bf16.msra.mxu0 %v5825_v9  ;;  %2035 = vmatpush2.bf16.msra.mxu1 %v5826_v27  ;;  %v2100_v9 = vld [vmem:[%s5722_s12 + $0x1b8] sm:$0xff]  ;;  %v2099_v27 = vld [vmem:[%s5722_s12 + $0x1b0] sm:$0xff] }
 0x1b6   : > { %3605 = vmatprep.subr.msk.mxu0 %vm2117_vm0, %v2112_v54  ;;  %2193 = vmatprep.subr.mxu1 %v2076_v0  ;;  %v4990_v54 = vld [vmem:[%s5720_s10 + $0xe4] ss:$8 sps:$4 sm:$0xff]  }
 0x1b7   : > { %v2101_v0 = vld [vmem:[%s5722_s12 + $0x1c0] sm:$0xff] }
 0x1b8   : > { %1964 = vmatmul.mubr.bf16.vlgmr.msra.gmra.mxu0 %v5827_v14  ;;  %2037 = vmatmul.mubr.bf16.vlgmr.msra.gmra.mxu1 %v5827_v14  ;;  %v2098_v14 = vld [vmem:[%s5722_s12 + $0x1a8] sm:$0xff] }
 0x1b9   : > { %3606 = vmatpush1.msk.msra.mxu0 %vm2117_vm0, %v2110_v49  ;;  %2186 = vmatprep.mubr.f32.mxu0 %v3994_v4  ;;  %v2105_v49 = vld [vmem:[%s5722_s12 + $0x1e0] sm:$0xff] }
 0x1ba   : > { %2534 = vmatprep.subr.bf16.mxu0 %v4756_v32  ;;  %2194 = vmatpush1.msra.mxu1 %v2075_v43  ;;  %v5005_v43 = vld [vmem:[%s5720_s10 + $0xe0] ss:$8 sps:$4 sm:$0xff]  }
 0x1bb   : > { %2195 = vmatprep.subr.mxu1 %v2074_v8  ;;  %v5014_v8 = vld [vmem:[%s5720_s10 + $0xd4] ss:$8 sps:$4 sm:$0xff]  }
 0x1bc   : > { %2196 = vmatpush1.msra.mxu1 %v2073_v7  ;;  %v2097_v7 = vld [vmem:[%s5722_s12 + $0x1a0] sm:$0xff] }
 0x1bd   : > { %2197 = vmatprep.subr.mxu1 %v2072_v58  ;;  %v2096_v58 = vld [vmem:[%s5722_s12 + $0x198] sm:$0xff] }
 0x1be   : > { %2198 = vmatpush1.msra.mxu1 %v2071_v1  ;;  %v2095_v1 = vld [vmem:[%s5722_s12 + $0x190] sm:$0xff] }
 0x1bf   : > { %2199 = vmatprep.subr.mxu1 %v2070_v53  ;;  %v5029_v53 = vld [vmem:[%s5720_s10 + $0xd0] ss:$8 sps:$4 sm:$0xff]  }
 0x1c0   : > { %3607 = vmatmul.mubr.msk.f32.vlgmr.msra.gmra.mxu0 %vm2113_vm1, %v4790_v29  ;;  %2200 = vmatpush1.msra.mxu1 %v2069_v36  ;;  %v5038_v36 = vld [vmem:[%s5720_s10 + $0xc4] ss:$8 sps:$4 sm:$0xff]  }
 0x1c1   : > { %2535 = vmatpush1.bf16.msra.mxu0 %v4785_v51  ;;  %2566 = vmatprep.mubr.bf16.mxu0 %v3962_v35  ;;  %v2094_v35 = vld [vmem:[%s5722_s12 + $0x188] sm:$0xff] }
 0x1c2   : > { %2536 = vmatprep.subr.bf16.mxu0 %v4799_v11  ;;  %2201 = vmatprep.subr.mxu1 %v2068_v39  ;;  %v2093_v39 = vld [vmem:[%s5722_s12 + $0x180] sm:$0xff] }
 0x1c3   : > { %2202 = vmatpush1.msra.mxu1 %v2067_v31  ;;  %v2092_v31 = vld [vmem:[%s5722_s12 + $0x178] sm:$0xff] }
 0x1c4   : > { %2203 = vmatprep.subr.mxu1 %v2066_v50  ;;  %v2091_v50 = vld [vmem:[%s5722_s12 + $0x170] sm:$0xff] }
 0x1c5   : > { %2537 = vmatpush1.bf16.msra.mxu0 %v4813_v37  ;;  %2204 = vmatpush1.msra.mxu1 %v2065_v12  ;;  %v5053_v12 = vld [vmem:[%s5720_s10 + $0xc0] ss:$8 sps:$4 sm:$0xff]  }
 0x1c6   : > { %2538 = vmatprep.subr.bf16.mxu0 %v4822_v55  ;;  %2205 = vmatprep.subr.mxu1 %v2064_v21  ;;  %v2090_v21 = vld [vmem:[%s5722_s12 + $0x168] sm:$0xff] }
 0x1c7   : > { %2206 = vmatpush1.msra.mxu1 %v2063_v57  ;;  %v5062_v57 = vld [vmem:[%s5720_s10 + $0xb4] ss:$8 sps:$4 sm:$0xff]  }
 0x1c8   : > { %2207 = vmatprep.subr.mxu1 %v2062_v30  ;;  %v2089_v30 = vld [vmem:[%s5722_s12 + $0x160] sm:$0xff] }
 0x1c9   : > { %2539 = vmatpush1.bf16.msra.mxu0 %v4837_v10  ;;  %2208 = vmatpush1.msra.mxu1 %v2061_v6  ;;  %v2088_v6 = vld [vmem:[%s5722_s12 + $0x158] sm:$0xff] }
 0x1ca   : > { %2540 = vmatprep.subr.bf16.mxu0 %v4846_v46  ;;  %2209 = vmatprep.subr.mxu1 %v2060_v17  ;;  %v2087_v17 = vld [vmem:[%s5722_s12 + $0x150] sm:$0xff] }
 0x1cb   : > { %2210 = vmatpush1.msra.mxu1 %v2059_v28  ;;  %v5077_v28 = vld [vmem:[%s5720_s10 + $0xb0] ss:$8 sps:$4 sm:$0xff]  }
 0x1cc   : > { %2211 = vmatprep.subr.mxu1 %v2058_v25  ;;  %v2086_v25 = vld [vmem:[%s5722_s12 + $0x148] sm:$0xff] }
 0x1cd   : > { %2541 = vmatpush1.bf16.msra.mxu0 %v4861_v16  ;;  %2212 = vmatpush1.msra.mxu1 %v2057_v41  ;;  %v5086_v41 = vld [vmem:[%s5720_s10 + $0xa4] ss:$8 sps:$4 sm:$0xff]  }
 0x1ce   : > { %2542 = vmatprep.subr.bf16.mxu0 %v4870_v20  ;;  %2213 = vmatprep.subr.mxu1 %v2056_v33  ;;  %v2085_v33 = vld [vmem:[%s5722_s12 + $0x140] sm:$0xff] }
 0x1cf   : > { %2214 = vmatpush1.msra.mxu1 %v2055_v2  ;;  %v2084_v2 = vld [vmem:[%s5722_s12 + $0x138] sm:$0xff] }
 0x1d0   : > { %2215 = vmatprep.subr.mxu1 %v2054_v60  ;;  %v2083_v60 = vld [vmem:[%s5722_s12 + $0x130] sm:$0xff] }
 0x1d1   : > { %2543 = vmatpush1.bf16.msra.mxu0 %v4885_v52  ;;  %2216 = vmatpush1.msra.mxu1 %v2053_v62  ;;  %v5101_v62 = vld [vmem:[%s5720_s10 + $0xa0] ss:$8 sps:$4 sm:$0xff]  }
 0x1d2   : > { %2544 = vmatprep.subr.bf16.mxu0 %v4894_v63  ;;  %2217 = vmatprep.subr.mxu1 %v2052_v56  ;;  %v2082_v56 = vld [vmem:[%s5722_s12 + $0x128] sm:$0xff] }
 0x1d3   : > { %2218 = vmatpush1.msra.mxu1 %v2051_v45  ;;  %v5110_v45 = vld [vmem:[%s5720_s10 + $0x94] ss:$8 sps:$4 sm:$0xff]  }
 0x1d4   : > { %2219 = vmatprep.subr.mxu1 %v2050_v3  ;;  %v2081_v3 = vld [vmem:[%s5722_s12 + $0x120] sm:$0xff] }
 0x1d5   : > { %2545 = vmatpush1.bf16.msra.mxu0 %v4909_v59  ;;  %2220 = vmatpush1.msra.mxu1 %v2049_v15  ;;  %v2080_v15 = vld [vmem:[%s5722_s12 + $0x118] sm:$0xff] }
 0x1d6   : > { %2546 = vmatprep.subr.bf16.mxu0 %v4918_v5  ;;  %2221 = vmatprep.subr.mxu1 %v2048_v42  ;;  %v5122_v42 = vld [vmem:[%s5720_s10 + $0x90] ss:$8 sps:$4 sm:$0xff]  }
 0x1d7   : > { %2222 = vmatpush1.msra.mxu1 %v2047_v18  ;;  %v5128_v18 = vld [vmem:[%s5720_s10 + $0x84] ss:$8 sps:$4 sm:$0xff]  }
 0x1d8   : > { %2223 = vmatprep.subr.mxu1 %v2046_v47  ;;  %v2079_v47 = vld [vmem:[%s5722_s12 + $0x110] sm:$0xff] }
 0x1d9   : > { %2547 = vmatpush1.bf16.msra.mxu0 %v4933_v26  ;;  %2224 = vmatpush1.msra.mxu1 %v2045_v19  ;;  %v2078_v19 = vld [vmem:[%s5722_s12 + $0x108] sm:$0xff] }
 0x1da   : > { %2548 = vmatprep.subr.bf16.mxu0 %v4942_v24  ;;  %2225 = vmatprep.subr.mxu1 %v2108_v34  ;;  %v5140_v34 = vld [vmem:[%s5720_s10 + $0x80] ss:$8 sps:$4 sm:$0xff]  }
 0x1db   : > { %2226 = vmatpush2.msra.mxu1 %v2107_v48  ;;  %v2077_v48 = vld [vmem:[%s5722_s12 + $0x100] sm:$0xff] }
 0x1dc   : > { %2227 = vmatprep.subr.mxu1 %v2106_v44  ;;  %v3960_v44 = vld [vmem:[%s4618_s1] ss:$8 sps:$4 sm:$0xff]  }
 0x1dd   : > { %2549 = vmatpush1.bf16.msra.mxu0 %v4957_v38  ;;  %2228 = vmatpush2.msra.mxu1 %v2105_v49  ;;  %v3963_v49 = vld [vmem:[%s4618_s1 + $0x14] ss:$8 sps:$4 sm:$0xff]  }
 0x1de   : > { %2550 = vmatprep.subr.bf16.mxu0 %v4966_v22  ;;  %2229 = vmatprep.subr.mxu1 %v2104_v61  ;;  %v3965_v61 = vld [vmem:[%s4618_s1 + $0x10] ss:$8 sps:$4 sm:$0xff]  }
 0x1df   : > { %2230 = vmatpush2.msra.mxu1 %v2103_v40  ;;  %v3966_v40 = vld [vmem:[%s4618_s1 + $0x24] ss:$8 sps:$4 sm:$0xff]  }
 0x1e0   : > { %2231 = vmatprep.subr.mxu1 %v2102_v13  ;;  %v3968_v13 = vld [vmem:[%s4618_s1 + $0x20] ss:$8 sps:$4 sm:$0xff]  }
 0x1e1   : > { %2551 = vmatpush2.bf16.msra.mxu0 %v4981_v23  ;;  %2232 = vmatpush2.msra.mxu1 %v2101_v0  ;;  %v3969_v0 = vld [vmem:[%s4618_s1 + $0x34] ss:$8 sps:$4 sm:$0xff]  }
 0x1e2   : > { %2552 = vmatprep.subr.bf16.mxu0 %v4990_v54  ;;  %2233 = vmatprep.subr.mxu1 %v2100_v9  ;;  %v3971_v9 = vld [vmem:[%s4618_s1 + $0x30] ss:$8 sps:$4 sm:$0xff]  }
 0x1e3   : > { %2234 = vmatpush2.msra.mxu1 %v2099_v27 }
 0x1e4   : > { %2235 = vmatprep.subr.mxu1 %v2098_v14 }
 0x1e5   : > { %2553 = vmatpush2.bf16.msra.mxu0 %v5005_v43  ;;  %2236 = vmatpush2.msra.mxu1 %v2097_v7  ;;  %v3974_v7 = vld [vmem:[%s5160_s0 + $0x4] ss:$8 sps:$4 sm:$0xff]  }
 0x1e6   : > { %2554 = vmatprep.subr.bf16.mxu0 %v5014_v8  ;;  %2237 = vmatprep.subr.mxu1 %v2096_v58 }
 0x1e7   : > { %2238 = vmatpush2.msra.mxu1 %v2095_v1 }
 0x1e8   : > { %2239 = vmatprep.subr.mxu1 %v2094_v35 }
 0x1e9   : > { %2555 = vmatpush2.bf16.msra.mxu0 %v5029_v53  ;;  %2240 = vmatpush2.msra.mxu1 %v2093_v39 }
 0x1ea   : > { %2556 = vmatprep.subr.bf16.mxu0 %v5038_v36  ;;  %2241 = vmatprep.subr.mxu1 %v2092_v31 }
 0x1eb   : > { %2242 = vmatpush2.msra.mxu1 %v2091_v50 }
 0x1ec   : > { %2243 = vmatprep.subr.mxu1 %v2090_v21 }
 0x1ed   : > { %2557 = vmatpush2.bf16.msra.mxu0 %v5053_v12  ;;  %2244 = vmatpush2.msra.mxu1 %v2089_v30 }
 0x1ee   : > { %2558 = vmatprep.subr.bf16.mxu0 %v5062_v57  ;;  %2245 = vmatprep.subr.mxu1 %v2088_v6 }
 0x1ef   : > { %2246 = vmatpush2.msra.mxu1 %v2087_v17 }
 0x1f0   : > { %2247 = vmatprep.subr.mxu1 %v2086_v25 }
 0x1f1   : > { %2559 = vmatpush2.bf16.msra.mxu0 %v5077_v28  ;;  %2248 = vmatpush2.msra.mxu1 %v2085_v33 }
 0x1f2   : > { %2560 = vmatprep.subr.bf16.mxu0 %v5086_v41  ;;  %2249 = vmatprep.subr.mxu1 %v2084_v2 }
 0x1f3   : > { %2250 = vmatpush2.msra.mxu1 %v2083_v60 }
 0x1f4   : > { %2251 = vmatprep.subr.mxu1 %v2082_v56 }
 0x1f5   : > { %2561 = vmatpush2.bf16.msra.mxu0 %v5101_v62  ;;  %2252 = vmatpush2.msra.mxu1 %v2081_v3 }
 0x1f6   : > { %2562 = vmatprep.subr.bf16.mxu0 %v5110_v45  ;;  %2253 = vmatprep.subr.mxu1 %v2080_v15 }
 0x1f7   : > { %2254 = vmatpush2.msra.mxu1 %v2079_v47 }
 0x1f8   : > { %2255 = vmatprep.subr.mxu1 %v2078_v19 }
 0x1f9   : > { %2563 = vmatpush2.bf16.msra.mxu0 %v5122_v42  ;;  %2256 = vmatpush2.msra.mxu1 %v2077_v48 }
 0x1fa   : > { %2564 = vmatprep.subr.bf16.mxu0 %v5128_v18  ;;  %2671 = vmatprep.subr.bf16.mxu1 %v4756_v32  ;;  %v3995_v32 = vmov 0  }
 0x1fb   : > { %3766 = vset.pattern.permute.xlu0 %v3995_v32 }
 0x1fd   : > { %2565 = vmatpush2.bf16.msra.mxu0 %v5140_v34 }
 0x200   : > { %2567 = vmatmul.mubr.bf16.vlgmr.msra.gmra.mxu0 %v3960_v44 }
 0x201   : > { %2576 = vmatprep.mubr.bf16.mxu0 %v3963_v49 }
 0x208   : > { %2577 = vmatmul.mubr.bf16.gmra.mxu0 %v3965_v61 }
 0x209   : > { %2586 = vmatprep.mubr.bf16.mxu0 %v3966_v40 }
 0x210   : > { %2587 = vmatmul.mubr.bf16.gmra.mxu0 %v3968_v13 }
 0x211   : > { %2596 = vmatprep.mubr.bf16.mxu0 %v3969_v0 }
 0x218   : > { %2597 = vmatmul.mubr.bf16.gmra.mxu0 %v3971_v9 }
 0x219   : > { %2805 = vmatprep.mubr.bf16.mxu0 %v3995_v32 }
 0x278   : > { %v1965_v27 = vpop.f32.mrf.mxu0  ;;  %v5164_v14 = vpop.f32.mrf.mxu1 }
 0x27a   : > { %v1967_v58 = vpop.f32.mrf.mxu0  ;;  %v5167_v1 = vpop.f32.mrf.mxu1 }
 0x27b   : > { %2257 = vmatprep.mubr.f32.mxu1 %v1967_v58 }
 0x27c   : > { %2258 = vmatmul.mubr.f32.vlgmr.msra.gmra.mxu1 %v1965_v27  ;;  %v1969_v35 = vpop.f32.mrf.mxu0  ;;  %v2042_v39 = vpop.f32.mrf.mxu1 }
 0x27d   : > { %2672 = vmatpush1.bf16.msra.mxu1 %v4785_v51  ;;  %2703 = vmatprep.mubr.bf16.mxu1 %v3974_v7  ;;  %v3972_v51 = vld [vmem:[%s5160_s0] ss:$8 sps:$4 sm:$0xff]  }
 0x27e   : > { %2673 = vmatprep.subr.bf16.mxu1 %v4799_v11  ;;  %v1970_v31 = vpop.f32.mrf.mxu0  ;;  %v2043_v50 = vpop.f32.mrf.mxu1  ;;  %v3975_v11 = vld [vmem:[%s5160_s0 + $0x14] ss:$8 sps:$4 sm:$0xff]  }
 0x281   : > { %2674 = vmatpush1.bf16.msra.mxu1 %v4813_v37  ;;  %v5202_v37 = vpop.f32.mrf.mxu0 }
 0x282   : > { %2675 = vmatprep.subr.bf16.mxu1 %v4822_v55 }
 0x283   : > { %v5204_v55 = vpop.f32.mrf.mxu0 }
 0x285   : > { %2676 = vmatpush1.bf16.msra.mxu1 %v4837_v10  ;;  %v3977_v10 = vld [vmem:[%s5160_s0 + $0x10] ss:$8 sps:$4 sm:$0xff]  }
 0x286   : > { %2677 = vmatprep.subr.bf16.mxu1 %v4846_v46 }
 0x289   : > { %2678 = vmatpush1.bf16.msra.mxu1 %v4861_v16  ;;  %v3978_v16 = vld [vmem:[%s5160_s0 + $0x24] ss:$8 sps:$4 sm:$0xff]  }
 0x28a   : > { %2679 = vmatprep.subr.bf16.mxu1 %v4870_v20 }
 0x28d   : > { %2680 = vmatpush1.bf16.msra.mxu1 %v4885_v52 }
 0x28e   : > { %2681 = vmatprep.subr.bf16.mxu1 %v4894_v63 }
 0x291   : > { %2682 = vmatpush1.bf16.msra.mxu1 %v4909_v59  ;;  %v3980_v59 = vld [vmem:[%s5160_s0 + $0x20] ss:$8 sps:$4 sm:$0xff]  }
 0x292   : > { %2683 = vmatprep.subr.bf16.mxu1 %v4918_v5 }
 0x295   : > { %2684 = vmatpush1.bf16.msra.mxu1 %v4933_v26  ;;  %v3981_v26 = vld [vmem:[%s5160_s0 + $0x34] ss:$8 sps:$4 sm:$0xff]  }
 0x296   : > { %2685 = vmatprep.subr.bf16.mxu1 %v4942_v24 }
 0x299   : > { %2686 = vmatpush1.bf16.msra.mxu1 %v4957_v38 }
 0x29a   : > { %2687 = vmatprep.subr.bf16.mxu1 %v4966_v22 }
 0x29d   : > { %2688 = vmatpush2.bf16.msra.mxu1 %v4981_v23  ;;  %v3983_v23 = vld [vmem:[%s5160_s0 + $0x30] ss:$8 sps:$4 sm:$0xff]   ;;  %s766_s0 = scalar_lea.vmem %s5832_s27, %s5834_s30 }
 0x29e   : > { %2689 = vmatprep.subr.bf16.mxu1 %v4990_v54 }
 0x2a1   : > { %2690 = vmatpush2.bf16.msra.mxu1 %v5005_v43 }
 0x2a2   : > { %2691 = vmatprep.subr.bf16.mxu1 %v5014_v8  ;;  %v2322_v8 = vld [vmem:[%s5721_s11] sm:$0x3] }
 0x2a5   : > { %2692 = vmatpush2.bf16.msra.mxu1 %v5029_v53 }
 0x2a6   : > { %2693 = vmatprep.subr.bf16.mxu1 %v5038_v36  ;;  %v5830_v36 = vld [vmem:[#allocation3_spill] sm:$0xff] }
 0x2a9   : > { %2694 = vmatpush2.bf16.msra.mxu1 %v5053_v12  ;;  %v5215_v12 = vrot.slane %v2322_v8, %v5830_v36 }
 0x2aa   : > { %2695 = vmatprep.subr.bf16.mxu1 %v5062_v57  ;;  %v5831_v57 = vld [vmem:[#allocation4_spill] sm:$0xff] }
 0x2ab   : > { %v5218_v30 = vrot.slane %v2322_v8, %v5831_v57 }
 0x2ad   : > { %2696 = vmatpush2.bf16.msra.mxu1 %v5077_v28 }
 0x2ae   : > { %2697 = vmatprep.subr.bf16.mxu1 %v5086_v41 }
 0x2b1   : > { %2698 = vmatpush2.bf16.msra.mxu1 %v5101_v62 }
 0x2b2   : > { %2699 = vmatprep.subr.bf16.mxu1 %v5110_v45 }
 0x2b5   : > { %2700 = vmatpush2.bf16.msra.mxu1 %v5122_v42 }
 0x2b6   : > { %2701 = vmatprep.subr.bf16.mxu1 %v5128_v18 }
 0x2b9   : > { %2702 = vmatpush2.bf16.msra.mxu1 %v5140_v34 }
 0x2bc   : > { %2704 = vmatmul.mubr.bf16.vlgmr.msra.gmra.mxu1 %v3972_v51 }
 0x2bd   : > { %2713 = vmatprep.mubr.bf16.mxu1 %v3975_v11 }
 0x2c0   : > { %v2568_v46 = vpop.f32.mrf.mxu0 }
 0x2c1   : > { %v2569_v31 = vadd.f32 %v2568_v46, %v5215_v12  ;;  %v5239_v46 = vld [vmem:[%s5717_s7] sm:$0x1] }
 0x2c2   : > { %v2570_v20 = vpop.f32.mrf.mxu0 }
 0x2c3   : > { %v2571_v44 = vadd.f32 %v2570_v20, %v5218_v30 }
 0x2c4   : > { %2714 = vmatmul.mubr.bf16.gmra.mxu1 %v3977_v10  ;;  %v2572_v52 = vpop.f32.mrf.mxu0 }
 0x2c5   : > { %2723 = vmatprep.mubr.bf16.mxu1 %v3978_v16  ;;  %v2573_v50 = vadd.f32 %v2572_v52, %v5215_v12  ;;  %v2608_v16 = vmax.f32 %v2571_v44, 0.0 }
 0x2c6   : > { %v2574_v63 = vpop.f32.mrf.mxu0 }
 0x2c7   : > { %v2575_v49 = vadd.f32 %v2574_v63, %v5218_v30 }
 0x2c8   : > { %v2578_v5 = vpop.f32.mrf.mxu0 }
 0x2c9   : > { %v2579_v61 = vadd.f32 %v2578_v5, %v5215_v12  ;;  %v2610_v20 = vmax.f32 %v2575_v49, 0.0  ;;  %v2609_v5 = vmax.f32 %v2573_v50, 0.0 }
 0x2ca   : > { %v2580_v24 = vpop.f32.mrf.mxu0 }
 0x2cb   : > { %v2581_v60 = vadd.f32 %v2580_v24, %v5218_v30  ;;  %v2611_v51 = vmax.f32 %v2579_v61, 0.0  ;;  %v2762_v24 = vpack.c.bf16 %v2610_v20, %v2608_v16 }
 0x2cc   : > { %2724 = vmatmul.mubr.bf16.gmra.mxu1 %v3980_v59  ;;  %v2582_v38 = vpop.f32.mrf.mxu0  ;;  %v2607_v59 = vmax.f32 %v2569_v31, 0.0 }
 0x2cd   : > { %2733 = vmatprep.mubr.bf16.mxu1 %v3981_v26  ;;  %v2583_v13 = vadd.f32 %v2582_v38, %v5215_v12  ;;  %v2612_v7 = vmax.f32 %v2581_v60, 0.0 }
 0x2ce   : > { %v2584_v22 = vpop.f32.mrf.mxu0  ;;  %v2761_v38 = vpack.c.bf16 %v2609_v5, %v2607_v59 }
 0x2cf   : > { %v2585_v62 = vadd.f32 %v2584_v22, %v5218_v30  ;;  %v2613_v11 = vmax.f32 %v2583_v13, 0.0 }
 0x2d0   : > { %v2588_v54 = vpop.f32.mrf.mxu0 }
 0x2d1   : > { %v2589_v45 = vadd.f32 %v2588_v54, %v5215_v12  ;;  %v2614_v58 = vmax.f32 %v2585_v62, 0.0  ;;  %v2763_v26 = vpack.c.bf16 %v2613_v11, %v2611_v51 }
 0x2d2   : > { %v2590_v43 = vpop.f32.mrf.mxu0 }
 0x2d3   : > { %v2591_v17 = vadd.f32 %v2590_v43, %v5218_v30  ;;  %v2615_v0 = vmax.f32 %v2589_v45, 0.0  ;;  %v2764_v63 = vpack.c.bf16 %v2614_v58, %v2612_v7 }
 0x2d4   : > { %2734 = vmatmul.mubr.bf16.gmra.mxu1 %v3983_v23  ;;  %v2592_v53 = vpop.f32.mrf.mxu0 }
 0x2d5   : > { %v2616_v3 = vmax.f32 %v2591_v17, 0.0  ;;  %v2593_v15 = vadd.f32 %v2592_v53, %v5215_v12 }
 0x2d6   : > { %v2594_v21 = vpop.f32.mrf.mxu0 }
 0x2d7   : > { %v2595_v41 = vadd.f32 %v2594_v21, %v5218_v30  ;;  %v2617_v9 = vmax.f32 %v2593_v15, 0.0 }
 0x2d8   : > { %v2598_v6 = vpop.f32.mrf.mxu0 }
 0x2d9   : > { %v2599_v28 = vadd.f32 %v2598_v6, %v5215_v12  ;;  %v2618_v47 = vmax.f32 %v2595_v41, 0.0  ;;  %v2765_v10 = vpack.c.bf16 %v2617_v9, %v2615_v0 }
 0x2da   : > { %v2600_v25 = vpop.f32.mrf.mxu0 }
 0x2db   : > { %v2601_v33 = vadd.f32 %v2600_v25, %v5218_v30  ;;  %v2619_v42 = vmax.f32 %v2599_v28, 0.0  ;;  %v2766_v35 = vpack.c.bf16 %v2618_v47, %v2616_v3 }
 0x2dc   : > { %v2602_v2 = vpop.f32.mrf.mxu0 }
 0x2dd   : > { %v2603_v56 = vadd.f32 %v2602_v2, %v5215_v12  ;;  %v2620_v19 = vmax.f32 %v2601_v33, 0.0 }
 0x2de   : > { %v2604_v18 = vpop.f32.mrf.mxu0 }
 0x2df   : > { %v2621_v34 = vmax.f32 %v2603_v56, 0.0  ;;  %v2605_v48 = vadd.f32 %v2604_v18, %v5218_v30 }
 0x2e1   : > { %v2622_v40 = vmax.f32 %v2605_v48, 0.0  ;;  %v2767_v27 = vpack.c.bf16 %v2621_v34, %v2619_v42 }
 0x2e3   : > { %v2768_v39 = vpack.c.bf16 %v2622_v40, %v2620_v19 }
 0x2e5   : > { %2781 = vmatprep.subr.bf16.mxu0 %v2768_v39 }
 0x2e6   : > { %2782 = vmatpush1.bf16.msra.mxu0 %v2767_v27 }
 0x2e7   : > { %2783 = vmatprep.subr.bf16.mxu0 %v2766_v35 }
 0x2ea   : > { %2784 = vmatpush1.bf16.msra.mxu0 %v2765_v10 }
 0x2eb   : > { %2785 = vmatprep.subr.bf16.mxu0 %v2764_v63 }
 0x2ee   : > { %2786 = vmatpush1.bf16.msra.mxu0 %v2763_v26 }
 0x2ef   : > { %2787 = vmatprep.subr.bf16.mxu0 %v2762_v24 }
 0x2f2   : > { %2788 = vmatpush1.bf16.msra.mxu0 %v2761_v38 }
 0x2f5   : > { %3656 = vmatmul.mubr.msk.bf16.vlgmr.msra.gmra.mxu0 %vm2769_vm2, %v5239_v46 }
 0x2f6   : > { %2854 = vmatprep.mubr.bf16.mxu0 %v3995_v32 }
 0x33c   : > { %v5244_v52 = vpop.f32.mrf.mxu1 }
 0x33e   : > { %v5246_v22 = vpop.f32.mrf.mxu1 }
 0x37c   : > { %v2705_v23 = vpop.f32.mrf.mxu1 }
 0x37d   : > { %v2706_v26 = vadd.f32 %v2705_v23, %v5215_v12 }
 0x37e   : > { %v2707_v54 = vpop.f32.mrf.mxu1 }
 0x37f   : > { %v2708_v11 = vadd.f32 %v2707_v54, %v5218_v30 }
 0x380   : > { %v2709_v43 = vpop.f32.mrf.mxu1 }
 0x381   : > { %v2710_v16 = vadd.f32 %v2709_v43, %v5215_v12  ;;  %v2745_v38 = vmax.f32 %v2708_v11, 0.0  ;;  %v2924_v11 = vld [vmem:[%s5725_s15 + $0x1e8] sm:$0xff] }
 0x382   : > { %v2711_v8 = vpop.f32.mrf.mxu1 }
 0x383   : > { %v2712_v35 = vadd.f32 %v2711_v8, %v5218_v30  ;;  %v2746_v8 = vmax.f32 %v2710_v16, 0.0  ;;  %v2922_v16 = vld [vmem:[%s5725_s15 + $0x1d8] sm:$0xff] }
 0x384   : > { %v2715_v53 = vpop.f32.mrf.mxu1 }
 0x385   : > { %v2716_v50 = vadd.f32 %v2715_v53, %v5215_v12  ;;  %v2747_v59 = vmax.f32 %v2712_v35, 0.0  ;;  %v2865_v35 = vld [vmem:[%s5725_s15 + $0x10] sm:$0xff] }
 0x386   : > { %v2717_v21 = vpop.f32.mrf.mxu1 }
 0x387   : > { %v2718_v13 = vadd.f32 %v2717_v21, %v5218_v30  ;;  %v2748_v24 = vmax.f32 %v2716_v50, 0.0  ;;  %v2815_v54 = vpack.c.bf16 %v2747_v59, %v2745_v38  ;;  %v2744_v21 = vmax.f32 %v2706_v26, 0.0  ;;  %v2926_v50 = vld [vmem:[%s5725_s15 + $0x1f8] sm:$0xff]  ;;  %v2919_v59 = vld [vmem:[%s5725_s15 + $0x1c0] sm:$0xff]  ;;  %v2917_v26 = vld [vmem:[%s5725_s15 + $0x1b0] sm:$0xff] }
 0x388   : > { %v2719_v6 = vpop.f32.mrf.mxu1  ;;  %v2915_v38 = vld [vmem:[%s5725_s15 + $0x1a0] sm:$0xff] }
 0x389   : > { %v2720_v27 = vadd.f32 %v2719_v6, %v5215_v12  ;;  %v2749_v10 = vmax.f32 %v2718_v13, 0.0  ;;  %v2814_v6 = vpack.c.bf16 %v2746_v8, %v2744_v21  ;;  %v2871_v13 = vld [vmem:[%s5725_s15 + $0x40] sm:$0xff]  ;;  %v2914_v8 = vld [vmem:[%s5725_s15 + $0x198] sm:$0xff] }
 0x38a   : > { %v2721_v17 = vpop.f32.mrf.mxu1  ;;  %v2910_v21 = vld [vmem:[%s5725_s15 + $0x178] sm:$0xff] }
 0x38b   : > { %v2722_v34 = vadd.f32 %v2721_v17, %v5218_v30  ;;  %v2750_v20 = vmax.f32 %v2720_v27, 0.0  ;;  %v2893_v17 = vld [vmem:[%s5725_s15 + $0xf0] sm:$0xff]  ;;  %v2868_v27 = vld [vmem:[%s5725_s15 + $0x28] sm:$0xff] }
 0x38c   : > { %v2725_v28 = vpop.f32.mrf.mxu1 }
 0x38d   : > { %v2726_v61 = vadd.f32 %v2725_v28, %v5215_v12  ;;  %v2751_v39 = vmax.f32 %v2722_v34, 0.0  ;;  %v2816_v53 = vpack.c.bf16 %v2750_v20, %v2748_v24  ;;  %v2877_v34 = vld [vmem:[%s5725_s15 + $0x70] sm:$0xff]  ;;  %v2916_v24 = vld [vmem:[%s5725_s15 + $0x1a8] sm:$0xff] }
 0x38e   : > { %v2727_v25 = vpop.f32.mrf.mxu1  ;;  %v2921_v20 = vld [vmem:[%s5725_s15 + $0x1d0] sm:$0xff] }
 0x38f   : > { %v2728_v42 = vadd.f32 %v2727_v25, %v5218_v30  ;;  %v2752_v51 = vmax.f32 %v2726_v61, 0.0  ;;  %v2817_v5 = vpack.c.bf16 %v2751_v39, %v2749_v10  ;;  %v2892_v25 = vld [vmem:[%s5725_s15 + $0xe8] sm:$0xff]  ;;  %v2873_v61 = vld [vmem:[%s5725_s15 + $0x50] sm:$0xff]  ;;  %v2923_v10 = vld [vmem:[%s5725_s15 + $0x1e0] sm:$0xff] }
 0x390   : > { %v2729_v41 = vpop.f32.mrf.mxu1  ;;  %v2864_v39 = vld [vmem:[%s5725_s15 + $0x8] sm:$0xff] }
 0x391   : > { %v2730_v47 = vadd.f32 %v2729_v41, %v5215_v12  ;;  %v2753_v0 = vmax.f32 %v2728_v42, 0.0  ;;  %v2881_v42 = vld [vmem:[%s5725_s15 + $0x90] sm:$0xff] }
 0x392   : > { %v2731_v33 = vpop.f32.mrf.mxu1 }
 0x393   : > { %v2732_v32 = vadd.f32 %v2731_v33, %v5218_v30  ;;  %v2754_v7 = vmax.f32 %v2730_v47, 0.0  ;;  %v2890_v33 = vld [vmem:[%s5725_s15 + $0xd8] sm:$0xff]  ;;  %v2879_v47 = vld [vmem:[%s5725_s15 + $0x80] sm:$0xff] }
 0x394   : > { %v2735_v2 = vpop.f32.mrf.mxu1 }
 0x395   : > { %v2736_v3 = vadd.f32 %v2735_v2, %v5215_v12  ;;  %v2755_v48 = vmax.f32 %v2732_v32, 0.0  ;;  %v2818_v63 = vpack.c.bf16 %v2754_v7, %v2752_v51  ;;  %v2889_v2 = vld [vmem:[%s5725_s15 + $0xd0] sm:$0xff]  ;;  %v2886_v32 = vld [vmem:[%s5725_s15 + $0xb8] sm:$0xff]  ;;  %v2867_v7 = vld [vmem:[%s5725_s15 + $0x20] sm:$0xff] }
 0x396   : > { %v2737_v60 = vpop.f32.mrf.mxu1  ;;  %v2925_v51 = vld [vmem:[%s5725_s15 + $0x1f0] sm:$0xff] }
 0x397   : > { %v2738_v56 = vadd.f32 %v2737_v60, %v5218_v30  ;;  %v2756_v40 = vmax.f32 %v2736_v3, 0.0  ;;  %v2819_v31 = vpack.c.bf16 %v2755_v48, %v2753_v0  ;;  %v2883_v3 = vld [vmem:[%s5725_s15 + $0xa0] sm:$0xff]  ;;  %v2876_v48 = vld [vmem:[%s5725_s15 + $0x68] sm:$0xff]  ;;  %v2870_v0 = vld [vmem:[%s5725_s15 + $0x38] sm:$0xff] }
 0x398   : > { %v2739_v62 = vpop.f32.mrf.mxu1 }
 0x399   : > { %v2740_v45 = vadd.f32 %v2739_v62, %v5215_v12  ;;  %v2757_v44 = vmax.f32 %v2738_v56, 0.0  ;;  %v2894_v12 = vld [vmem:[%s5725_s15 + $0xf8] sm:$0xff]  ;;  %v2887_v62 = vld [vmem:[%s5725_s15 + $0xc0] sm:$0xff]  ;;  %v2885_v56 = vld [vmem:[%s5725_s15 + $0xb0] sm:$0xff] }
 0x39a   : > { %v2741_v15 = vpop.f32.mrf.mxu1 }
 0x39b   : > { %v2742_v18 = vadd.f32 %v2741_v15, %v5218_v30  ;;  %v2758_v19 = vmax.f32 %v2740_v45, 0.0  ;;  %v2927_v30 = vld [vmem:[%s5726_s16] sm:$0xff]  ;;  %v2884_v45 = vld [vmem:[%s5725_s15 + $0xa8] sm:$0xff]  ;;  %v2882_v15 = vld [vmem:[%s5725_s15 + $0x98] sm:$0xff] }
 0x39c   : > { %v2929_v43 = vcombine.high %v2927_v30, %v2927_v30 }
 0x39d   : > { %v2759_v49 = vmax.f32 %v2742_v18, 0.0  ;;  %v2820_v58 = vpack.c.bf16 %v2758_v19, %v2756_v40  ;;  %v2880_v18 = vld [vmem:[%s5725_s15 + $0x88] sm:$0xff]  ;;  %v2878_v19 = vld [vmem:[%s5725_s15 + $0x78] sm:$0xff] }
 0x39e   : > { %v2872_v40 = vld [vmem:[%s5725_s15 + $0x48] sm:$0xff] }
 0x39f   : > { %v2821_v9 = vpack.c.bf16 %v2759_v49, %v2757_v44  ;;  %v2875_v44 = vld [vmem:[%s5725_s15 + $0x60] sm:$0xff]  ;;  %v2874_v49 = vld [vmem:[%s5725_s15 + $0x58] sm:$0xff] }
 0x3a1   : > { %2830 = vmatprep.subr.bf16.mxu0 %v2821_v9  ;;  %v2869_v9 = vld [vmem:[%s5725_s15 + $0x30] sm:$0xff] }
 0x3a2   : > { %2831 = vmatpush1.bf16.msra.mxu0 %v2820_v58  ;;  %v2866_v58 = vld [vmem:[%s5725_s15 + $0x18] sm:$0xff] }
 0x3a3   : > { %2832 = vmatprep.subr.bf16.mxu0 %v2819_v31  ;;  %v2863_v31 = vld [vmem:[%s5725_s15] sm:$0xff] }
 0x3a6   : > { %2833 = vmatpush1.bf16.msra.mxu0 %v2818_v63  ;;  %v2920_v63 = vld [vmem:[%s5725_s15 + $0x1c8] sm:$0xff] }
 0x3a7   : > { %2834 = vmatprep.subr.bf16.mxu0 %v2817_v5  ;;  %v2918_v5 = vld [vmem:[%s5725_s15 + $0x1b8] sm:$0xff] }
 0x3aa   : > { %2835 = vmatpush1.bf16.msra.mxu0 %v2816_v53  ;;  %v2913_v53 = vld [vmem:[%s5725_s15 + $0x190] sm:$0xff] }
 0x3ab   : > { %2836 = vmatprep.subr.bf16.mxu0 %v2815_v54  ;;  %v2911_v54 = vld [vmem:[%s5725_s15 + $0x180] sm:$0xff] }
 0x3ae   : > { %2837 = vmatpush1.bf16.msra.mxu0 %v2814_v6  ;;  %v2908_v6 = vld [vmem:[%s5725_s15 + $0x168] sm:$0xff] }
 0x3af   : > { %3658 = vmatprep.subr.msk.mxu0 %vm2117_vm0, %v2929_v43  ;;  %v2909_v43 = vld [vmem:[%s5725_s15 + $0x170] sm:$0xff] }
 0x3b1   : > { %3657 = vmatmul.mubr.msk.bf16.vlgmr.msra.gmra.mxu0 %vm2769_vm2, %v5239_v46  ;;  %v2891_v46 = vld [vmem:[%s5725_s15 + $0xe0] sm:$0xff] }
 0x3b2   : > { %3659 = vmatpush1.msk.msra.mxu0 %vm2117_vm0, %v2927_v30  ;;  %2998 = vmatprep.mubr.f32.mxu0 %v3994_v4  ;;  %v2912_v30 = vld [vmem:[%s5725_s15 + $0x188] sm:$0xff] }
 0x3b3   : > { %3005 = vmatprep.subr.mxu0 %v2894_v12  ;;  %v2907_v12 = vld [vmem:[%s5725_s15 + $0x160] sm:$0xff] }
 0x3b5   : > { %v5275_v23 = vpop.f32.mrf.mxu0 }
 0x3b7   : > { %v2809_v28 = vpop.f32.mrf.mxu0 }
 0x3b9   : > { %3660 = vmatmul.mubr.msk.f32.vlgmr.msra.gmra.mxu0 %vm2113_vm1, %v4790_v29  ;;  %v2811_v41 = vpop.f32.mrf.mxu0  ;;  %v2888_v29 = vld [vmem:[%s5725_s15 + $0xc8] sm:$0xff] }
 0x3ba   : > { %3006 = vmatpush1.msra.mxu0 %v2893_v17  ;;  %3069 = vmatprep.mubr.f32.mxu0 %v2809_v28  ;;  %v2906_v17 = vld [vmem:[%s5725_s15 + $0x158] sm:$0xff]  ;;  %v2905_v28 = vld [vmem:[%s5725_s15 + $0x150] sm:$0xff] }
 0x3bb   : > { %3007 = vmatprep.subr.mxu0 %v2892_v25  ;;  %v2812_v60 = vpop.f32.mrf.mxu0  ;;  %v2904_v25 = vld [vmem:[%s5725_s15 + $0x148] sm:$0xff]  ;;  %v2902_v41 = vld [vmem:[%s5725_s15 + $0x138] sm:$0xff] }
 0x3bc   : > { %3008 = vmatpush1.msra.mxu0 %v2891_v46  ;;  %v2903_v46 = vld [vmem:[%s5725_s15 + $0x140] sm:$0xff] }
 0x3bd   : > { %3009 = vmatprep.subr.mxu0 %v2890_v33  ;;  %v2901_v33 = vld [vmem:[%s5725_s15 + $0x130] sm:$0xff]  ;;  %v2899_v60 = vld [vmem:[%s5725_s15 + $0x120] sm:$0xff] }
 0x3be   : > { %3010 = vmatpush1.msra.mxu0 %v2889_v2  ;;  %v2900_v2 = vld [vmem:[%s5725_s15 + $0x128] sm:$0xff] }
 0x3bf   : > { %3011 = vmatprep.subr.mxu0 %v2888_v29  ;;  %v2898_v29 = vld [vmem:[%s5725_s15 + $0x118] sm:$0xff] }
 0x3c0   : > { %3012 = vmatpush1.msra.mxu0 %v2887_v62  ;;  %v2897_v62 = vld [vmem:[%s5725_s15 + $0x110] sm:$0xff] }
 0x3c1   : > { %3013 = vmatprep.subr.mxu0 %v2886_v32  ;;  %v2896_v32 = vld [vmem:[%s5725_s15 + $0x108] sm:$0xff] }
 0x3c2   : > { %3014 = vmatpush1.msra.mxu0 %v2885_v56  ;;  %v2895_v56 = vld [vmem:[%s5725_s15 + $0x100] sm:$0xff] }
 0x3c3   : > { %3015 = vmatprep.subr.mxu0 %v2884_v45  ;;  %v3157_v45 = vld [vmem:[%s5729_s19 + $0xf8] sm:$0xff] }
 0x3c4   : > { %3016 = vmatpush1.msra.mxu0 %v2883_v3  ;;  %v3141_v3 = vld [vmem:[%s5729_s19 + $0x78] sm:$0xff]  ;;  %3668 = vmatprep.subr.mxu1 %v3157_v45 }
 0x3c5   : > { %3017 = vmatprep.subr.mxu0 %v2882_v15  ;;  %v3156_v15 = vld [vmem:[%s5729_s19 + $0xf0] sm:$0xff]  ;;  %3669 = vmatpush3.msra.mxu1 %v3141_v3 }
 0x3c6   : > { %3018 = vmatpush1.msra.mxu0 %v2881_v42  ;;  %v3140_v42 = vld [vmem:[%s5729_s19 + $0x70] sm:$0xff]  ;;  %3670 = vmatprep.subr.mxu1 %v3156_v15 }
 0x3c7   : > { %3019 = vmatprep.subr.mxu0 %v2880_v18  ;;  %v3139_v18 = vld [vmem:[%s5729_s19 + $0x68] sm:$0xff]  ;;  %3671 = vmatpush3.msra.mxu1 %v3140_v42 }
 0x3c8   : > { %3020 = vmatpush1.msra.mxu0 %v2879_v47  ;;  %v3154_v47 = vld [vmem:[%s5729_s19 + $0xe0] sm:$0xff] }
 0x3c9   : > { %3021 = vmatprep.subr.mxu0 %v2878_v19  ;;  %v3138_v19 = vld [vmem:[%s5729_s19 + $0x60] sm:$0xff] }
 0x3ca   : > { %3022 = vmatpush1.msra.mxu0 %v2877_v34  ;;  %v3153_v34 = vld [vmem:[%s5729_s19 + $0xd8] sm:$0xff] }
 0x3cb   : > { %3023 = vmatprep.subr.mxu0 %v2876_v48  ;;  %v3137_v48 = vld [vmem:[%s5729_s19 + $0x58] sm:$0xff] }
 0x3cc   : > { %3024 = vmatpush1.msra.mxu0 %v2875_v44  ;;  %v3152_v44 = vld [vmem:[%s5729_s19 + $0xd0] sm:$0xff] }
 0x3cd   : > { %3025 = vmatprep.subr.mxu0 %v2874_v49  ;;  %v3136_v49 = vld [vmem:[%s5729_s19 + $0x50] sm:$0xff] }
 0x3ce   : > { %3026 = vmatpush1.msra.mxu0 %v2873_v61  ;;  %v3151_v61 = vld [vmem:[%s5729_s19 + $0xc8] sm:$0xff] }
 0x3cf   : > { %3027 = vmatprep.subr.mxu0 %v2872_v40  ;;  %v3135_v40 = vld [vmem:[%s5729_s19 + $0x48] sm:$0xff] }
 0x3d0   : > { %3028 = vmatpush1.msra.mxu0 %v2871_v13  ;;  %v3150_v13 = vld [vmem:[%s5729_s19 + $0xc0] sm:$0xff] }
 0x3d1   : > { %3029 = vmatprep.subr.mxu0 %v2870_v0  ;;  %v3134_v0 = vld [vmem:[%s5729_s19 + $0x40] sm:$0xff] }
 0x3d2   : > { %3030 = vmatpush1.msra.mxu0 %v2869_v9  ;;  %v3149_v9 = vld [vmem:[%s5729_s19 + $0xb8] sm:$0xff] }
 0x3d3   : > { %3031 = vmatprep.subr.mxu0 %v2868_v27  ;;  %v3133_v27 = vld [vmem:[%s5729_s19 + $0x38] sm:$0xff] }
 0x3d4   : > { %3032 = vmatpush1.msra.mxu0 %v2867_v7  ;;  %v3148_v7 = vld [vmem:[%s5729_s19 + $0xb0] sm:$0xff] }
 0x3d5   : > { %3033 = vmatprep.subr.mxu0 %v2866_v58  ;;  %v3132_v58 = vld [vmem:[%s5729_s19 + $0x30] sm:$0xff] }
 0x3d6   : > { %3034 = vmatpush1.msra.mxu0 %v2865_v35  ;;  %v3147_v35 = vld [vmem:[%s5729_s19 + $0xa8] sm:$0xff] }
 0x3d7   : > { %3035 = vmatprep.subr.mxu0 %v2864_v39  ;;  %v3131_v39 = vld [vmem:[%s5729_s19 + $0x28] sm:$0xff] }
 0x3d8   : > { %3036 = vmatpush1.msra.mxu0 %v2863_v31  ;;  %v3146_v31 = vld [vmem:[%s5729_s19 + $0xa0] sm:$0xff] }
 0x3d9   : > { %3037 = vmatprep.subr.mxu0 %v2926_v50  ;;  %v3130_v50 = vld [vmem:[%s5729_s19 + $0x20] sm:$0xff] }
 0x3da   : > { %3038 = vmatpush2.msra.mxu0 %v2925_v51  ;;  %v3145_v51 = vld [vmem:[%s5729_s19 + $0x98] sm:$0xff] }
 0x3db   : > { %3039 = vmatprep.subr.mxu0 %v2924_v11  ;;  %v3129_v11 = vld [vmem:[%s5729_s19 + $0x18] sm:$0xff] }
 0x3dc   : > { %3040 = vmatpush2.msra.mxu0 %v2923_v10  ;;  %v3144_v10 = vld [vmem:[%s5729_s19 + $0x90] sm:$0xff] }
 0x3dd   : > { %3041 = vmatprep.subr.mxu0 %v2922_v16  ;;  %v3128_v16 = vld [vmem:[%s5729_s19 + $0x10] sm:$0xff] }
 0x3de   : > { %3042 = vmatpush2.msra.mxu0 %v2921_v20  ;;  %v3143_v20 = vld [vmem:[%s5729_s19 + $0x88] sm:$0xff] }
 0x3df   : > { %3043 = vmatprep.subr.mxu0 %v2920_v63  ;;  %v3127_v63 = vld [vmem:[%s5729_s19 + $0x8] sm:$0xff] }
 0x3e0   : > { %3044 = vmatpush2.msra.mxu0 %v2919_v59  ;;  %v3142_v59 = vld [vmem:[%s5729_s19 + $0x80] sm:$0xff] }
 0x3e1   : > { %3045 = vmatprep.subr.mxu0 %v2918_v5  ;;  %v3126_v5 = vld [vmem:[%s5729_s19] sm:$0xff] }
 0x3e2   : > { %3046 = vmatpush2.msra.mxu0 %v2917_v26  ;;  %v3125_v26 = vld [vmem:[%s5728_s18 + $0xf8] sm:$0xff] }
 0x3e3   : > { %3047 = vmatprep.subr.mxu0 %v2916_v24  ;;  %v3302_v24 = vld [vmem:[%s5730_s20 + $0x18] sm:$0xff] }
 0x3e4   : > { %3048 = vmatpush2.msra.mxu0 %v2915_v38  ;;  %v3301_v38 = vld [vmem:[%s5730_s20 + $0x10] sm:$0xff] }
 0x3e5   : > { %3049 = vmatprep.subr.mxu0 %v2914_v8  ;;  %v3300_v8 = vld [vmem:[%s5730_s20 + $0x8] sm:$0xff] }
 0x3e6   : > { %3050 = vmatpush2.msra.mxu0 %v2913_v53  ;;  %v3299_v53 = vld [vmem:[%s5730_s20] sm:$0xff] }
 0x3e7   : > { %3051 = vmatprep.subr.mxu0 %v2912_v30  ;;  %v3298_v30 = vld [vmem:[%s766_s0] sm:$0x1] }
 0x3e8   : > { %3052 = vmatpush2.msra.mxu0 %v2911_v54 }
 0x3e9   : > { %3053 = vmatprep.subr.mxu0 %v2910_v21 }
 0x3ea   : > { %3054 = vmatpush2.msra.mxu0 %v2909_v43 }
 0x3eb   : > { %3055 = vmatprep.subr.mxu0 %v2908_v6 }
 0x3ec   : > { %3056 = vmatpush2.msra.mxu0 %v2907_v12 }
 0x3ed   : > { %3057 = vmatprep.subr.mxu0 %v2906_v17  ;;  %v3076_v17 = vld [vmem:[%s5727_s17] sm:$0x3] }
 0x3ee   : > { %3058 = vmatpush2.msra.mxu0 %v2905_v28  ;;  %v5595_v28 = vld [vmem:[%s5724_s14] sm:$0x3] }
 0x3ef   : > { %3059 = vmatprep.subr.mxu0 %v2904_v25 }
 0x3f0   : > { %3060 = vmatpush2.msra.mxu0 %v2903_v46  ;;  %v2273_v46 = vrot.slane %v5595_v28, %v5831_v57 }
 0x3f1   : > { %3061 = vmatprep.subr.mxu0 %v2902_v41  ;;  %v3081_v41 = vrot.slane %v3076_v17, %v5830_v36 }
 0x3f2   : > { %3062 = vmatpush2.msra.mxu0 %v2901_v33 }
 0x3f3   : > { %3063 = vmatprep.subr.mxu0 %v2900_v2 }
 0x3f4   : > { %3064 = vmatpush2.msra.mxu0 %v2899_v60  ;;  %v3085_v60 = vrot.slane %v3076_v17, %v5831_v57 }
 0x3f5   : > { %3065 = vmatprep.subr.mxu0 %v2898_v29 }
 0x3f6   : > { %3066 = vmatpush2.msra.mxu0 %v2897_v62 }
 0x3f7   : > { %3067 = vmatprep.subr.mxu0 %v2896_v32 }
 0x3f8   : > { %3068 = vmatpush2.msra.mxu0 %v2895_v56 }
 0x3f9   : > { %3070 = vmatmul.mubr.f32.vlgmr.msra.gmra.mxu0 %v5275_v23  ;;  %3743 = vmatprep.subr.mxu0 %v3994_v4  ;;  %v3155_v23 = vld [vmem:[%s5729_s19 + $0xe8] sm:$0xff] }
 0x3fa   : > { %3672 = vmatprep.subr.mxu1 %v3155_v23  ;;  %3744 = vmatpush3.msra.mxu0 %v3302_v24  ;;  %v3095_v24 = vld [vmem:[%s5728_s18 + $0x8] sm:$0xff] }
 0x3fb   : > { %3673 = vmatpush3.msra.mxu1 %v3139_v18  ;;  %3751 = vmatprep.mubr.msk.f32.mxu0 %vm3996_vm3, %v3994_v4 }
 0x3fc   : > { %3674 = vmatprep.subr.mxu1 %v3154_v47  ;;  %3745 = vmatprep.subr.mxu0 %v3994_v4  ;;  %v3108_v47 = vld [vmem:[%s5728_s18 + $0x70] sm:$0xff] }
 0x3fd   : > { %3675 = vmatpush3.msra.mxu1 %v3138_v19  ;;  %3746 = vmatpush3.msra.mxu0 %v3301_v38  ;;  %v3123_v19 = vld [vmem:[%s5728_s18 + $0xe8] sm:$0xff]  ;;  %v3110_v38 = vld [vmem:[%s5728_s18 + $0x80] sm:$0xff] }
 0x3fe   : > { %3676 = vmatprep.subr.mxu1 %v3153_v34  ;;  %3747 = vmatprep.subr.mxu0 %v3994_v4  ;;  %v3107_v34 = vld [vmem:[%s5728_s18 + $0x68] sm:$0xff] }
 0x3ff   : > { %3677 = vmatpush3.msra.mxu1 %v3137_v48  ;;  %3748 = vmatpush3.msra.mxu0 %v3300_v8  ;;  %v3106_v48 = vld [vmem:[%s5728_s18 + $0x60] sm:$0xff] }
 0x400   : > { %3678 = vmatprep.subr.mxu1 %v3152_v44  ;;  %3749 = vmatprep.subr.mxu0 %v3994_v4  ;;  %v2262_v4 = vadd.f32 %v5246_v22, %v5204_v55  ;;  %v3109_v55 = vld [vmem:[%s5728_s18 + $0x78] sm:$0xff]  ;;  %v3124_v22 = vld [vmem:[%s5728_s18 + $0xf0] sm:$0xff]  ;;  %v3094_v8 = vld [vmem:[%s5728_s18] sm:$0xff] }
 0x401   : > { %3679 = vmatpush3.msra.mxu1 %v3136_v49  ;;  %3750 = vmatpush3.msra.mxu0 %v3299_v53  ;;  %v3121_v44 = vld [vmem:[%s5728_s18 + $0xd8] sm:$0xff] }
 0x402   : > { %3680 = vmatprep.subr.mxu1 %v3151_v61  ;;  %3752 = vmatmul.mubr.msk.f32.vlgmr.msra.gmra.mxu0 %vm3308_vm4, %v3298_v30  ;;  %v2277_v62 = vadd.f32 %v2273_v46, %v2262_v4  ;;  %v3105_v49 = vld [vmem:[%s5728_s18 + $0x58] sm:$0xff]  ;;  %v3120_v61 = vld [vmem:[%s5728_s18 + $0xd0] sm:$0xff]  ;;  %v3382_v4 = vld [vmem:[#allocation2] sm:$0x1] }
 0x403   : > { %3681 = vmatpush3.msra.mxu1 %v3135_v40  ;;  %v3104_v40 = vld [vmem:[%s5728_s18 + $0x50] sm:$0xff] }
 0x404   : > { %3682 = vmatprep.subr.mxu1 %v3150_v13  ;;  %v2279_v15 = vmax.f32 %v2277_v62, 0.0  ;;  %v3119_v13 = vld [vmem:[%s5728_s18 + $0xc8] sm:$0xff] }
 0x405   : > { %3683 = vmatpush3.msra.mxu1 %v3134_v0  ;;  %v3103_v0 = vld [vmem:[%s5728_s18 + $0x48] sm:$0xff] }
 0x406   : > { %3684 = vmatprep.subr.mxu1 %v3149_v9  ;;  %v2281_v57 = vmul.f32 %v2279_v15, %v5167_v1  ;;  %v3122_v1 = vld [vmem:[%s5728_s18 + $0xe0] sm:$0xff] }
 0x407   : > { %3685 = vmatpush3.msra.mxu1 %v3133_v27  ;;  %v3118_v9 = vld [vmem:[%s5728_s18 + $0xc0] sm:$0xff] }
 0x408   : > { %3686 = vmatprep.subr.mxu1 %v3148_v7  ;;  %v3102_v27 = vld [vmem:[%s5728_s18 + $0x40] sm:$0xff]  ;;  %v3117_v7 = vld [vmem:[%s5728_s18 + $0xb8] sm:$0xff] }
 0x409   : > { %3687 = vmatpush3.msra.mxu1 %v3132_v58  ;;  %v3101_v58 = vld [vmem:[%s5728_s18 + $0x38] sm:$0xff] }
 0x40a   : > { %3688 = vmatprep.subr.mxu1 %v3147_v35  ;;  %v3116_v35 = vld [vmem:[%s5728_s18 + $0xb0] sm:$0xff] }
 0x40b   : > { %3689 = vmatpush3.msra.mxu1 %v3131_v39  ;;  %v3100_v39 = vld [vmem:[%s5728_s18 + $0x30] sm:$0xff] }
 0x40c   : > { %3690 = vmatprep.subr.mxu1 %v3146_v31  ;;  %v3115_v31 = vld [vmem:[%s5728_s18 + $0xa8] sm:$0xff] }
 0x40d   : > { %3691 = vmatpush3.msra.mxu1 %v3130_v50  ;;  %v2260_v50 = vadd.f32 %v5244_v52, %v5202_v37  ;;  %v3113_v37 = vld [vmem:[%s5728_s18 + $0x98] sm:$0xff] }
 0x40e   : > { %3692 = vmatprep.subr.mxu1 %v3145_v51  ;;  %v2269_v51 = vrot.slane %v5595_v28, %v5830_v36 }
 0x40f   : > { %3693 = vmatpush3.msra.mxu1 %v3129_v11  ;;  %v3099_v11 = vld [vmem:[%s5728_s18 + $0x28] sm:$0xff] }
 0x410   : > { %3694 = vmatprep.subr.mxu1 %v3144_v10  ;;  %v3114_v10 = vld [vmem:[%s5728_s18 + $0xa0] sm:$0xff]  ;;  %v2276_v52 = vadd.f32 %v2269_v51, %v2260_v50 }
 0x411   : > { %3695 = vmatpush3.msra.mxu1 %v3128_v16  ;;  %v3098_v16 = vld [vmem:[%s5728_s18 + $0x20] sm:$0xff] }
 0x412   : > { %3696 = vmatprep.subr.mxu1 %v3143_v20  ;;  %v3097_v20 = vld [vmem:[%s5728_s18 + $0x18] sm:$0xff] }
 0x413   : > { %3697 = vmatpush3.msra.mxu1 %v3127_v63  ;;  %v3112_v63 = vld [vmem:[%s5728_s18 + $0x90] sm:$0xff] }
 0x414   : > { %3698 = vmatprep.subr.mxu1 %v3142_v59  ;;  %v3096_v59 = vld [vmem:[%s5728_s18 + $0x10] sm:$0xff] }
 0x415   : > { %3699 = vmatpush3.msra.mxu1 %v3126_v5  ;;  %v3111_v5 = vld [vmem:[%s5728_s18 + $0x88] sm:$0xff] }
 0x416   : > { %3703 = vmatprep.subr.mxu1 %v3125_v26  ;;  %v2278_v26 = vmax.f32 %v2276_v52, 0.0 }
 0x418   : > { %v2280_v53 = vmul.f32 %v2278_v26, %v5164_v14 }
 0x471   : > { %v2856_v54 = vpop.f32.mrf.mxu0 }
 0x473   : > { %v2858_v21 = vpop.f32.mrf.mxu0 }
 0x475   : > { %v2860_v43 = vpop.f32.mrf.mxu0 }
 0x477   : > { %v2861_v6 = vpop.f32.mrf.mxu0 }
 0x479   : > { %v3000_v12 = vpop.f32.mrf.mxu0 }
 0x47b   : > { %v3002_v25 = vpop.f32.mrf.mxu0 }
 0x4b9   : > { %v3071_v33 = vpop.f32.mrf.mxu0 }
 0x4ba   : > { %v3072_v2 = vadd.f32 %v3071_v33, %v3000_v12 }
 0x4bb   : > { %v3073_v29 = vpop.f32.mrf.mxu0 }
 0x4bc   : > { %v3088_v32 = vadd.f32 %v3081_v41, %v3072_v2  ;;  %v3074_v56 = vadd.f32 %v3073_v29, %v3002_v25 }
 0x4be   : > { %v3089_v45 = vadd.f32 %v3085_v60, %v3074_v56  ;;  %v3090_v3 = vmax.f32 %v3088_v32, 0.0 }
 0x4c0   : > { %v3091_v42 = vmax.f32 %v3089_v45, 0.0  ;;  %v3092_v18 = vmul.f32 %v3090_v3, %v2856_v54 }
 0x4c2   : > { %v3093_v23 = vmul.f32 %v3091_v42, %v2858_v21  ;;  %v3378_v30 = vpop.f32.mrf.mxu0 }
 0x4c4   : > { %3222 = vmatprep.mubr.f32.mxu1 %v3093_v23  ;;  %v3753_v54 = vpop.f32.mrf.mxu0 }
 0x4c5   : > { %3223 = vmatmul.mubr.f32.vlgmr.msra.gmra.mxu1 %v3092_v18 }
 0x4c6   : > { %3704 = vmatpush3.msra.mxu1 %v3109_v55  ;;  %3292 = vmatprep.mubr.f32.mxu1 %v2281_v57 }
 0x4c7   : > { %3705 = vmatprep.subr.mxu1 %v3124_v22 }
 0x4c8   : > { %3706 = vmatpush3.msra.mxu1 %v3108_v47 }
 0x4c9   : > { %3707 = vmatprep.subr.mxu1 %v3123_v19 }
 0x4ca   : > { %3708 = vmatpush3.msra.mxu1 %v3107_v34 }
 0x4cb   : > { %3709 = vmatprep.subr.mxu1 %v3122_v1 }
 0x4cc   : > { %3710 = vmatpush3.msra.mxu1 %v3106_v48 }
 0x4cd   : > { %3711 = vmatprep.subr.mxu1 %v3121_v44 }
 0x4ce   : > { %3712 = vmatpush3.msra.mxu1 %v3105_v49 }
 0x4cf   : > { %3713 = vmatprep.subr.mxu1 %v3120_v61 }
 0x4d0   : > { %3714 = vmatpush3.msra.mxu1 %v3104_v40 }
 0x4d1   : > { %3715 = vmatprep.subr.mxu1 %v3119_v13 }
 0x4d2   : > { %3716 = vmatpush3.msra.mxu1 %v3103_v0 }
 0x4d3   : > { %3717 = vmatprep.subr.mxu1 %v3118_v9 }
 0x4d4   : > { %3718 = vmatpush3.msra.mxu1 %v3102_v27 }
 0x4d5   : > { %3719 = vmatprep.subr.mxu1 %v3117_v7 }
 0x4d6   : > { %3720 = vmatpush3.msra.mxu1 %v3101_v58 }
 0x4d7   : > { %3721 = vmatprep.subr.mxu1 %v3116_v35 }
 0x4d8   : > { %3722 = vmatpush3.msra.mxu1 %v3100_v39 }
 0x4d9   : > { %3723 = vmatprep.subr.mxu1 %v3115_v31 }
 0x4da   : > { %3724 = vmatpush3.msra.mxu1 %v3099_v11 }
 0x4db   : > { %3725 = vmatprep.subr.mxu1 %v3114_v10 }
 0x4dc   : > { %3726 = vmatpush3.msra.mxu1 %v3098_v16 }
 0x4dd   : > { %3727 = vmatprep.subr.mxu1 %v3113_v37 }
 0x4de   : > { %3728 = vmatpush3.msra.mxu1 %v3097_v20 }
 0x4df   : > { %3729 = vmatprep.subr.mxu1 %v3112_v63 }
 0x4e0   : > { %3730 = vmatpush3.msra.mxu1 %v3096_v59 }
 0x4e1   : > { %3731 = vmatprep.subr.mxu1 %v3111_v5 }
 0x4e2   : > { %3732 = vmatpush3.msra.mxu1 %v3095_v24 }
 0x4e3   : > { %3733 = vmatprep.subr.mxu1 %v3110_v38 }
 0x4e4   : > { %3734 = vmatpush3.msra.mxu1 %v3094_v8 }
 0x4e5   : > { %3293 = vmatmul.mubr.f32.vlgmr.msra.gmra.mxu1 %v2280_v53 }
 0x585   : > { %v3700_v21 = vpop.f32.mrf.mxu1 }
 0x587   : > { %v3701_v43 = vpop.f32.mrf.mxu1 }
 0x588   : > { %v3702_v17 = vadd.f32 %v3701_v43, %v3700_v21 }
 0x5a5   : > { %v3735_v6 = vpop.f32.mrf.mxu1 }
 0x5a7   : > { %v3736_v12 = vpop.f32.mrf.mxu1 }
 0x5a8   : > { %v3737_v28 = vadd.f32 %v3736_v12, %v3735_v6 }
 0x5aa   : > { %v3295_v25 = vadd.f32 %v3737_v28, %v3702_v17 }
 0x5ac   : > { %3305 = vperm.xlu0 %3766, %v3295_v25  }
 0x5b0   : > { %3385 = vperm.xlu0 %3766, %v3382_v4  }
 0x627   : > { %v3306_v46 = vpop.permute.xlu0 %3305 }
 0x628   : > { %v3379_v33 = vadd.f32 %v3378_v30, %v3306_v46 }
 0x62b   : > { %v3386_v41 = vpop.permute.xlu0 %3385 }
 0x62c   : > { %v3391_v14 = vrot.slane %v3386_v41, %v5830_v36 }
 0x62e   : > { %v3392_v2 = vadd.f32 %v3391_v14, %v3379_v33 }
 0x630   : > { %3393 = vst [vmem:[%s769_s3] sm:$0x1] %v3392_v2 }
 0x631 PF: > { %s34_s29 = sadd.s32 1, %s3991_s29  }
 0x632   : > { %p31_p4 = scmp.ge.s32.totalorder %s34_s29, 4  }
 0x634   :  { %33 = sbr.rel (!%p31_p4) target bundleno = 8 (0x8), region = 153 }

</bundles_post_ra>
